<compile_context>
chip_gen: v7x
topology: tpu7x:2x2x1
jax: 0.10.0
libtpu: 0.0.40
codegen_flags: <defaults>
</compile_context>

<pallas_src>
import functools

import jax
import jax.numpy as jnp
from jax.experimental import pallas as pl
from jax.experimental.pallas import tpu as pltpu


def _silu(x):
    return x * jax.nn.sigmoid(x)


def _dot(a, w_ref):
    # bf16 MXU operands, f32 accumulation; epilogue math stays f32.
    w = w_ref[...]
    return jnp.dot(a.astype(w.dtype), w, preferred_element_type=jnp.float32)


def _mbconv(a, we, be, dww, dwb, sw1, sb1, sw2, sb2, wp, bp, xpad, *, H, W, skip):
    """One MBConv block (expand 1x1 -> dw 3x3 -> SE -> project 1x1 -> residual),
    entirely on VMEM-resident values.  a: (H*W, c_in) f32 -> (H*W, c_out) f32."""
    HW = H * W
    inp = a

    # 1x1 expand conv + folded BN + SiLU
    e = _silu(_dot(a, we) + be[...])                       # (HW, c_exp) f32
    ce = e.shape[-1]

    # depthwise 3x3, stride 1, SAME, + folded BN + SiLU.
    # Halo buffer in VMEM scratch (border already zeroed once at grid step 0);
    # 9 shifted taps are static-offset slices of the scratch ref.
    # TODO(synk): the dj-shifted reads are unaligned sublane slices; pltpu.roll-based
    # taps (XLU) would avoid the per-tap relayout if this ever becomes compute-critical.
    xpad[1:H + 1, 1:W + 1, :] = e.reshape(H, W, ce)
    acc = jnp.zeros((H, W, ce), jnp.float32)
    for di in range(3):
        for dj in range(3):
            acc = acc + xpad[di:di + H, dj:dj + W, :] * dww[di * 3 + dj, :]
    d = _silu(acc + dwb[...]).reshape(HW, ce)

    # squeeze-and-excite: global mean -> FC -> SiLU -> FC -> sigmoid -> scale
    m = jnp.mean(d, axis=0, keepdims=True)                 # (1, c_exp)
    h = _silu(_dot(m, sw1) + sb1[...])
    s = jax.nn.sigmoid(_dot(h, sw2) + sb2[...])
    d = d * s

    # 1x1 project conv + folded BN (no activation) + residual
    p = _dot(d, wp) + bp[...]
    if skip:
        p = p + inp
    return p


def _fused_kernel(patches_ref,
                  stem_w, stem_b,
                  b1_we, b1_be, b1_dww, b1_dwb, b1_sw1, b1_sb1, b1_sw2, b1_sb2,
                  b1_wp, b1_bp,
                  b2_we, b2_be, b2_dww, b2_dwb, b2_sw1, b2_sb1, b2_sw2, b2_sb2,
                  b2_wp, b2_bp,
                  head_w, head_b,
                  out_ref, xpad1, xpad2, *, H, W):
    # Zero the depthwise halo buffers exactly once; only the interior is rewritten
    # per image, so the zero border persists across the whole grid.
    @pl.when(pl.program_id(0) == 0)
    def _init():
        xpad1[...] = jnp.zeros_like(xpad1)
        xpad2[...] = jnp.zeros_like(xpad2)

    # stem 3x3/s2 conv (as matmul over im2col patches) + folded BN + SiLU
    a = _silu(_dot(patches_ref[0], stem_w) + stem_b[...])  # (H*W, c_stem) f32
    # two MBConv blocks, all intermediates VMEM-resident
    a = _mbconv(a, b1_we, b1_be, b1_dww, b1_dwb, b1_sw1, b1_sb1, b1_sw2, b1_sb2,
                b1_wp, b1_bp, xpad1, H=H, W=W, skip=False)
    a = _mbconv(a, b2_we, b2_be, b2_dww, b2_dwb, b2_sw1, b2_sb1, b2_sw2, b2_sb2,
                b2_wp, b2_bp, xpad2, H=H, W=W, skip=True)
    # head 1x1 conv + folded BN + SiLU, then global average pool (== _avg_pooling)
    hfeat = _silu(_dot(a, head_w) + head_b[...])           # (H*W, c_head) f32
    pooled = jnp.mean(hfeat, axis=0, keepdims=True)        # (1, c_head)
    out_ref[...] = pooled.reshape(1, 1, -1).astype(out_ref.dtype)


# ---------------------------------------------------------------------------
# Wrapper glue
# ---------------------------------------------------------------------------
def _stem_im2col(x_nhwc, k=3, stride=2):
    """TF-style SAME padding (out = ceil(in/stride)) + im2col for the stride-2 stem."""
    N, H, W, Cin = x_nhwc.shape
    Ho = -(-H // stride)
    Wo = -(-W // stride)
    ph = max((Ho - 1) * stride + k - H, 0)
    pw = max((Wo - 1) * stride + k - W, 0)
    xp = jnp.pad(x_nhwc, ((0, 0), (ph // 2, ph - ph // 2),
                          (pw // 2, pw - pw // 2), (0, 0)))
    # TODO(synk): im2col is XLA glue (9x inflation of the tiny stem input); fold it
    # into the kernel with strided pl.ds loads if scaled to real B5 resolutions.
    cols = [xp[:, di:di + stride * (Ho - 1) + 1:stride,
               dj:dj + stride * (Wo - 1) + 1:stride, :]
            for di in range(k) for dj in range(k)]
    patches = jnp.concatenate(cols, axis=-1).reshape(N, Ho * Wo, k * k * Cin)
    return patches.astype(jnp.bfloat16), Ho, Wo


def _pack_params(p):
    """Fold BN scale into conv weights; cast matmul-operand weights to bf16."""
    def mm(w, scale):
        return (w * scale).astype(jnp.bfloat16)

    def blk(q):
        return (
            mm(q["expand_w"], q["expand_scale"]), q["expand_bias"],
            (q["dw_w"] * q["dw_scale"]).astype(jnp.float32), q["dw_bias"],
            q["se_w1"].astype(jnp.bfloat16), q["se_b1"],
            q["se_w2"].astype(jnp.bfloat16), q["se_b2"],
            mm(q["proj_w"], q["proj_scale"]), q["proj_bias"],
        )

    return ((mm(p["stem_w"], p["stem_scale"]), p["stem_bias"])
            + blk(p["block1"]) + blk(p["block2"])
            + (mm(p["head_w"], p["head_scale"]), p["head_bias"]))


def efficientnet_ic50_forward(x_nchw, params):
    # PyTorch input is NCHW; convert to NHWC for the kernel.
    x = jnp.transpose(x_nchw, (0, 2, 3, 1)).astype(jnp.float32)
    N = x.shape[0]
    patches, Ho, Wo = _stem_im2col(x)
    HW, Kc = patches.shape[1], patches.shape[2]
    flat = _pack_params(params)
    c_exp1 = params["block1"]["dw_w"].shape[1]
    c_exp2 = params["block2"]["dw_w"].shape[1]
    c_head = params["head_w"].shape[1]

    whole = lambda n: (0, 0)                   # all weights are rank-2, fully resident
    in_specs = [pl.BlockSpec((1, HW, Kc), lambda n: (n, 0, 0))]
    in_specs += [pl.BlockSpec(w.shape, whole) for w in flat]

    pooled = pl.pallas_call(
        functools.partial(_fused_kernel, H=Ho, W=Wo),
        out_shape=jax.ShapeDtypeStruct((N, 1, c_head), jnp.float32),
        grid_spec=pltpu.PrefetchScalarGridSpec(
            num_scalar_prefetch=0,
            grid=(N,),                         # one image per step; parallel -> megacore
            in_specs=in_specs,
            out_specs=pl.BlockSpec((1, 1, c_head), lambda n: (n, 0, 0)),
            scratch_shapes=[
                pltpu.VMEM((Ho + 2, Wo + 2, c_exp1), jnp.float32),
                pltpu.VMEM((Ho + 2, Wo + 2, c_exp2), jnp.float32),
            ],
        ),
        compiler_params=pltpu.CompilerParams(dimension_semantics=("parallel",)),
    )(patches, *flat)

    # match AdaptiveAvgPool2d(1) output layout: (N, C, 1, 1) in NCHW
    return pooled.reshape(N, c_head)[:, :, None, None]


# ---------------------------------------------------------------------------
# Deterministic synthetic parameters (BN folded at pack time)
# ---------------------------------------------------------------------------
def _bn_fold(key, c, eps=1e-3):
    k1, k2, k3, k4 = jax.random.split(key, 4)
    gamma = 1.0 + 0.1 * jax.random.normal(k1, (c,))
    beta = 0.1 * jax.random.normal(k2, (c,))
    mean = 0.1 * jax.random.normal(k3, (c,))
    var = 1.0 + 0.1 * jax.random.uniform(k4, (c,))
    scale = gamma / jnp.sqrt(var + eps)
    bias = beta - mean * scale
    return (scale.reshape(1, c).astype(jnp.float32),
            bias.reshape(1, c).astype(jnp.float32))


def init_params(key):
    keys = jax.random.split(key, 40)
    it = iter(keys)
    nk = lambda: next(it)
    p = {}
    cin, cstem = 3, 16
    p["stem_w"] = (jax.random.normal(nk(), (9 * cin, cstem)) / jnp.sqrt(9 * cin)).astype(jnp.float32)
    p["stem_scale"], p["stem_bias"] = _bn_fold(nk(), cstem)

    def mbconv_params(c_in, c_out, expand, se_ratio=0.25):
        q = {}
        c_exp = c_in * expand
        q["expand_w"] = (jax.random.normal(nk(), (c_in, c_exp)) / jnp.sqrt(c_in)).astype(jnp.float32)
        q["expand_scale"], q["expand_bias"] = _bn_fold(nk(), c_exp)
        q["dw_w"] = (jax.random.normal(nk(), (9, c_exp)) / 3.0).astype(jnp.float32)
        q["dw_scale"], q["dw_bias"] = _bn_fold(nk(), c_exp)
        c_se = max(1, int(c_in * se_ratio))
        q["se_w1"] = (jax.random.normal(nk(), (c_exp, c_se)) / jnp.sqrt(c_exp)).astype(jnp.float32)
        q["se_b1"] = (0.01 * jax.random.normal(nk(), (1, c_se))).astype(jnp.float32)
        q["se_w2"] = (jax.random.normal(nk(), (c_se, c_exp)) / jnp.sqrt(c_se)).astype(jnp.float32)
        q["se_b2"] = (0.01 * jax.random.normal(nk(), (1, c_exp))).astype(jnp.float32)
        q["proj_w"] = (jax.random.normal(nk(), (c_exp, c_out)) / jnp.sqrt(c_exp)).astype(jnp.float32)
        q["proj_scale"], q["proj_bias"] = _bn_fold(nk(), c_out)
        return q

    p["block1"] = mbconv_params(16, 24, 4)
    p["block2"] = mbconv_params(24, 24, 4)
    c_head = 128                                            # lane-dense pooled output
    p["head_w"] = (jax.random.normal(nk(), (24, c_head)) / jnp.sqrt(24)).astype(jnp.float32)
    p["head_scale"], p["head_bias"] = _bn_fold(nk(), c_head)
    return p


if __name__ == "__main__":
    key = jax.random.PRNGKey(0)
    pkey, xkey = jax.random.split(key)
    params = init_params(pkey)
    # small NCHW input consistent with the PyTorch module's image input
    x = jax.random.normal(xkey, (2, 3, 32, 32), dtype=jnp.float32)
    fwd = jax.jit(lambda inp: efficientnet_ic50_forward(inp, params))
    out = jax.block_until_ready(fwd(x))
    assert out.shape == (2, 128, 1, 1), out.shape
    assert bool(jnp.all(jnp.isfinite(out)))
    print("KERNEL_OK")
</pallas_src>

<mosaic_0001>
module attributes {stable_mosaic.version = 11 : i64} {
  func.func @_fused_kernel(%arg0: i32, %arg1: memref<1x256x27xbf16, #tpu.memory_space<vmem>>, %arg2: memref<27x16xbf16, #tpu.memory_space<vmem>>, %arg3: memref<1x16xf32, #tpu.memory_space<vmem>>, %arg4: memref<16x64xbf16, #tpu.memory_space<vmem>>, %arg5: memref<1x64xf32, #tpu.memory_space<vmem>>, %arg6: memref<9x64xf32, #tpu.memory_space<vmem>>, %arg7: memref<1x64xf32, #tpu.memory_space<vmem>>, %arg8: memref<64x4xbf16, #tpu.memory_space<vmem>>, %arg9: memref<1x4xf32, #tpu.memory_space<vmem>>, %arg10: memref<4x64xbf16, #tpu.memory_space<vmem>>, %arg11: memref<1x64xf32, #tpu.memory_space<vmem>>, %arg12: memref<64x24xbf16, #tpu.memory_space<vmem>>, %arg13: memref<1x24xf32, #tpu.memory_space<vmem>>, %arg14: memref<24x96xbf16, #tpu.memory_space<vmem>>, %arg15: memref<1x96xf32, #tpu.memory_space<vmem>>, %arg16: memref<9x96xf32, #tpu.memory_space<vmem>>, %arg17: memref<1x96xf32, #tpu.memory_space<vmem>>, %arg18: memref<96x6xbf16, #tpu.memory_space<vmem>>, %arg19: memref<1x6xf32, #tpu.memory_space<vmem>>, %arg20: memref<6x96xbf16, #tpu.memory_space<vmem>>, %arg21: memref<1x96xf32, #tpu.memory_space<vmem>>, %arg22: memref<96x24xbf16, #tpu.memory_space<vmem>>, %arg23: memref<1x24xf32, #tpu.memory_space<vmem>>, %arg24: memref<24x128xbf16, #tpu.memory_space<vmem>>, %arg25: memref<1x128xf32, #tpu.memory_space<vmem>>, %arg26: memref<1x1x128xf32, #tpu.memory_space<vmem>>, %arg27: memref<18x18x64xf32, #tpu.memory_space<vmem>>, %arg28: memref<18x18x96xf32, #tpu.memory_space<vmem>>) attributes {dimension_semantics = [#tpu.dimension_semantics<parallel>], iteration_bounds = array<i64: 2>, scalar_prefetch = 0 : i64, scratch_operands = 2 : i64, tpu.core_type = #tpu.core_type<tc>, window_params = [{transform_indices = @transform_0, window_bounds = array<i64: 1, 256, 27>}, {pipeline_mode = #tpu.pipeline_mode<synchronous>, transform_indices = @transform_1, window_bounds = array<i64: 27, 16>}, {pipeline_mode = #tpu.pipeline_mode<synchronous>, transform_indices = @transform_2, window_bounds = array<i64: 1, 16>}, {pipeline_mode = #tpu.pipeline_mode<synchronous>, transform_indices = @transform_3, window_bounds = array<i64: 16, 64>}, {pipeline_mode = #tpu.pipeline_mode<synchronous>, transform_indices = @transform_4, window_bounds = array<i64: 1, 64>}, {pipeline_mode = #tpu.pipeline_mode<synchronous>, transform_indices = @transform_5, window_bounds = array<i64: 9, 64>}, {pipeline_mode = #tpu.pipeline_mode<synchronous>, transform_indices = @transform_6, window_bounds = array<i64: 1, 64>}, {pipeline_mode = #tpu.pipeline_mode<synchronous>, transform_indices = @transform_7, window_bounds = array<i64: 64, 4>}, {pipeline_mode = #tpu.pipeline_mode<synchronous>, transform_indices = @transform_8, window_bounds = array<i64: 1, 4>}, {pipeline_mode = #tpu.pipeline_mode<synchronous>, transform_indices = @transform_9, window_bounds = array<i64: 4, 64>}, {pipeline_mode = #tpu.pipeline_mode<synchronous>, transform_indices = @transform_10, window_bounds = array<i64: 1, 64>}, {pipeline_mode = #tpu.pipeline_mode<synchronous>, transform_indices = @transform_11, window_bounds = array<i64: 64, 24>}, {pipeline_mode = #tpu.pipeline_mode<synchronous>, transform_indices = @transform_12, window_bounds = array<i64: 1, 24>}, {pipeline_mode = #tpu.pipeline_mode<synchronous>, transform_indices = @transform_13, window_bounds = array<i64: 24, 96>}, {pipeline_mode = #tpu.pipeline_mode<synchronous>, transform_indices = @transform_14, window_bounds = array<i64: 1, 96>}, {pipeline_mode = #tpu.pipeline_mode<synchronous>, transform_indices = @transform_15, window_bounds = array<i64: 9, 96>}, {pipeline_mode = #tpu.pipeline_mode<synchronous>, transform_indices = @transform_16, window_bounds = array<i64: 1, 96>}, {pipeline_mode = #tpu.pipeline_mode<synchronous>, transform_indices = @transform_17, window_bounds = array<i64: 96, 6>}, {pipeline_mode = #tpu.pipeline_mode<synchronous>, transform_indices = @transform_18, window_bounds = array<i64: 1, 6>}, {pipeline_mode = #tpu.pipeline_mode<synchronous>, transform_indices = @transform_19, window_bounds = array<i64: 6, 96>}, {pipeline_mode = #tpu.pipeline_mode<synchronous>, transform_indices = @transform_20, window_bounds = array<i64: 1, 96>}, {pipeline_mode = #tpu.pipeline_mode<synchronous>, transform_indices = @transform_21, window_bounds = array<i64: 96, 24>}, {pipeline_mode = #tpu.pipeline_mode<synchronous>, transform_indices = @transform_22, window_bounds = array<i64: 1, 24>}, {pipeline_mode = #tpu.pipeline_mode<synchronous>, transform_indices = @transform_23, window_bounds = array<i64: 24, 128>}, {pipeline_mode = #tpu.pipeline_mode<synchronous>, transform_indices = @transform_24, window_bounds = array<i64: 1, 128>}, {transform_indices = @transform_25, window_bounds = array<i64: 1, 1, 128>}]} {
    %c0_i32 = arith.constant 0 : i32
    %0 = arith.cmpi eq, %arg0, %c0_i32 : i32
    %1 = arith.extui %0 : i1 to i32
    %c0_i32_0 = arith.constant 0 : i32
    %2 = arith.cmpi ne, %1, %c0_i32_0 : i32
    scf.if %2 {
      %cst_165 = arith.constant 0.000000e+00 : f32
      %279 = vector.broadcast %cst_165 : f32 to vector<18x18x64xf32>
      %c0_166 = arith.constant 0 : index
      %c0_167 = arith.constant 0 : index
      %c0_168 = arith.constant 0 : index
      %280 = vector.load %arg27[%c0_166, %c0_167, %c0_168] : memref<18x18x64xf32, #tpu.memory_space<vmem>>, vector<18x18x64xf32>
      tpu.vector_store %arg27[%c0_166, %c0_167, %c0_168], %279 {strides = array<i32>} : memref<18x18x64xf32, #tpu.memory_space<vmem>>, vector<18x18x64xf32>,
      %cst_169 = arith.constant 0.000000e+00 : f32
      %281 = vector.broadcast %cst_169 : f32 to vector<18x18x96xf32>
      %c0_170 = arith.constant 0 : index
      %c0_171 = arith.constant 0 : index
      %c0_172 = arith.constant 0 : index
      %282 = vector.load %arg28[%c0_170, %c0_171, %c0_172] : memref<18x18x96xf32, #tpu.memory_space<vmem>>, vector<18x18x96xf32>
      tpu.vector_store %arg28[%c0_170, %c0_171, %c0_172], %281 {strides = array<i32>} : memref<18x18x96xf32, #tpu.memory_space<vmem>>, vector<18x18x96xf32>,
    } else {
    }
    %c0 = arith.constant 0 : index
    %c0_1 = arith.constant 0 : index
    %c0_2 = arith.constant 0 : index
    %3 = vector.load %arg1[%c0, %c0_1, %c0_2] : memref<1x256x27xbf16, #tpu.memory_space<vmem>>, vector<1x256x27xbf16>
    %4 = vector.shape_cast %3 : vector<1x256x27xbf16> to vector<256x27xbf16>
    %c0_3 = arith.constant 0 : index
    %c0_4 = arith.constant 0 : index
    %5 = vector.load %arg2[%c0_3, %c0_4] : memref<27x16xbf16, #tpu.memory_space<vmem>>, vector<27x16xbf16>
    %cst = arith.constant dense<0.000000e+00> : vector<256x16xf32>
    %6 = tpu.matmul %4, %5, %cst {dimension_numbers = #tpu.dot_dimension_numbers<[1], [0], [0], [1], [0, 0, 1, 1], [], []>} : vector<256x27xbf16>, vector<27x16xbf16>, vector<256x16xf32> -> vector<256x16xf32>
    %c0_5 = arith.constant 0 : index
    %c0_6 = arith.constant 0 : index
    %7 = vector.load %arg3[%c0_5, %c0_6] : memref<1x16xf32, #tpu.memory_space<vmem>>, vector<1x16xf32>
    %8 = vector.broadcast %7 : vector<1x16xf32> to vector<256x16xf32>
    %9 = arith.addf %6, %8 : vector<256x16xf32>
    %10 = arith.negf %9 : vector<256x16xf32>
    %11 = math.exp %10 : vector<256x16xf32>
    %cst_7 = arith.constant 1.000000e+00 : f32
    %12 = vector.broadcast %cst_7 : f32 to vector<256x16xf32>
    %13 = arith.addf %12, %11 : vector<256x16xf32>
    %14 = arith.divf %12, %13 : vector<256x16xf32>
    %15 = arith.mulf %9, %14 : vector<256x16xf32>
    %c0_8 = arith.constant 0 : index
    %c0_9 = arith.constant 0 : index
    %16 = vector.load %arg4[%c0_8, %c0_9] : memref<16x64xbf16, #tpu.memory_space<vmem>>, vector<16x64xbf16>
    %17 = arith.truncf %15 : vector<256x16xf32> to vector<256x16xbf16>
    %cst_10 = arith.constant dense<0.000000e+00> : vector<256x64xf32>
    %18 = tpu.matmul %17, %16, %cst_10 {dimension_numbers = #tpu.dot_dimension_numbers<[1], [0], [0], [1], [0, 0, 1, 1], [], []>} : vector<256x16xbf16>, vector<16x64xbf16>, vector<256x64xf32> -> vector<256x64xf32>
    %c0_11 = arith.constant 0 : index
    %c0_12 = arith.constant 0 : index
    %19 = vector.load %arg5[%c0_11, %c0_12] : memref<1x64xf32, #tpu.memory_space<vmem>>, vector<1x64xf32>
    %20 = vector.broadcast %19 : vector<1x64xf32> to vector<256x64xf32>
    %21 = arith.addf %18, %20 : vector<256x64xf32>
    %22 = arith.negf %21 : vector<256x64xf32>
    %23 = math.exp %22 : vector<256x64xf32>
    %cst_13 = arith.constant 1.000000e+00 : f32
    %24 = vector.broadcast %cst_13 : f32 to vector<256x64xf32>
    %25 = arith.addf %24, %23 : vector<256x64xf32>
    %26 = arith.divf %24, %25 : vector<256x64xf32>
    %27 = arith.mulf %21, %26 : vector<256x64xf32>
    %28 = vector.shape_cast %27 : vector<256x64xf32> to vector<16x16x64xf32>
    %c1 = arith.constant 1 : index
    %c1_14 = arith.constant 1 : index
    %c0_15 = arith.constant 0 : index
    %29 = vector.load %arg27[%c1, %c1_14, %c0_15] : memref<18x18x64xf32, #tpu.memory_space<vmem>>, vector<16x16x64xf32>
    tpu.vector_store %arg27[%c1, %c1_14, %c0_15], %28 {strides = array<i32>} : memref<18x18x64xf32, #tpu.memory_space<vmem>>, vector<16x16x64xf32>,
    %cst_16 = arith.constant 0.000000e+00 : f32
    %30 = vector.broadcast %cst_16 : f32 to vector<16x16x64xf32>
    %c0_17 = arith.constant 0 : index
    %c0_18 = arith.constant 0 : index
    %c0_19 = arith.constant 0 : index
    %31 = vector.load %arg27[%c0_17, %c0_18, %c0_19] : memref<18x18x64xf32, #tpu.memory_space<vmem>>, vector<16x16x64xf32>
    %c0_20 = arith.constant 0 : index
    %c0_21 = arith.constant 0 : index
    %32 = vector.load %arg6[%c0_20, %c0_21] : memref<9x64xf32, #tpu.memory_space<vmem>>, vector<1x64xf32>
    %33 = vector.shape_cast %32 : vector<1x64xf32> to vector<64xf32>
    %34 = vector.shape_cast %33 : vector<64xf32> to vector<1x1x64xf32>
    %35 = vector.broadcast %34 : vector<1x1x64xf32> to vector<16x16x64xf32>
    %36 = arith.mulf %31, %35 : vector<16x16x64xf32>
    %37 = arith.addf %30, %36 : vector<16x16x64xf32>
    %c0_22 = arith.constant 0 : index
    %c1_23 = arith.constant 1 : index
    %c0_24 = arith.constant 0 : index
    %38 = vector.load %arg27[%c0_22, %c1_23, %c0_24] : memref<18x18x64xf32, #tpu.memory_space<vmem>>, vector<16x16x64xf32>
    %c1_25 = arith.constant 1 : index
    %c0_26 = arith.constant 0 : index
    %39 = vector.load %arg6[%c1_25, %c0_26] : memref<9x64xf32, #tpu.memory_space<vmem>>, vector<1x64xf32>
    %40 = vector.shape_cast %39 : vector<1x64xf32> to vector<64xf32>
    %41 = vector.shape_cast %40 : vector<64xf32> to vector<1x1x64xf32>
    %42 = vector.broadcast %41 : vector<1x1x64xf32> to vector<16x16x64xf32>
    %43 = arith.mulf %38, %42 : vector<16x16x64xf32>
    %44 = arith.addf %37, %43 : vector<16x16x64xf32>
    %c0_27 = arith.constant 0 : index
    %c2 = arith.constant 2 : index
    %c0_28 = arith.constant 0 : index
    %45 = vector.load %arg27[%c0_27, %c2, %c0_28] : memref<18x18x64xf32, #tpu.memory_space<vmem>>, vector<16x16x64xf32>
    %c2_29 = arith.constant 2 : index
    %c0_30 = arith.constant 0 : index
    %46 = vector.load %arg6[%c2_29, %c0_30] : memref<9x64xf32, #tpu.memory_space<vmem>>, vector<1x64xf32>
    %47 = vector.shape_cast %46 : vector<1x64xf32> to vector<64xf32>
    %48 = vector.shape_cast %47 : vector<64xf32> to vector<1x1x64xf32>
    %49 = vector.broadcast %48 : vector<1x1x64xf32> to vector<16x16x64xf32>
    %50 = arith.mulf %45, %49 : vector<16x16x64xf32>
    %51 = arith.addf %44, %50 : vector<16x16x64xf32>
    %c1_31 = arith.constant 1 : index
    %c0_32 = arith.constant 0 : index
    %c0_33 = arith.constant 0 : index
    %52 = vector.load %arg27[%c1_31, %c0_32, %c0_33] : memref<18x18x64xf32, #tpu.memory_space<vmem>>, vector<16x16x64xf32>
    %c3 = arith.constant 3 : index
    %c0_34 = arith.constant 0 : index
    %53 = vector.load %arg6[%c3, %c0_34] : memref<9x64xf32, #tpu.memory_space<vmem>>, vector<1x64xf32>
    %54 = vector.shape_cast %53 : vector<1x64xf32> to vector<64xf32>
    %55 = vector.shape_cast %54 : vector<64xf32> to vector<1x1x64xf32>
    %56 = vector.broadcast %55 : vector<1x1x64xf32> to vector<16x16x64xf32>
    %57 = arith.mulf %52, %56 : vector<16x16x64xf32>
    %58 = arith.addf %51, %57 : vector<16x16x64xf32>
    %c1_35 = arith.constant 1 : index
    %c1_36 = arith.constant 1 : index
    %c0_37 = arith.constant 0 : index
    %59 = vector.load %arg27[%c1_35, %c1_36, %c0_37] : memref<18x18x64xf32, #tpu.memory_space<vmem>>, vector<16x16x64xf32>
    %c4 = arith.constant 4 : index
    %c0_38 = arith.constant 0 : index
    %60 = vector.load %arg6[%c4, %c0_38] : memref<9x64xf32, #tpu.memory_space<vmem>>, vector<1x64xf32>
    %61 = vector.shape_cast %60 : vector<1x64xf32> to vector<64xf32>
    %62 = vector.shape_cast %61 : vector<64xf32> to vector<1x1x64xf32>
    %63 = vector.broadcast %62 : vector<1x1x64xf32> to vector<16x16x64xf32>
    %64 = arith.mulf %59, %63 : vector<16x16x64xf32>
    %65 = arith.addf %58, %64 : vector<16x16x64xf32>
    %c1_39 = arith.constant 1 : index
    %c2_40 = arith.constant 2 : index
    %c0_41 = arith.constant 0 : index
    %66 = vector.load %arg27[%c1_39, %c2_40, %c0_41] : memref<18x18x64xf32, #tpu.memory_space<vmem>>, vector<16x16x64xf32>
    %c5 = arith.constant 5 : index
    %c0_42 = arith.constant 0 : index
    %67 = vector.load %arg6[%c5, %c0_42] : memref<9x64xf32, #tpu.memory_space<vmem>>, vector<1x64xf32>
    %68 = vector.shape_cast %67 : vector<1x64xf32> to vector<64xf32>
    %69 = vector.shape_cast %68 : vector<64xf32> to vector<1x1x64xf32>
    %70 = vector.broadcast %69 : vector<1x1x64xf32> to vector<16x16x64xf32>
    %71 = arith.mulf %66, %70 : vector<16x16x64xf32>
    %72 = arith.addf %65, %71 : vector<16x16x64xf32>
    %c2_43 = arith.constant 2 : index
    %c0_44 = arith.constant 0 : index
    %c0_45 = arith.constant 0 : index
    %73 = vector.load %arg27[%c2_43, %c0_44, %c0_45] : memref<18x18x64xf32, #tpu.memory_space<vmem>>, vector<16x16x64xf32>
    %c6 = arith.constant 6 : index
    %c0_46 = arith.constant 0 : index
    %74 = vector.load %arg6[%c6, %c0_46] : memref<9x64xf32, #tpu.memory_space<vmem>>, vector<1x64xf32>
    %75 = vector.shape_cast %74 : vector<1x64xf32> to vector<64xf32>
    %76 = vector.shape_cast %75 : vector<64xf32> to vector<1x1x64xf32>
    %77 = vector.broadcast %76 : vector<1x1x64xf32> to vector<16x16x64xf32>
    %78 = arith.mulf %73, %77 : vector<16x16x64xf32>
    %79 = arith.addf %72, %78 : vector<16x16x64xf32>
    %c2_47 = arith.constant 2 : index
    %c1_48 = arith.constant 1 : index
    %c0_49 = arith.constant 0 : index
    %80 = vector.load %arg27[%c2_47, %c1_48, %c0_49] : memref<18x18x64xf32, #tpu.memory_space<vmem>>, vector<16x16x64xf32>
    %c7 = arith.constant 7 : index
    %c0_50 = arith.constant 0 : index
    %81 = vector.load %arg6[%c7, %c0_50] : memref<9x64xf32, #tpu.memory_space<vmem>>, vector<1x64xf32>
    %82 = vector.shape_cast %81 : vector<1x64xf32> to vector<64xf32>
    %83 = vector.shape_cast %82 : vector<64xf32> to vector<1x1x64xf32>
    %84 = vector.broadcast %83 : vector<1x1x64xf32> to vector<16x16x64xf32>
    %85 = arith.mulf %80, %84 : vector<16x16x64xf32>
    %86 = arith.addf %79, %85 : vector<16x16x64xf32>
    %c2_51 = arith.constant 2 : index
    %c2_52 = arith.constant 2 : index
    %c0_53 = arith.constant 0 : index
    %87 = vector.load %arg27[%c2_51, %c2_52, %c0_53] : memref<18x18x64xf32, #tpu.memory_space<vmem>>, vector<16x16x64xf32>
    %c8 = arith.constant 8 : index
    %c0_54 = arith.constant 0 : index
    %88 = vector.load %arg6[%c8, %c0_54] : memref<9x64xf32, #tpu.memory_space<vmem>>, vector<1x64xf32>
    %89 = vector.shape_cast %88 : vector<1x64xf32> to vector<64xf32>
    %90 = vector.shape_cast %89 : vector<64xf32> to vector<1x1x64xf32>
    %91 = vector.broadcast %90 : vector<1x1x64xf32> to vector<16x16x64xf32>
    %92 = arith.mulf %87, %91 : vector<16x16x64xf32>
    %93 = arith.addf %86, %92 : vector<16x16x64xf32>
    %c0_55 = arith.constant 0 : index
    %c0_56 = arith.constant 0 : index
    %94 = vector.load %arg7[%c0_55, %c0_56] : memref<1x64xf32, #tpu.memory_space<vmem>>, vector<1x64xf32>
    %95 = vector.shape_cast %94 : vector<1x64xf32> to vector<1x1x64xf32>
    %96 = vector.broadcast %95 : vector<1x1x64xf32> to vector<16x16x64xf32>
    %97 = arith.addf %93, %96 : vector<16x16x64xf32>
    %98 = arith.negf %97 : vector<16x16x64xf32>
    %99 = math.exp %98 : vector<16x16x64xf32>
    %cst_57 = arith.constant 1.000000e+00 : f32
    %100 = vector.broadcast %cst_57 : f32 to vector<16x16x64xf32>
    %101 = arith.addf %100, %99 : vector<16x16x64xf32>
    %102 = arith.divf %100, %101 : vector<16x16x64xf32>
    %103 = arith.mulf %97, %102 : vector<16x16x64xf32>
    %104 = vector.shape_cast %103 : vector<16x16x64xf32> to vector<256x64xf32>
    %cst_58 = arith.constant dense<0.000000e+00> : vector<64xf32>
    %105 = vector.multi_reduction <add>, %104, %cst_58 [0] : vector<256x64xf32> to vector<64xf32>
    %106 = vector.shape_cast %105 : vector<64xf32> to vector<1x64xf32>
    %cst_59 = arith.constant 2.560000e+02 : f32
    %107 = vector.broadcast %cst_59 : f32 to vector<1x64xf32>
    %108 = arith.divf %106, %107 : vector<1x64xf32>
    %c0_60 = arith.constant 0 : index
    %c0_61 = arith.constant 0 : index
    %109 = vector.load %arg8[%c0_60, %c0_61] : memref<64x4xbf16, #tpu.memory_space<vmem>>, vector<64x4xbf16>
    %110 = arith.truncf %108 : vector<1x64xf32> to vector<1x64xbf16>
    %cst_62 = arith.constant dense<0.000000e+00> : vector<1x4xf32>
    %111 = tpu.matmul %110, %109, %cst_62 {dimension_numbers = #tpu.dot_dimension_numbers<[1], [0], [0], [1], [0, 0, 1, 1], [], []>} : vector<1x64xbf16>, vector<64x4xbf16>, vector<1x4xf32> -> vector<1x4xf32>
    %c0_63 = arith.constant 0 : index
    %c0_64 = arith.constant 0 : index
    %112 = vector.load %arg9[%c0_63, %c0_64] : memref<1x4xf32, #tpu.memory_space<vmem>>, vector<1x4xf32>
    %113 = arith.addf %111, %112 : vector<1x4xf32>
    %114 = arith.negf %113 : vector<1x4xf32>
    %115 = math.exp %114 : vector<1x4xf32>
    %cst_65 = arith.constant 1.000000e+00 : f32
    %116 = vector.broadcast %cst_65 : f32 to vector<1x4xf32>
    %117 = arith.addf %116, %115 : vector<1x4xf32>
    %118 = arith.divf %116, %117 : vector<1x4xf32>
    %119 = arith.mulf %113, %118 : vector<1x4xf32>
    %c0_66 = arith.constant 0 : index
    %c0_67 = arith.constant 0 : index
    %120 = vector.load %arg10[%c0_66, %c0_67] : memref<4x64xbf16, #tpu.memory_space<vmem>>, vector<4x64xbf16>
    %121 = arith.truncf %119 : vector<1x4xf32> to vector<1x4xbf16>
    %cst_68 = arith.constant dense<0.000000e+00> : vector<1x64xf32>
    %122 = tpu.matmul %121, %120, %cst_68 {dimension_numbers = #tpu.dot_dimension_numbers<[1], [0], [0], [1], [0, 0, 1, 1], [], []>} : vector<1x4xbf16>, vector<4x64xbf16>, vector<1x64xf32> -> vector<1x64xf32>
    %c0_69 = arith.constant 0 : index
    %c0_70 = arith.constant 0 : index
    %123 = vector.load %arg11[%c0_69, %c0_70] : memref<1x64xf32, #tpu.memory_space<vmem>>, vector<1x64xf32>
    %124 = arith.addf %122, %123 : vector<1x64xf32>
    %125 = arith.negf %124 : vector<1x64xf32>
    %126 = math.exp %125 : vector<1x64xf32>
    %cst_71 = arith.constant 1.000000e+00 : f32
    %127 = vector.broadcast %cst_71 : f32 to vector<1x64xf32>
    %128 = arith.addf %127, %126 : vector<1x64xf32>
    %129 = arith.divf %127, %128 : vector<1x64xf32>
    %130 = vector.broadcast %129 : vector<1x64xf32> to vector<256x64xf32>
    %131 = arith.mulf %104, %130 : vector<256x64xf32>
    %c0_72 = arith.constant 0 : index
    %c0_73 = arith.constant 0 : index
    %132 = vector.load %arg12[%c0_72, %c0_73] : memref<64x24xbf16, #tpu.memory_space<vmem>>, vector<64x24xbf16>
    %133 = arith.truncf %131 : vector<256x64xf32> to vector<256x64xbf16>
    %cst_74 = arith.constant dense<0.000000e+00> : vector<256x24xf32>
    %134 = tpu.matmul %133, %132, %cst_74 {dimension_numbers = #tpu.dot_dimension_numbers<[1], [0], [0], [1], [0, 0, 1, 1], [], []>} : vector<256x64xbf16>, vector<64x24xbf16>, vector<256x24xf32> -> vector<256x24xf32>
    %c0_75 = arith.constant 0 : index
    %c0_76 = arith.constant 0 : index
    %135 = vector.load %arg13[%c0_75, %c0_76] : memref<1x24xf32, #tpu.memory_space<vmem>>, vector<1x24xf32>
    %136 = vector.broadcast %135 : vector<1x24xf32> to vector<256x24xf32>
    %137 = arith.addf %134, %136 : vector<256x24xf32>
    %c0_77 = arith.constant 0 : index
    %c0_78 = arith.constant 0 : index
    %138 = vector.load %arg14[%c0_77, %c0_78] : memref<24x96xbf16, #tpu.memory_space<vmem>>, vector<24x96xbf16>
    %139 = arith.truncf %137 : vector<256x24xf32> to vector<256x24xbf16>
    %cst_79 = arith.constant dense<0.000000e+00> : vector<256x96xf32>
    %140 = tpu.matmul %139, %138, %cst_79 {dimension_numbers = #tpu.dot_dimension_numbers<[1], [0], [0], [1], [0, 0, 1, 1], [], []>} : vector<256x24xbf16>, vector<24x96xbf16>, vector<256x96xf32> -> vector<256x96xf32>
    %c0_80 = arith.constant 0 : index
    %c0_81 = arith.constant 0 : index
    %141 = vector.load %arg15[%c0_80, %c0_81] : memref<1x96xf32, #tpu.memory_space<vmem>>, vector<1x96xf32>
    %142 = vector.broadcast %141 : vector<1x96xf32> to vector<256x96xf32>
    %143 = arith.addf %140, %142 : vector<256x96xf32>
    %144 = arith.negf %143 : vector<256x96xf32>
    %145 = math.exp %144 : vector<256x96xf32>
    %cst_82 = arith.constant 1.000000e+00 : f32
    %146 = vector.broadcast %cst_82 : f32 to vector<256x96xf32>
    %147 = arith.addf %146, %145 : vector<256x96xf32>
    %148 = arith.divf %146, %147 : vector<256x96xf32>
    %149 = arith.mulf %143, %148 : vector<256x96xf32>
    %150 = vector.shape_cast %149 : vector<256x96xf32> to vector<16x16x96xf32>
    %c1_83 = arith.constant 1 : index
    %c1_84 = arith.constant 1 : index
    %c0_85 = arith.constant 0 : index
    %151 = vector.load %arg28[%c1_83, %c1_84, %c0_85] : memref<18x18x96xf32, #tpu.memory_space<vmem>>, vector<16x16x96xf32>
    tpu.vector_store %arg28[%c1_83, %c1_84, %c0_85], %150 {strides = array<i32>} : memref<18x18x96xf32, #tpu.memory_space<vmem>>, vector<16x16x96xf32>,
    %cst_86 = arith.constant 0.000000e+00 : f32
    %152 = vector.broadcast %cst_86 : f32 to vector<16x16x96xf32>
    %c0_87 = arith.constant 0 : index
    %c0_88 = arith.constant 0 : index
    %c0_89 = arith.constant 0 : index
    %153 = vector.load %arg28[%c0_87, %c0_88, %c0_89] : memref<18x18x96xf32, #tpu.memory_space<vmem>>, vector<16x16x96xf32>
    %c0_90 = arith.constant 0 : index
    %c0_91 = arith.constant 0 : index
    %154 = vector.load %arg16[%c0_90, %c0_91] : memref<9x96xf32, #tpu.memory_space<vmem>>, vector<1x96xf32>
    %155 = vector.shape_cast %154 : vector<1x96xf32> to vector<96xf32>
    %156 = vector.shape_cast %155 : vector<96xf32> to vector<1x1x96xf32>
    %157 = vector.broadcast %156 : vector<1x1x96xf32> to vector<16x16x96xf32>
    %158 = arith.mulf %153, %157 : vector<16x16x96xf32>
    %159 = arith.addf %152, %158 : vector<16x16x96xf32>
    %c0_92 = arith.constant 0 : index
    %c1_93 = arith.constant 1 : index
    %c0_94 = arith.constant 0 : index
    %160 = vector.load %arg28[%c0_92, %c1_93, %c0_94] : memref<18x18x96xf32, #tpu.memory_space<vmem>>, vector<16x16x96xf32>
    %c1_95 = arith.constant 1 : index
    %c0_96 = arith.constant 0 : index
    %161 = vector.load %arg16[%c1_95, %c0_96] : memref<9x96xf32, #tpu.memory_space<vmem>>, vector<1x96xf32>
    %162 = vector.shape_cast %161 : vector<1x96xf32> to vector<96xf32>
    %163 = vector.shape_cast %162 : vector<96xf32> to vector<1x1x96xf32>
    %164 = vector.broadcast %163 : vector<1x1x96xf32> to vector<16x16x96xf32>
    %165 = arith.mulf %160, %164 : vector<16x16x96xf32>
    %166 = arith.addf %159, %165 : vector<16x16x96xf32>
    %c0_97 = arith.constant 0 : index
    %c2_98 = arith.constant 2 : index
    %c0_99 = arith.constant 0 : index
    %167 = vector.load %arg28[%c0_97, %c2_98, %c0_99] : memref<18x18x96xf32, #tpu.memory_space<vmem>>, vector<16x16x96xf32>
    %c2_100 = arith.constant 2 : index
    %c0_101 = arith.constant 0 : index
    %168 = vector.load %arg16[%c2_100, %c0_101] : memref<9x96xf32, #tpu.memory_space<vmem>>, vector<1x96xf32>
    %169 = vector.shape_cast %168 : vector<1x96xf32> to vector<96xf32>
    %170 = vector.shape_cast %169 : vector<96xf32> to vector<1x1x96xf32>
    %171 = vector.broadcast %170 : vector<1x1x96xf32> to vector<16x16x96xf32>
    %172 = arith.mulf %167, %171 : vector<16x16x96xf32>
    %173 = arith.addf %166, %172 : vector<16x16x96xf32>
    %c1_102 = arith.constant 1 : index
    %c0_103 = arith.constant 0 : index
    %c0_104 = arith.constant 0 : index
    %174 = vector.load %arg28[%c1_102, %c0_103, %c0_104] : memref<18x18x96xf32, #tpu.memory_space<vmem>>, vector<16x16x96xf32>
    %c3_105 = arith.constant 3 : index
    %c0_106 = arith.constant 0 : index
    %175 = vector.load %arg16[%c3_105, %c0_106] : memref<9x96xf32, #tpu.memory_space<vmem>>, vector<1x96xf32>
    %176 = vector.shape_cast %175 : vector<1x96xf32> to vector<96xf32>
    %177 = vector.shape_cast %176 : vector<96xf32> to vector<1x1x96xf32>
    %178 = vector.broadcast %177 : vector<1x1x96xf32> to vector<16x16x96xf32>
    %179 = arith.mulf %174, %178 : vector<16x16x96xf32>
    %180 = arith.addf %173, %179 : vector<16x16x96xf32>
    %c1_107 = arith.constant 1 : index
    %c1_108 = arith.constant 1 : index
    %c0_109 = arith.constant 0 : index
    %181 = vector.load %arg28[%c1_107, %c1_108, %c0_109] : memref<18x18x96xf32, #tpu.memory_space<vmem>>, vector<16x16x96xf32>
    %c4_110 = arith.constant 4 : index
    %c0_111 = arith.constant 0 : index
    %182 = vector.load %arg16[%c4_110, %c0_111] : memref<9x96xf32, #tpu.memory_space<vmem>>, vector<1x96xf32>
    %183 = vector.shape_cast %182 : vector<1x96xf32> to vector<96xf32>
    %184 = vector.shape_cast %183 : vector<96xf32> to vector<1x1x96xf32>
    %185 = vector.broadcast %184 : vector<1x1x96xf32> to vector<16x16x96xf32>
    %186 = arith.mulf %181, %185 : vector<16x16x96xf32>
    %187 = arith.addf %180, %186 : vector<16x16x96xf32>
    %c1_112 = arith.constant 1 : index
    %c2_113 = arith.constant 2 : index
    %c0_114 = arith.constant 0 : index
    %188 = vector.load %arg28[%c1_112, %c2_113, %c0_114] : memref<18x18x96xf32, #tpu.memory_space<vmem>>, vector<16x16x96xf32>
    %c5_115 = arith.constant 5 : index
    %c0_116 = arith.constant 0 : index
    %189 = vector.load %arg16[%c5_115, %c0_116] : memref<9x96xf32, #tpu.memory_space<vmem>>, vector<1x96xf32>
    %190 = vector.shape_cast %189 : vector<1x96xf32> to vector<96xf32>
    %191 = vector.shape_cast %190 : vector<96xf32> to vector<1x1x96xf32>
    %192 = vector.broadcast %191 : vector<1x1x96xf32> to vector<16x16x96xf32>
    %193 = arith.mulf %188, %192 : vector<16x16x96xf32>
    %194 = arith.addf %187, %193 : vector<16x16x96xf32>
    %c2_117 = arith.constant 2 : index
    %c0_118 = arith.constant 0 : index
    %c0_119 = arith.constant 0 : index
    %195 = vector.load %arg28[%c2_117, %c0_118, %c0_119] : memref<18x18x96xf32, #tpu.memory_space<vmem>>, vector<16x16x96xf32>
    %c6_120 = arith.constant 6 : index
    %c0_121 = arith.constant 0 : index
    %196 = vector.load %arg16[%c6_120, %c0_121] : memref<9x96xf32, #tpu.memory_space<vmem>>, vector<1x96xf32>
    %197 = vector.shape_cast %196 : vector<1x96xf32> to vector<96xf32>
    %198 = vector.shape_cast %197 : vector<96xf32> to vector<1x1x96xf32>
    %199 = vector.broadcast %198 : vector<1x1x96xf32> to vector<16x16x96xf32>
    %200 = arith.mulf %195, %199 : vector<16x16x96xf32>
    %201 = arith.addf %194, %200 : vector<16x16x96xf32>
    %c2_122 = arith.constant 2 : index
    %c1_123 = arith.constant 1 : index
    %c0_124 = arith.constant 0 : index
    %202 = vector.load %arg28[%c2_122, %c1_123, %c0_124] : memref<18x18x96xf32, #tpu.memory_space<vmem>>, vector<16x16x96xf32>
    %c7_125 = arith.constant 7 : index
    %c0_126 = arith.constant 0 : index
    %203 = vector.load %arg16[%c7_125, %c0_126] : memref<9x96xf32, #tpu.memory_space<vmem>>, vector<1x96xf32>
    %204 = vector.shape_cast %203 : vector<1x96xf32> to vector<96xf32>
    %205 = vector.shape_cast %204 : vector<96xf32> to vector<1x1x96xf32>
    %206 = vector.broadcast %205 : vector<1x1x96xf32> to vector<16x16x96xf32>
    %207 = arith.mulf %202, %206 : vector<16x16x96xf32>
    %208 = arith.addf %201, %207 : vector<16x16x96xf32>
    %c2_127 = arith.constant 2 : index
    %c2_128 = arith.constant 2 : index
    %c0_129 = arith.constant 0 : index
    %209 = vector.load %arg28[%c2_127, %c2_128, %c0_129] : memref<18x18x96xf32, #tpu.memory_space<vmem>>, vector<16x16x96xf32>
    %c8_130 = arith.constant 8 : index
    %c0_131 = arith.constant 0 : index
    %210 = vector.load %arg16[%c8_130, %c0_131] : memref<9x96xf32, #tpu.memory_space<vmem>>, vector<1x96xf32>
    %211 = vector.shape_cast %210 : vector<1x96xf32> to vector<96xf32>
    %212 = vector.shape_cast %211 : vector<96xf32> to vector<1x1x96xf32>
    %213 = vector.broadcast %212 : vector<1x1x96xf32> to vector<16x16x96xf32>
    %214 = arith.mulf %209, %213 : vector<16x16x96xf32>
    %215 = arith.addf %208, %214 : vector<16x16x96xf32>
    %c0_132 = arith.constant 0 : index
    %c0_133 = arith.constant 0 : index
    %216 = vector.load %arg17[%c0_132, %c0_133] : memref<1x96xf32, #tpu.memory_space<vmem>>, vector<1x96xf32>
    %217 = vector.shape_cast %216 : vector<1x96xf32> to vector<1x1x96xf32>
    %218 = vector.broadcast %217 : vector<1x1x96xf32> to vector<16x16x96xf32>
    %219 = arith.addf %215, %218 : vector<16x16x96xf32>
    %220 = arith.negf %219 : vector<16x16x96xf32>
    %221 = math.exp %220 : vector<16x16x96xf32>
    %cst_134 = arith.constant 1.000000e+00 : f32
    %222 = vector.broadcast %cst_134 : f32 to vector<16x16x96xf32>
    %223 = arith.addf %222, %221 : vector<16x16x96xf32>
    %224 = arith.divf %222, %223 : vector<16x16x96xf32>
    %225 = arith.mulf %219, %224 : vector<16x16x96xf32>
    %226 = vector.shape_cast %225 : vector<16x16x96xf32> to vector<256x96xf32>
    %cst_135 = arith.constant dense<0.000000e+00> : vector<96xf32>
    %227 = vector.multi_reduction <add>, %226, %cst_135 [0] : vector<256x96xf32> to vector<96xf32>
    %228 = vector.shape_cast %227 : vector<96xf32> to vector<1x96xf32>
    %cst_136 = arith.constant 2.560000e+02 : f32
    %229 = vector.broadcast %cst_136 : f32 to vector<1x96xf32>
    %230 = arith.divf %228, %229 : vector<1x96xf32>
    %c0_137 = arith.constant 0 : index
    %c0_138 = arith.constant 0 : index
    %231 = vector.load %arg18[%c0_137, %c0_138] : memref<96x6xbf16, #tpu.memory_space<vmem>>, vector<96x6xbf16>
    %232 = arith.truncf %230 : vector<1x96xf32> to vector<1x96xbf16>
    %cst_139 = arith.constant dense<0.000000e+00> : vector<1x6xf32>
    %233 = tpu.matmul %232, %231, %cst_139 {dimension_numbers = #tpu.dot_dimension_numbers<[1], [0], [0], [1], [0, 0, 1, 1], [], []>} : vector<1x96xbf16>, vector<96x6xbf16>, vector<1x6xf32> -> vector<1x6xf32>
    %c0_140 = arith.constant 0 : index
    %c0_141 = arith.constant 0 : index
    %234 = vector.load %arg19[%c0_140, %c0_141] : memref<1x6xf32, #tpu.memory_space<vmem>>, vector<1x6xf32>
    %235 = arith.addf %233, %234 : vector<1x6xf32>
    %236 = arith.negf %235 : vector<1x6xf32>
    %237 = math.exp %236 : vector<1x6xf32>
    %cst_142 = arith.constant 1.000000e+00 : f32
    %238 = vector.broadcast %cst_142 : f32 to vector<1x6xf32>
    %239 = arith.addf %238, %237 : vector<1x6xf32>
    %240 = arith.divf %238, %239 : vector<1x6xf32>
    %241 = arith.mulf %235, %240 : vector<1x6xf32>
    %c0_143 = arith.constant 0 : index
    %c0_144 = arith.constant 0 : index
    %242 = vector.load %arg20[%c0_143, %c0_144] : memref<6x96xbf16, #tpu.memory_space<vmem>>, vector<6x96xbf16>
    %243 = arith.truncf %241 : vector<1x6xf32> to vector<1x6xbf16>
    %cst_145 = arith.constant dense<0.000000e+00> : vector<1x96xf32>
    %244 = tpu.matmul %243, %242, %cst_145 {dimension_numbers = #tpu.dot_dimension_numbers<[1], [0], [0], [1], [0, 0, 1, 1], [], []>} : vector<1x6xbf16>, vector<6x96xbf16>, vector<1x96xf32> -> vector<1x96xf32>
    %c0_146 = arith.constant 0 : index
    %c0_147 = arith.constant 0 : index
    %245 = vector.load %arg21[%c0_146, %c0_147] : memref<1x96xf32, #tpu.memory_space<vmem>>, vector<1x96xf32>
    %246 = arith.addf %244, %245 : vector<1x96xf32>
    %247 = arith.negf %246 : vector<1x96xf32>
    %248 = math.exp %247 : vector<1x96xf32>
    %cst_148 = arith.constant 1.000000e+00 : f32
    %249 = vector.broadcast %cst_148 : f32 to vector<1x96xf32>
    %250 = arith.addf %249, %248 : vector<1x96xf32>
    %251 = arith.divf %249, %250 : vector<1x96xf32>
    %252 = vector.broadcast %251 : vector<1x96xf32> to vector<256x96xf32>
    %253 = arith.mulf %226, %252 : vector<256x96xf32>
    %c0_149 = arith.constant 0 : index
    %c0_150 = arith.constant 0 : index
    %254 = vector.load %arg22[%c0_149, %c0_150] : memref<96x24xbf16, #tpu.memory_space<vmem>>, vector<96x24xbf16>
    %255 = arith.truncf %253 : vector<256x96xf32> to vector<256x96xbf16>
    %cst_151 = arith.constant dense<0.000000e+00> : vector<256x24xf32>
    %256 = tpu.matmul %255, %254, %cst_151 {dimension_numbers = #tpu.dot_dimension_numbers<[1], [0], [0], [1], [0, 0, 1, 1], [], []>} : vector<256x96xbf16>, vector<96x24xbf16>, vector<256x24xf32> -> vector<256x24xf32>
    %c0_152 = arith.constant 0 : index
    %c0_153 = arith.constant 0 : index
    %257 = vector.load %arg23[%c0_152, %c0_153] : memref<1x24xf32, #tpu.memory_space<vmem>>, vector<1x24xf32>
    %258 = vector.broadcast %257 : vector<1x24xf32> to vector<256x24xf32>
    %259 = arith.addf %256, %258 : vector<256x24xf32>
    %260 = arith.addf %259, %137 : vector<256x24xf32>
    %c0_154 = arith.constant 0 : index
    %c0_155 = arith.constant 0 : index
    %261 = vector.load %arg24[%c0_154, %c0_155] : memref<24x128xbf16, #tpu.memory_space<vmem>>, vector<24x128xbf16>
    %262 = arith.truncf %260 : vector<256x24xf32> to vector<256x24xbf16>
    %cst_156 = arith.constant dense<0.000000e+00> : vector<256x128xf32>
    %263 = tpu.matmul %262, %261, %cst_156 {dimension_numbers = #tpu.dot_dimension_numbers<[1], [0], [0], [1], [0, 0, 1, 1], [], []>} : vector<256x24xbf16>, vector<24x128xbf16>, vector<256x128xf32> -> vector<256x128xf32>
    %c0_157 = arith.constant 0 : index
    %c0_158 = arith.constant 0 : index
    %264 = vector.load %arg25[%c0_157, %c0_158] : memref<1x128xf32, #tpu.memory_space<vmem>>, vector<1x128xf32>
    %265 = vector.broadcast %264 : vector<1x128xf32> to vector<256x128xf32>
    %266 = arith.addf %263, %265 : vector<256x128xf32>
    %267 = arith.negf %266 : vector<256x128xf32>
    %268 = math.exp %267 : vector<256x128xf32>
    %cst_159 = arith.constant 1.000000e+00 : f32
    %269 = vector.broadcast %cst_159 : f32 to vector<256x128xf32>
    %270 = arith.addf %269, %268 : vector<256x128xf32>
    %271 = arith.divf %269, %270 : vector<256x128xf32>
    %272 = arith.mulf %266, %271 : vector<256x128xf32>
    %cst_160 = arith.constant dense<0.000000e+00> : vector<128xf32>
    %273 = vector.multi_reduction <add>, %272, %cst_160 [0] : vector<256x128xf32> to vector<128xf32>
    %274 = vector.shape_cast %273 : vector<128xf32> to vector<1x128xf32>
    %cst_161 = arith.constant 2.560000e+02 : f32
    %275 = vector.broadcast %cst_161 : f32 to vector<1x128xf32>
    %276 = arith.divf %274, %275 : vector<1x128xf32>
    %277 = vector.shape_cast %276 : vector<1x128xf32> to vector<1x1x128xf32>
    %c0_162 = arith.constant 0 : index
    %c0_163 = arith.constant 0 : index
    %c0_164 = arith.constant 0 : index
    %278 = vector.load %arg26[%c0_162, %c0_163, %c0_164] : memref<1x1x128xf32, #tpu.memory_space<vmem>>, vector<1x1x128xf32>
    tpu.vector_store %arg26[%c0_162, %c0_163, %c0_164], %277 {strides = array<i32>} : memref<1x1x128xf32, #tpu.memory_space<vmem>>, vector<1x1x128xf32>,
    return
  }
  func.func @transform_0(%arg0: i32) -> (i32, i32, i32) {
    %c0_i32 = arith.constant 0 : i32
    %c0_i32_0 = arith.constant 0 : i32
    %c0_i32_1 = arith.constant 0 : i32
    return %arg0, %c0_i32, %c0_i32_0 : i32, i32, i32
  }
  func.func @transform_1(%arg0: i32) -> (i32, i32) {
    %c0_i32 = arith.constant 0 : i32
    %c0_i32_0 = arith.constant 0 : i32
    %c0_i32_1 = arith.constant 0 : i32
    return %c0_i32, %c0_i32_0 : i32, i32
  }
  func.func @transform_2(%arg0: i32) -> (i32, i32) {
    %c0_i32 = arith.constant 0 : i32
    %c0_i32_0 = arith.constant 0 : i32
    %c0_i32_1 = arith.constant 0 : i32
    return %c0_i32, %c0_i32_0 : i32, i32
  }
  func.func @transform_3(%arg0: i32) -> (i32, i32) {
    %c0_i32 = arith.constant 0 : i32
    %c0_i32_0 = arith.constant 0 : i32
    %c0_i32_1 = arith.constant 0 : i32
    return %c0_i32, %c0_i32_0 : i32, i32
  }
  func.func @transform_4(%arg0: i32) -> (i32, i32) {
    %c0_i32 = arith.constant 0 : i32
    %c0_i32_0 = arith.constant 0 : i32
    %c0_i32_1 = arith.constant 0 : i32
    return %c0_i32, %c0_i32_0 : i32, i32
  }
  func.func @transform_5(%arg0: i32) -> (i32, i32) {
    %c0_i32 = arith.constant 0 : i32
    %c0_i32_0 = arith.constant 0 : i32
    %c0_i32_1 = arith.constant 0 : i32
    return %c0_i32, %c0_i32_0 : i32, i32
  }
  func.func @transform_6(%arg0: i32) -> (i32, i32) {
    %c0_i32 = arith.constant 0 : i32
    %c0_i32_0 = arith.constant 0 : i32
    %c0_i32_1 = arith.constant 0 : i32
    return %c0_i32, %c0_i32_0 : i32, i32
  }
  func.func @transform_7(%arg0: i32) -> (i32, i32) {
    %c0_i32 = arith.constant 0 : i32
    %c0_i32_0 = arith.constant 0 : i32
    %c0_i32_1 = arith.constant 0 : i32
    return %c0_i32, %c0_i32_0 : i32, i32
  }
  func.func @transform_8(%arg0: i32) -> (i32, i32) {
    %c0_i32 = arith.constant 0 : i32
    %c0_i32_0 = arith.constant 0 : i32
    %c0_i32_1 = arith.constant 0 : i32
    return %c0_i32, %c0_i32_0 : i32, i32
  }
  func.func @transform_9(%arg0: i32) -> (i32, i32) {
    %c0_i32 = arith.constant 0 : i32
    %c0_i32_0 = arith.constant 0 : i32
    %c0_i32_1 = arith.constant 0 : i32
    return %c0_i32, %c0_i32_0 : i32, i32
  }
  func.func @transform_10(%arg0: i32) -> (i32, i32) {
    %c0_i32 = arith.constant 0 : i32
    %c0_i32_0 = arith.constant 0 : i32
    %c0_i32_1 = arith.constant 0 : i32
    return %c0_i32, %c0_i32_0 : i32, i32
  }
  func.func @transform_11(%arg0: i32) -> (i32, i32) {
    %c0_i32 = arith.constant 0 : i32
    %c0_i32_0 = arith.constant 0 : i32
    %c0_i32_1 = arith.constant 0 : i32
    return %c0_i32, %c0_i32_0 : i32, i32
  }
  func.func @transform_12(%arg0: i32) -> (i32, i32) {
    %c0_i32 = arith.constant 0 : i32
    %c0_i32_0 = arith.constant 0 : i32
    %c0_i32_1 = arith.constant 0 : i32
    return %c0_i32, %c0_i32_0 : i32, i32
  }
  func.func @transform_13(%arg0: i32) -> (i32, i32) {
    %c0_i32 = arith.constant 0 : i32
    %c0_i32_0 = arith.constant 0 : i32
    %c0_i32_1 = arith.constant 0 : i32
    return %c0_i32, %c0_i32_0 : i32, i32
  }
  func.func @transform_14(%arg0: i32) -> (i32, i32) {
    %c0_i32 = arith.constant 0 : i32
    %c0_i32_0 = arith.constant 0 : i32
    %c0_i32_1 = arith.constant 0 : i32
    return %c0_i32, %c0_i32_0 : i32, i32
  }
  func.func @transform_15(%arg0: i32) -> (i32, i32) {
    %c0_i32 = arith.constant 0 : i32
    %c0_i32_0 = arith.constant 0 : i32
    %c0_i32_1 = arith.constant 0 : i32
    return %c0_i32, %c0_i32_0 : i32, i32
  }
  func.func @transform_16(%arg0: i32) -> (i32, i32) {
    %c0_i32 = arith.constant 0 : i32
    %c0_i32_0 = arith.constant 0 : i32
    %c0_i32_1 = arith.constant 0 : i32
    return %c0_i32, %c0_i32_0 : i32, i32
  }
  func.func @transform_17(%arg0: i32) -> (i32, i32) {
    %c0_i32 = arith.constant 0 : i32
    %c0_i32_0 = arith.constant 0 : i32
    %c0_i32_1 = arith.constant 0 : i32
    return %c0_i32, %c0_i32_0 : i32, i32
  }
  func.func @transform_18(%arg0: i32) -> (i32, i32) {
    %c0_i32 = arith.constant 0 : i32
    %c0_i32_0 = arith.constant 0 : i32
    %c0_i32_1 = arith.constant 0 : i32
    return %c0_i32, %c0_i32_0 : i32, i32
  }
  func.func @transform_19(%arg0: i32) -> (i32, i32) {
    %c0_i32 = arith.constant 0 : i32
    %c0_i32_0 = arith.constant 0 : i32
    %c0_i32_1 = arith.constant 0 : i32
    return %c0_i32, %c0_i32_0 : i32, i32
  }
  func.func @transform_20(%arg0: i32) -> (i32, i32) {
    %c0_i32 = arith.constant 0 : i32
    %c0_i32_0 = arith.constant 0 : i32
    %c0_i32_1 = arith.constant 0 : i32
    return %c0_i32, %c0_i32_0 : i32, i32
  }
  func.func @transform_21(%arg0: i32) -> (i32, i32) {
    %c0_i32 = arith.constant 0 : i32
    %c0_i32_0 = arith.constant 0 : i32
    %c0_i32_1 = arith.constant 0 : i32
    return %c0_i32, %c0_i32_0 : i32, i32
  }
  func.func @transform_22(%arg0: i32) -> (i32, i32) {
    %c0_i32 = arith.constant 0 : i32
    %c0_i32_0 = arith.constant 0 : i32
    %c0_i32_1 = arith.constant 0 : i32
    return %c0_i32, %c0_i32_0 : i32, i32
  }
  func.func @transform_23(%arg0: i32) -> (i32, i32) {
    %c0_i32 = arith.constant 0 : i32
    %c0_i32_0 = arith.constant 0 : i32
    %c0_i32_1 = arith.constant 0 : i32
    return %c0_i32, %c0_i32_0 : i32, i32
  }
  func.func @transform_24(%arg0: i32) -> (i32, i32) {
    %c0_i32 = arith.constant 0 : i32
    %c0_i32_0 = arith.constant 0 : i32
    %c0_i32_1 = arith.constant 0 : i32
    return %c0_i32, %c0_i32_0 : i32, i32
  }
  func.func @transform_25(%arg0: i32) -> (i32, i32, i32) {
    %c0_i32 = arith.constant 0 : i32
    %c0_i32_0 = arith.constant 0 : i32
    %c0_i32_1 = arith.constant 0 : i32
    return %arg0, %c0_i32, %c0_i32_0 : i32, i32, i32
  }
}

</mosaic_0001>

<bundles_post_ra>
// kernel: _lambda_.1
= control target key start
LH: loop header
LB: loop body
LE: loop exit
PB: predicated region body
PF: predicated region fallthrough
CT: control target
= control target key end

     0   :  { %s11878_s0 = inlined_call_operand.vmem [shape: bf16[2,256,27], index: 0, kind: input, shape index: {}]   ;;  %s11879_s1 = inlined_call_operand.vmem [shape: bf16[27,16], index: 1, kind: input, shape index: {}]   ;;  %s11880_s2 = inlined_call_operand.vmem [shape: f32[1,16], index: 2, kind: input, shape index: {}]   ;;  %s11881_s3 = inlined_call_operand.vmem [shape: bf16[16,64], index: 3, kind: input, shape index: {}]   ;;  %s11882_s4 = inlined_call_operand.vmem [shape: f32[1,64], index: 4, kind: input, shape index: {}]   ;;  %s11883_s5 = inlined_call_operand.vmem [shape: f32[9,64], index: 5, kind: input, shape index: {}]   ;;  %s11884_s6 = inlined_call_operand.vmem [shape: f32[1,64], index: 6, kind: input, shape index: {}]   ;;  %s11885_s7 = inlined_call_operand.vmem [shape: bf16[64,4], index: 7, kind: input, shape index: {}]   ;;  %s11886_s8 = inlined_call_operand.vmem [shape: f32[1,4], index: 8, kind: input, shape index: {}]   ;;  %s11887_s9 = inlined_call_operand.vmem [shape: bf16[4,64], index: 9, kind: input, shape index: {}]   ;;  %s11888_s10 = inlined_call_operand.vmem [shape: f32[1,64], index: 10, kind: input, shape index: {}]   ;;  %s11889_s11 = inlined_call_operand.vmem [shape: bf16[64,24], index: 11, kind: input, shape index: {}]   ;;  %s11890_s12 = inlined_call_operand.vmem [shape: f32[1,24], index: 12, kind: input, shape index: {}]   ;;  %s11891_s13 = inlined_call_operand.vmem [shape: bf16[24,96], index: 13, kind: input, shape index: {}]   ;;  %s11892_s14 = inlined_call_operand.vmem [shape: f32[1,96], index: 14, kind: input, shape index: {}]   ;;  %s11893_s15 = inlined_call_operand.vmem [shape: f32[9,96], index: 15, kind: input, shape index: {}]   ;;  %s11894_s16 = inlined_call_operand.vmem [shape: f32[1,96], index: 16, kind: input, shape index: {}]   ;;  %s11895_s17 = inlined_call_operand.vmem [shape: bf16[96,6], index: 17, kind: input, shape index: {}]   ;;  %s11896_s18 = inlined_call_operand.vmem [shape: f32[1,6], index: 18, kind: input, shape index: {}]   ;;  %s11897_s19 = inlined_call_operand.vmem [shape: bf16[6,96], index: 19, kind: input, shape index: {}]   ;;  %s11898_s20 = inlined_call_operand.vmem [shape: f32[1,96], index: 20, kind: input, shape index: {}]   ;;  %s11899_s21 = inlined_call_operand.vmem [shape: bf16[96,24], index: 21, kind: input, shape index: {}]   ;;  %s11900_s22 = inlined_call_operand.vmem [shape: f32[1,24], index: 22, kind: input, shape index: {}]   ;;  %s11901_s23 = inlined_call_operand.vmem [shape: bf16[24,128], index: 23, kind: input, shape index: {}]   ;;  %s11902_s24 = inlined_call_operand.vmem [shape: f32[1,128], index: 24, kind: input, shape index: {}]   ;;  %s11903_s25 = inlined_call_operand.hbm [shape: f32[2,1,128], index: 25, kind: output, shape index: {}]  }
   0x1   :  { %11994 = sst [smem:[#allocation62_spill]] %s11878_s0 }
   0x2   :  { %11995 = sst [smem:[#allocation63_spill]] %s11879_s1 }
   0x3   :  { %11996 = sst [smem:[#allocation64_spill]] %s11880_s2 }
   0x4   :  { %11997 = sst [smem:[#allocation65_spill]] %s11881_s3 }
   0x5   :  { %11998 = sst [smem:[#allocation66_spill]] %s11882_s4 }
   0x6   :  { %11999 = sst [smem:[#allocation67_spill]] %s11883_s5 }
   0x7   :  { %12000 = sst [smem:[#allocation68_spill]] %s11884_s6 }
   0x8   :  { %12001 = sst [smem:[#allocation69_spill]] %s11885_s7 }
   0x9   :  { %12002 = sst [smem:[#allocation70_spill]] %s11886_s8 }
   0xa   :  { %12003 = sst [smem:[#allocation71_spill]] %s11887_s9 }
   0xb   :  { %12004 = sst [smem:[#allocation72_spill]] %s11888_s10 }
   0xc   :  { %12005 = sst [smem:[#allocation73_spill]] %s11889_s11 }
   0xd   :  { %30 = vsyncpa [#allocation5], 0 }
   0xe   :  { %32 = vsyncpa [#allocation5 + $0x1], 0  ;;  %s8346_s29 = smov 0   ;;  %s8348_s2 = smov 0  }
   0xf   :  { %s8350_s6 = smov 0   ;;  %s8352_s30 = smov 0  }
  0x10 LB: > { %12006 = sst [smem:[#allocation7_spill]] %s8205_s6  ;;  %s8367_s7 = sadd.s32 4294967295, %s8209_s30   ;;  %s8209_s30 = sphi %s8352_s30, %s12202_s30   ;;  %s8205_s6 = sphi %s8350_s6, %s12207_s6   ;;  %s8201_s2 = sphi %s8348_s2, %s12206_s2   ;;  %s8197_s29 = sphi %s8346_s29, %s12205_s29  }
  0x11   : > { %s6471_s3 = sadd.s32 4294967294, %s8209_s30   ;;  %s8371_s26 = sadd.s32 1, %s8209_s30  }
  0x12   : > { %12007 = sst [smem:[#allocation8_spill]] %s8371_s26  ;;  %s575_s1 = sadd.s32 1, %s8205_s6 }
  0x13   : > { %s572_s8 = ssub.s32 %s8209_s30, %s8371_s26  ;;  %p585_p0 = scmp.ne.s32.totalorder %s8205_s6, %s8201_s2 }
  0x14   : > { %p573_p1 = scmp.eq.s32.totalorder %s572_s8, 0  ;;  %p586_p2 = scmp.eq.s32.totalorder %s8367_s7, 1 }
  0x15   : > { %p591_p3 = scmp.ne.s32.totalorder %s8201_s2, %s8197_s29  ;;  %p592_p4 = scmp.eq.s32.totalorder %s6471_s3, 1 }
  0x16   : > { %s8382_s27 = scalar_select %p573_p1, %s8205_s6, %s575_s1  }
  0x17   : > { %p8384_p5 = por %p586_p2, %p585_p0  ;;  %p8388_p6 = por %p592_p4, %p591_p3 }
  0x18   : > { %12008 = sst [smem:[#allocation9_spill]] %s8382_s27  ;;  %p6474_p7 = scmp.ge.s32.totalorder %s8209_s30, 1 }
  0x19   : > { %s12010_s28 = scalar_select %p8388_p6, 1, 0 }
  0x1a   : > { %p690_p8 = scmp.lt.s32.totalorder %s8209_s30, 3 }
  0x1b   : > { %12011 = sst [smem:[#allocation10_spill]] %s12010_s28 }
  0x1c   : > { %p691_p9 = pnand %p6474_p7, %p690_p8 }
  0x1e   : > { %694 = sbr.rel (%p691_p9) target bundleno = 3166 (0xc5e), region = 120 }
  0x25   : > { %s11910_s9 = sand.u32 1, %s8201_s2   ;;  %p757_p10 = scmp.lt.s32.totalorder %s8367_s7, 1 }
  0x26   : > { %s12012_s8 = sld [smem:[#allocation62_spill]]  ;;  %s8404_s6 = scalar_lea.vmem [#allocation4], %s11910_s9 }
  0x27   : > { %s758_s5 = scalar_select %p757_p10, %s8367_s7, 1 }
  0x28   : > { %p6477_p11 = scmp.ne.s32.totalorder %s8367_s7, 0 }
  0x29   : > { %s6846_s0 = sshll.u32 %s758_s5, 7  ;;  %vm767_vm0 = vcmask (!%p6477_p11), 523264   ;;  %vm770_vm1 = vcmask (!%p6477_p11), 517120   ;;  %vm823_vm2 = vcmask (!%p6477_p11), 785408   ;;  %v8211_v0 = vmov (!%p6477_p11), 0.0  }
  0x2a   : > { %766 = sbr.rel (%p6477_p11) target bundleno = 96 (0x60), region = 124  ;;  %768 = vst.msk [vmem:[#allocation2] sm:$0xff] (!%p6477_p11), %vm767_vm0, %v8211_v0  ;;  %769 = vst.msk [vmem:[#allocation2 + $0x8] sm:$0xff] (!%p6477_p11), %vm767_vm0, %v8211_v0  ;;  %vm826_vm3 = vcmask (!%p6477_p11), 779264  }
  0x2b   : > { %772 = vst.msk [vmem:[#allocation2 + $0x18] sm:$0xff] (!%p6477_p11), %vm767_vm0, %v8211_v0  ;;  %773 = vst.msk [vmem:[#allocation2 + $0x20] sm:$0xff] (!%p6477_p11), %vm767_vm0, %v8211_v0 }
  0x2c   : > { %s8400_s27 = scalar_lea.vmem %s12012_s8, %s6846_s0  ;;  %775 = vst.msk [vmem:[#allocation2 + $0x30] sm:$0xff] (!%p6477_p11), %vm767_vm0, %v8211_v0  ;;  %776 = vst.msk [vmem:[#allocation2 + $0x38] sm:$0xff] (!%p6477_p11), %vm767_vm0, %v8211_v0 }
  0x2d   : > { %778 = vst.msk [vmem:[#allocation2 + $0x48] sm:$0xff] (!%p6477_p11), %vm767_vm0, %v8211_v0  ;;  %779 = vst.msk [vmem:[#allocation2 + $0x50] sm:$0xff] (!%p6477_p11), %vm767_vm0, %v8211_v0 }
  0x2e   : > { %781 = vst.msk [vmem:[#allocation2 + $0x60] sm:$0xff] (!%p6477_p11), %vm767_vm0, %v8211_v0  ;;  %782 = vst.msk [vmem:[#allocation2 + $0x68] sm:$0xff] (!%p6477_p11), %vm767_vm0, %v8211_v0 }
  0x2f   : > { %784 = vst.msk [vmem:[#allocation2 + $0x78] sm:$0xff] (!%p6477_p11), %vm767_vm0, %v8211_v0  ;;  %785 = vst.msk [vmem:[#allocation2 + $0x80] sm:$0xff] (!%p6477_p11), %vm767_vm0, %v8211_v0 }
  0x30   : > { %787 = vst.msk [vmem:[#allocation2 + $0x90] sm:$0xff] (!%p6477_p11), %vm767_vm0, %v8211_v0  ;;  %788 = vst.msk [vmem:[#allocation2 + $0x98] sm:$0xff] (!%p6477_p11), %vm767_vm0, %v8211_v0 }
  0x31   : > { %790 = vst.msk [vmem:[#allocation2 + $0xa8] sm:$0xff] %vm767_vm0, %v8211_v0  ;;  %791 = vst.msk [vmem:[#allocation2 + $0xb0] sm:$0xff] %vm767_vm0, %v8211_v0 }
  0x32   : > { %793 = vst.msk [vmem:[#allocation2 + $0xc0] sm:$0xff] %vm767_vm0, %v8211_v0  ;;  %794 = vst.msk [vmem:[#allocation2 + $0xc8] sm:$0xff] %vm767_vm0, %v8211_v0 }
  0x33   : > { %796 = vst.msk [vmem:[#allocation2 + $0xd8] sm:$0xff] %vm767_vm0, %v8211_v0  ;;  %797 = vst.msk [vmem:[#allocation2 + $0xe0] sm:$0xff] %vm767_vm0, %v8211_v0 }
  0x34   : > { %799 = vst.msk [vmem:[#allocation2 + $0xf0] sm:$0xff] %vm767_vm0, %v8211_v0  ;;  %800 = vst.msk [vmem:[#allocation2 + $0xf8] sm:$0xff] %vm767_vm0, %v8211_v0 }
  0x35   : > { %802 = vst.msk [vmem:[#allocation2 + $0x108] sm:$0xff] %vm767_vm0, %v8211_v0  ;;  %803 = vst.msk [vmem:[#allocation2 + $0x110] sm:$0xff] %vm767_vm0, %v8211_v0 }
  0x36   : > { %805 = vst.msk [vmem:[#allocation2 + $0x120] sm:$0xff] %vm767_vm0, %v8211_v0  ;;  %806 = vst.msk [vmem:[#allocation2 + $0x128] sm:$0xff] %vm767_vm0, %v8211_v0 }
  0x37   : > { %808 = vst.msk [vmem:[#allocation2 + $0x138] sm:$0xff] %vm767_vm0, %v8211_v0  ;;  %809 = vst.msk [vmem:[#allocation2 + $0x140] sm:$0xff] %vm767_vm0, %v8211_v0 }
  0x38   : > { %811 = vst.msk [vmem:[#allocation2 + $0x150] sm:$0xff] %vm767_vm0, %v8211_v0  ;;  %812 = vst.msk [vmem:[#allocation2 + $0x158] sm:$0xff] %vm767_vm0, %v8211_v0 }
  0x39   : > { %814 = vst.msk [vmem:[#allocation2 + $0x168] sm:$0xff] %vm767_vm0, %v8211_v0  ;;  %815 = vst.msk [vmem:[#allocation2 + $0x170] sm:$0xff] %vm767_vm0, %v8211_v0 }
  0x3a   : > { %817 = vst.msk [vmem:[#allocation2 + $0x180] sm:$0xff] %vm767_vm0, %v8211_v0  ;;  %818 = vst.msk [vmem:[#allocation2 + $0x188] sm:$0xff] %vm767_vm0, %v8211_v0 }
  0x3b   : > { %820 = vst.msk [vmem:[#allocation2 + $0x198] sm:$0xff] %vm767_vm0, %v8211_v0  ;;  %821 = vst.msk [vmem:[#allocation2 + $0x1a0] sm:$0xff] %vm767_vm0, %v8211_v0 }
  0x3c   : > { %771 = vst.msk [vmem:[#allocation2 + $0x10] sm:$0x3] %vm770_vm1, %v8211_v0  ;;  %774 = vst.msk [vmem:[#allocation2 + $0x28] sm:$0x3] %vm770_vm1, %v8211_v0 }
  0x3d   : > { %777 = vst.msk [vmem:[#allocation2 + $0x40] sm:$0x3] %vm770_vm1, %v8211_v0  ;;  %780 = vst.msk [vmem:[#allocation2 + $0x58] sm:$0x3] %vm770_vm1, %v8211_v0 }
  0x3e   : > { %783 = vst.msk [vmem:[#allocation2 + $0x70] sm:$0x3] %vm770_vm1, %v8211_v0  ;;  %786 = vst.msk [vmem:[#allocation2 + $0x88] sm:$0x3] %vm770_vm1, %v8211_v0 }
  0x3f   : > { %789 = vst.msk [vmem:[#allocation2 + $0xa0] sm:$0x3] %vm770_vm1, %v8211_v0  ;;  %792 = vst.msk [vmem:[#allocation2 + $0xb8] sm:$0x3] %vm770_vm1, %v8211_v0 }
  0x40   : > { %795 = vst.msk [vmem:[#allocation2 + $0xd0] sm:$0x3] %vm770_vm1, %v8211_v0  ;;  %798 = vst.msk [vmem:[#allocation2 + $0xe8] sm:$0x3] %vm770_vm1, %v8211_v0 }
  0x41   : > { %801 = vst.msk [vmem:[#allocation2 + $0x100] sm:$0x3] %vm770_vm1, %v8211_v0  ;;  %804 = vst.msk [vmem:[#allocation2 + $0x118] sm:$0x3] %vm770_vm1, %v8211_v0 }
  0x42   : > { %807 = vst.msk [vmem:[#allocation2 + $0x130] sm:$0x3] %vm770_vm1, %v8211_v0  ;;  %810 = vst.msk [vmem:[#allocation2 + $0x148] sm:$0x3] %vm770_vm1, %v8211_v0 }
  0x43   : > { %813 = vst.msk [vmem:[#allocation2 + $0x160] sm:$0x3] %vm770_vm1, %v8211_v0  ;;  %816 = vst.msk [vmem:[#allocation2 + $0x178] sm:$0x3] %vm770_vm1, %v8211_v0 }
  0x44   : > { %819 = vst.msk [vmem:[#allocation2 + $0x190] sm:$0x3] %vm770_vm1, %v8211_v0  ;;  %822 = vst.msk [vmem:[#allocation2 + $0x1a8] sm:$0x3] %vm770_vm1, %v8211_v0 }
  0x45   : > { %824 = vst.msk [vmem:[#allocation3] sm:$0xff] %vm823_vm2, %v8211_v0  ;;  %825 = vst.msk [vmem:[#allocation3 + $0x8] sm:$0xff] %vm823_vm2, %v8211_v0 }
  0x46   : > { %828 = vst.msk [vmem:[#allocation3 + $0x18] sm:$0xff] %vm823_vm2, %v8211_v0  ;;  %829 = vst.msk [vmem:[#allocation3 + $0x20] sm:$0xff] %vm823_vm2, %v8211_v0 }
  0x47   : > { %831 = vst.msk [vmem:[#allocation3 + $0x30] sm:$0xff] %vm823_vm2, %v8211_v0  ;;  %832 = vst.msk [vmem:[#allocation3 + $0x38] sm:$0xff] %vm823_vm2, %v8211_v0 }
  0x48   : > { %834 = vst.msk [vmem:[#allocation3 + $0x48] sm:$0xff] %vm823_vm2, %v8211_v0  ;;  %835 = vst.msk [vmem:[#allocation3 + $0x50] sm:$0xff] %vm823_vm2, %v8211_v0 }
  0x49   : > { %837 = vst.msk [vmem:[#allocation3 + $0x60] sm:$0xff] %vm823_vm2, %v8211_v0  ;;  %838 = vst.msk [vmem:[#allocation3 + $0x68] sm:$0xff] %vm823_vm2, %v8211_v0 }
  0x4a   : > { %840 = vst.msk [vmem:[#allocation3 + $0x78] sm:$0xff] %vm823_vm2, %v8211_v0  ;;  %841 = vst.msk [vmem:[#allocation3 + $0x80] sm:$0xff] %vm823_vm2, %v8211_v0 }
  0x4b   : > { %843 = vst.msk [vmem:[#allocation3 + $0x90] sm:$0xff] %vm823_vm2, %v8211_v0  ;;  %844 = vst.msk [vmem:[#allocation3 + $0x98] sm:$0xff] %vm823_vm2, %v8211_v0 }
  0x4c   : > { %846 = vst.msk [vmem:[#allocation3 + $0xa8] sm:$0xff] %vm823_vm2, %v8211_v0  ;;  %847 = vst.msk [vmem:[#allocation3 + $0xb0] sm:$0xff] %vm823_vm2, %v8211_v0 }
  0x4d   : > { %849 = vst.msk [vmem:[#allocation3 + $0xc0] sm:$0xff] %vm823_vm2, %v8211_v0  ;;  %850 = vst.msk [vmem:[#allocation3 + $0xc8] sm:$0xff] %vm823_vm2, %v8211_v0 }
  0x4e   : > { %852 = vst.msk [vmem:[#allocation3 + $0xd8] sm:$0xff] %vm823_vm2, %v8211_v0  ;;  %853 = vst.msk [vmem:[#allocation3 + $0xe0] sm:$0xff] %vm823_vm2, %v8211_v0 }
  0x4f   : > { %855 = vst.msk [vmem:[#allocation3 + $0xf0] sm:$0xff] %vm823_vm2, %v8211_v0  ;;  %856 = vst.msk [vmem:[#allocation3 + $0xf8] sm:$0xff] %vm823_vm2, %v8211_v0 }
  0x50   : > { %858 = vst.msk [vmem:[#allocation3 + $0x108] sm:$0xff] %vm823_vm2, %v8211_v0  ;;  %859 = vst.msk [vmem:[#allocation3 + $0x110] sm:$0xff] %vm823_vm2, %v8211_v0 }
  0x51   : > { %861 = vst.msk [vmem:[#allocation3 + $0x120] sm:$0xff] %vm823_vm2, %v8211_v0  ;;  %862 = vst.msk [vmem:[#allocation3 + $0x128] sm:$0xff] %vm823_vm2, %v8211_v0 }
  0x52   : > { %864 = vst.msk [vmem:[#allocation3 + $0x138] sm:$0xff] %vm823_vm2, %v8211_v0  ;;  %865 = vst.msk [vmem:[#allocation3 + $0x140] sm:$0xff] %vm823_vm2, %v8211_v0 }
  0x53   : > { %867 = vst.msk [vmem:[#allocation3 + $0x150] sm:$0xff] %vm823_vm2, %v8211_v0  ;;  %868 = vst.msk [vmem:[#allocation3 + $0x158] sm:$0xff] %vm823_vm2, %v8211_v0 }
  0x54   : > { %870 = vst.msk [vmem:[#allocation3 + $0x168] sm:$0xff] %vm823_vm2, %v8211_v0  ;;  %871 = vst.msk [vmem:[#allocation3 + $0x170] sm:$0xff] %vm823_vm2, %v8211_v0 }
  0x55   : > { %873 = vst.msk [vmem:[#allocation3 + $0x180] sm:$0xff] %vm823_vm2, %v8211_v0  ;;  %874 = vst.msk [vmem:[#allocation3 + $0x188] sm:$0xff] %vm823_vm2, %v8211_v0 }
  0x56   : > { %876 = vst.msk [vmem:[#allocation3 + $0x198] sm:$0xff] %vm823_vm2, %v8211_v0  ;;  %877 = vst.msk [vmem:[#allocation3 + $0x1a0] sm:$0xff] %vm823_vm2, %v8211_v0 }
  0x57   : > { %827 = vst.msk [vmem:[#allocation3 + $0x10] sm:$0x3] %vm826_vm3, %v8211_v0  ;;  %830 = vst.msk [vmem:[#allocation3 + $0x28] sm:$0x3] %vm826_vm3, %v8211_v0 }
  0x58   : > { %833 = vst.msk [vmem:[#allocation3 + $0x40] sm:$0x3] %vm826_vm3, %v8211_v0  ;;  %836 = vst.msk [vmem:[#allocation3 + $0x58] sm:$0x3] %vm826_vm3, %v8211_v0 }
  0x59   : > { %839 = vst.msk [vmem:[#allocation3 + $0x70] sm:$0x3] %vm826_vm3, %v8211_v0  ;;  %842 = vst.msk [vmem:[#allocation3 + $0x88] sm:$0x3] %vm826_vm3, %v8211_v0 }
  0x5a   : > { %845 = vst.msk [vmem:[#allocation3 + $0xa0] sm:$0x3] %vm826_vm3, %v8211_v0  ;;  %848 = vst.msk [vmem:[#allocation3 + $0xb8] sm:$0x3] %vm826_vm3, %v8211_v0 }
  0x5b   : > { %851 = vst.msk [vmem:[#allocation3 + $0xd0] sm:$0x3] %vm826_vm3, %v8211_v0  ;;  %854 = vst.msk [vmem:[#allocation3 + $0xe8] sm:$0x3] %vm826_vm3, %v8211_v0 }
  0x5c   : > { %857 = vst.msk [vmem:[#allocation3 + $0x100] sm:$0x3] %vm826_vm3, %v8211_v0  ;;  %860 = vst.msk [vmem:[#allocation3 + $0x118] sm:$0x3] %vm826_vm3, %v8211_v0 }
  0x5d   : > { %863 = vst.msk [vmem:[#allocation3 + $0x130] sm:$0x3] %vm826_vm3, %v8211_v0  ;;  %866 = vst.msk [vmem:[#allocation3 + $0x148] sm:$0x3] %vm826_vm3, %v8211_v0 }
  0x5e   : > { %869 = vst.msk [vmem:[#allocation3 + $0x160] sm:$0x3] %vm826_vm3, %v8211_v0  ;;  %872 = vst.msk [vmem:[#allocation3 + $0x178] sm:$0x3] %vm826_vm3, %v8211_v0 }
  0x5f   : > { %875 = vst.msk [vmem:[#allocation3 + $0x190] sm:$0x3] %vm826_vm3, %v8211_v0  ;;  %878 = vst.msk [vmem:[#allocation3 + $0x1a8] sm:$0x3] %vm826_vm3, %v8211_v0 }
  0x60 PF: > { %s12013_s3 = sld [smem:[#allocation63_spill]]  ;;  %vm1062_vm4 = vcmask 1044480   ;;  %vm1063_vm5 = vcmask 1045504   ;;  %v8212_v3 = vmov 65535   ;;  %v7289_v5 = vld [vmem:[%s8400_s27] sm:$0xff]   ;;  %vm1013_vm6 = vcmask 220160  }
  0x61   : > { %v1064_v4 = vsel %vm1062_vm4, 4294967295, %v8212_v3  ;;  %6980 = vmatprep.mubr.msk.bf16.mxu0 %vm1013_vm6, %v7289_v5  ;;  %v7290_v8 = vld [vmem:[%s8400_s27 + $0x8] sm:$0xff]   ;;  %v7291_v9 = vld [vmem:[%s8400_s27 + $0x10] sm:$0xff]   ;;  %v7292_v10 = vld [vmem:[%s8400_s27 + $0x18] sm:$0xff]   ;;  %s12014_s1 = sld [smem:[#allocation65_spill]]  ;;  %vm1485_vm7 = vcmask 130048  }
  0x62   : > { %v1065_v6 = vsel %vm1063_vm5, %v1064_v4, 0  ;;  %v7293_v11 = vld [vmem:[%s8400_s27 + $0x20] sm:$0xff]   ;;  %v7294_v12 = vld [vmem:[%s8400_s27 + $0x28] sm:$0xff]   ;;  %v7295_v13 = vld [vmem:[%s8400_s27 + $0x30] sm:$0xff]   ;;  %vm1920_vm8 = vcmask 523264   ;;  %s12023_s5 = sld [smem:[#allocation68_spill]] }
  0x63   : > { %v7296_v14 = vld [vmem:[%s8400_s27 + $0x38] sm:$0xff]   ;;  %v7297_v15 = vld [vmem:[%s8400_s27 + $0x40] sm:$0xff]   ;;  %v7298_v16 = vld [vmem:[%s8400_s27 + $0x48] sm:$0xff]   ;;  %vm8214_vm9 = vmmov 0   ;;  %s12058_s8 = sld [smem:[#allocation71_spill]]  ;;  %vm3288_vm10 = vcmask 1041408  }
  0x64   : > { %v7299_v17 = vld [vmem:[%s8400_s27 + $0x50] sm:$0xff]   ;;  %v7300_v18 = vld [vmem:[%s8400_s27 + $0x58] sm:$0xff]   ;;  %v7301_v19 = vld [vmem:[%s8400_s27 + $0x60] sm:$0xff]   ;;  %vm3284_vm11 = vcmask 31744   ;;  %s12060_s11 = sld [smem:[#allocation73_spill]]  ;;  %vm3722_vm12 = vcmask 1043456  }
  0x65   : > { %v7302_v20 = vld [vmem:[%s8400_s27 + $0x68] sm:$0xff]   ;;  %v7303_v21 = vld [vmem:[%s8400_s27 + $0x70] sm:$0xff]   ;;  %v7304_v22 = vld [vmem:[%s8400_s27 + $0x78] sm:$0xff]   ;;  %s12034_s27 = sld [smem:[#allocation69_spill]]  ;;  %s12061_s10 = sld [smem:[#allocation72_spill]]  ;;  %vm3673_vm13 = vcmask 195584  }
  0x66   : > { %v7287_v1 = vld [vmem:[%s12013_s3] sm:$0xff]   ;;  %v7288_v2 = vld [vmem:[%s12013_s3 + $0x8] sm:$0x3f]   ;;  %s12015_s3 = sld [smem:[#allocation64_spill]]  ;;  %vm4112_vm14 = vcmask 785408   ;;  %vm5495_vm15 = vcmask 1042432  }
  0x67   : > { %6976 = vmatprep.subr.bf16.mxu0 %v7287_v1  ;;  %v1067_v7 = vand.u32 %v7288_v2, %v1065_v6  ;;  %v7305_v23 = vld [vmem:[%s12014_s1] sm:$0xff]   ;;  %s12017_s1 = sld [smem:[#allocation67_spill]]  ;;  %vm5491_vm0 = vcmask 48128   ;;  %s12200_s0 = sand.u32 1, %s8201_s2  }
  0x68   : > { %6977 = vmatpush3.bf16.msra.mxu0 %v7287_v1  ;;  %7012 = vmatprep.subr.bf16.mxu1 %v7305_v23 }
  0x69   : > { %6978 = vmatprep.subr.bf16.mxu0 %v1067_v7  ;;  %7013 = vmatpush3.bf16.msra.mxu1 %v7305_v23 }
  0x6c   : > { %6979 = vmatpush3.bf16.msra.mxu0 %v1067_v7  ;;  %v8667_v24 = vld [vmem:[%s12015_s3] ss:$0 sm:$0xff]  ;;  %s12016_s3 = sld [smem:[#allocation66_spill]] }
  0x6f   : > { %6981 = vmatmul.mubr.msk.bf16.vlgmr.msra.gmra.mrb[0].mxu0 %vm1013_vm6, %v7290_v8 }
  0x70   : > { %6984 = vmatprep.mubr.msk.bf16.mxu0 %vm1013_vm6, %v7291_v9 }
  0x77   : > { %6985 = vmatmul.mubr.msk.bf16.gmra.mrb[4].mxu0 %vm1013_vm6, %v7292_v10 }
  0x78   : > { %6988 = vmatprep.mubr.msk.bf16.mxu0 %vm1013_vm6, %v7293_v11 }
  0x7f   : > { %6989 = vmatmul.mubr.msk.bf16.gmra.mrb[8].mxu0 %vm1013_vm6, %v7294_v12 }
  0x80   : > { %6992 = vmatprep.mubr.msk.bf16.mxu0 %vm1013_vm6, %v7295_v13 }
  0x87   : > { %6993 = vmatmul.mubr.msk.bf16.gmra.mrb[12].mxu0 %vm1013_vm6, %v7296_v14 }
  0x88   : > { %6996 = vmatprep.mubr.msk.bf16.mxu0 %vm1013_vm6, %v7297_v15 }
  0x8f   : > { %6997 = vmatmul.mubr.msk.bf16.gmra.mrb[16].mxu0 %vm1013_vm6, %v7298_v16 }
  0x90   : > { %7000 = vmatprep.mubr.msk.bf16.mxu0 %vm1013_vm6, %v7299_v17 }
  0x97   : > { %7001 = vmatmul.mubr.msk.bf16.gmra.mrb[20].mxu0 %vm1013_vm6, %v7300_v18 }
  0x98   : > { %7004 = vmatprep.mubr.msk.bf16.mxu0 %vm1013_vm6, %v7301_v19 }
  0x9f   : > { %7005 = vmatmul.mubr.msk.bf16.gmra.mrb[24].mxu0 %vm1013_vm6, %v7302_v20 }
  0xa0   : > { %7008 = vmatprep.mubr.msk.bf16.mxu0 %vm1013_vm6, %v7303_v21 }
  0xa7   : > { %7009 = vmatmul.mubr.msk.bf16.gmra.mrb[28].mxu0 %vm1013_vm6, %v7304_v22 }
 0x142   : > { %v6982_v25 = vpop.f32.mrb[0].mxu0 }
 0x143   : > { %v8670_v26 = vadd.f32 %v6982_v25, %v8667_v24  ;;  %v1103_v27 = vpop.f32.mrb[1].mxu0 }
 0x144   : > { %v8673_v28 = vadd.f32 %v8667_v24, %v1103_v27  ;;  %v6983_v29 = vpop.f32.mrb[2].mxu0 }
 0x145   : > { %v6515_v30 = vmul.f32 -1.442695, %v8670_v26  ;;  %v8677_v31 = vadd.f32 %v6983_v29, %v8667_v24  ;;  %v1106_v32 = vpop.f32.mrb[3].mxu0 }
 0x146   : > { %v6513_v33 = vmul.f32 -1.442695, %v8673_v28  ;;  %v8681_v34 = vadd.f32 %v8667_v24, %v1106_v32 }
 0x147   : > { %7330 = vpow2.f32 %v6515_v30  ;;  %v6516_v35 = vmul.f32 -1.442695, %v8677_v31 }
 0x148   : > { %7332 = vpow2.f32 %v6513_v33  ;;  %v6514_v36 = vmul.f32 -1.442695, %v8681_v34 }
 0x149   : > { %7334 = vpow2.f32 %v6516_v35 }
 0x14a   : > { %7336 = vpow2.f32 %v6514_v36  ;;  %v6986_v37 = vpop.f32.mrb[4].mxu0 }
 0x14b   : > { %v8686_v38 = vadd.f32 %v6986_v37, %v8667_v24  ;;  %v1119_v39 = vpop.f32.mrb[5].mxu0 }
 0x14c   : > { %v8689_v40 = vadd.f32 %v8667_v24, %v1119_v39  ;;  %v6987_v41 = vpop.f32.mrb[6].mxu0 }
 0x14d   : > { %v6519_v42 = vmul.f32 -1.442695, %v8686_v38  ;;  %v8693_v43 = vadd.f32 %v6987_v41, %v8667_v24  ;;  %v1122_v44 = vpop.f32.mrb[7].mxu0 }
 0x14e   : > { %v6517_v45 = vmul.f32 -1.442695, %v8689_v40  ;;  %v8697_v46 = vadd.f32 %v8667_v24, %v1122_v44 }
 0x14f   : > { %7338 = vpow2.f32 %v6519_v42  ;;  %v6520_v47 = vmul.f32 -1.442695, %v8693_v43 }
 0x150   : > { %7340 = vpow2.f32 %v6517_v45  ;;  %v6518_v48 = vmul.f32 -1.442695, %v8697_v46 }
 0x151   : > { %v7331_v49 = vpop.eup %7330  ;;  %7342 = vpow2.f32 %v6520_v47 }
 0x152   : > { %v7333_v50 = vpop.eup %7332  ;;  %v1328_v51 = vadd.f32 1.0, %v7331_v49  ;;  %7344 = vpow2.f32 %v6518_v48  ;;  %v6990_v52 = vpop.f32.mrb[8].mxu0 }
 0x153   : > { %v7335_v53 = vpop.eup %7334  ;;  %v1326_v54 = vadd.f32 1.0, %v7333_v50  ;;  %v8702_v55 = vadd.f32 %v6990_v52, %v8667_v24  ;;  %v1135_v56 = vpop.f32.mrb[9].mxu0 }
 0x154   : > { %v7337_v57 = vpop.eup %7336  ;;  %7346 = vrcp.f32 %v1328_v51  ;;  %v1329_v58 = vadd.f32 1.0, %v7335_v53  ;;  %v8705_v59 = vadd.f32 %v8667_v24, %v1135_v56  ;;  %v6991_v60 = vpop.f32.mrb[10].mxu0 }
 0x155   : > { %7348 = vrcp.f32 %v1326_v54  ;;  %v1327_v61 = vadd.f32 1.0, %v7337_v57  ;;  %v6523_v62 = vmul.f32 -1.442695, %v8702_v55  ;;  %v8709_v63 = vadd.f32 %v6991_v60, %v8667_v24  ;;  %v1138_v0 = vpop.f32.mrb[11].mxu0 }
 0x156   : > { %7350 = vrcp.f32 %v1329_v58  ;;  %v6521_v1 = vmul.f32 -1.442695, %v8705_v59  ;;  %v8713_v2 = vadd.f32 %v8667_v24, %v1138_v0 }
 0x157   : > { %7352 = vrcp.f32 %v1327_v61  ;;  %v6524_v3 = vmul.f32 -1.442695, %v8709_v63 }
 0x158   : > { %7354 = vpow2.f32 %v6523_v62  ;;  %v6522_v4 = vmul.f32 -1.442695, %v8713_v2 }
 0x159   : > { %v7339_v5 = vpop.eup %7338  ;;  %7356 = vpow2.f32 %v6521_v1 }
 0x15a   : > { %v7341_v6 = vpop.eup %7340  ;;  %v1332_v7 = vadd.f32 1.0, %v7339_v5  ;;  %7358 = vpow2.f32 %v6524_v3  ;;  %v6994_v8 = vpop.f32.mrb[12].mxu0 }
 0x15b   : > { %v7343_v9 = vpop.eup %7342  ;;  %v1330_v10 = vadd.f32 1.0, %v7341_v6  ;;  %7360 = vpow2.f32 %v6522_v4  ;;  %v8718_v11 = vadd.f32 %v6994_v8, %v8667_v24  ;;  %v1151_v12 = vpop.f32.mrb[13].mxu0 }
 0x15c   : > { %v7345_v13 = vpop.eup %7344  ;;  %7362 = vrcp.f32 %v1332_v7  ;;  %v1333_v14 = vadd.f32 1.0, %v7343_v9  ;;  %v8721_v15 = vadd.f32 %v8667_v24, %v1151_v12  ;;  %v6995_v16 = vpop.f32.mrb[14].mxu0 }
 0x15d   : > { %7364 = vrcp.f32 %v1330_v10  ;;  %v1331_v17 = vadd.f32 1.0, %v7345_v13  ;;  %v6527_v18 = vmul.f32 -1.442695, %v8718_v11  ;;  %v8725_v19 = vadd.f32 %v6995_v16, %v8667_v24  ;;  %v1154_v20 = vpop.f32.mrb[15].mxu0 }
 0x15e   : > { %v7347_v21 = vpop.eup %7346  ;;  %7366 = vrcp.f32 %v1333_v14  ;;  %v6525_v22 = vmul.f32 -1.442695, %v8721_v15  ;;  %v8729_v23 = vadd.f32 %v8667_v24, %v1154_v20 }
 0x15f   : > { %v7349_v25 = vpop.eup %7348  ;;  %7368 = vrcp.f32 %v1331_v17  ;;  %v6528_v27 = vmul.f32 -1.442695, %v8725_v19  ;;  %v1424_v33 = vmul.f32 %v7347_v21, %v8670_v26 }
 0x160   : > { %v7351_v29 = vpop.eup %7350  ;;  %7370 = vpow2.f32 %v6527_v18  ;;  %v6526_v30 = vmul.f32 -1.442695, %v8729_v23  ;;  %v1422_v37 = vmul.f32 %v7349_v25, %v8673_v28 }
 0x161   : > { %v7353_v32 = vpop.eup %7352  ;;  %v1425_v35 = vmul.f32 %v7351_v29, %v8677_v31  ;;  %7372 = vpow2.f32 %v6525_v22 }
 0x162   : > { %v7355_v36 = vpop.eup %7354  ;;  %v1423_v39 = vmul.f32 %v7353_v32, %v8681_v34  ;;  %7374 = vpow2.f32 %v6528_v27  ;;  %v6998_v41 = vpop.f32.mrb[16].mxu0 }
 0x163   : > { %v7357_v42 = vpop.eup %7356  ;;  %v1457_v44 = vpack.c.bf16 %v1425_v35, %v1424_v33  ;;  %v1336_v45 = vadd.f32 1.0, %v7355_v36  ;;  %7376 = vpow2.f32 %v6526_v30  ;;  %v8738_v47 = vadd.f32 %v6998_v41, %v8667_v24  ;;  %v1167_v48 = vpop.f32.mrb[17].mxu0 }
 0x164   : > { %v7359_v26 = vpop.eup %7358  ;;  %v1334_v49 = vadd.f32 1.0, %v7357_v42  ;;  %v8741_v31 = vadd.f32 %v8667_v24, %v1167_v48  ;;  %v6999_v50 = vpop.f32.mrb[18].mxu0  ;;  %v1456_v28 = vpack.c.bf16 %v1423_v39, %v1422_v37 }
 0x165   : > { %v7361_v51 = vpop.eup %7360  ;;  %7378 = vrcp.f32 %v1336_v45  ;;  %v1337_v34 = vadd.f32 1.0, %v7359_v26  ;;  %v6531_v52 = vmul.f32 -1.442695, %v8738_v47  ;;  %v8745_v53 = vadd.f32 %v6999_v50, %v8667_v24  ;;  %v1170_v54 = vpop.f32.mrb[19].mxu0 }
 0x166   : > { %v7363_v56 = vpop.eup %7362  ;;  %7380 = vrcp.f32 %v1334_v49  ;;  %v1335_v57 = vadd.f32 1.0, %v7361_v51  ;;  %v6529_v58 = vmul.f32 -1.442695, %v8741_v31  ;;  %v8749_v60 = vadd.f32 %v8667_v24, %v1170_v54  ;;  %7014 = vmatprep.mubr.msk.bf16.mxu1 %vm1485_vm7, %v1456_v28 }
 0x167   : > { %v7365_v61 = vpop.eup %7364  ;;  %7382 = vrcp.f32 %v1337_v34  ;;  %v6532_v62 = vmul.f32 -1.442695, %v8745_v53  ;;  %7015 = vmatmul.mubr.msk.bf16.vlgmr.msra.gmra.mrb[0].mxu1 %vm1485_vm7, %v1457_v44  ;;  %v1428_v4 = vmul.f32 %v7363_v56, %v8686_v38 }
 0x168   : > { %v7367_v0 = vpop.eup %7366  ;;  %7384 = vrcp.f32 %v1335_v57  ;;  %v6530_v1 = vmul.f32 -1.442695, %v8749_v60  ;;  %v1426_v7 = vmul.f32 %v7365_v61, %v8689_v40 }
 0x169   : > { %v7369_v3 = vpop.eup %7368  ;;  %v1429_v5 = vmul.f32 %v7367_v0, %v8693_v43  ;;  %7386 = vpow2.f32 %v6531_v52 }
 0x16a   : > { %v7371_v6 = vpop.eup %7370  ;;  %v1427_v8 = vmul.f32 %v7369_v3, %v8697_v46  ;;  %7388 = vpow2.f32 %v6529_v58  ;;  %v7002_v9 = vpop.f32.mrb[20].mxu0 }
 0x16b   : > { %v7373_v10 = vpop.eup %7372  ;;  %v1459_v12 = vpack.c.bf16 %v1429_v5, %v1428_v4  ;;  %v1340_v13 = vadd.f32 1.0, %v7371_v6  ;;  %7390 = vpow2.f32 %v6532_v62  ;;  %v8760_v14 = vadd.f32 %v7002_v9, %v8667_v24  ;;  %v1183_v16 = vpop.f32.mrb[21].mxu0 }
 0x16c   : > { %v7375_v17 = vpop.eup %7374  ;;  %v1458_v38 = vpack.c.bf16 %v1427_v8, %v1426_v7  ;;  %v1338_v18 = vadd.f32 1.0, %v7373_v10  ;;  %7392 = vpow2.f32 %v6530_v1  ;;  %v8763_v43 = vadd.f32 %v8667_v24, %v1183_v16  ;;  %v7003_v40 = vpop.f32.mrb[22].mxu0 }
 0x16d   : > { %v7377_v20 = vpop.eup %7376  ;;  %7394 = vrcp.f32 %v1340_v13  ;;  %v1341_v46 = vadd.f32 1.0, %v7375_v17  ;;  %v6535_v21 = vmul.f32 -1.442695, %v8760_v14  ;;  %v8767_v22 = vadd.f32 %v7003_v40, %v8667_v24  ;;  %v1186_v25 = vpop.f32.mrb[23].mxu0 }
 0x16e   : > { %7396 = vrcp.f32 %v1338_v18  ;;  %v1339_v27 = vadd.f32 1.0, %v7377_v20  ;;  %v6533_v29 = vmul.f32 -1.442695, %v8763_v43  ;;  %v8771_v30 = vadd.f32 %v8667_v24, %v1186_v25  ;;  %7018 = vmatprep.mubr.msk.bf16.mxu1 %vm1485_vm7, %v1458_v38 }
 0x16f   : > { %v7379_v32 = vpop.eup %7378  ;;  %7398 = vrcp.f32 %v1341_v46  ;;  %v6536_v33 = vmul.f32 -1.442695, %v8767_v22  ;;  %7019 = vmatmul.mubr.msk.bf16.gmra.mrb[4].mxu1 %vm1485_vm7, %v1459_v12 }
 0x170   : > { %v7381_v35 = vpop.eup %7380  ;;  %7400 = vrcp.f32 %v1339_v27  ;;  %v6534_v36 = vmul.f32 -1.442695, %v8771_v30  ;;  %v1432_v41 = vmul.f32 %v7379_v32, %v8702_v55 }
 0x171   : > { %v7383_v37 = vpop.eup %7382  ;;  %7402 = vpow2.f32 %v6535_v21  ;;  %v1430_v48 = vmul.f32 %v7381_v35, %v8705_v59 }
 0x172   : > { %v7385_v39 = vpop.eup %7384  ;;  %v1433_v42 = vmul.f32 %v7383_v37, %v8709_v63  ;;  %7404 = vpow2.f32 %v6533_v29  ;;  %v7006_v44 = vpop.f32.mrb[24].mxu0 }
 0x173   : > { %v7387_v45 = vpop.eup %7386  ;;  %v1431_v26 = vmul.f32 %v7385_v39, %v8713_v2  ;;  %7406 = vpow2.f32 %v6536_v33  ;;  %v8782_v49 = vadd.f32 %v7006_v44, %v8667_v24  ;;  %v1199_v50 = vpop.f32.mrb[25].mxu0 }
 0x174   : > { %v7389_v28 = vpop.eup %7388  ;;  %v1461_v51 = vpack.c.bf16 %v1433_v42, %v1432_v41  ;;  %v1344_v34 = vadd.f32 1.0, %v7387_v45  ;;  %7408 = vpow2.f32 %v6534_v36  ;;  %v8785_v55 = vadd.f32 %v8667_v24, %v1199_v50  ;;  %v7007_v63 = vpop.f32.mrb[26].mxu0 }
 0x175   : > { %v7391_v52 = vpop.eup %7390  ;;  %v1460_v54 = vpack.c.bf16 %v1431_v26, %v1430_v48  ;;  %v1342_v56 = vadd.f32 1.0, %v7389_v28  ;;  %v8788_v59 = vadd.f32 %v7007_v63, %v8667_v24  ;;  %v1202_v2 = vpop.f32.mrb[27].mxu0  ;;  %v6539_v61 = vmul.f32 -1.442695, %v8782_v49 }
 0x176   : > { %v7393_v57 = vpop.eup %7392  ;;  %7410 = vrcp.f32 %v1344_v34  ;;  %v1345_v58 = vadd.f32 1.0, %v7391_v52  ;;  %v8792_v62 = vadd.f32 %v8667_v24, %v1202_v2  ;;  %v6537_v3 = vmul.f32 -1.442695, %v8785_v55 }
 0x177   : > { %v7395_v0 = vpop.eup %7394  ;;  %7412 = vrcp.f32 %v1342_v56  ;;  %v1343_v1 = vadd.f32 1.0, %v7393_v57  ;;  %7022 = vmatprep.mubr.msk.bf16.mxu1 %vm1485_vm7, %v1460_v54  ;;  %v6540_v5 = vmul.f32 -1.442695, %v8788_v59 }
 0x178   : > { %v7397_v4 = vpop.eup %7396  ;;  %7414 = vrcp.f32 %v1345_v58  ;;  %7023 = vmatmul.mubr.msk.bf16.gmra.mrb[8].mxu1 %vm1485_vm7, %v1461_v51  ;;  %v6538_v7 = vmul.f32 -1.442695, %v8792_v62  ;;  %v1436_v9 = vmul.f32 %v7395_v0, %v8718_v11 }
 0x179   : > { %v7399_v6 = vpop.eup %7398  ;;  %7416 = vrcp.f32 %v1343_v1  ;;  %v1434_v16 = vmul.f32 %v7397_v4, %v8721_v15 }
 0x17a   : > { %v7401_v8 = vpop.eup %7400  ;;  %v1437_v10 = vmul.f32 %v7399_v6, %v8725_v19  ;;  %7418 = vpow2.f32 %v6539_v61  ;;  %v7010_v12 = vpop.f32.mrb[28].mxu0 }
 0x17b   : > { %v7403_v13 = vpop.eup %7402  ;;  %v1435_v17 = vmul.f32 %v7401_v8, %v8729_v23  ;;  %7420 = vpow2.f32 %v6537_v3  ;;  %v8804_v38 = vadd.f32 %v7010_v12, %v8667_v24  ;;  %v1215_v18 = vpop.f32.mrb[29].mxu0 }
 0x17c   : > { %v7405_v40 = vpop.eup %7404  ;;  %v1463_v20 = vpack.c.bf16 %v1437_v10, %v1436_v9  ;;  %v1348_v46 = vadd.f32 1.0, %v7403_v13  ;;  %7422 = vpow2.f32 %v6540_v5  ;;  %v8807_v11 = vadd.f32 %v8667_v24, %v1215_v18  ;;  %v7011_v19 = vpop.f32.mrb[30].mxu0 }
 0x17d   : > { %v7407_v21 = vpop.eup %7406  ;;  %v1462_v25 = vpack.c.bf16 %v1435_v17, %v1434_v16  ;;  %v1346_v27 = vadd.f32 1.0, %v7405_v40  ;;  %7424 = vpow2.f32 %v6538_v7  ;;  %v1218_v15 = vpop.f32.mrb[31].mxu0  ;;  %v6543_v32 = vmul.f32 -1.442695, %v8804_v38 }
 0x17e   : > { %v7409_v29 = vpop.eup %7408  ;;  %7426 = vrcp.f32 %v1348_v46  ;;  %v1349_v23 = vadd.f32 1.0, %v7407_v21  ;;  %v8811_v33 = vadd.f32 %v7011_v19, %v8667_v24  ;;  %v6541_v36 = vmul.f32 -1.442695, %v8807_v11 }
 0x17f   : > { %7428 = vrcp.f32 %v1346_v27  ;;  %v1347_v35 = vadd.f32 1.0, %v7409_v29  ;;  %v8815_v37 = vadd.f32 %v8667_v24, %v1218_v15  ;;  %7026 = vmatprep.mubr.msk.bf16.mxu1 %vm1485_vm7, %v1462_v25 }
 0x180   : > { %v7411_v39 = vpop.eup %7410  ;;  %7430 = vrcp.f32 %v1349_v23  ;;  %v6544_v41 = vmul.f32 -1.442695, %v8811_v33  ;;  %7027 = vmatmul.mubr.msk.bf16.gmra.mrb[12].mxu1 %vm1485_vm7, %v1463_v20 }
 0x181   : > { %v7413_v42 = vpop.eup %7412  ;;  %7432 = vrcp.f32 %v1347_v35  ;;  %v6542_v44 = vmul.f32 -1.442695, %v8815_v37  ;;  %v1440_v26 = vmul.f32 %v7411_v39, %v8738_v47  ;;  %v8848_v35 = vld [vmem:[%s12016_s3] ss:$0 sm:$0xff] }
 0x182   : > { %v7415_v45 = vpop.eup %7414  ;;  %7434 = vpow2.f32 %v6543_v32  ;;  %v1438_v28 = vmul.f32 %v7413_v42, %v8741_v31 }
 0x183   : > { %v7417_v48 = vpop.eup %7416  ;;  %v1441_v24 = vmul.f32 %v7415_v45, %v8745_v53  ;;  %7436 = vpow2.f32 %v6541_v36 }
 0x184   : > { %v7419_v50 = vpop.eup %7418  ;;  %v1439_v51 = vmul.f32 %v7417_v48, %v8749_v60  ;;  %7438 = vpow2.f32 %v6544_v41 }
 0x185   : > { %v7421_v34 = vpop.eup %7420  ;;  %v1465_v63 = vpack.c.bf16 %v1441_v24, %v1440_v26  ;;  %v1352_v52 = vadd.f32 1.0, %v7419_v50  ;;  %7440 = vpow2.f32 %v6542_v44 }
 0x186   : > { %v7423_v54 = vpop.eup %7422  ;;  %v1464_v56 = vpack.c.bf16 %v1439_v51, %v1438_v28  ;;  %v1350_v2 = vadd.f32 1.0, %v7421_v34 }
 0x187   : > { %v7425_v57 = vpop.eup %7424  ;;  %7442 = vrcp.f32 %v1352_v52  ;;  %v1353_v58 = vadd.f32 1.0, %v7423_v54 }
 0x188   : > { %v7427_v47 = vpop.eup %7426  ;;  %7444 = vrcp.f32 %v1350_v2  ;;  %v1351_v53 = vadd.f32 1.0, %v7425_v57  ;;  %7030 = vmatprep.mubr.msk.bf16.mxu1 %vm1485_vm7, %v1464_v56 }
 0x189   : > { %v7429_v61 = vpop.eup %7428  ;;  %7446 = vrcp.f32 %v1353_v58  ;;  %7031 = vmatmul.mubr.msk.bf16.gmra.mrb[16].mxu1 %vm1485_vm7, %v1465_v63  ;;  %v1444_v0 = vmul.f32 %v7427_v47, %v8760_v14 }
 0x18a   : > { %v7431_v31 = vpop.eup %7430  ;;  %7448 = vrcp.f32 %v1351_v53  ;;  %v1442_v4 = vmul.f32 %v7429_v61, %v8763_v43 }
 0x18b   : > { %v7433_v60 = vpop.eup %7432  ;;  %v1445_v1 = vmul.f32 %v7431_v31, %v8767_v22 }
 0x18c   : > { %v7435_v3 = vpop.eup %7434  ;;  %v1443_v5 = vmul.f32 %v7433_v60, %v8771_v30 }
 0x18d   : > { %v7437_v6 = vpop.eup %7436  ;;  %v1467_v7 = vpack.c.bf16 %v1445_v1, %v1444_v0  ;;  %v1356_v8 = vadd.f32 1.0, %v7435_v3 }
 0x18e   : > { %v7439_v9 = vpop.eup %7438  ;;  %v1466_v10 = vpack.c.bf16 %v1443_v5, %v1442_v4  ;;  %v1354_v12 = vadd.f32 1.0, %v7437_v6 }
 0x18f   : > { %v7441_v13 = vpop.eup %7440  ;;  %7450 = vrcp.f32 %v1356_v8  ;;  %v1357_v16 = vadd.f32 1.0, %v7439_v9 }
 0x190   : > { %7452 = vrcp.f32 %v1354_v12  ;;  %v1355_v17 = vadd.f32 1.0, %v7441_v13  ;;  %7034 = vmatprep.mubr.msk.bf16.mxu1 %vm1485_vm7, %v1466_v10 }
 0x191   : > { %v7443_v14 = vpop.eup %7442  ;;  %7454 = vrcp.f32 %v1357_v16  ;;  %7035 = vmatmul.mubr.msk.bf16.gmra.mrb[20].mxu1 %vm1485_vm7, %v1467_v7 }
 0x192   : > { %v7445_v43 = vpop.eup %7444  ;;  %7456 = vrcp.f32 %v1355_v17  ;;  %v1448_v18 = vmul.f32 %v7443_v14, %v8782_v49 }
 0x193   : > { %v7447_v22 = vpop.eup %7446  ;;  %v1446_v20 = vmul.f32 %v7445_v43, %v8785_v55 }
 0x194   : > { %v7449_v30 = vpop.eup %7448  ;;  %v1449_v40 = vmul.f32 %v7447_v22, %v8788_v59 }
 0x195   : > { %v1447_v46 = vmul.f32 %v7449_v30, %v8792_v62 }
 0x196   : > { %v1469_v19 = vpack.c.bf16 %v1449_v40, %v1448_v18 }
 0x197   : > { %v1468_v21 = vpack.c.bf16 %v1447_v46, %v1446_v20 }
 0x199   : > { %v7451_v25 = vpop.eup %7450  ;;  %7038 = vmatprep.mubr.msk.bf16.mxu1 %vm1485_vm7, %v1468_v21 }
 0x19a   : > { %v7453_v27 = vpop.eup %7452  ;;  %7039 = vmatmul.mubr.msk.bf16.gmra.mrb[24].mxu1 %vm1485_vm7, %v1469_v19  ;;  %v1452_v23 = vmul.f32 %v7451_v25, %v8804_v38 }
 0x19b   : > { %v7455_v15 = vpop.eup %7454  ;;  %v1450_v59 = vmul.f32 %v7453_v27, %v8807_v11 }
 0x19c   : > { %v7457_v29 = vpop.eup %7456  ;;  %v1453_v49 = vmul.f32 %v7455_v15, %v8811_v33 }
 0x19d   : > { %v1451_v55 = vmul.f32 %v7457_v29, %v8815_v37 }
 0x19e   : > { %v1471_v32 = vpack.c.bf16 %v1453_v49, %v1452_v23 }
 0x19f   : > { %v1470_v62 = vpack.c.bf16 %v1451_v55, %v1450_v59 }
 0x1a1   : > { %7042 = vmatprep.mubr.msk.bf16.mxu1 %vm1485_vm7, %v1470_v62 }
 0x1a2   : > { %7043 = vmatmul.mubr.msk.bf16.gmra.mrb[28].mxu1 %vm1485_vm7, %v1471_v32 }
 0x23a   : > { %v7016_v36 = vpop.f32.mrb[0].mxu1 }
 0x23b   : > { %v8851_v38 = vadd.f32 %v7016_v36, %v8848_v35  ;;  %v1568_v33 = vpop.f32.mrb[1].mxu1 }
 0x23c   : > { %v8854_v11 = vadd.f32 %v8848_v35, %v1568_v33  ;;  %v7017_v37 = vpop.f32.mrb[2].mxu1 }
 0x23d   : > { %v6565_v39 = vmul.f32 -1.442695, %v8851_v38  ;;  %v8858_v41 = vadd.f32 %v7017_v37, %v8848_v35  ;;  %v1571_v42 = vpop.f32.mrb[3].mxu1 }
 0x23e   : > { %v6563_v44 = vmul.f32 -1.442695, %v8854_v11  ;;  %v8862_v45 = vadd.f32 %v8848_v35, %v1571_v42 }
 0x23f   : > { %7458 = vpow2.f32 %v6565_v39  ;;  %v6566_v48 = vmul.f32 -1.442695, %v8858_v41  ;;  %v8921_v39 = vld [vmem:[%s12017_s1] ss:$0 sm:$0xff] }
 0x240   : > { %7460 = vpow2.f32 %v6563_v44  ;;  %v6564_v26 = vmul.f32 -1.442695, %v8862_v45 }
 0x241   : > { %7462 = vpow2.f32 %v6566_v48  ;;  %v1953_v48 = vld [vmem:[#allocation2] sm:$0xff] }
 0x242   : > { %7464 = vpow2.f32 %v6564_v26  ;;  %v7020_v24 = vpop.f32.mrb[4].mxu1  ;;  %v2054_v26 = vld [vmem:[#allocation2 + $0x1] sm:$0xff] }
 0x243   : > { %v8867_v50 = vadd.f32 %v7020_v24, %v8848_v35  ;;  %v1584_v28 = vpop.f32.mrb[5].mxu1 }
 0x244   : > { %v8870_v51 = vadd.f32 %v8848_v35, %v1584_v28  ;;  %v7021_v34 = vpop.f32.mrb[6].mxu1 }
 0x245   : > { %v6569_v63 = vmul.f32 -1.442695, %v8867_v50  ;;  %v8874_v52 = vadd.f32 %v7021_v34, %v8848_v35  ;;  %v1587_v54 = vpop.f32.mrb[7].mxu1 }
 0x246   : > { %v6567_v56 = vmul.f32 -1.442695, %v8870_v51  ;;  %v8879_v57 = vadd.f32 %v8848_v35, %v1587_v54 }
 0x247   : > { %7466 = vpow2.f32 %v6569_v63  ;;  %v6570_v2 = vmul.f32 -1.442695, %v8874_v52 }
 0x248   : > { %7468 = vpow2.f32 %v6567_v56  ;;  %v6568_v3 = vmul.f32 -1.442695, %v8879_v57 }
 0x249   : > { %v7459_v58 = vpop.eup %7458  ;;  %7470 = vpow2.f32 %v6570_v2 }
 0x24a   : > { %v7461_v47 = vpop.eup %7460  ;;  %v1793_v53 = vadd.f32 1.0, %v7459_v58  ;;  %v1990_v58 = vmul.f32 %v8921_v39, %v1953_v48 }
 0x24b   : > { %v7463_v61 = vpop.eup %7462  ;;  %v1791_v31 = vadd.f32 1.0, %v7461_v47  ;;  %v7024_v60 = vpop.f32.mrb[8].mxu1 }
 0x24c   : > { %v7465_v0 = vpop.eup %7464  ;;  %7472 = vrcp.f32 %v1793_v53  ;;  %v1794_v1 = vadd.f32 1.0, %v7463_v61  ;;  %v8883_v4 = vadd.f32 %v7024_v60, %v8848_v35  ;;  %v1600_v5 = vpop.f32.mrb[9].mxu1  ;;  %v2155_v53 = vld [vmem:[#allocation2 + $0x2] sm:$0xff] }
 0x24d   : > { %7474 = vrcp.f32 %v1791_v31  ;;  %v1792_v6 = vadd.f32 1.0, %v7465_v0  ;;  %v8886_v7 = vadd.f32 %v8848_v35, %v1600_v5  ;;  %v7025_v8 = vpop.f32.mrb[10].mxu1  ;;  %v8940_v61 = vld [vmem:[%s12017_s1 + $0x2] ss:$0 sm:$0xff]  ;;  %v1954_v31 = vld [vmem:[#allocation2 + $0x8] sm:$0xff] }
 0x24e   : > { %7476 = vrcp.f32 %v1794_v1  ;;  %v6573_v9 = vmul.f32 -1.442695, %v8883_v4  ;;  %v8890_v10 = vadd.f32 %v7025_v8, %v8848_v35  ;;  %v1603_v12 = vpop.f32.mrb[11].mxu1  ;;  %v2192_v1 = vmul.f32 %v8940_v61, %v2155_v53 }
 0x24f   : > { %7478 = vrcp.f32 %v1792_v6  ;;  %v6571_v13 = vmul.f32 -1.442695, %v8886_v7  ;;  %v8894_v16 = vadd.f32 %v8848_v35, %v1603_v12  ;;  %v1991_v6 = vmul.f32 %v8921_v39, %v1954_v31  ;;  %v8955_v12 = vld [vmem:[%s12017_s1 + $0x3] ss:$0 sm:$0xff] }
 0x250   : > { %7480 = vpow2.f32 %v6568_v3  ;;  %v6574_v17 = vmul.f32 -1.442695, %v8890_v10 }
 0x251   : > { %v7467_v14 = vpop.eup %7466  ;;  %7482 = vpow2.f32 %v6573_v9  ;;  %v6572_v30 = vmul.f32 -1.442695, %v8894_v16 }
 0x252   : > { %v7469_v43 = vpop.eup %7468  ;;  %v1797_v22 = vadd.f32 1.0, %v7467_v14  ;;  %7484 = vpow2.f32 %v6571_v13 }
 0x253   : > { %v1795_v18 = vadd.f32 1.0, %v7469_v43  ;;  %7486 = vpow2.f32 %v6574_v17  ;;  %v8898_v40 = vpop.f32.mrb[12].mxu1  ;;  %v7471_v46 = vpop.eup %7470  ;;  %v2156_v17 = vld [vmem:[#allocation2 + $0xa] sm:$0xff] }
 0x254   : > { %7488 = vrcp.f32 %v1797_v22  ;;  %v8900_v20 = vpop.f32.mrb[13].mxu1 }
 0x255   : > { %7490 = vrcp.f32 %v1795_v18  ;;  %v8902_v19 = vpop.f32.mrb[14].mxu1 }
 0x256   : > { %v7473_v21 = vpop.eup %7472  ;;  %7492 = vpow2.f32 %v6572_v30  ;;  %v8904_v25 = vpop.f32.mrb[15].mxu1 }
 0x257   : > { %v7475_v27 = vpop.eup %7474  ;;  %v1889_v15 = vmul.f32 %v7473_v21, %v8851_v38 }
 0x258   : > { %v7477_v29 = vpop.eup %7476  ;;  %v1887_v23 = vmul.f32 %v7475_v27, %v8854_v11 }
 0x259   : > { %v7479_v49 = vpop.eup %7478  ;;  %1923 = vst.msk [vmem:[#allocation2 + $0x31] sm:$0xff] %vm1920_vm8, %v1889_v15  ;;  %v1890_v59 = vmul.f32 %v7477_v29, %v8858_v41  ;;  %v1798_v41 = vadd.f32 1.0, %v7471_v46  ;;  %v2193_v46 = vmul.f32 %v8940_v61, %v2156_v17 }
 0x25a   : > { %v7481_v55 = vpop.eup %7480  ;;  %1921 = vst.msk [vmem:[#allocation2 + $0x19] sm:$0xff] %vm1920_vm8, %v1887_v23  ;;  %v1888_v32 = vmul.f32 %v7479_v49, %v8862_v45  ;;  %v8928_v45 = vld [vmem:[%s12017_s1 + $0x1] ss:$0 sm:$0xff]  ;;  %v8966_v49 = vld [vmem:[%s12017_s1 + $0x4] ss:$0 sm:$0xff] }
 0x25b   : > { %v7483_v62 = vpop.eup %7482  ;;  %1924 = vst.msk [vmem:[#allocation2 + $0x39] sm:$0xff] %vm1920_vm8, %v1890_v59  ;;  %v1796_v28 = vadd.f32 1.0, %v7481_v55  ;;  %v2091_v47 = vmul.f32 %v8928_v45, %v2054_v26  ;;  %7494 = vrcp.f32 %v1798_v41 }
 0x25c   : > { %v7485_v36 = vpop.eup %7484  ;;  %1922 = vst.msk [vmem:[#allocation2 + $0x21] sm:$0xff] %vm1920_vm8, %v1888_v32  ;;  %v8914_v38 = vpop.f32.mrb[16].mxu1  ;;  %v1801_v56 = vadd.f32 1.0, %v7483_v62 }
 0x25d   : > { %v7487_v33 = vpop.eup %7486  ;;  %v8916_v11 = vpop.f32.mrb[17].mxu1  ;;  %v1799_v2 = vadd.f32 1.0, %v7485_v36  ;;  %7496 = vrcp.f32 %v1796_v28  ;;  %v2123_v5 = vadd.f32 %v2091_v47, %v1990_v58 }
 0x25e   : > { %v7489_v37 = vpop.eup %7488  ;;  %v8923_v42 = vpop.f32.mrb[18].mxu1  ;;  %7498 = vrcp.f32 %v1801_v56  ;;  %v8980_v56 = vld [vmem:[%s12017_s1 + $0x5] ss:$0 sm:$0xff] }
 0x25f   : > { %v7491_v44 = vpop.eup %7490  ;;  %v1893_v24 = vmul.f32 %v7489_v37, %v8867_v50  ;;  %v8931_v34 = vpop.f32.mrb[19].mxu1  ;;  %v1802_v50 = vadd.f32 1.0, %v7487_v33  ;;  %7500 = vrcp.f32 %v1799_v2  ;;  %v2224_v22 = vadd.f32 %v2192_v1, %v2123_v5 }
 0x260   : > { %v7493_v63 = vpop.eup %7492  ;;  %v1891_v54 = vmul.f32 %v7491_v44, %v8870_v51  ;;  %v2055_v51 = vld [vmem:[#allocation2 + $0x9] sm:$0xff] }
 0x261   : > { %1927 = vst.msk [vmem:[#allocation2 + $0x61] sm:$0xff] %vm1920_vm8, %v1893_v24  ;;  %v1800_v60 = vadd.f32 1.0, %v7493_v63  ;;  %v2092_v8 = vmul.f32 %v8928_v45, %v2055_v51  ;;  %7502 = vrcp.f32 %v1802_v50  ;;  %v1955_v13 = vld [vmem:[#allocation2 + $0x18] sm:$0xff] }
 0x262   : > { %1925 = vst.msk [vmem:[#allocation2 + $0x49] sm:$0xff] %vm1920_vm8, %v1891_v54  ;;  %v2056_v43 = vld [vmem:[#allocation2 + $0x19] sm:$0xff]  ;;  %v2293_v30 = vmul.f32 %v8955_v12, %v1955_v13  ;;  %v1992_v15 = vmul.f32 %v8921_v39, %v1955_v13 }
 0x263   : > { %7504 = vrcp.f32 %v1800_v60  ;;  %v2124_v18 = vadd.f32 %v2092_v8, %v1991_v6  ;;  %v1956_v21 = vld [vmem:[#allocation2 + $0x20] sm:$0xff]  ;;  %v2093_v29 = vmul.f32 %v8928_v45, %v2056_v43  ;;  %v2394_v24 = vmul.f32 %v8966_v49, %v2056_v43  ;;  %v1957_v60 = vld [vmem:[#allocation2 + $0x30] sm:$0xff] }
 0x264   : > { %v8943_v0 = vpop.f32.mrb[20].mxu1  ;;  %v2157_v59 = vld [vmem:[#allocation2 + $0x1a] sm:$0xff]  ;;  %v2325_v62 = vadd.f32 %v2293_v30, %v2224_v22  ;;  %v2294_v37 = vmul.f32 %v8955_v12, %v1956_v21  ;;  %v1993_v2 = vmul.f32 %v8921_v39, %v1956_v21  ;;  %v8992_v6 = vadd.f32 %v8898_v40, %v8848_v35  ;;  %v2058_v8 = vld [vmem:[#allocation2 + $0x31] sm:$0xff]  ;;  %v2158_v13 = vld [vmem:[#allocation2 + $0x22] sm:$0xff] }
 0x265   : > { %v8946_v3 = vpop.f32.mrb[21].mxu1  ;;  %v7495_v27 = vpop.eup %7494  ;;  %v2057_v36 = vld [vmem:[#allocation2 + $0x21] sm:$0xff]  ;;  %v2225_v33 = vadd.f32 %v2193_v46, %v2124_v18  ;;  %v2125_v26 = vadd.f32 %v2093_v29, %v1992_v15  ;;  %v2194_v28 = vmul.f32 %v8940_v61, %v2157_v59  ;;  %v2495_v17 = vmul.f32 %v8980_v56, %v2157_v59  ;;  %v1958_v29 = vld [vmem:[#allocation2 + $0x38] sm:$0xff] }
 0x266   : > { %v8950_v9 = vpop.f32.mrb[22].mxu1  ;;  %v2094_v58 = vmul.f32 %v8928_v45, %v2057_v36  ;;  %v1894_v47 = vmul.f32 %v7495_v27, %v8874_v52  ;;  %v2426_v53 = vadd.f32 %v2394_v24, %v2325_v62  ;;  %v2395_v1 = vmul.f32 %v8966_v49, %v2057_v36  ;;  %v9031_v62 = vld [vmem:[%s12017_s1 + $0x7] ss:$0 sm:$0xff] }
 0x267   : > { %v8957_v14 = vpop.f32.mrb[23].mxu1  ;;  %v7497_v23 = vpop.eup %7496  ;;  %v2326_v50 = vadd.f32 %v2294_v37, %v2225_v33  ;;  %v2226_v52 = vadd.f32 %v2194_v28, %v2125_v26  ;;  %v9007_v43 = vadd.f32 %v8848_v35, %v8900_v20  ;;  %v2295_v22 = vmul.f32 %v8955_v12, %v1957_v60 }
 0x268   : > { %v7499_v32 = vpop.eup %7498  ;;  %v1892_v31 = vmul.f32 %v7497_v23, %v8879_v57  ;;  %1928 = vst.msk [vmem:[#allocation2 + $0x69] sm:$0xff] %vm1920_vm8, %v1894_v47  ;;  %v2126_v40 = vadd.f32 %v2094_v58, %v1993_v2  ;;  %v2527_v18 = vadd.f32 %v2495_v17, %v2426_v53  ;;  %v1994_v46 = vmul.f32 %v8921_v39, %v1957_v60  ;;  %v2159_v23 = vld [vmem:[#allocation2 + $0x32] sm:$0xff] }
 0x269   : > { %v7501_v44 = vpop.eup %7500  ;;  %v1897_v51 = vmul.f32 %v7499_v32, %v8883_v4  ;;  %v2427_v30 = vadd.f32 %v2395_v1, %v2326_v50  ;;  %v2095_v21 = vmul.f32 %v8928_v45, %v2058_v8  ;;  %v2195_v20 = vmul.f32 %v8940_v61, %v2158_v13  ;;  %v1959_v26 = vld [vmem:[#allocation2 + $0x48] sm:$0xff]  ;;  %v2059_v58 = vld [vmem:[#allocation2 + $0x39] sm:$0xff] }
 0x26a   : > { %v1895_v5 = vmul.f32 %v7501_v44, %v8886_v7  ;;  %1926 = vst.msk [vmem:[#allocation2 + $0x51] sm:$0xff] %vm1920_vm8, %v1892_v31  ;;  %v9002_v7 = vld [vmem:[%s12017_s1 + $0x6] ss:$0 sm:$0xff]  ;;  %v6577_v27 = vmul.f32 -1.442695, %v8992_v6  ;;  %v2327_v59 = vadd.f32 %v2295_v22, %v2226_v52  ;;  %v2496_v32 = vmul.f32 %v8980_v56, %v2158_v13 }
 0x26b   : > { %v7503_v48 = vpop.eup %7502  ;;  %1931 = vst.msk [vmem:[#allocation2 + $0x91] sm:$0xff] %vm1920_vm8, %v1897_v51  ;;  %v2597_v15 = vmul.f32 %v9002_v7, %v1957_v60  ;;  %v2227_v36 = vadd.f32 %v2195_v20, %v2126_v40  ;;  %v6575_v33 = vmul.f32 -1.442695, %v9007_v43  ;;  %v2396_v37 = vmul.f32 %v8966_v49, %v2058_v8  ;;  %v9044_v31 = vld [vmem:[%s12017_s1 + $0x8] ss:$0 sm:$0xff]  ;;  %v2160_v40 = vld [vmem:[#allocation2 + $0x3a] sm:$0xff] }
 0x26c   : > { %v1898_v57 = vmul.f32 %v7503_v48, %v8890_v10  ;;  %1929 = vst.msk [vmem:[#allocation2 + $0x79] sm:$0xff] %vm1920_vm8, %v1895_v5  ;;  %v9014_v10 = vadd.f32 %v8902_v19, %v8848_v35  ;;  %v9026_v19 = vadd.f32 %v8848_v35, %v8904_v25  ;;  %v2528_v44 = vadd.f32 %v2496_v32, %v2427_v30 }
 0x26d   : > { %v8968_v55 = vpop.f32.mrb[24].mxu1  ;;  %v7505_v54 = vpop.eup %7504  ;;  %v2629_v48 = vadd.f32 %v2597_v15, %v2527_v18  ;;  %v2127_v28 = vadd.f32 %v2095_v21, %v1994_v46  ;;  %v2296_v25 = vmul.f32 %v8955_v12, %v1958_v29  ;;  %7506 = vpow2.f32 %v6577_v27  ;;  %v2060_v18 = vld [vmem:[#allocation2 + $0x49] sm:$0xff] }
 0x26e   : > { %v8971_v41 = vpop.f32.mrb[25].mxu1  ;;  %v1896_v4 = vmul.f32 %v7505_v54, %v8894_v16  ;;  %1932 = vst.msk [vmem:[#allocation2 + $0x99] sm:$0xff] %vm1920_vm8, %v1898_v57  ;;  %v6578_v24 = vmul.f32 -1.442695, %v9014_v10  ;;  %v2196_v54 = vmul.f32 %v8940_v61, %v2159_v23  ;;  %v2698_v2 = vmul.f32 %v9031_v62, %v2058_v8 }
 0x26f   : > { %12018 = vst [vmem:[#allocation11_spill] sm:$0xff] %v8971_v41  ;;  %v8975_v63 = vpop.f32.mrb[26].mxu1  ;;  %v2598_v47 = vmul.f32 %v9002_v7, %v1958_v29  ;;  %v2428_v53 = vadd.f32 %v2396_v37, %v2327_v59  ;;  %v6576_v50 = vmul.f32 -1.442695, %v9026_v19  ;;  %v2328_v51 = vadd.f32 %v2296_v25, %v2227_v36  ;;  %v1961_v25 = vld [vmem:[#allocation2 + $0x60] sm:$0xff] }
 0x270   : > { %12019 = vst [vmem:[#allocation12_spill] sm:$0xff] %v8975_v63  ;;  %1930 = vst.msk [vmem:[#allocation2 + $0x81] sm:$0xff] %vm1920_vm8, %v1896_v4  ;;  %v9016_v16 = vpop.f32.mrb[27].mxu1  ;;  %v2297_v60 = vmul.f32 %v8955_v12, %v1959_v26  ;;  %7508 = vpow2.f32 %v6575_v33  ;;  %v2497_v1 = vmul.f32 %v8980_v56, %v2159_v23  ;;  %v2730_v13 = vadd.f32 %v2698_v2, %v2629_v48  ;;  %v9062_v33 = vld [vmem:[%s12023_s5] ss:$0 sm:$0xff] }
 0x271   : > { %12020 = vst [vmem:[#allocation13_spill] sm:$0xff] %v9016_v16  ;;  %v2630_v5 = vadd.f32 %v2598_v47, %v2528_v44  ;;  %7510 = vpow2.f32 %v6578_v24  ;;  %v1995_v8 = vmul.f32 %v8921_v39, %v1958_v29  ;;  %v2096_v52 = vmul.f32 %v8928_v45, %v2059_v58  ;;  %v1960_v24 = vld [vmem:[#allocation2 + $0x50] sm:$0xff] }
 0x272   : > { %v2228_v17 = vadd.f32 %v2196_v54, %v2127_v28  ;;  %v2397_v57 = vmul.f32 %v8966_v49, %v2059_v58  ;;  %v2699_v22 = vmul.f32 %v9031_v62, %v2059_v58  ;;  %v2799_v30 = vmul.f32 %v9044_v31, %v2159_v23  ;;  %v2161_v28 = vld [vmem:[#allocation2 + $0x4a] sm:$0xff] }
 0x273   : > { %v2529_v46 = vadd.f32 %v2497_v1, %v2428_v53  ;;  %7512 = vpow2.f32 %v6576_v50  ;;  %v2599_v59 = vmul.f32 %v9002_v7, %v1959_v26  ;;  %v2128_v32 = vadd.f32 %v2096_v52, %v1995_v8 }
 0x274   : > { %v2329_v20 = vadd.f32 %v2297_v60, %v2228_v17  ;;  %v2429_v27 = vadd.f32 %v2397_v57, %v2328_v51  ;;  %v2731_v15 = vadd.f32 %v2699_v22, %v2630_v5  ;;  %v2831_v29 = vadd.f32 %v2799_v30, %v2730_v13  ;;  %v2061_v22 = vld [vmem:[#allocation2 + $0x51] sm:$0xff] }
 0x275   : > { %v9051_v4 = vpop.f32.mrb[28].mxu1  ;;  %v2498_v36 = vmul.f32 %v8980_v56, %v2160_v40  ;;  %v2398_v23 = vmul.f32 %v8966_v49, %v2060_v18  ;;  %v2197_v37 = vmul.f32 %v8940_v61, %v2160_v40  ;;  %v2800_v44 = vmul.f32 %v9044_v31, %v2160_v40 }
 0x276   : > { %12021 = vst [vmem:[#allocation14_spill] sm:$0xff] %v9051_v4  ;;  %v9055_v21 = vpop.f32.mrb[29].mxu1  ;;  %v2631_v48 = vadd.f32 %v2599_v59, %v2529_v46  ;;  %v1996_v2 = vmul.f32 %v8921_v39, %v1959_v26  ;;  %v2097_v58 = vmul.f32 %v8928_v45, %v2060_v18  ;;  %v9070_v51 = vadd.f32 %v9062_v33, %v2831_v29 }
 0x277   : > { %12022 = vst [vmem:[#allocation15_spill] sm:$0xff] %v9055_v21  ;;  %v7507_v54 = vpop.eup %7506  ;;  %v2430_v47 = vadd.f32 %v2398_v23, %v2329_v20  ;;  %v2530_v53 = vadd.f32 %v2498_v36, %v2429_v27  ;;  %v2832_v50 = vadd.f32 %v2800_v44, %v2731_v15  ;;  %v2700_v60 = vmul.f32 %v9031_v62, %v2060_v18  ;;  %v2062_v18 = vld [vmem:[#allocation2 + $0x61] sm:$0xff]  ;;  %v9082_v29 = vpop.f32.mrb[30].mxu1 }
 0x278   : > { %v2229_v5 = vadd.f32 %v2197_v37, %v2128_v32  ;;  %v2499_v13 = vmul.f32 %v8980_v56, %v2161_v28  ;;  %v2600_v8 = vmul.f32 %v9002_v7, %v1960_v24  ;;  %v9077_v52 = vadd.f32 %v8914_v38, %v8848_v35  ;;  %12025 = vst [vmem:[#allocation17_spill] sm:$0xff] %v9082_v29 }
 0x279   : > { %v1998_v17 = vmul.f32 %v8921_v39, %v1961_v25  ;;  %v2601_v57 = vmul.f32 %v9002_v7, %v1961_v25  ;;  %v2732_v40 = vadd.f32 %v2700_v60, %v2631_v48  ;;  %v2298_v30 = vmul.f32 %v8955_v12, %v1960_v24  ;;  %v9094_v60 = vpop.f32.mrb[31].mxu1 }
 0x27a   : > { %v7509_v1 = vpop.eup %7508  ;;  %12024 = vst [vmem:[#allocation16_spill] sm:$0xff] %v9077_v52  ;;  %v2129_v46 = vadd.f32 %v2097_v58, %v1996_v2  ;;  %v2531_v20 = vadd.f32 %v2499_v13, %v2430_v47  ;;  %v2632_v27 = vadd.f32 %v2600_v8, %v2530_v53  ;;  %v1805_v15 = vadd.f32 1.0, %v7507_v54  ;;  %v2162_v58 = vld [vmem:[#allocation2 + $0x52] sm:$0xff]  ;;  %12026 = vst [vmem:[#allocation18_spill] sm:$0xff] %v9094_v60 }
 0x27b   : > { %v7511_v26 = vpop.eup %7510  ;;  %v9085_v38 = vadd.f32 %v9062_v33, %v2832_v50  ;;  %v6605_v32 = vmul.f32 -1.442695, %v9070_v51  ;;  %v2801_v36 = vmul.f32 %v9044_v31, %v2161_v28  ;;  %v1803_v23 = vadd.f32 1.0, %v7509_v1 }
 0x27c   : > { %v1997_v37 = vmul.f32 %v8921_v39, %v1960_v24  ;;  %v2098_v44 = vmul.f32 %v8928_v45, %v2061_v22  ;;  %v2198_v48 = vmul.f32 %v8940_v61, %v2161_v28  ;;  %v2701_v2 = vmul.f32 %v9031_v62, %v2061_v22 }
 0x27d   : > { %v7513_v59 = vpop.eup %7512  ;;  %v2099_v54 = vmul.f32 %v8928_v45, %v2062_v18  ;;  %v2330_v47 = vadd.f32 %v2298_v30, %v2229_v5  ;;  %v2833_v53 = vadd.f32 %v2801_v36, %v2732_v40  ;;  %v1806_v50 = vadd.f32 1.0, %v7511_v26  ;;  %v2163_v26 = vld [vmem:[#allocation2 + $0x62] sm:$0xff] }
 0x27e   : > { %v2633_v13 = vadd.f32 %v2601_v57, %v2531_v20  ;;  %v2733_v8 = vadd.f32 %v2701_v2, %v2632_v27  ;;  %7514 = vrcp.f32 %v1805_v15  ;;  %v1804_v1 = vadd.f32 1.0, %v7513_v59  ;;  %v1962_v30 = vld [vmem:[#allocation2 + $0x68] sm:$0xff]  ;;  %v9115_v2 = vld [vmem:[#allocation2 + $0x78] sm:$0xff] }
 0x27f   : > { %7516 = vpow2.f32 %v6605_v32  ;;  %v6606_v24 = vmul.f32 -1.442695, %v9085_v38  ;;  %v2702_v29 = vmul.f32 %v9031_v62, %v2062_v18  ;;  %v2399_v28 = vmul.f32 %v8966_v49, %v2061_v22  ;;  %v2063_v20 = vld [vmem:[#allocation2 + $0x69] sm:$0xff] }
 0x280   : > { %v2130_v21 = vadd.f32 %v2098_v44, %v1997_v37  ;;  %v2230_v4 = vadd.f32 %v2198_v48, %v2129_v46  ;;  %v2802_v16 = vmul.f32 %v9044_v31, %v2162_v58  ;;  %7518 = vrcp.f32 %v1803_v23 }
 0x281   : > { %v2299_v5 = vmul.f32 %v8955_v12, %v1961_v25  ;;  %v2431_v40 = vadd.f32 %v2399_v28, %v2330_v47  ;;  %v9102_v57 = vadd.f32 %v9062_v33, %v2833_v53  ;;  %7520 = vrcp.f32 %v1806_v50  ;;  %v2164_v50 = vld [vmem:[#allocation2 + $0x6a] sm:$0xff] }
 0x282   : > { %v2199_v27 = vmul.f32 %v8940_v61, %v2162_v58  ;;  %v2734_v15 = vadd.f32 %v2702_v29, %v2633_v13  ;;  %v2834_v59 = vadd.f32 %v2802_v16, %v2733_v8  ;;  %7522 = vrcp.f32 %v1804_v1 }
 0x283   : > { %7524 = vpow2.f32 %v6606_v24  ;;  %v2400_v22 = vmul.f32 %v8966_v49, %v2062_v18  ;;  %v2500_v46 = vmul.f32 %v8980_v56, %v2162_v58  ;;  %v9109_v25 = vadd.f32 %v8848_v35, %v8916_v11  ;;  %v9135_v24 = vld [vmem:[#allocation2 + $0x80] sm:$0xff] }
 0x284   : > { %v2131_v32 = vadd.f32 %v2099_v54, %v1998_v17  ;;  %v2803_v36 = vmul.f32 %v9044_v31, %v2163_v26  ;;  %v2231_v23 = vadd.f32 %v2199_v27, %v2130_v21  ;;  %v2331_v37 = vadd.f32 %v2299_v5, %v2230_v4 }
 0x285   : > { %12027 = vst [vmem:[#allocation19_spill] sm:$0xff] %v9109_v25  ;;  %v1999_v44 = vmul.f32 %v8921_v39, %v1962_v30  ;;  %v2100_v29 = vmul.f32 %v8928_v45, %v2063_v20  ;;  %v2532_v16 = vadd.f32 %v2500_v46, %v2431_v40  ;;  %v6607_v48 = vmul.f32 -1.442695, %v9102_v57 }
 0x286   : > { %v2200_v18 = vmul.f32 %v8940_v61, %v2163_v26  ;;  %v2300_v58 = vmul.f32 %v8955_v12, %v1962_v30  ;;  %v2835_v11 = vadd.f32 %v2803_v36, %v2734_v15  ;;  %v9120_v17 = vadd.f32 %v9062_v33, %v2834_v59 }
 0x287   : > { %v2602_v21 = vmul.f32 %v9002_v7, %v1962_v30  ;;  %v9124_v4 = vmul.f32 -1.442695, %v9077_v52  ;;  %v9127_v54 = vmul.f32 -1.442695, %v9109_v25  ;;  %v9131_v47 = vadd.f32 %v8923_v42, %v8848_v35  ;;  %v2065_v52 = vld [vmem:[#allocation2 + $0x81] sm:$0xff] }
 0x288   : > { %v7515_v53 = vpop.eup %7514  ;;  %v2332_v13 = vadd.f32 %v2300_v58, %v2231_v23  ;;  %v2301_v8 = vmul.f32 %v8955_v12, %v9115_v2  ;;  %v2432_v1 = vadd.f32 %v2400_v22, %v2331_v37  ;;  %v9139_v28 = vadd.f32 %v8848_v35, %v8931_v34 }
 0x289   : > { %v7517_v5 = vpop.eup %7516  ;;  %v2132_v40 = vadd.f32 %v2100_v29, %v1999_v44  ;;  %v2401_v30 = vmul.f32 %v8966_v49, %v2063_v20  ;;  %v2634_v27 = vadd.f32 %v2602_v21, %v2532_v16  ;;  %7526 = vpow2.f32 %v6607_v48  ;;  %v2064_v44 = vld [vmem:[#allocation2 + $0x79] sm:$0xff] }
 0x28a   : > { %v7519_v42 = vpop.eup %7518  ;;  %v2232_v15 = vadd.f32 %v2200_v18, %v2131_v32  ;;  %v2501_v59 = vmul.f32 %v8980_v56, %v2163_v26  ;;  %v9144_v46 = vadd.f32 %v9062_v33, %v2835_v11  ;;  %v6608_v22 = vmul.f32 -1.442695, %v9120_v17 }
 0x28b   : > { %v7521_v36 = vpop.eup %7520  ;;  %v2201_v23 = vmul.f32 %v8940_v61, %v2164_v50  ;;  %v2502_v34 = vmul.f32 %v8980_v56, %v2164_v50  ;;  %v2703_v37 = vmul.f32 %v9031_v62, %v2063_v20  ;;  %v2302_v29 = vmul.f32 %v8955_v12, %v9135_v24 }
 0x28c   : > { %v7523_v16 = vpop.eup %7522  ;;  %v2804_v32 = vmul.f32 %v9044_v31, %v2164_v50  ;;  %v2333_v26 = vadd.f32 %v2301_v8, %v2232_v15  ;;  %v2533_v48 = vadd.f32 %v2501_v59, %v2432_v1  ;;  %v2433_v18 = vadd.f32 %v2401_v30, %v2332_v13  ;;  %v2165_v8 = vld [vmem:[#allocation2 + $0x7a] sm:$0xff]  ;;  %v1965_v15 = vld [vmem:[#allocation2 + $0x90] sm:$0xff] }
 0x28d   : > { %v7525_v58 = vpop.eup %7524  ;;  %v2233_v11 = vadd.f32 %v2201_v23, %v2132_v40  ;;  %v2735_v21 = vadd.f32 %v2703_v37, %v2634_v27  ;;  %v1901_v60 = vmul.f32 %v7515_v53, %v8992_v6  ;;  %v1899_v63 = vmul.f32 %v7519_v42, %v9007_v43 }
 0x28e   : > { %7528 = vpow2.f32 %v6608_v22  ;;  %v6609_v20 = vmul.f32 -1.442695, %v9144_v46  ;;  %v2402_v41 = vmul.f32 %v8966_v49, %v2064_v44  ;;  %v2603_v25 = vmul.f32 %v9002_v7, %v9115_v2 }
 0x28f   : > { %v2998_v50 = vadd.f32 1.0, %v7517_v5  ;;  %v2334_v1 = vadd.f32 %v2302_v29, %v2233_v11  ;;  %1935 = vst.msk [vmem:[#allocation2 + $0xc1] sm:$0xff] %vm1920_vm8, %v1901_v60  ;;  %1933 = vst.msk [vmem:[#allocation2 + $0xa9] sm:$0xff] %vm1920_vm8, %v1899_v63  ;;  %v1902_v6 = vmul.f32 %v7521_v36, %v9014_v10  ;;  %v1900_v43 = vmul.f32 %v7523_v16, %v9026_v19  ;;  %v9173_v19 = vld [vmem:[#allocation2 + $0x82] sm:$0xff]  ;;  %v9189_v16 = vld [vmem:[#allocation2 + $0x91] sm:$0xff] }
 0x290   : > { %v2999_v53 = vadd.f32 1.0, %v7525_v58  ;;  %v2434_v13 = vadd.f32 %v2402_v41, %v2333_v26  ;;  %v2635_v40 = vadd.f32 %v2603_v25, %v2533_v48  ;;  %v2534_v30 = vadd.f32 %v2502_v34, %v2433_v18  ;;  %v9197_v18 = vld [vmem:[#allocation2 + $0x98] sm:$0xff] }
 0x291   : > { %v2836_v27 = vadd.f32 %v2804_v32, %v2735_v21  ;;  %v2403_v42 = vmul.f32 %v8966_v49, %v2065_v52  ;;  %1936 = vst.msk [vmem:[#allocation2 + $0xc9] sm:$0xff] %vm1920_vm8, %v1902_v6  ;;  %1934 = vst.msk [vmem:[#allocation2 + $0xb1] sm:$0xff] %vm1920_vm8, %v1900_v43  ;;  %v9167_v5 = vmul.f32 -1.442695, %v9131_v47  ;;  %v9170_v63 = vmul.f32 -1.442695, %v9139_v28 }
 0x292   : > { %7530 = vpow2.f32 %v6609_v20  ;;  %v2704_v10 = vmul.f32 %v9031_v62, %v2064_v44  ;;  %v2503_v41 = vmul.f32 %v8980_v56, %v2165_v8  ;;  %v2604_v60 = vmul.f32 %v9002_v7, %v9135_v24 }
 0x293   : > { %v7527_v25 = vpop.eup %7526  ;;  %7532 = vrcp.f32 %v2998_v50  ;;  %v2435_v59 = vadd.f32 %v2403_v42, %v2334_v1  ;;  %v9180_v22 = vadd.f32 %v8943_v0, %v8848_v35  ;;  %v9184_v36 = vadd.f32 %v8848_v35, %v8946_v3 }
 0x294   : > { %7534 = vrcp.f32 %v2999_v53  ;;  %v2736_v23 = vadd.f32 %v2704_v10, %v2635_v40  ;;  %v2535_v34 = vadd.f32 %v2503_v41, %v2434_v13  ;;  %v2636_v37 = vadd.f32 %v2604_v60, %v2534_v30 }
 0x295   : > { %v9187_v29 = vadd.f32 %v9062_v33, %v2836_v27  ;;  %v2000_v32 = vmul.f32 %v8921_v39, %v9115_v2  ;;  %v2101_v26 = vmul.f32 %v8928_v45, %v2064_v44  ;;  %v2504_v0 = vmul.f32 %v8980_v56, %v9173_v19  ;;  %v9219_v27 = vld [vmem:[#allocation2 + $0x99] sm:$0xff] }
 0x296   : > { %v3000_v48 = vadd.f32 1.0, %v7527_v25  ;;  %v2605_v3 = vmul.f32 %v9002_v7, %v1965_v15  ;;  %v2705_v58 = vmul.f32 %v9031_v62, %v2065_v52  ;;  %v2805_v11 = vmul.f32 %v9044_v31, %v2165_v8  ;;  %v2167_v25 = vld [vmem:[#allocation2 + $0x92] sm:$0xff] }
 0x297   : > { %v2536_v21 = vadd.f32 %v2504_v0, %v2435_v59  ;;  %v9202_v20 = vmul.f32 -1.442695, %v9180_v22  ;;  %v9206_v2 = vadd.f32 %v8950_v9, %v8848_v35  ;;  %v9210_v44 = vadd.f32 %v8848_v35, %v8957_v14 }
 0x298   : > { %v7529_v50 = vpop.eup %7528  ;;  %v2706_v1 = vmul.f32 %v9031_v62, %v9189_v16  ;;  %v2637_v6 = vadd.f32 %v2605_v3, %v2535_v34  ;;  %v2737_v43 = vadd.f32 %v2705_v58, %v2636_v37  ;;  %v2837_v53 = vadd.f32 %v2805_v11, %v2736_v23 }
 0x299   : > { %v6610_v13 = vmul.f32 -1.442695, %v9187_v29  ;;  %v2133_v40 = vadd.f32 %v2101_v26, %v2000_v32  ;;  %v2606_v30 = vmul.f32 %v9002_v7, %v9197_v18  ;;  %v2001_v9 = vmul.f32 %v8921_v39, %v9135_v24 }
 0x29a   : > { %7536 = vrcp.f32 %v3000_v48  ;;  %v2102_v14 = vmul.f32 %v8928_v45, %v2065_v52  ;;  %v2202_v42 = vmul.f32 %v8940_v61, %v2165_v8  ;;  %v2806_v10 = vmul.f32 %v9044_v31, %v9173_v19 }
 0x29b   : > { %v3001_v41 = vadd.f32 1.0, %v7529_v50  ;;  %v2002_v60 = vmul.f32 %v8921_v39, %v1965_v15  ;;  %v2638_v59 = vadd.f32 %v2606_v30, %v2536_v21  ;;  %7538 = vpow2.f32 %v9124_v4  ;;  %v2168_v4 = vld [vmem:[#allocation2 + $0x9a] sm:$0xff] }
 0x29c   : > { %v7531_v23 = vpop.eup %7530  ;;  %v2738_v34 = vadd.f32 %v2706_v1, %v2637_v6  ;;  %v2838_v24 = vadd.f32 %v2806_v10, %v2737_v43  ;;  %v9228_v37 = vadd.f32 %v9062_v33, %v2837_v53  ;;  %7540 = vpow2.f32 %v9127_v54 }
 0x29d   : > { %v7533_v52 = vpop.eup %7532  ;;  %7542 = vpow2.f32 %v6610_v13  ;;  %v2103_v8 = vmul.f32 %v8928_v45, %v9189_v16  ;;  %v2303_v32 = vmul.f32 %v8955_v12, %v1965_v15  ;;  %v2707_v26 = vmul.f32 %v9031_v62, %v9219_v27 }
 0x29e   : > { %v7535_v0 = vpop.eup %7534  ;;  %v2807_v48 = vmul.f32 %v9044_v31, %v2167_v25  ;;  %v2134_v3 = vadd.f32 %v2102_v14, %v2001_v9  ;;  %v2234_v58 = vadd.f32 %v2202_v42, %v2133_v40  ;;  %7544 = vpow2.f32 %v9167_v5 }
 0x29f   : > { %v3002_v11 = vadd.f32 1.0, %v7531_v23  ;;  %7546 = vrcp.f32 %v3001_v41  ;;  %v2203_v54 = vmul.f32 %v8940_v61, %v9173_v19  ;;  %v2739_v21 = vadd.f32 %v2707_v26, %v2638_v59 }
 0x2a0   : > { %v2839_v50 = vadd.f32 %v2807_v48, %v2738_v34  ;;  %v9241_v15 = vadd.f32 %v9062_v33, %v2838_v24  ;;  %v6611_v1 = vmul.f32 -1.442695, %v9228_v37  ;;  %7548 = vpow2.f32 %v9170_v63 }
 0x2a1   : > { %v2135_v6 = vadd.f32 %v2103_v8, %v2002_v60  ;;  %v2003_v43 = vmul.f32 %v8921_v39, %v9197_v18  ;;  %v2104_v5 = vmul.f32 %v8928_v45, %v9219_v27  ;;  %v2808_v53 = vmul.f32 %v9044_v31, %v2168_v4  ;;  %v9275_v8 = vld [vmem:[#allocation2 + $0xa8] sm:$0xff] }
 0x2a2   : > { %v9251_v19 = vmul.f32 %v7533_v52, %v9070_v51  ;;  %v2204_v13 = vmul.f32 %v8940_v61, %v2167_v25  ;;  %v2235_v40 = vadd.f32 %v2203_v54, %v2134_v3  ;;  %v2335_v30 = vadd.f32 %v2303_v32, %v2234_v58 }
 0x2a3   : > { %v9255_v9 = vmul.f32 %v7535_v0, %v9085_v38  ;;  %7550 = vrcp.f32 %v3002_v11  ;;  %v2404_v63 = vmul.f32 %v8966_v49, %v9189_v16  ;;  %v2840_v14 = vadd.f32 %v2808_v53, %v2739_v21 }
 0x2a4   : > { %12028 = vst [vmem:[#allocation20_spill] sm:$0xff] %v9251_v19  ;;  %v7537_v42 = vpop.eup %7536  ;;  %v2304_v10 = vmul.f32 %v8955_v12, %v9197_v18  ;;  %v9262_v41 = vadd.f32 %v9062_v33, %v2839_v50  ;;  %7552 = vpow2.f32 %v6611_v1  ;;  %v6612_v51 = vmul.f32 -1.442695, %v9241_v15 }
 0x2a5   : > { %12029 = vst [vmem:[#allocation21_spill] sm:$0xff] %v9255_v9  ;;  %v7539_v60 = vpop.eup %7538  ;;  %v2136_v59 = vadd.f32 %v2104_v5, %v2003_v43  ;;  %v2205_v38 = vmul.f32 %v8940_v61, %v2168_v4  ;;  %v9267_v23 = vmul.f32 -1.442695, %v9184_v36  ;;  %v9271_v16 = vadd.f32 %v8968_v55, %v8848_v35 }
 0x2a6   : > { %v7541_v34 = vpop.eup %7540  ;;  %v3126_v18 = vsel %vm1920_vm8, %v9251_v19, 0.0  ;;  %v2236_v24 = vadd.f32 %v2204_v13, %v2135_v6  ;;  %v2336_v52 = vadd.f32 %v2304_v10, %v2235_v40  ;;  %v2436_v32 = vadd.f32 %v2404_v63, %v2335_v30  ;;  %v9292_v6 = vld [vmem:[#allocation2 + $0xb0] sm:$0xff] }
 0x2a7   : > { %v7543_v26 = vpop.eup %7542  ;;  %v3127_v0 = vsel %vm1920_vm8, %v9255_v9, 0.0  ;;  %v2405_v48 = vmul.f32 %v8966_v49, %v9219_v27  ;;  %v2505_v3 = vmul.f32 %v8980_v56, %v2167_v25  ;;  %v9283_v35 = vadd.f32 %v9062_v33, %v2840_v14 }
 0x2a8   : > { %v7545_v55 = vpop.eup %7544  ;;  %v9286_v58 = vmul.f32 %v7537_v42, %v9102_v57  ;;  %7554 = vpow2.f32 %v6612_v51  ;;  %v6613_v11 = vmul.f32 -1.442695, %v9262_v41  ;;  %v1809_v54 = vadd.f32 1.0, %v7539_v60  ;;  %v1969_v60 = vld [vmem:[#allocation2 + $0xc0] sm:$0xff] }
 0x2a9   : > { %v7547_v21 = vpop.eup %7546  ;;  %v2237_v50 = vadd.f32 %v2205_v38, %v2136_v59  ;;  %v2506_v1 = vmul.f32 %v8980_v56, %v2168_v4  ;;  %v2305_v27 = vmul.f32 %v8955_v12, %v9275_v8  ;;  %v1807_v25 = vadd.f32 1.0, %v7541_v34  ;;  %v2068_v4 = vld [vmem:[#allocation2 + $0xa9] sm:$0xff] }
 0x2aa   : > { %12030 = vst [vmem:[#allocation22_spill] sm:$0xff] %v9286_v58  ;;  %v7549_v43 = vpop.eup %7548  ;;  %v3003_v5 = vadd.f32 1.0, %v7543_v26  ;;  %v2537_v53 = vadd.f32 %v2505_v3, %v2436_v32  ;;  %v2437_v13 = vadd.f32 %v2405_v48, %v2336_v52  ;;  %7556 = vrcp.f32 %v1809_v54  ;;  %v2069_v3 = vld [vmem:[#allocation2 + $0xb1] sm:$0xff] }
 0x2ab   : > { %v3128_v57 = vadd.f32 %v3127_v0, %v3126_v18  ;;  %v6614_v40 = vmul.f32 -1.442695, %v9283_v35  ;;  %7558 = vrcp.f32 %v1807_v25  ;;  %v1810_v30 = vadd.f32 1.0, %v7545_v55  ;;  %v9307_v0 = vld [vmem:[#allocation2 + $0xc1] sm:$0xff]  ;;  %v2169_v54 = vld [vmem:[#allocation2 + $0xaa] sm:$0xff] }
 0x2ac   : > { %v3129_v63 = vsel %vm1920_vm8, %v9286_v58, 0.0  ;;  %7560 = vpow2.f32 %v6613_v11  ;;  %v2607_v14 = vmul.f32 %v9002_v7, %v9275_v8  ;;  %v2306_v42 = vmul.f32 %v8955_v12, %v9292_v6 }
 0x2ad   : > { %v7551_v10 = vpop.eup %7550  ;;  %v9302_v51 = vmul.f32 %v7547_v21, %v9120_v17  ;;  %v2337_v59 = vadd.f32 %v2305_v27, %v2236_v24  ;;  %7562 = vrcp.f32 %v1810_v30  ;;  %v1808_v38 = vadd.f32 1.0, %v7549_v43  ;;  %v2170_v30 = vld [vmem:[#allocation2 + $0xb2] sm:$0xff] }
 0x2ae   : > { %v7553_v34 = vpop.eup %7552  ;;  %7564 = vrcp.f32 %v3003_v5  ;;  %v2639_v18 = vadd.f32 %v2607_v14, %v2537_v53  ;;  %v2538_v52 = vadd.f32 %v2506_v1, %v2437_v13  ;;  %v9305_v32 = vmul.f32 -1.442695, %v9206_v2 }
 0x2af   : > { %12031 = vst [vmem:[#allocation23_spill] sm:$0xff] %v9302_v51  ;;  %v3130_v26 = vadd.f32 %v3129_v63, %v3128_v57  ;;  %7566 = vpow2.f32 %v6614_v40  ;;  %v2406_v48 = vmul.f32 %v8966_v49, %v2068_v4  ;;  %v9311_v17 = vmul.f32 -1.442695, %v9210_v44 }
 0x2b0   : > { %v9314_v24 = vmul.f32 %v7551_v10, %v9144_v46  ;;  %v9317_v55 = vmul.f32 %v8921_v39, %v1969_v60  ;;  %v2708_v11 = vmul.f32 %v9031_v62, %v2068_v4  ;;  %v2338_v21 = vadd.f32 %v2306_v42, %v2237_v50 }
 0x2b1   : > { %v3131_v1 = vsel %vm1920_vm8, %v9302_v51, 0.0  ;;  %v3004_v27 = vadd.f32 1.0, %v7553_v34  ;;  %v2438_v25 = vadd.f32 %v2406_v48, %v2337_v59  ;;  %7568 = vrcp.f32 %v1808_v38  ;;  %v9339_v48 = vld [vmem:[#allocation2 + $0xc8] sm:$0xff] }
 0x2b2   : > { %v7555_v43 = vpop.eup %7554  ;;  %v9324_v5 = vmul.f32 %v8928_v45, %v9307_v0  ;;  %v2740_v46 = vadd.f32 %v2708_v11, %v2639_v18  ;;  %v2407_v53 = vmul.f32 %v8966_v49, %v2069_v3  ;;  %v2608_v13 = vmul.f32 %v9002_v7, %v9292_v6  ;;  %v12032_v51 = vld [vmem:[#allocation16_spill] sm:$0xff] }
 0x2b3   : > { %v9330_v57 = vmul.f32 %v8955_v12, %v1969_v60  ;;  %v2004_v50 = vmul.f32 %v8921_v39, %v9275_v8  ;;  %v2105_v40 = vmul.f32 %v8928_v45, %v2068_v4  ;;  %v2507_v63 = vmul.f32 %v8980_v56, %v2169_v54 }
 0x2b4   : > { %v7557_v14 = vpop.eup %7556  ;;  %v9336_v42 = vadd.f32 %v3131_v1, %v3130_v26  ;;  %v2439_v10 = vadd.f32 %v2407_v53, %v2338_v21  ;;  %v2640_v59 = vadd.f32 %v2608_v13, %v2538_v52  ;;  %v2809_v38 = vmul.f32 %v9044_v31, %v2169_v54  ;;  %v12033_v26 = vld [vmem:[#allocation19_spill] sm:$0xff] }
 0x2b5   : > { %v7559_v34 = vpop.eup %7558  ;;  %v3005_v18 = vadd.f32 1.0, %v7555_v43  ;;  %7570 = vrcp.f32 %v3004_v27  ;;  %v2539_v11 = vadd.f32 %v2507_v63, %v2438_v25  ;;  %v1905_v8 = vmul.f32 %v7557_v14, %v12032_v51  ;;  %v7307_v14 = vld [vmem:[%s12034_s27 + $0x8] sm:$0xff]  }
 0x2b6   : > { %v7561_v58 = vpop.eup %7560  ;;  %v2508_v4 = vmul.f32 %v8980_v56, %v2170_v30  ;;  %v2709_v9 = vmul.f32 %v9031_v62, %v2069_v3  ;;  %v2841_v19 = vadd.f32 %v2809_v38, %v2740_v46  ;;  %v1903_v1 = vmul.f32 %v7559_v34, %v12033_v26  ;;  %v7306_v56 = vld [vmem:[%s12034_s27] sm:$0xff]  }
 0x2b7   : > { %v7563_v21 = vpop.eup %7562  ;;  %v2609_v52 = vmul.f32 %v9002_v7, %v1969_v60  ;;  %v2137_v53 = vadd.f32 %v2105_v40, %v2004_v50  ;;  %v2005_v27 = vmul.f32 %v8921_v39, %v9292_v6  ;;  %v2106_v43 = vmul.f32 %v8928_v45, %v2069_v3  ;;  %1939 = vst.msk [vmem:[#allocation2 + $0xf1] sm:$0xff] %vm1920_vm8, %v1905_v8 }
 0x2b8   : > { %v7565_v51 = vpop.eup %7564  ;;  %v2610_v25 = vmul.f32 %v9002_v7, %v9339_v48  ;;  %v2540_v46 = vadd.f32 %v2508_v4, %v2439_v10  ;;  %v2741_v13 = vadd.f32 %v2709_v9, %v2640_v59  ;;  %1937 = vst.msk [vmem:[#allocation2 + $0xd9] sm:$0xff] %vm1920_vm8, %v1903_v1  ;;  %v1906_v60 = vmul.f32 %v7563_v21, %v9131_v47  ;;  %v9376_v59 = vld [vmem:[#allocation2 + $0xc2] sm:$0xff] }
 0x2b9   : > { %v7567_v50 = vpop.eup %7566  ;;  %v3006_v39 = vadd.f32 1.0, %v7561_v58  ;;  %v2641_v6 = vadd.f32 %v2609_v52, %v2539_v11  ;;  %7572 = vrcp.f32 %v3005_v18  ;;  %v2206_v45 = vmul.f32 %v8940_v61, %v2169_v54  ;;  %v2071_v54 = vld [vmem:[#allocation2 + $0xc9] sm:$0xff] }
 0x2ba   : > { %v2810_v3 = vmul.f32 %v9044_v31, %v2170_v30  ;;  %v9360_v40 = vadd.f32 %v9062_v33, %v2841_v19  ;;  %1940 = vst.msk [vmem:[#allocation2 + $0xf9] sm:$0xff] %vm1920_vm8, %v1906_v60  ;;  %v11921_v7 = vmov 0.0   ;;  %v9367_v9 = vmul.f32 %v7565_v51, %v9187_v29  ;;  %v9419_v51 = vld [vmem:[%s12017_s1 + $0x1] ss:$0 sm:$0xff] }
 0x2bb   : > { %7046 = vmatprep.subr.bf16.mxu1 %v11921_v7  ;;  %7054 = vmatprep.mubr.msk.bf16.mxu1 %vm8214_vm9, %v11921_v7  ;;  %v7569_v47 = vpop.eup %7568  ;;  %v3133_v58 = vsel %vm1920_vm8, %v9314_v24, 0.0  ;;  %v2710_v19 = vmul.f32 %v9031_v62, %v9307_v0  ;;  %v2138_v63 = vadd.f32 %v2106_v43, %v2005_v27  ;;  %v3007_v10 = vadd.f32 1.0, %v7567_v50  ;;  %v9412_v43 = vld [vmem:[%s12017_s1] ss:$0 sm:$0xff] }
 0x2bc   : > { %7047 = vmatpush3.bf16.msra.mxu1 %v7306_v56  ;;  %v2642_v38 = vadd.f32 %v2610_v25, %v2540_v46  ;;  %v2842_v34 = vadd.f32 %v2810_v3, %v2741_v13  ;;  %v1904_v29 = vmul.f32 %v7569_v47, %v9139_v28  ;;  %7574 = vrcp.f32 %v3006_v39  ;;  %v9432_v3 = vld [vmem:[%s12017_s1 + $0x3] ss:$0 sm:$0xff] }
 0x2bd   : > { %7048 = vmatprep.subr.bf16.mxu1 %v11921_v7  ;;  %v2408_v18 = vmul.f32 %v8966_v49, %v9307_v0  ;;  %v2207_v11 = vmul.f32 %v8940_v61, %v2170_v30  ;;  %v2742_v8 = vadd.f32 %v2710_v19, %v2641_v6  ;;  %v2139_v4 = vadd.f32 %v9324_v5, %v9317_v55  ;;  %v2172_v49 = vld [vmem:[#allocation2 + $0xca] sm:$0xff]  ;;  %v9399_v55 = vld [vmem:[%s12017_s1 + $0x2] ss:$0 sm:$0xff]  ;;  %v9446_v19 = vld [vmem:[%s12017_s1 + $0x4] ss:$0 sm:$0xff] }
 0x2be   : > { %v2711_v26 = vmul.f32 %v9031_v62, %v2071_v54  ;;  %v2238_v1 = vadd.f32 %v2206_v45, %v2137_v53  ;;  %v6615_v21 = vmul.f32 -1.442695, %v9360_v40  ;;  %1938 = vst.msk [vmem:[#allocation2 + $0xe1] sm:$0xff] %vm1920_vm8, %v1904_v29  ;;  %v3134_v52 = vadd.f32 %v3133_v58, %v9336_v42  ;;  %v7308_v62 = vld [vmem:[%s12034_s27 + $0x10] sm:$0xff]  }
 0x2bf   : > { %v7571_v28 = vpop.eup %7570  ;;  %v3135_v27 = vsel %vm1920_vm8, %v9367_v9, 0.0  ;;  %v2811_v61 = vmul.f32 %v9044_v31, %v9376_v59  ;;  %v2239_v0 = vadd.f32 %v2207_v11, %v2138_v63  ;;  %7576 = vrcp.f32 %v3007_v10  ;;  %v9406_v53 = vld [vmem:[#allocation2 + $0xd8] sm:$0xff] }
 0x2c0   : > { %7049 = vmatpush3.bf16.msra.mxu1 %v7307_v14  ;;  %v2208_v5 = vmul.f32 %v9399_v55, %v9376_v59  ;;  %v2743_v30 = vadd.f32 %v2711_v26, %v2642_v38  ;;  %v9404_v42 = vadd.f32 %v9062_v33, %v2842_v34  ;;  %v2007_v56 = vmul.f32 %v9412_v43, %v9339_v48  ;;  %v9456_v34 = vld [vmem:[#allocation2 + $0xd9] sm:$0xff] }
 0x2c1   : > { %7050 = vmatprep.subr.bf16.mxu1 %v11921_v7  ;;  %v2108_v25 = vmul.f32 %v9419_v51, %v2071_v54  ;;  %v2308_v46 = vmul.f32 %v8955_v12, %v9339_v48  ;;  %v2843_v13 = vadd.f32 %v2811_v61, %v2742_v8  ;;  %v9425_v60 = vmul.f32 %v7571_v28, %v9228_v37  ;;  %v7309_v12 = vld [vmem:[%s12034_s27 + $0x18] sm:$0xff]  }
 0x2c2   : > { %v2812_v50 = vmul.f32 %v9044_v31, %v2172_v49  ;;  %v2339_v39 = vadd.f32 %v9330_v57, %v2238_v1  ;;  %7578 = vpow2.f32 %v6615_v21  ;;  %v3136_v6 = vadd.f32 %v3135_v27, %v3134_v52 }
 0x2c3   : > { %12035 = vst [vmem:[#allocation16_spill] sm:$0xff] %v9425_v60  ;;  %v2340_v45 = vadd.f32 %v2308_v46, %v2239_v0  ;;  %v2309_v47 = vmul.f32 %v9432_v3, %v9406_v53  ;;  %7580 = vpow2.f32 %v9202_v20  ;;  %v7573_v31 = vpop.eup %7572  ;;  %v2209_v37 = vmul.f32 %v9399_v55, %v2172_v49 }
 0x2c4   : > { %7051 = vmatpush3.bf16.msra.mxu1 %v7308_v62  ;;  %v2240_v57 = vadd.f32 %v2208_v5, %v2139_v4  ;;  %v2844_v48 = vadd.f32 %v2812_v50, %v2743_v30  ;;  %v6616_v58 = vmul.f32 -1.442695, %v9404_v42  ;;  %v2409_v20 = vmul.f32 %v9446_v19, %v2071_v54  ;;  %v9494_v30 = vld [vmem:[%s12016_s3] ss:$0 sm:$0xff]  ;;  %s6843_s3 = sshll.u32 %s8367_s7, 4  ;;  %s8215_s7 = smov [#allocation4]  }
 0x2c5   : > { %7052 = vmatprep.subr.bf16.mxu1 %v11921_v7  ;;  %v9450_v63 = vadd.f32 %v9062_v33, %v2843_v13  ;;  %7582 = vpow2.f32 %v9267_v23  ;;  %v6589_v14 = vmul.f32 -1.442695, %v9271_v16  ;;  %v3137_v10 = vsel %vm1920_vm8, %v9425_v60, 0.0  ;;  %v9458_v11 = vld [vmem:[#allocation2 + $0xe0] sm:$0xff]  ;;  %s11833_s28 = scalar_lea.hbm %s11903_s25, %s6843_s3 }
 0x2c6   : > { %v2140_v38 = vadd.f32 %v2108_v25, %v2007_v56  ;;  %v2440_v29 = vadd.f32 %v2408_v18, %v2339_v39  ;;  %7584 = vpow2.f32 %v9305_v32  ;;  %v7575_v8 = vpop.eup %7574  ;;  %v9462_v54 = vmul.f32 %v7573_v31, %v9241_v15  ;;  %v9468_v23 = vld [vmem:[%s12017_s1 + $0x5] ss:$0 sm:$0xff]  ;;  %v9504_v13 = vld [vmem:[%s12017_s1 + $0x6] ss:$0 sm:$0xff] }
 0x2c7   : > { %v2341_v4 = vadd.f32 %v2309_v47, %v2240_v57  ;;  %v2441_v26 = vadd.f32 %v2409_v20, %v2340_v45  ;;  %7586 = vpow2.f32 %v9311_v17  ;;  %v2509_v18 = vmul.f32 %v9468_v23, %v9376_v59  ;;  %v9489_v62 = vld [vmem:[#allocation2 + $0xe1] sm:$0xff] }
 0x2c8   : > { %12036 = vst [vmem:[#allocation19_spill] sm:$0xff] %v9462_v54  ;;  %7053 = vmatpush3.bf16.msra.mxu1 %v7309_v12  ;;  %v2510_v1 = vmul.f32 %v9468_v23, %v2172_v49  ;;  %v9474_v32 = vadd.f32 %v9062_v33, %v2844_v48  ;;  %7588 = vpow2.f32 %v6616_v58  ;;  %v6617_v15 = vmul.f32 -1.442695, %v9450_v63  ;;  %v9485_v49 = vld [vmem:[#allocation2 + $0xda] sm:$0xff]  ;;  %v12038_v56 = vld [vmem:[#allocation11_spill] sm:$0xff]  ;;  %v9521_v58 = vld [vmem:[#allocation2 + $0xf0] sm:$0xff] }
 0x2c9   : > { %7058 = vmatprep.subr.bf16.mxu1 %v11921_v7  ;;  %v2410_v17 = vmul.f32 %v9446_v19, %v9456_v34  ;;  %v2310_v21 = vmul.f32 %v9432_v3, %v9458_v11  ;;  %7590 = vpow2.f32 %v6589_v14  ;;  %v7577_v28 = vpop.eup %7576  ;;  %v9483_v59 = vmul.f32 %v7575_v8, %v9262_v41 }
 0x2ca   : > { %v3138_v52 = vadd.f32 %v3137_v10, %v3136_v6  ;;  %v2241_v27 = vadd.f32 %v2209_v37, %v2140_v38  ;;  %v2541_v33 = vadd.f32 %v2509_v18, %v2440_v29  ;;  %v3139_v61 = vsel %vm1920_vm8, %v9462_v54, 0.0  ;;  %v12039_v6 = vld [vmem:[#allocation12_spill] sm:$0xff]  ;;  %v9525_v38 = vld [vmem:[#allocation2 + $0xe2] sm:$0xff] }
 0x2cb   : > { %12037 = vst [vmem:[#allocation24_spill] sm:$0xff] %v9483_v59  ;;  %v2442_v0 = vadd.f32 %v2410_v17, %v2341_v4  ;;  %v2542_v5 = vadd.f32 %v2510_v1, %v2441_v26  ;;  %v9498_v41 = vadd.f32 %v9494_v30, %v12038_v56  ;;  %v6618_v46 = vmul.f32 -1.442695, %v9474_v32  ;;  %v9531_v18 = vld [vmem:[%s12017_s1 + $0x7] ss:$0 sm:$0xff] }
 0x2cc   : > { %v7579_v25 = vpop.eup %7578  ;;  %v2611_v50 = vmul.f32 %v9504_v13, %v9406_v53  ;;  %v2342_v39 = vadd.f32 %v2310_v21, %v2241_v27  ;;  %v9510_v45 = vadd.f32 %v9494_v30, %v12039_v6  ;;  %v9513_v12 = vmul.f32 %v7577_v28, %v9283_v35 }
 0x2cd   : > { %v7581_v47 = vpop.eup %7580  ;;  %7592 = vpow2.f32 %v6617_v15  ;;  %v2511_v31 = vmul.f32 %v9468_v23, %v9485_v49  ;;  %v2612_v37 = vmul.f32 %v9504_v13, %v9458_v11  ;;  %v3140_v57 = vadd.f32 %v3139_v61, %v3138_v52 }
 0x2ce   : > { %12040 = vst [vmem:[#allocation11_spill] sm:$0xff] %v9513_v12  ;;  %v3141_v48 = vsel %vm1920_vm8, %v9483_v59, 0.0  ;;  %v2643_v20 = vadd.f32 %v2611_v50, %v2541_v33  ;;  %v2411_v14 = vmul.f32 %v9446_v19, %v9489_v62  ;;  %v3008_v35 = vadd.f32 1.0, %v7579_v25  ;;  %v12041_v33 = vld [vmem:[#allocation13_spill] sm:$0xff] }
 0x2cf   : > { %v7583_v10 = vpop.eup %7582  ;;  %v2543_v29 = vadd.f32 %v2511_v31, %v2442_v0  ;;  %v2644_v8 = vadd.f32 %v2612_v37, %v2542_v5  ;;  %v6587_v4 = vmul.f32 -1.442695, %v9498_v41  ;;  %7594 = vpow2.f32 %v6618_v46  ;;  %v9544_v5 = vld [vmem:[#allocation2 + $0xf1] sm:$0xff] }
 0x2d0   : > { %v7585_v26 = vpop.eup %7584  ;;  %v2712_v1 = vmul.f32 %v9531_v18, %v9456_v34  ;;  %v2443_v15 = vadd.f32 %v2411_v14, %v2342_v39  ;;  %v1813_v17 = vadd.f32 1.0, %v7581_v47  ;;  %v2613_v28 = vmul.f32 %v9504_v13, %v9521_v58  ;;  %v9548_v39 = vld [vmem:[#allocation2 + $0xf8] sm:$0xff]  ;;  %v9553_v14 = vld [vmem:[%s12017_s1 + $0x8] ss:$0 sm:$0xff] }
 0x2d1   : > { %v7587_v21 = vpop.eup %7586  ;;  %v2713_v52 = vmul.f32 %v9531_v18, %v9489_v62  ;;  %v6590_v27 = vmul.f32 -1.442695, %v9510_v45  ;;  %v9542_v61 = vadd.f32 %v9494_v30, %v12041_v33  ;;  %v2512_v25 = vmul.f32 %v9468_v23, %v9525_v38 }
 0x2d2   : > { %v7589_v0 = vpop.eup %7588  ;;  %v2744_v56 = vadd.f32 %v2712_v1, %v2643_v20  ;;  %7596 = vrcp.f32 %v1813_v17  ;;  %v1811_v46 = vadd.f32 1.0, %v7583_v10  ;;  %v2645_v6 = vadd.f32 %v2613_v28, %v2543_v29  ;;  %v9561_v29 = vld [vmem:[#allocation2 + $0xf2] sm:$0xff] }
 0x2d3   : > { %v7591_v50 = vpop.eup %7590  ;;  %7598 = vrcp.f32 %v3008_v35  ;;  %v2745_v47 = vadd.f32 %v2713_v52, %v2644_v8  ;;  %v1814_v31 = vadd.f32 1.0, %v7585_v26  ;;  %v2544_v37 = vadd.f32 %v2512_v25, %v2443_v15  ;;  %v9565_v52 = vld [vmem:[#allocation2 + $0xf9] sm:$0xff] }
 0x2d4   : > { %v2813_v20 = vmul.f32 %v9553_v14, %v9485_v49  ;;  %7600 = vrcp.f32 %v1811_v46  ;;  %v1812_v1 = vadd.f32 1.0, %v7587_v21  ;;  %v3009_v17 = vadd.f32 1.0, %v7589_v0  ;;  %v12042_v25 = vld [vmem:[#allocation14_spill] sm:$0xff] }
 0x2d5   : > { %v2714_v10 = vmul.f32 %v9531_v18, %v9544_v5  ;;  %v2814_v35 = vmul.f32 %v9553_v14, %v9525_v38  ;;  %7602 = vrcp.f32 %v1814_v31  ;;  %v2614_v8 = vmul.f32 %v9504_v13, %v9548_v39 }
 0x2d6   : > { %v2845_v26 = vadd.f32 %v2813_v20, %v2744_v56  ;;  %7604 = vrcp.f32 %v1812_v1  ;;  %v1817_v15 = vadd.f32 1.0, %v7591_v50  ;;  %v6588_v0 = vmul.f32 -1.442695, %v9542_v61 }
 0x2d7   : > { %v7593_v28 = vpop.eup %7592  ;;  %v2746_v21 = vadd.f32 %v2714_v10, %v2645_v6  ;;  %v2846_v33 = vadd.f32 %v2814_v35, %v2745_v47  ;;  %v9570_v46 = vadd.f32 %v9494_v30, %v12042_v25  ;;  %v2008_v31 = vmul.f32 %v9412_v43, %v9406_v53  ;;  %v9585_v53 = vld [vmem:[%s12023_s5] ss:$0 sm:$0xff]  ;;  %s6416_s5 = sshll.u32 %s8404_s6, 4  ;;  %s11835_s5 = int_to_ptr.vmem [resolvable:$true] %s6416_s5 }
 0x2d8   : > { %v2109_v7 = vmul.f32 %v9419_v51, %v9456_v34  ;;  %v2646_v56 = vadd.f32 %v2614_v8, %v2544_v37  ;;  %7606 = vrcp.f32 %v1817_v15  ;;  %v3142_v50 = vadd.f32 %v3141_v48, %v3140_v57  ;;  %v9590_v57 = vld [vmem:[#allocation2 + $0xfa] sm:$0xff] }
 0x2d9   : > { %v3143_v20 = vsel %vm1920_vm8, %v9513_v12, 0.0  ;;  %v2815_v6 = vmul.f32 %v9553_v14, %v9561_v29  ;;  %7608 = vpow2.f32 %v6587_v4  ;;  %v7595_v47 = vpop.eup %7594  ;;  %v3010_v1 = vadd.f32 1.0, %v7593_v28 }
 0x2da   : > { %7610 = vrcp.f32 %v3009_v17  ;;  %v2715_v10 = vmul.f32 %v9531_v18, %v9565_v52  ;;  %v9588_v34 = vadd.f32 %v9585_v53, %v2845_v26  ;;  %v9593_v37 = vadd.f32 %v9585_v53, %v2846_v33 }
 0x2db   : > { %v2847_v48 = vadd.f32 %v2815_v6, %v2746_v21  ;;  %7612 = vpow2.f32 %v6590_v27  ;;  %v6593_v4 = vmul.f32 -1.442695, %v9570_v46  ;;  %v2141_v35 = vadd.f32 %v2109_v7, %v2008_v31 }
 0x2dc   : > { %v7597_v17 = vpop.eup %7596  ;;  %v2210_v8 = vmul.f32 %v9399_v55, %v9485_v49  ;;  %v2747_v15 = vadd.f32 %v2715_v10, %v2646_v56  ;;  %7614 = vpow2.f32 %v6588_v0  ;;  %v3011_v25 = vadd.f32 1.0, %v7595_v47  ;;  %v12043_v49 = vld [vmem:[#allocation15_spill] sm:$0xff] }
 0x2dd   : > { %v7599_v28 = vpop.eup %7598  ;;  %v2009_v26 = vmul.f32 %v9412_v43, %v9458_v11  ;;  %v2110_v21 = vmul.f32 %v9419_v51, %v9489_v62  ;;  %v1909_v33 = vmul.f32 %v7597_v17, %v9180_v22  ;;  %7616 = vrcp.f32 %v3010_v1  ;;  %v12044_v17 = vld [vmem:[#allocation17_spill] sm:$0xff] }
 0x2de   : > { %v7601_v27 = vpop.eup %7600  ;;  %v2816_v7 = vmul.f32 %v9553_v14, %v9590_v57  ;;  %v6619_v31 = vmul.f32 -1.442695, %v9588_v34  ;;  %v9608_v0 = vadd.f32 %v9494_v30, %v12043_v49  ;;  %v9611_v6 = vadd.f32 %v9585_v53, %v2847_v48 }
 0x2df   : > { %v7603_v56 = vpop.eup %7602  ;;  %v6620_v11 = vmul.f32 -1.442695, %v9593_v37  ;;  %1943 = vst.msk [vmem:[#allocation2 + $0x121] sm:$0xff] %vm1920_vm8, %v1909_v33  ;;  %v1907_v22 = vmul.f32 %v7601_v27, %v9184_v36  ;;  %7618 = vpow2.f32 %v6593_v4  ;;  %v2242_v47 = vadd.f32 %v2210_v8, %v2141_v35 }
 0x2e0   : > { %v7605_v62 = vpop.eup %7604  ;;  %v2848_v1 = vadd.f32 %v2816_v7, %v2747_v15  ;;  %v1910_v10 = vmul.f32 %v7603_v56, %v9206_v2  ;;  %v9619_v49 = vadd.f32 %v9494_v30, %v12044_v17  ;;  %7620 = vrcp.f32 %v3011_v25 }
 0x2e1   : > { %v2010_v48 = vmul.f32 %v9412_v43, %v9521_v58  ;;  %v2142_v12 = vadd.f32 %v2110_v21, %v2009_v26  ;;  %1941 = vst.msk [vmem:[#allocation2 + $0x109] sm:$0xff] %vm1920_vm8, %v1907_v22  ;;  %v1908_v33 = vmul.f32 %v7605_v62, %v9210_v44  ;;  %v9626_v4 = vmul.f32 %v7599_v28, %v9360_v40 }
 0x2e2   : > { %v7607_v36 = vpop.eup %7606  ;;  %v2111_v2 = vmul.f32 %v9419_v51, %v9544_v5  ;;  %v2311_v35 = vmul.f32 %v9432_v3, %v9521_v58  ;;  %7622 = vpow2.f32 %v6619_v31  ;;  %1944 = vst.msk [vmem:[#allocation2 + $0x129] sm:$0xff] %vm1920_vm8, %v1910_v10  ;;  %v2211_v15 = vmul.f32 %v9399_v55, %v9525_v38  ;;  %v12046_v58 = vld [vmem:[#allocation18_spill] sm:$0xff] }
 0x2e3   : > { %12045 = vst [vmem:[#allocation12_spill] sm:$0xff] %v9626_v4  ;;  %v7609_v8 = vpop.eup %7608  ;;  %7624 = vpow2.f32 %v6620_v11  ;;  %v6621_v44 = vmul.f32 -1.442695, %v9611_v6  ;;  %1942 = vst.msk [vmem:[#allocation2 + $0x111] sm:$0xff] %vm1920_vm8, %v1908_v33  ;;  %v1913_v40 = vmul.f32 %v7607_v36, %v9271_v16  ;;  %v3144_v25 = vadd.f32 %v3143_v20, %v3142_v50 }
 0x2e4   : > { %v7611_v28 = vpop.eup %7610  ;;  %v2343_v26 = vadd.f32 %v2311_v35, %v2242_v47  ;;  %v9639_v21 = vadd.f32 %v9585_v53, %v2848_v1  ;;  %v9643_v27 = vadd.f32 %v9494_v30, %v12046_v58  ;;  %v2011_v38 = vmul.f32 %v9412_v43, %v9548_v39 }
 0x2e5   : > { %v7613_v7 = vpop.eup %7612  ;;  %v2112_v31 = vmul.f32 %v9419_v51, %v9565_v52  ;;  %v2243_v56 = vadd.f32 %v2211_v15, %v2142_v12  ;;  %1947 = vst.msk [vmem:[#allocation2 + $0x151] sm:$0xff] %vm1920_vm8, %v1913_v40  ;;  %v6591_v16 = vmul.f32 -1.442695, %v9608_v0  ;;  %v2143_v20 = vadd.f32 %v2111_v2, %v2010_v48 }
 0x2e6   : > { %v7615_v50 = vpop.eup %7614  ;;  %v2412_v11 = vmul.f32 %v9446_v19, %v9544_v5  ;;  %v2212_v30 = vmul.f32 %v9399_v55, %v9561_v29  ;;  %v6594_v22 = vmul.f32 -1.442695, %v9619_v49  ;;  %v9657_v62 = vmul.f32 %v7611_v28, %v9404_v42 }
 0x2e7   : > { %v3145_v12 = vsel %vm1920_vm8, %v9626_v4, 0.0  ;;  %v2312_v47 = vmul.f32 %v9432_v3, %v9548_v39  ;;  %7626 = vpow2.f32 %v6621_v44  ;;  %v7617_v1 = vpop.eup %7616  ;;  %v6622_v10 = vmul.f32 -1.442695, %v9639_v21 }
 0x2e8   : > { %12047 = vst [vmem:[#allocation13_spill] sm:$0xff] %v9657_v62  ;;  %v1975_v17 = vld [vmem:[#allocation2 + $0x108] sm:$0xff]  ;;  %v2444_v5 = vadd.f32 %v2412_v11, %v2343_v26  ;;  %v9665_v48 = vmul.f32 -1.442695, %v9643_v27  ;;  %v2144_v36 = vadd.f32 %v2112_v31, %v2011_v38  ;;  %v1815_v35 = vadd.f32 1.0, %v7609_v8 }
 0x2e9   : > { %v7619_v33 = vpop.eup %7618  ;;  %v2344_v2 = vadd.f32 %v2312_v47, %v2243_v56  ;;  %v2313_v42 = vmul.f32 %v9432_v3, %v1975_v17  ;;  %v3146_v15 = vadd.f32 %v3145_v12, %v3144_v25  ;;  %v2413_v40 = vmul.f32 %v9446_v19, %v9565_v52  ;;  %v2076_v25 = vld [vmem:[#allocation2 + $0x109] sm:$0xff] }
 0x2ea   : > { %v2513_v39 = vmul.f32 %v9468_v23, %v9561_v29  ;;  %v1818_v44 = vadd.f32 1.0, %v7613_v7  ;;  %v7621_v28 = vpop.eup %7620  ;;  %v9673_v26 = vmul.f32 %v7617_v1, %v9450_v63  ;;  %v3147_v58 = vsel %vm1920_vm8, %v9657_v62, 0.0  ;;  %v9723_v62 = vld [vmem:[#allocation2 + $0x129] sm:$0xff] }
 0x2eb   : > { %v2244_v38 = vadd.f32 %v2212_v30, %v2143_v20  ;;  %v1816_v31 = vadd.f32 1.0, %v7615_v50  ;;  %v2213_v8 = vmul.f32 %v9399_v55, %v9590_v57  ;;  %7628 = vpow2.f32 %v6622_v10  ;;  %v1976_v20 = vld [vmem:[#allocation2 + $0x110] sm:$0xff] }
 0x2ec   : > { %12048 = vst [vmem:[#allocation14_spill] sm:$0xff] %v9673_v26  ;;  %v7623_v56 = vpop.eup %7622  ;;  %v2545_v52 = vadd.f32 %v2513_v39, %v2444_v5  ;;  %v1821_v11 = vadd.f32 1.0, %v7619_v33  ;;  %v2514_v29 = vmul.f32 %v9468_v23, %v9590_v57  ;;  %v2445_v63 = vadd.f32 %v2413_v40, %v2344_v2 }
 0x2ed   : > { %v7625_v12 = vpop.eup %7624  ;;  %v2345_v7 = vadd.f32 %v2313_v42, %v2244_v38  ;;  %7630 = vrcp.f32 %v1815_v35  ;;  %v9681_v47 = vadd.f32 %v3147_v58, %v3146_v15  ;;  %v2245_v1 = vadd.f32 %v2213_v8, %v2144_v36  ;;  %v2077_v42 = vld [vmem:[#allocation2 + $0x111] sm:$0xff]  ;;  %v9692_v15 = vld [vmem:[#allocation2 + $0x120] sm:$0xff] }
 0x2ee   : > { %v2615_v50 = vmul.f32 %v9504_v13, %v1975_v17  ;;  %7632 = vrcp.f32 %v1818_v44  ;;  %v9686_v30 = vsel %vm1920_vm8, %v9673_v26, 0.0  ;;  %v3012_v10 = vadd.f32 1.0, %v7623_v56  ;;  %v2177_v35 = vld [vmem:[#allocation2 + $0x10a] sm:$0xff] }
 0x2ef   : > { %v2414_v5 = vmul.f32 %v9446_v19, %v2076_v25  ;;  %7634 = vrcp.f32 %v1816_v31  ;;  %v9690_v57 = vmul.f32 %v7621_v28, %v9474_v32  ;;  %v3013_v33 = vadd.f32 1.0, %v7625_v12  ;;  %v9698_v28 = vld [vmem:[#allocation2 + $0x112] sm:$0xff]  ;;  %v9700_v31 = vld [vmem:[#allocation2 + $0x121] sm:$0xff] }
 0x2f0   : > { %v2647_v2 = vadd.f32 %v2615_v50, %v2545_v52  ;;  %7636 = vrcp.f32 %v1821_v11  ;;  %v2314_v39 = vmul.f32 %v9432_v3, %v1976_v20  ;;  %v2546_v44 = vadd.f32 %v2514_v29, %v2445_v63  ;;  %v9702_v56 = vld [vmem:[#allocation2 + $0x128] sm:$0xff] }
 0x2f1   : > { %12049 = vst [vmem:[#allocation15_spill] sm:$0xff] %v9690_v57  ;;  %v7627_v36 = vpop.eup %7626  ;;  %v2446_v40 = vadd.f32 %v2414_v5, %v2345_v7  ;;  %7638 = vpow2.f32 %v6591_v16  ;;  %v2012_v58 = vmul.f32 %v9412_v43, %v1975_v17  ;;  %v2113_v38 = vmul.f32 %v9419_v51, %v2076_v25 }
 0x2f2   : > { %v2716_v32 = vmul.f32 %v9531_v18, %v2076_v25  ;;  %7640 = vpow2.f32 %v6594_v22  ;;  %v2346_v8 = vadd.f32 %v2314_v39, %v2245_v1  ;;  %v2415_v52 = vmul.f32 %v9446_v19, %v2077_v42  ;;  %v9708_v25 = vld [vmem:[#allocation2 + $0x122] sm:$0xff] }
 0x2f3   : > { %7642 = vrcp.f32 %v3012_v10  ;;  %v2515_v11 = vmul.f32 %v9468_v23, %v2177_v35  ;;  %v3014_v16 = vadd.f32 1.0, %v7627_v36  ;;  %v2617_v17 = vmul.f32 %v9504_v13, %v9692_v15 }
 0x2f4   : > { %7644 = vrcp.f32 %v3013_v33  ;;  %v2748_v12 = vadd.f32 %v2716_v32, %v2647_v2  ;;  %v2447_v29 = vadd.f32 %v2415_v52, %v2346_v8  ;;  %v2516_v22 = vmul.f32 %v9468_v23, %v9698_v28 }
 0x2f5   : > { %v2547_v7 = vadd.f32 %v2515_v11, %v2446_v40  ;;  %v2616_v63 = vmul.f32 %v9504_v13, %v1976_v20  ;;  %v7629_v1 = vpop.eup %7628  ;;  %v2718_v50 = vmul.f32 %v9531_v18, %v9700_v31  ;;  %v2145_v10 = vadd.f32 %v2113_v38, %v2012_v58 }
 0x2f6   : > { %v2618_v5 = vmul.f32 %v9504_v13, %v9702_v56  ;;  %v2817_v33 = vmul.f32 %v9553_v14, %v2177_v35  ;;  %v2548_v36 = vadd.f32 %v2516_v22, %v2447_v29  ;;  %v2717_v8 = vmul.f32 %v9531_v18, %v2077_v42 }
 0x2f7   : > { %v7631_v2 = vpop.eup %7630  ;;  %v2648_v39 = vadd.f32 %v2616_v63, %v2546_v44  ;;  %v2649_v32 = vadd.f32 %v2617_v17, %v2547_v7  ;;  %v2819_v40 = vmul.f32 %v9553_v14, %v9708_v25  ;;  %v2013_v11 = vmul.f32 %v9412_v43, %v1976_v20 }
 0x2f8   : > { %v7633_v52 = vpop.eup %7632  ;;  %v2214_v26 = vmul.f32 %v9399_v55, %v2177_v35  ;;  %v2849_v58 = vadd.f32 %v2817_v33, %v2748_v12  ;;  %v2114_v4 = vmul.f32 %v9419_v51, %v2077_v42  ;;  %v2818_v44 = vmul.f32 %v9553_v14, %v9698_v28 }
 0x2f9   : > { %v7635_v38 = vpop.eup %7634  ;;  %v2749_v59 = vadd.f32 %v2717_v8, %v2648_v39  ;;  %v2750_v29 = vadd.f32 %v2718_v50, %v2649_v32  ;;  %v3015_v22 = vadd.f32 1.0, %v7629_v1  ;;  %7646 = vrcp.f32 %v3014_v16 }
 0x2fa   : > { %v7637_v17 = vpop.eup %7636  ;;  %v2650_v7 = vadd.f32 %v2618_v5, %v2548_v36  ;;  %v9729_v63 = vadd.f32 %v9585_v53, %v2849_v58  ;;  %v2014_v35 = vmul.f32 %v9412_v43, %v9692_v15  ;;  %v2115_v12 = vmul.f32 %v9419_v51, %v9700_v31  ;;  %v9739_v36 = vld [vmem:[#allocation2 + $0x12a] sm:$0xff] }
 0x2fb   : > { %v7639_v20 = vpop.eup %7638  ;;  %v2850_v42 = vadd.f32 %v2818_v44, %v2749_v59  ;;  %v2851_v33 = vadd.f32 %v2819_v40, %v2750_v29  ;;  %v2719_v39 = vmul.f32 %v9531_v18, %v9723_v62  ;;  %v2246_v32 = vadd.f32 %v2214_v26, %v2145_v10 }
 0x2fc   : > { %v7641_v50 = vpop.eup %7640  ;;  %v6623_v16 = vmul.f32 -1.442695, %v9729_v63  ;;  %v1911_v1 = vmul.f32 %v7631_v2, %v9498_v41  ;;  %v2146_v8 = vadd.f32 %v2114_v4, %v2013_v11  ;;  %v1914_v59 = vmul.f32 %v7633_v52, %v9510_v45 }
 0x2fd   : > { %v7643_v5 = vpop.eup %7642  ;;  %v9742_v58 = vadd.f32 %v9585_v53, %v2850_v42  ;;  %v9745_v54 = vadd.f32 %v9585_v53, %v2851_v33  ;;  %v2315_v26 = vmul.f32 %v9432_v3, %v9692_v15  ;;  %v2751_v10 = vadd.f32 %v2719_v39, %v2650_v7 }
 0x2fe   : > { %v7645_v40 = vpop.eup %7644  ;;  %7648 = vpow2.f32 %v6623_v16  ;;  %1945 = vst.msk [vmem:[#allocation2 + $0x139] sm:$0xff] %vm1920_vm8, %v1911_v1  ;;  %v1912_v41 = vmul.f32 %v7635_v38, %v9542_v61  ;;  %v2215_v4 = vmul.f32 %v9399_v55, %v9698_v28  ;;  %1948 = vst.msk [vmem:[#allocation2 + $0x159] sm:$0xff] %vm1920_vm8, %v1914_v59  ;;  %v1917_v45 = vmul.f32 %v7637_v17, %v9570_v46 }
 0x2ff   : > { %7650 = vrcp.f32 %v3015_v22  ;;  %v6624_v2 = vmul.f32 -1.442695, %v9742_v58  ;;  %v2820_v52 = vmul.f32 %v9553_v14, %v9739_v36  ;;  %v2347_v15 = vadd.f32 %v2315_v26, %v2246_v32 }
 0x300   : > { %v6625_v11 = vmul.f32 -1.442695, %v9745_v54  ;;  %1946 = vst.msk [vmem:[#allocation2 + $0x141] sm:$0xff] %vm1920_vm8, %v1912_v41  ;;  %v3150_v61 = vadd.f32 %v9686_v30, %v9681_v47  ;;  %v3151_v28 = vsel %vm1920_vm8, %v9690_v57, 0.0  ;;  %v2247_v38 = vadd.f32 %v2215_v4, %v2146_v8  ;;  %1951 = vst.msk [vmem:[#allocation2 + $0x181] sm:$0xff] %vm1920_vm8, %v1917_v45 }
 0x301   : > { %7652 = vpow2.f32 %v9665_v48  ;;  %v9768_v46 = vmul.f32 %v7643_v5, %v9588_v34  ;;  %v2147_v29 = vadd.f32 %v2115_v12, %v2014_v35  ;;  %v2416_v44 = vmul.f32 %v9446_v19, %v9700_v31  ;;  %v2590_v12 = vld [vmem:[#allocation2 + $0x198] sm:$0xff] }
 0x302   : > { %v2852_v17 = vadd.f32 %v2820_v52, %v2751_v10  ;;  %v2015_v22 = vmul.f32 %v9412_v43, %v9702_v56  ;;  %v2116_v47 = vmul.f32 %v9419_v51, %v9723_v62  ;;  %v2316_v30 = vmul.f32 %v9432_v3, %v9702_v56  ;;  %v9804_v52 = vld [vmem:[#allocation2 + $0x150] sm:$0xff] }
 0x303   : > { %12050 = vst [vmem:[#allocation17_spill] sm:$0xff] %v9768_v46  ;;  %7654 = vpow2.f32 %v6624_v2  ;;  %v7647_v7 = vpop.eup %7646  ;;  %v2216_v34 = vmul.f32 %v9399_v55, %v9708_v25  ;;  %v2448_v48 = vadd.f32 %v2416_v44, %v2347_v15  ;;  %v1819_v35 = vadd.f32 1.0, %v7639_v20  ;;  %v9806_v15 = vld [vmem:[#allocation2 + $0x151] sm:$0xff] }
 0x304   : > { %7656 = vpow2.f32 %v6625_v11  ;;  %v9781_v31 = vmul.f32 %v7645_v40, %v9593_v37  ;;  %v3152_v42 = vadd.f32 %v3151_v28, %v3150_v61  ;;  %v2517_v33 = vmul.f32 %v9468_v23, %v9708_v25 }
 0x305   : > { %v2348_v39 = vadd.f32 %v2316_v30, %v2247_v38  ;;  %v1979_v32 = vld [vmem:[#allocation2 + $0x138] sm:$0xff]  ;;  %v3153_v56 = vsel %vm1920_vm8, %v9768_v46, 0.0  ;;  %v9788_v16 = vadd.f32 %v9585_v53, %v2852_v17  ;;  %v1822_v5 = vadd.f32 1.0, %v7641_v50 }
 0x306   : > { %12051 = vst [vmem:[#allocation18_spill] sm:$0xff] %v9781_v31  ;;  %v2317_v1 = vmul.f32 %v9432_v3, %v1979_v32  ;;  %v2217_v20 = vmul.f32 %v9399_v55, %v9739_v36  ;;  %v2417_v37 = vmul.f32 %v9446_v19, %v9723_v62  ;;  %v9796_v8 = vmul.f32 %v9504_v13, %v2590_v12  ;;  %v2080_v26 = vld [vmem:[#allocation2 + $0x139] sm:$0xff] }
 0x307   : > { %v2148_v59 = vadd.f32 %v2116_v47, %v2015_v22  ;;  %v2248_v40 = vadd.f32 %v2216_v34, %v2147_v29  ;;  %v2549_v10 = vadd.f32 %v2517_v33, %v2448_v48  ;;  %7658 = vrcp.f32 %v1819_v35 }
 0x308   : > { %v7649_v25 = vpop.eup %7648  ;;  %v9799_v4 = vmul.f32 %v7647_v7, %v9611_v6  ;;  %v3154_v50 = vadd.f32 %v3153_v56, %v3152_v42  ;;  %v3155_v2 = vsel %vm1920_vm8, %v9781_v31, 0.0  ;;  %v2449_v45 = vadd.f32 %v2417_v37, %v2348_v39  ;;  %v1980_v7 = vld [vmem:[#allocation2 + $0x140] sm:$0xff] }
 0x309   : > { %v7651_v41 = vpop.eup %7650  ;;  %v6626_v62 = vmul.f32 -1.442695, %v9788_v16  ;;  %v2349_v11 = vadd.f32 %v2317_v1, %v2248_v40  ;;  %v2619_v61 = vmul.f32 %v9504_v13, %v1979_v32  ;;  %7660 = vrcp.f32 %v1822_v5  ;;  %v2181_v42 = vld [vmem:[#allocation2 + $0x13a] sm:$0xff] }
 0x30a   : > { %12052 = vst [vmem:[#allocation25_spill] sm:$0xff] %v9799_v4  ;;  %v2518_v6 = vmul.f32 %v9468_v23, %v9739_v36  ;;  %v3016_v38 = vadd.f32 1.0, %v7649_v25  ;;  %v2016_v29 = vmul.f32 %v9412_v43, %v1979_v32  ;;  %v2117_v44 = vmul.f32 %v9419_v51, %v2080_v26  ;;  %v2081_v56 = vld [vmem:[#allocation2 + $0x141] sm:$0xff] }
 0x30b   : > { %v7653_v28 = vpop.eup %7652  ;;  %v9814_v17 = vmul.f32 %v7651_v41, %v9639_v21  ;;  %v2249_v22 = vadd.f32 %v2217_v20, %v2148_v59  ;;  %v2418_v47 = vmul.f32 %v9446_v19, %v2080_v26  ;;  %v2651_v30 = vadd.f32 %v2619_v61, %v2549_v10  ;;  %v9827_v21 = vld [vmem:[#allocation2 + $0x158] sm:$0xff]  ;;  %v2182_v10 = vld [vmem:[#allocation2 + $0x142] sm:$0xff] }
 0x30c   : > { %v9817_v48 = vadd.f32 %v3155_v2, %v3154_v50  ;;  %v9821_v35 = vsel %vm1920_vm8, %v9799_v4, 0.0  ;;  %v2621_v36 = vmul.f32 %v9504_v13, %v9804_v52  ;;  %v2722_v12 = vmul.f32 %v9531_v18, %v9806_v15 }
 0x30d   : > { %12053 = vst [vmem:[#allocation26_spill] sm:$0xff] %v9814_v17  ;;  %v7655_v34 = vpop.eup %7654  ;;  %7662 = vpow2.f32 %v6626_v62  ;;  %v2450_v39 = vadd.f32 %v2418_v47, %v2349_v11  ;;  %v2720_v32 = vmul.f32 %v9531_v18, %v2080_v26  ;;  %v2550_v1 = vadd.f32 %v2518_v6, %v2449_v45 }
 0x30e   : > { %v7657_v33 = vpop.eup %7656  ;;  %7664 = vrcp.f32 %v3016_v38  ;;  %v2149_v5 = vadd.f32 %v2117_v44, %v2016_v29  ;;  %v2318_v20 = vmul.f32 %v9432_v3, %v1980_v7  ;;  %v1820_v37 = vadd.f32 1.0, %v7653_v28  ;;  %v9839_v38 = vld [vmem:[#allocation2 + $0x159] sm:$0xff] }
 0x30f   : > { %v3017_v25 = vadd.f32 1.0, %v7655_v34  ;;  %v2752_v59 = vadd.f32 %v2720_v32, %v2651_v30  ;;  %v2622_v40 = vmul.f32 %v9504_v13, %v9827_v21  ;;  %v2519_v41 = vmul.f32 %v9468_v23, %v2181_v42  ;;  %v9841_v29 = vld [vmem:[#allocation2 + $0x152] sm:$0xff] }
 0x310   : > { %v3018_v50 = vadd.f32 1.0, %v7657_v33  ;;  %v2350_v2 = vadd.f32 %v2318_v20, %v2249_v22  ;;  %v2419_v62 = vmul.f32 %v9446_v19, %v2081_v56  ;;  %v2620_v26 = vmul.f32 %v9504_v13, %v1980_v7 }
 0x311   : > { %v7659_v45 = vpop.eup %7658  ;;  %v2017_v11 = vmul.f32 %v9412_v43, %v1980_v7  ;;  %v2118_v61 = vmul.f32 %v9419_v51, %v2081_v56  ;;  %v2551_v28 = vadd.f32 %v2519_v41, %v2450_v39  ;;  %v2821_v6 = vmul.f32 %v9553_v14, %v2181_v42 }
 0x312   : > { %v2451_v44 = vadd.f32 %v2419_v62, %v2350_v2  ;;  %v2520_v47 = vmul.f32 %v9468_v23, %v2182_v10  ;;  %v2652_v22 = vadd.f32 %v2620_v26, %v2550_v1  ;;  %v2721_v30 = vmul.f32 %v9531_v18, %v2081_v56 }
 0x313   : > { %v7661_v34 = vpop.eup %7660  ;;  %7666 = vrcp.f32 %v3017_v25  ;;  %v2218_v33 = vmul.f32 %v9399_v55, %v2181_v42  ;;  %v2653_v7 = vadd.f32 %v2621_v36, %v2551_v28  ;;  %v2853_v32 = vadd.f32 %v2821_v6, %v2752_v59 }
 0x314   : > { %v2552_v20 = vadd.f32 %v2520_v47, %v2451_v44  ;;  %v2753_v39 = vadd.f32 %v2721_v30, %v2652_v22  ;;  %v2822_v41 = vmul.f32 %v9553_v14, %v2182_v10  ;;  %v1915_v4 = vmul.f32 %v7659_v45, %v9608_v0  ;;  %v2184_v0 = vld [vmem:[#allocation2 + $0x15a] sm:$0xff] }
 0x315   : > { %v2723_v2 = vmul.f32 %v9531_v18, %v9839_v38  ;;  %v2823_v1 = vmul.f32 %v9553_v14, %v9841_v29  ;;  %v2754_v62 = vadd.f32 %v2722_v12, %v2653_v7  ;;  %v9853_v56 = vadd.f32 %v9585_v53, %v2853_v32 }
 0x316   : > { %v2654_v25 = vadd.f32 %v2622_v40, %v2552_v20  ;;  %v2854_v42 = vadd.f32 %v2822_v41, %v2753_v39  ;;  %1949 = vst.msk [vmem:[#allocation2 + $0x169] sm:$0xff] %vm1920_vm8, %v1915_v4  ;;  %v1918_v36 = vmul.f32 %v7661_v34, %v9619_v49  ;;  %7668 = vrcp.f32 %v1820_v37  ;;  %v2591_v49 = vld [vmem:[#allocation2 + $0x1a0] sm:$0xff] }
 0x317   : > { %v7663_v59 = vpop.eup %7662  ;;  %7670 = vrcp.f32 %v3018_v50  ;;  %v2150_v26 = vadd.f32 %v2118_v61, %v2017_v11  ;;  %v2250_v45 = vadd.f32 %v2218_v33, %v2149_v5  ;;  %v6627_v28 = vmul.f32 -1.442695, %v9853_v56  ;;  %v2691_v37 = vld [vmem:[#allocation2 + $0x199] sm:$0xff] }
 0x318   : > { %v7665_v6 = vpop.eup %7664  ;;  %v2018_v12 = vmul.f32 %v9412_v43, %v9804_v52  ;;  %v2119_v40 = vmul.f32 %v9419_v51, %v9806_v15  ;;  %v2755_v44 = vadd.f32 %v2723_v2, %v2654_v25  ;;  %v9863_v4 = vadd.f32 %v9585_v53, %v2854_v42  ;;  %1952 = vst.msk [vmem:[#allocation2 + $0x189] sm:$0xff] %vm1920_vm8, %v1918_v36 }
 0x319   : > { %v2319_v5 = vmul.f32 %v9432_v3, %v9804_v52  ;;  %v2019_v50 = vmul.f32 %v9412_v43, %v9827_v21  ;;  %v2219_v11 = vmul.f32 %v9399_v55, %v2182_v10  ;;  %v2855_v61 = vadd.f32 %v2823_v1, %v2754_v62  ;;  %v2692_v52 = vld [vmem:[#allocation2 + $0x1a1] sm:$0xff] }
 0x31a   : > { %v2120_v47 = vmul.f32 %v9419_v51, %v9839_v38  ;;  %v2824_v22 = vmul.f32 %v9553_v14, %v2184_v0  ;;  %7672 = vpow2.f32 %v6627_v28  ;;  %v6628_v30 = vmul.f32 -1.442695, %v9863_v4  ;;  %v2792_v10 = vld [vmem:[#allocation2 + $0x19a] sm:$0xff] }
 0x31b   : > { %v2251_v34 = vadd.f32 %v2219_v11, %v2150_v26  ;;  %v2351_v33 = vadd.f32 %v2319_v5, %v2250_v45  ;;  %v9876_v7 = vmul.f32 %v9504_v13, %v2591_v49  ;;  %v9879_v32 = vmul.f32 %v9531_v18, %v2691_v37 }
 0x31c   : > { %v3158_v43 = vadd.f32 %v9821_v35, %v9817_v48  ;;  %7674 = vpow2.f32 %v6628_v30  ;;  %v2856_v51 = vadd.f32 %v2824_v22, %v2755_v44  ;;  %v9884_v20 = vadd.f32 %v9585_v53, %v2855_v61  ;;  %v2387_v22 = vld [vmem:[#allocation2 + $0x181] sm:$0xff] }
 0x31d   : > { %v7667_v39 = vpop.eup %7666  ;;  %v9887_v41 = vmul.f32 %v7665_v6, %v9729_v63  ;;  %v3159_v2 = vsel %vm1920_vm8, %v9814_v17, 0.0  ;;  %v2420_v1 = vmul.f32 %v9446_v19, %v9806_v15  ;;  %v2320_v62 = vmul.f32 %v9432_v3, %v9827_v21  ;;  %v1983_v44 = vld [vmem:[#allocation2 + $0x168] sm:$0xff] }
 0x31e   : > { %v2151_v48 = vadd.f32 %v2119_v40, %v2018_v12  ;;  %v2152_v35 = vadd.f32 %v2120_v47, %v2019_v50  ;;  %v2220_v25 = vmul.f32 %v9399_v55, %v9841_v29  ;;  %v9898_v42 = vmul.f32 %v9531_v18, %v2692_v52  ;;  %v2084_v61 = vld [vmem:[#allocation2 + $0x169] sm:$0xff] }
 0x31f   : > { %12054 = vst [vmem:[#allocation27_spill] sm:$0xff] %v9887_v41  ;;  %v3019_v36 = vadd.f32 1.0, %v7663_v59  ;;  %v2352_v63 = vadd.f32 %v2320_v62, %v2251_v34  ;;  %v2452_v26 = vadd.f32 %v2420_v1, %v2351_v33  ;;  %v9901_v45 = vmul.f32 %v9553_v14, %v2792_v10 }
 0x320   : > { %v7669_v28 = vpop.eup %7668  ;;  %v3160_v6 = vadd.f32 %v3159_v2, %v3158_v43  ;;  %v2221_v15 = vmul.f32 %v9399_v55, %v2184_v0  ;;  %v9905_v21 = vadd.f32 %v9585_v53, %v2856_v51  ;;  %v6629_v12 = vmul.f32 -1.442695, %v9884_v20  ;;  %v8126_v51 = vld [vmem:[%s12017_s1 + $0x1] ss:$0 sm:$0xff] }
 0x321   : > { %v7671_v40 = vpop.eup %7670  ;;  %v9909_v49 = vmul.f32 %v7667_v39, %v9742_v58  ;;  %v3161_v59 = vsel %vm1920_vm8, %v9887_v41, 0.0  ;;  %v2421_v37 = vmul.f32 %v9446_v19, %v9839_v38  ;;  %v2521_v5 = vmul.f32 %v9468_v23, %v9841_v29  ;;  %v2286_v58 = vld [vmem:[#allocation2 + $0x180] sm:$0xff] }
 0x322   : > { %v2252_v55 = vadd.f32 %v2220_v25, %v2151_v48  ;;  %v9917_v50 = vadd.f32 %v2221_v15, %v2152_v35  ;;  %v2522_v11 = vmul.f32 %v9468_v23, %v2184_v0  ;;  %v1916_v47 = vmul.f32 %v7669_v28, %v9643_v27  ;;  %v8125_v0 = vld [vmem:[%s12017_s1] ss:$0 sm:$0xff]  ;;  %v2287_v25 = vld [vmem:[#allocation2 + $0x188] sm:$0xff] }
 0x323   : > { %12055 = vst [vmem:[#allocation28_spill] sm:$0xff] %v9909_v49  ;;  %7676 = vrcp.f32 %v3019_v36  ;;  %v2321_v30 = vmul.f32 %v9432_v3, %v1983_v44  ;;  %v2553_v34 = vadd.f32 %v2521_v5, %v2452_v26  ;;  %v2453_v33 = vadd.f32 %v2421_v37, %v2352_v63  ;;  %v2388_v28 = vld [vmem:[#allocation2 + $0x189] sm:$0xff] }
 0x324   : > { %v7673_v52 = vpop.eup %7672  ;;  %v3162_v38 = vadd.f32 %v3161_v59, %v3160_v6  ;;  %1950 = vst.msk [vmem:[#allocation2 + $0x171] sm:$0xff] %vm1920_vm8, %v1916_v47  ;;  %7678 = vpow2.f32 %v6629_v12  ;;  %v6630_v29 = vmul.f32 -1.442695, %v9905_v21  ;;  %v9925_v43 = vmul.f32 %v7671_v40, %v9745_v54  ;;  %v2488_v6 = vld [vmem:[#allocation2 + $0x182] sm:$0xff]  ;;  %v2489_v15 = vld [vmem:[#allocation2 + $0x18a] sm:$0xff] }
 0x325   : > { %v3163_v27 = vsel %vm1920_vm8, %v9909_v49, 0.0  ;;  %v2020_v10 = vmul.f32 %v8125_v0, %v1983_v44  ;;  %v2121_v39 = vmul.f32 %v8126_v51, %v2084_v61  ;;  %v2623_v2 = vmul.f32 %v9504_v13, %v1983_v44 }
 0x326   : > { %12056 = vst [vmem:[#allocation29_spill] sm:$0xff] %v9925_v43  ;;  %v7675_v1 = vpop.eup %7674  ;;  %v2323_v62 = vmul.f32 %v9432_v3, %v2286_v58  ;;  %v9938_v54 = vmul.f32 %v9446_v19, %v2387_v22  ;;  %v2625_v48 = vmul.f32 %v9504_v13, %v2286_v58  ;;  %v9942_v35 = vmul.f32 %v9531_v18, %v2387_v22 }
 0x327   : > { %v3020_v36 = vadd.f32 1.0, %v7673_v52  ;;  %v2353_v63 = vadd.f32 %v2321_v30, %v2252_v55  ;;  %v2655_v26 = vadd.f32 %v2623_v2, %v2553_v34  ;;  %v2554_v12 = vadd.f32 %v2522_v11, %v2453_v33  ;;  %v8127_v55 = vld [vmem:[%s12017_s1 + $0x3] ss:$0 sm:$0xff]  ;;  %v8128_v11 = vld [vmem:[%s12017_s1 + $0x4] ss:$0 sm:$0xff] }
 0x328   : > { %v9944_v44 = vadd.f32 %v3163_v27, %v3162_v38  ;;  %v2422_v3 = vmul.f32 %v9446_v19, %v2084_v61  ;;  %7680 = vpow2.f32 %v6630_v29  ;;  %v9949_v40 = vsel %vm1920_vm8, %v9925_v43, 0.0  ;;  %v8129_v2 = vld [vmem:[%s12017_s1 + $0x2] ss:$0 sm:$0xff] }
 0x329   : > { %v3021_v59 = vadd.f32 1.0, %v7675_v1  ;;  %v2153_v37 = vadd.f32 %v2121_v39, %v2020_v10  ;;  %v2724_v5 = vmul.f32 %v9531_v18, %v2084_v61  ;;  %v2324_v47 = vmul.f32 %v8127_v55, %v2287_v25 }
 0x32a   : > { %v2425_v58 = vmul.f32 %v8128_v11, %v2388_v28  ;;  %v2525_v19 = vmul.f32 %v9468_v23, %v2488_v6  ;;  %v2526_v22 = vmul.f32 %v9468_v23, %v2489_v15  ;;  %v2626_v30 = vmul.f32 %v9504_v13, %v2287_v25 }
 0x32b   : > { %7682 = vrcp.f32 %v3020_v36  ;;  %v2454_v34 = vadd.f32 %v2422_v3, %v2353_v63  ;;  %v2756_v33 = vadd.f32 %v2724_v5, %v2655_v26  ;;  %v2727_v61 = vmul.f32 %v9531_v18, %v2388_v28  ;;  %v1984_v52 = vld [vmem:[#allocation2 + $0x170] sm:$0xff]  ;;  %v8130_v63 = vld [vmem:[%s12017_s1 + $0x5] ss:$0 sm:$0xff]  ;;  %s12059_s1 = sld [smem:[#allocation70_spill]] }
 0x32c   : > { %v2085_v38 = vld [vmem:[#allocation2 + $0x171] sm:$0xff]  ;;  %v2021_v27 = vmul.f32 %v8125_v0, %v1984_v52  ;;  %v2322_v43 = vmul.f32 %v8127_v55, %v1984_v52  ;;  %7684 = vrcp.f32 %v3021_v59  ;;  %v2624_v5 = vmul.f32 %v9504_v13, %v1984_v52 }
 0x32d   : > { %v2185_v29 = vld [vmem:[#allocation2 + $0x16a] sm:$0xff]  ;;  %v2122_v10 = vmul.f32 %v8126_v51, %v2085_v38  ;;  %v2186_v39 = vld [vmem:[#allocation2 + $0x172] sm:$0xff]  ;;  %v7677_v23 = vpop.eup %7676  ;;  %v2423_v36 = vmul.f32 %v8128_v11, %v2085_v38  ;;  %v2725_v55 = vmul.f32 %v9531_v18, %v2085_v38  ;;  %v2828_v52 = vmul.f32 %v9553_v14, %v2489_v15 }
 0x32e   : > { %v2222_v1 = vmul.f32 %v8129_v2, %v2185_v29  ;;  %v2223_v25 = vmul.f32 %v8129_v2, %v2186_v39  ;;  %v2523_v26 = vmul.f32 %v8130_v63, %v2185_v29  ;;  %v7679_v28 = vpop.eup %7678  ;;  %v2354_v51 = vadd.f32 %v2322_v43, %v9917_v50 }
 0x32f   : > { %v2154_v3 = vadd.f32 %v2122_v10, %v2021_v27  ;;  %v2524_v49 = vmul.f32 %v8130_v63, %v2186_v39  ;;  %v2825_v59 = vmul.f32 %v9553_v14, %v2185_v29  ;;  %v2656_v31 = vadd.f32 %v2624_v5, %v2554_v12 }
 0x330   : > { %v2254_v0 = vadd.f32 %v2222_v1, %v2153_v37  ;;  %v2555_v41 = vadd.f32 %v2523_v26, %v2454_v34  ;;  %v2455_v17 = vadd.f32 %v2423_v36, %v2354_v51  ;;  %v2826_v46 = vmul.f32 %v9553_v14, %v2186_v39 }
 0x331   : > { %v2255_v2 = vadd.f32 %v2223_v25, %v2154_v3  ;;  %v2857_v57 = vadd.f32 %v2825_v59, %v2756_v33  ;;  %v3022_v27 = vadd.f32 1.0, %v7679_v28  ;;  %v2757_v50 = vadd.f32 %v2725_v55, %v2656_v31 }
 0x332   : > { %v2355_v11 = vadd.f32 %v2323_v62, %v2254_v0  ;;  %v2657_v60 = vadd.f32 %v2625_v48, %v2555_v41  ;;  %v7681_v37 = vpop.eup %7680  ;;  %v2556_v10 = vadd.f32 %v2524_v49, %v2455_v17  ;;  %v2827_v34 = vmul.f32 %v9553_v14, %v2488_v6  ;;  %v2793_v41 = vld [vmem:[#allocation2 + $0x1a2] sm:$0xff] }
 0x333   : > { %v2356_v43 = vadd.f32 %v2324_v47, %v2255_v2  ;;  %v9978_v62 = vadd.f32 %v9585_v53, %v2857_v57  ;;  %v2858_v48 = vadd.f32 %v2826_v46, %v2757_v50  ;;  %v3023_v49 = vadd.f32 1.0, %v7681_v37 }
 0x334   : > { %v2456_v13 = vadd.f32 %v9938_v54, %v2355_v11  ;;  %v2758_v18 = vadd.f32 %v9942_v35, %v2657_v60  ;;  %v2658_v33 = vadd.f32 %v2626_v30, %v2556_v10  ;;  %7686 = vrcp.f32 %v3022_v27 }
 0x335   : > { %v2457_v12 = vadd.f32 %v2425_v58, %v2356_v43  ;;  %v7683_v29 = vpop.eup %7682  ;;  %v6631_v31 = vmul.f32 -1.442695, %v9978_v62  ;;  %v9983_v35 = vadd.f32 %v9585_v53, %v2858_v48  ;;  %v2830_v15 = vmul.f32 %v9553_v14, %v2793_v41 }
 0x336   : > { %v2557_v38 = vadd.f32 %v2525_v19, %v2456_v13  ;;  %v2859_v17 = vadd.f32 %v2827_v34, %v2758_v18  ;;  %v2759_v60 = vadd.f32 %v2727_v61, %v2658_v33  ;;  %v7685_v57 = vpop.eup %7684  ;;  %v9990_v46 = vmul.f32 %v7677_v23, %v9788_v16 }
 0x337   : > { %v2558_v54 = vadd.f32 %v2526_v22, %v2457_v12  ;;  %7688 = vpow2.f32 %v6631_v31  ;;  %v3166_v14 = vadd.f32 %v9949_v40, %v9944_v44  ;;  %v10009_v36 = vmul.f32 %v7685_v57, %v9863_v4 }
 0x338   : > { %v2659_v6 = vadd.f32 %v9796_v8, %v2557_v38  ;;  %v9987_v47 = vadd.f32 %v9585_v53, %v2859_v17  ;;  %v2860_v22 = vadd.f32 %v2828_v52, %v2759_v60  ;;  %v6632_v8 = vmul.f32 -1.442695, %v9983_v35 }
 0x339   : > { %v2660_v58 = vadd.f32 %v9876_v7, %v2558_v54  ;;  %7690 = vrcp.f32 %v3023_v49  ;;  %v10002_v7 = vmul.f32 %v7683_v29, %v9853_v56 }
 0x33a   : > { %v2760_v19 = vadd.f32 %v9879_v32, %v2659_v6  ;;  %v6633_v30 = vmul.f32 -1.442695, %v9987_v47  ;;  %v2899_v16 = vadd.f32 %v9585_v53, %v2860_v22  ;;  %7692 = vpow2.f32 %v6632_v8 }
 0x33b   : > { %v2761_v61 = vadd.f32 %v9898_v42, %v2660_v58  ;;  %v3167_v32 = vsel %vm1920_vm8, %v9990_v46, 0.0  ;;  %v3169_v56 = vsel %vm1920_vm8, %v10002_v7, 0.0 }
 0x33c   : > { %v2861_v39 = vadd.f32 %v9901_v45, %v2760_v19  ;;  %7694 = vpow2.f32 %v6633_v30  ;;  %v6634_v25 = vmul.f32 -1.442695, %v2899_v16  ;;  %v3168_v40 = vadd.f32 %v3167_v32, %v3166_v14 }
 0x33d   : > { %v2862_v1 = vadd.f32 %v2830_v15, %v2761_v61 }
 0x33e   : > { %v2900_v23 = vadd.f32 %v9585_v53, %v2861_v39  ;;  %7696 = vpow2.f32 %v6634_v25  ;;  %v7687_v45 = vpop.eup %7686  ;;  %v3170_v3 = vadd.f32 %v3169_v56, %v3168_v40  ;;  %v3281_v40 = vld [vmem:[%s12058_s8] sm:$0x3]  ;;  %s8147_s8 = scalar_lea.vmem %s11835_s5, 16 }
 0x33f   : > { %v2901_v44 = vadd.f32 %v9585_v53, %v2862_v1  ;;  %v10014_v51 = vmul.f32 %v7687_v45, %v9884_v20  ;;  %v3171_v53 = vsel %vm1920_vm8, %v10009_v36, 0.0  ;;  %v3290_v45 = vsel %vm3288_vm10, %v3281_v40, 0  ;;  %v3206_v56 = vld [vmem:[%s12059_s1] sm:$0x1]  ;;  %v12068_v40 = vld [vmem:[#allocation19_spill] sm:$0xff]  ;;  %s6404_s1 = scalar_lea.sflag [#allocation5], %s12200_s0  ;;  %p8148_p12 = scmp.ne.s32.totalorder %s11835_s5, %s8147_s8 }
 0x340   : > { %v6635_v42 = vmul.f32 -1.442695, %v2900_v23  ;;  %v3172_v2 = vadd.f32 %v3171_v53, %v3170_v3 }
 0x341   : > { %v6636_v63 = vmul.f32 -1.442695, %v2901_v44  ;;  %v7689_v26 = vpop.eup %7688  ;;  %v3173_v27 = vsel %vm1920_vm8, %v10014_v51, 0.0  ;;  %p8149_p13 = pnand %p8148_p12, %p8384_p5 }
 0x342   : > { %7698 = vpow2.f32 %v6635_v42  ;;  %v3024_v28 = vadd.f32 1.0, %v7689_v26  ;;  %v3174_v50 = vadd.f32 %v3173_v27, %v3172_v2  ;;  %v7310_v27 = vld [vmem:[%s12060_s11] sm:$0xff]  }
 0x343   : > { %7700 = vpow2.f32 %v6636_v63  ;;  %v7691_v0 = vpop.eup %7690  ;;  %p8150_p0 = pneg %p8149_p13 }
 0x344   : > { %v7693_v5 = vpop.eup %7692  ;;  %7702 = vrcp.f32 %v3024_v28  ;;  %v10019_v11 = vmul.f32 %v7691_v0, %v9905_v21 }
 0x345   : > { %v3025_v55 = vadd.f32 1.0, %v7693_v5 }
 0x346   : > { %v7695_v4 = vpop.eup %7694  ;;  %v3175_v13 = vsel %vm1920_vm8, %v10019_v11, 0.0 }
 0x347   : > { %v3026_v59 = vadd.f32 1.0, %v7695_v4  ;;  %7704 = vrcp.f32 %v3025_v55  ;;  %v3176_v12 = vadd.f32 %v3175_v13, %v3174_v50  ;;  %v7314_v50 = vld [vmem:[%s11891_s13] sm:$0xff]  }
 0x348   : > { %v7697_v37 = vpop.eup %7696  ;;  %7104 = vmatprep.subr.bf16.mxu0 %v7314_v50 }
 0x349   : > { %7706 = vrcp.f32 %v3026_v59  ;;  %v3027_v20 = vadd.f32 1.0, %v7697_v37  ;;  %v7311_v37 = vld [vmem:[%s12060_s11 + $0x8] sm:$0xff]   ;;  %7105 = vmatpush3.bf16.msra.mxu0 %v7314_v50  ;;  %v12076_v50 = vld [vmem:[#allocation18_spill] sm:$0xff] }
 0x34b   : > { %7708 = vrcp.f32 %v3027_v20  ;;  %v7312_v20 = vld [vmem:[%s12060_s11 + $0x10] sm:$0xff]  }
 0x34c   : > { %v7699_v10 = vpop.eup %7698 }
 0x34d   : > { %v3028_v43 = vadd.f32 1.0, %v7699_v10  ;;  %v7701_v34 = vpop.eup %7700  ;;  %v7313_v10 = vld [vmem:[%s12060_s11 + $0x18] sm:$0xff]  }
 0x34e   : > { %v3029_v18 = vadd.f32 1.0, %v7701_v34  ;;  %v7703_v52 = vpop.eup %7702  ;;  %v3283_v34 = vld [vmem:[%s12061_s10] sm:$0x1]  ;;  %s8151_s10 = sshll.u32 %s8215_s7, 4  ;;  %s8152_s10 = int_to_ptr.vmem [resolvable:$false] %s8151_s10 }
 0x34f   : > { %7710 = vrcp.f32 %v3028_v43  ;;  %v10026_v21 = vmul.f32 %v7703_v52, %v9978_v62  ;;  %v7315_v43 = vld [vmem:[%s11891_s13 + $0x8] ss:$0 sps:$4 sm:$0xff]   ;;  %s8153_s11 = scalar_lea.vmem %s8152_s10, 32  ;;  %p8154_p1 = scmp.lt.s32.totalorder %s11835_s5, %s8152_s10 }
 0x350   : > { %7712 = vrcp.f32 %v3029_v18  ;;  %7242 = vmatprep.subr.msk.bf16.mxu0 %vm3722_vm12, %v7315_v43  ;;  %v3724_v13 = vsel %vm3722_vm12, %v7315_v43, 0  ;;  %p8155_p2 = scmp.lt.s32.totalorder %s8153_s11, %s8147_s8 }
 0x351   : > { %v7705_v38 = vpop.eup %7704  ;;  %v3177_v33 = vsel %vm1920_vm8, %v10026_v21, 0.0  ;;  %7107 = vmatpush3.bf16.msra.mxu0 %v3724_v13  ;;  %v12077_v13 = vld [vmem:[#allocation25_spill] sm:$0xff] }
 0x352   : > { %v10031_v48 = vmul.f32 %v7705_v38, %v9983_v35  ;;  %v3178_v29 = vadd.f32 %v3177_v33, %v3176_v12  ;;  %p8156_p3 = por %p8155_p2, %p8154_p1 }
 0x353   : > { %v7707_v41 = vpop.eup %7706 }
 0x354   : > { %v10034_v17 = vmul.f32 %v7707_v41, %v9987_v47  ;;  %v3179_v31 = vsel %vm1920_vm8, %v10031_v48, 0.0  ;;  %p8157_p4 = pnand %p8156_p3, %p8150_p0 }
 0x355   : > { %v7709_v49 = vpop.eup %7708  ;;  %v3180_v54 = vadd.f32 %v3179_v31, %v3178_v29 }
 0x356   : > { %v3181_v62 = vsel %vm1920_vm8, %v10034_v17, 0.0  ;;  %v10040_v6 = vmul.f32 %v7709_v49, %v2899_v16  ;;  %v3338_v49 = vlaneseq }
 0x357   : > { %v3182_v57 = vadd.f32 %v3181_v62, %v3180_v54 }
 0x358   : > { %v3183_v35 = vsel %vm1920_vm8, %v10040_v6, 0.0  ;;  %v10086_v54 = vshrl.u32 %v3338_v49, 7  ;;  %v12081_v49 = vld [vmem:[#allocation29_spill] sm:$0xff] }
 0x359   : > { %v7711_v60 = vpop.eup %7710  ;;  %v3184_v47 = vadd.f32 %v3183_v35, %v3182_v57  ;;  %v12063_v35 = vld [vmem:[#allocation20_spill] sm:$0xff] }
 0x35a   : > { %v10042_v15 = vmul.f32 %v7711_v60, %v2900_v23  ;;  %v7713_v58 = vpop.eup %7712  ;;  %12062 = vst [vmem:[#allocation30_spill] sm:$0xff] %v10086_v54  ;;  %v11941_v62 = vsub.s32 0, %v10086_v54 }
 0x35b   : > { %v10046_v19 = vmul.f32 %v7713_v58, %v2901_v44  ;;  %v12057_v44 = vmov 0.0  }
 0x35c   : > { %v3185_v22 = vsel %vm1920_vm8, %v10042_v15, 0.0  ;;  %7140 = vmatprep.subr.bf16.mxu0 %v12057_v44 }
 0x35d   : > { %v3186_v8 = vadd.f32 %v3185_v22, %v3184_v47  ;;  %v3187_v30 = vsel %vm1920_vm8, %v10046_v19, 0.0  ;;  %v12064_v47 = vld [vmem:[#allocation21_spill] sm:$0xff] }
 0x35f   : > { %v3188_v14 = vadd.f32 %v3187_v30, %v3186_v8  ;;  %v12065_v8 = vld [vmem:[#allocation22_spill] sm:$0xff] }
 0x361   : > { %v3189_v61 = vrot.slane %v3188_v14, 4 }
 0x363   : > { %v3190_v39 = vadd.f32 %v3189_v61, %v3188_v14  ;;  %v12066_v14 = vld [vmem:[#allocation23_spill] sm:$0xff] }
 0x365   : > { %v3191_v16 = vrot.slane %v3190_v39, 2 }
 0x367   : > { %v3192_v32 = vadd.f32 %v3191_v16, %v3190_v39 }
 0x369   : > { %v3193_v1 = vrot.slane %v3192_v32, 1 }
 0x36b   : > { %v3194_v23 = vadd.f32 %v3193_v1, %v3192_v32 }
 0x36d   : > { %v3196_v25 = vmul.f32 0.00390625, %v3194_v23 }
 0x36f   : > { %v3205_v42 = vpack.c.bf16 %v3196_v25, %v3196_v25  ;;  %v12067_v25 = vld [vmem:[#allocation16_spill] sm:$0xff] }
 0x371   : > { %7055 = vmatmul.mubr.msk.bf16.vlgmr.msra.gmra.mrb[32].mxu1 %vm1920_vm8, %v3205_v42 }
 0x372   : > { %7060 = vmatprep.mubr.msk.bf16.mxu1 %vm8214_vm9, %v12057_v44  ;;  %7059 = vmatpush3.bf16.msra.mxu1 %v3290_v45 }
 0x373   : > { %7064 = vmatprep.subr.bf16.mxu1 %v7310_v27 }
 0x444   : > { %v3268_v63 = vpop.f32.mrb[32].mxu1 }
 0x445   : > { %v3269_v26 = vadd.f32 %v3268_v63, %v3206_v56  ;;  %v7056_v28 = vpop.f32.mrb[33].mxu1  ;;  %v12069_v56 = vld [vmem:[#allocation24_spill] sm:$0xff] }
 0x446   : > { %v3271_v3 = vpop.f32.mrb[34].mxu1 }
 0x447   : > { %v6642_v0 = vmul.f32 -1.442695, %v3269_v26  ;;  %v7057_v53 = vpop.f32.mrb[35].mxu1 }
 0x448   : > { %v12072_v53 = vld [vmem:[#allocation13_spill] sm:$0xff] }
 0x449   : > { %7714 = vpow2.f32 %v6642_v0 }
 0x453   : > { %v7715_v5 = vpop.eup %7714 }
 0x454   : > { %v3277_v4 = vadd.f32 1.0, %v7715_v5 }
 0x456   : > { %7716 = vrcp.f32 %v3277_v4  ;;  %v12073_v4 = vld [vmem:[#allocation14_spill] sm:$0xff] }
 0x460   : > { %v7717_v55 = vpop.eup %7716 }
 0x461   : > { %v3280_v59 = vmul.f32 %v7717_v55, %v3269_v26  ;;  %v12070_v26 = vld [vmem:[#allocation11_spill] sm:$0xff] }
 0x463   : > { %v3282_v2 = vpack.c.bf16 %v3280_v59, %v3280_v59  ;;  %v12074_v59 = vld [vmem:[#allocation15_spill] sm:$0xff] }
 0x465   : > { %7061 = vmatmul.mubr.msk.bf16.vlgmr.msra.gmra.mrb[36].mxu1 %vm3284_vm11, %v3282_v2 }
 0x466   : > { %7065 = vmatpush3.bf16.msra.mxu1 %v7310_v27 }
 0x467   : > { %7066 = vmatprep.subr.bf16.mxu1 %v7311_v37 }
 0x46a   : > { %7067 = vmatpush3.bf16.msra.mxu1 %v7311_v37 }
 0x46b   : > { %7068 = vmatprep.subr.bf16.mxu1 %v7312_v20 }
 0x46e   : > { %7069 = vmatpush3.bf16.msra.mxu1 %v7312_v20  ;;  %v12075_v20 = vld [vmem:[#allocation17_spill] sm:$0xff] }
 0x46f   : > { %7070 = vmatprep.subr.bf16.mxu1 %v7313_v10 }
 0x472   : > { %7071 = vmatpush3.bf16.msra.mxu1 %v7313_v10 }
 0x473   : > { %7156 = vmatprep.subr.bf16.mxu1 %v12057_v44 }
 0x538   : > { %v3326_v18 = vpop.f32.mrb[36].mxu1 }
 0x539   : > { %v3327_v52 = vadd.f32 %v3326_v18, %v3283_v34  ;;  %v7062_v12 = vpop.f32.mrb[37].mxu1  ;;  %v12078_v18 = vld [vmem:[#allocation26_spill] sm:$0xff] }
 0x53a   : > { %v3329_v38 = vpop.f32.mrb[38].mxu1 }
 0x53b   : > { %v6644_v33 = vmul.f32 -1.442695, %v3327_v52  ;;  %v7063_v41 = vpop.f32.mrb[39].mxu1 }
 0x53d   : > { %7718 = vpow2.f32 %v6644_v33  ;;  %v12079_v33 = vld [vmem:[#allocation27_spill] sm:$0xff] }
 0x547   : > { %v7719_v29 = vpop.eup %7718 }
 0x548   : > { %v3335_v31 = vadd.f32 1.0, %v7719_v29  ;;  %v12080_v29 = vld [vmem:[#allocation28_spill] sm:$0xff] }
 0x54a   : > { %7720 = vrcp.f32 %v3335_v31 }
 0x554   : > { %v7721_v60 = vpop.eup %7720 }
 0x555   : > { %v3341_v57 = vrot.slane %v7721_v60, %v11941_v62 }
 0x557   : > { %v3342_v58 = vmul.f32 %v3341_v57, %v12063_v35  ;;  %v3343_v22 = vmul.f32 %v3341_v57, %v12064_v47  ;;  %v3344_v30 = vmul.f32 %v3341_v57, %v12065_v8  ;;  %v3345_v61 = vmul.f32 %v3341_v57, %v12066_v14 }
 0x558   : > { %v3346_v39 = vmul.f32 %v3341_v57, %v9314_v24  ;;  %v3347_v16 = vmul.f32 %v3341_v57, %v9367_v9  ;;  %v3348_v42 = vmul.f32 %v3341_v57, %v12067_v25  ;;  %v3349_v45 = vmul.f32 %v3341_v57, %v12068_v40  ;;  %v12071_v9 = vld [vmem:[#allocation12_spill] sm:$0xff] }
 0x559   : > { %v3382_v32 = vpack.c.bf16 %v3343_v22, %v3342_v58  ;;  %v3383_v1 = vpack.c.bf16 %v3345_v61, %v3344_v30  ;;  %v3350_v63 = vmul.f32 %v3341_v57, %v12069_v56  ;;  %v3351_v28 = vmul.f32 %v3341_v57, %v12070_v26 }
 0x55a   : > { %v3384_v23 = vpack.c.bf16 %v3347_v16, %v3346_v39  ;;  %v3385_v24 = vpack.c.bf16 %v3349_v45, %v3348_v42  ;;  %v3352_v0 = vmul.f32 %v3341_v57, %v12071_v9  ;;  %v3353_v5 = vmul.f32 %v3341_v57, %v12072_v53 }
 0x55b   : > { %7072 = vmatprep.mubr.msk.bf16.mxu1 %vm1920_vm8, %v3382_v32  ;;  %v3386_v3 = vpack.c.bf16 %v3351_v28, %v3350_v63  ;;  %v3354_v55 = vmul.f32 %v3341_v57, %v12073_v4  ;;  %v3355_v2 = vmul.f32 %v3341_v57, %v12074_v59  ;;  %v3356_v10 = vmul.f32 %v3341_v57, %v12075_v20 }
 0x55c   : > { %7073 = vmatmul.mubr.msk.bf16.vlgmr.msra.gmra.mrb[40].mxu1 %vm1920_vm8, %v3383_v1  ;;  %v3387_v27 = vpack.c.bf16 %v3353_v5, %v3352_v0  ;;  %v3357_v43 = vmul.f32 %v3341_v57, %v12076_v50  ;;  %v3358_v34 = vmul.f32 %v3341_v57, %v12077_v13  ;;  %v3359_v52 = vmul.f32 %v3341_v57, %v12078_v18 }
 0x55d   : > { %7076 = vmatprep.mubr.msk.bf16.mxu1 %vm1920_vm8, %v3384_v23  ;;  %v3388_v37 = vpack.c.bf16 %v3355_v2, %v3354_v55  ;;  %v3360_v41 = vmul.f32 %v3341_v57, %v12079_v33  ;;  %v3361_v31 = vmul.f32 %v3341_v57, %v12080_v29  ;;  %v3362_v60 = vmul.f32 %v3341_v57, %v12081_v49 }
 0x55e   : > { %v3389_v12 = vpack.c.bf16 %v3357_v43, %v3356_v10  ;;  %v3390_v38 = vpack.c.bf16 %v3359_v52, %v3358_v34  ;;  %v3363_v35 = vmul.f32 %v3341_v57, %v9990_v46  ;;  %v3364_v22 = vmul.f32 %v3341_v57, %v10002_v7 }
 0x55f   : > { %v3391_v58 = vpack.c.bf16 %v3361_v31, %v3360_v41  ;;  %v3365_v8 = vmul.f32 %v3341_v57, %v10009_v36  ;;  %v3366_v30 = vmul.f32 %v3341_v57, %v10014_v51  ;;  %v3367_v14 = vmul.f32 %v3341_v57, %v10019_v11 }
 0x560   : > { %v3392_v47 = vpack.c.bf16 %v3363_v35, %v3362_v60  ;;  %v3368_v46 = vmul.f32 %v3341_v57, %v10026_v21  ;;  %v3369_v16 = vmul.f32 %v3341_v57, %v10031_v48  ;;  %v3370_v32 = vmul.f32 %v3341_v57, %v10034_v17  ;;  %v10144_v48 = vld [vmem:[%s11890_s12] ss:$0 sm:$0xff] }
 0x561   : > { %v3393_v61 = vpack.c.bf16 %v3365_v8, %v3364_v22  ;;  %v3394_v39 = vpack.c.bf16 %v3367_v14, %v3366_v30  ;;  %v3371_v7 = vmul.f32 %v3341_v57, %v10040_v6  ;;  %v3372_v51 = vmul.f32 %v3341_v57, %v10042_v15 }
 0x562   : > { %v3395_v1 = vpack.c.bf16 %v3369_v16, %v3368_v46  ;;  %v3373_v11 = vmul.f32 %v3341_v57, %v10046_v19 }
 0x563   : > { %v3396_v36 = vpack.c.bf16 %v3371_v7, %v3370_v32 }
 0x564   : > { %7077 = vmatmul.mubr.msk.bf16.gmra.mrb[44].mxu1 %vm1920_vm8, %v3385_v24  ;;  %v3397_v23 = vpack.c.bf16 %v3373_v11, %v3372_v51 }
 0x565   : > { %7080 = vmatprep.mubr.msk.bf16.mxu1 %vm1920_vm8, %v3386_v3 }
 0x56c   : > { %7081 = vmatmul.mubr.msk.bf16.gmra.mrb[48].mxu1 %vm1920_vm8, %v3387_v27 }
 0x56d   : > { %7084 = vmatprep.mubr.msk.bf16.mxu1 %vm1920_vm8, %v3388_v37 }
 0x574   : > { %7085 = vmatmul.mubr.msk.bf16.gmra.mrb[52].mxu1 %vm1920_vm8, %v3389_v12 }
 0x575   : > { %7088 = vmatprep.mubr.msk.bf16.mxu1 %vm1920_vm8, %v3390_v38 }
 0x57c   : > { %7089 = vmatmul.mubr.msk.bf16.gmra.mrb[56].mxu1 %vm1920_vm8, %v3391_v58 }
 0x57d   : > { %7092 = vmatprep.mubr.msk.bf16.mxu1 %vm1920_vm8, %v3392_v47 }
 0x584   : > { %7093 = vmatmul.mubr.msk.bf16.gmra.mrb[60].mxu1 %vm1920_vm8, %v3393_v61 }
 0x585   : > { %7096 = vmatprep.mubr.msk.bf16.mxu1 %vm1920_vm8, %v3394_v39 }
 0x58c   : > { %7097 = vmatmul.mubr.msk.bf16.gmra.mrb[64].mxu1 %vm1920_vm8, %v3395_v1 }
 0x58d   : > { %7100 = vmatprep.mubr.msk.bf16.mxu1 %vm1920_vm8, %v3396_v36 }
 0x594   : > { %7101 = vmatmul.mubr.msk.bf16.gmra.mrb[68].mxu1 %vm1920_vm8, %v3397_v23 }
 0x595   : > { %7158 = vmatprep.mubr.msk.bf16.mxu1 %vm8214_vm9, %v12057_v44 }
 0x62f   : > { %v7074_v21 = vpop.f32.mrb[40].mxu1 }
 0x630   : > { %v3511_v17 = vpop.f32.mrb[41].mxu1  ;;  %v10156_v42 = vadd.f32 %v7074_v21, %v10144_v48 }
 0x631   : > { %v7075_v6 = vpop.f32.mrb[42].mxu1  ;;  %v10150_v19 = vadd.f32 %v10144_v48, %v3511_v17 }
 0x632   : > { %v10147_v25 = vadd.f32 %v7075_v6, %v10144_v48  ;;  %v3514_v15 = vpop.f32.mrb[43].mxu1  ;;  %12085 = vst [vmem:[#allocation23_spill] sm:$0xff] %v10156_v42 }
 0x633   : > { %12083 = vst [vmem:[#allocation21_spill] sm:$0xff] %v10150_v19  ;;  %v10153_v57 = vadd.f32 %v10144_v48, %v3514_v15 }
 0x634   : > { %12082 = vst [vmem:[#allocation20_spill] sm:$0xff] %v10147_v25  ;;  %v3642_v45 = vpack.c.bf16 %v10147_v25, %v10156_v42 }
 0x635   : > { %12084 = vst [vmem:[#allocation22_spill] sm:$0xff] %v10153_v57  ;;  %v3641_v40 = vpack.c.bf16 %v10153_v57, %v10150_v19 }
 0x637   : > { %v7078_v56 = vpop.f32.mrb[44].mxu1  ;;  %7108 = vmatprep.mubr.msk.bf16.mxu0 %vm3673_vm13, %v3641_v40 }
 0x638   : > { %v3527_v63 = vpop.f32.mrb[45].mxu1  ;;  %7109 = vmatmul.mubr.msk.bf16.vlgmr.msra.gmra.mrb[32].mxu0 %vm3673_vm13, %v3642_v45  ;;  %v10174_v0 = vadd.f32 %v7078_v56, %v10144_v48 }
 0x639   : > { %v7079_v26 = vpop.f32.mrb[46].mxu1  ;;  %v10168_v3 = vadd.f32 %v10144_v48, %v3527_v63 }
 0x63a   : > { %v10165_v28 = vadd.f32 %v7079_v26, %v10144_v48  ;;  %v3530_v24 = vpop.f32.mrb[47].mxu1  ;;  %12089 = vst [vmem:[#allocation11_spill] sm:$0xff] %v10174_v0 }
 0x63b   : > { %12087 = vst [vmem:[#allocation19_spill] sm:$0xff] %v10168_v3  ;;  %v10171_v9 = vadd.f32 %v10144_v48, %v3530_v24 }
 0x63c   : > { %12086 = vst [vmem:[#allocation16_spill] sm:$0xff] %v10165_v28  ;;  %v3644_v5 = vpack.c.bf16 %v10165_v28, %v10174_v0 }
 0x63d   : > { %12088 = vst [vmem:[#allocation24_spill] sm:$0xff] %v10171_v9  ;;  %v3643_v53 = vpack.c.bf16 %v10171_v9, %v10168_v3 }
 0x63f   : > { %v7082_v4 = vpop.f32.mrb[48].mxu1  ;;  %7112 = vmatprep.mubr.msk.bf16.mxu0 %vm3673_vm13, %v3643_v53 }
 0x640   : > { %v3543_v55 = vpop.f32.mrb[49].mxu1  ;;  %7113 = vmatmul.mubr.msk.bf16.gmra.mrb[36].mxu0 %vm3673_vm13, %v3644_v5  ;;  %v10192_v10 = vadd.f32 %v7082_v4, %v10144_v48 }
 0x641   : > { %v7083_v59 = vpop.f32.mrb[50].mxu1  ;;  %v10186_v37 = vadd.f32 %v10144_v48, %v3543_v55 }
 0x642   : > { %v10183_v2 = vadd.f32 %v7083_v59, %v10144_v48  ;;  %v3546_v27 = vpop.f32.mrb[51].mxu1  ;;  %12093 = vst [vmem:[#allocation15_spill] sm:$0xff] %v10192_v10 }
 0x643   : > { %12091 = vst [vmem:[#allocation13_spill] sm:$0xff] %v10186_v37  ;;  %v10189_v20 = vadd.f32 %v10144_v48, %v3546_v27 }
 0x644   : > { %12090 = vst [vmem:[#allocation12_spill] sm:$0xff] %v10183_v2  ;;  %v3646_v43 = vpack.c.bf16 %v10183_v2, %v10192_v10 }
 0x645   : > { %12092 = vst [vmem:[#allocation14_spill] sm:$0xff] %v10189_v20  ;;  %v3645_v50 = vpack.c.bf16 %v10189_v20, %v10186_v37 }
 0x647   : > { %v7086_v13 = vpop.f32.mrb[52].mxu1  ;;  %7116 = vmatprep.mubr.msk.bf16.mxu0 %vm3673_vm13, %v3645_v50 }
 0x648   : > { %v3559_v34 = vpop.f32.mrb[53].mxu1  ;;  %7117 = vmatmul.mubr.msk.bf16.gmra.mrb[40].mxu0 %vm3673_vm13, %v3646_v43  ;;  %v10210_v41 = vadd.f32 %v7086_v13, %v10144_v48 }
 0x649   : > { %v7087_v18 = vpop.f32.mrb[54].mxu1  ;;  %v10204_v38 = vadd.f32 %v10144_v48, %v3559_v34 }
 0x64a   : > { %v10201_v52 = vadd.f32 %v7087_v18, %v10144_v48  ;;  %v3562_v12 = vpop.f32.mrb[55].mxu1  ;;  %12097 = vst [vmem:[#allocation26_spill] sm:$0xff] %v10210_v41  ;;  %v10295_v18 = vld [vmem:[%s11892_s14] ss:$0 sm:$0xff] }
 0x64b   : > { %12095 = vst [vmem:[#allocation18_spill] sm:$0xff] %v10204_v38  ;;  %v10207_v33 = vadd.f32 %v10144_v48, %v3562_v12 }
 0x64c   : > { %12094 = vst [vmem:[#allocation17_spill] sm:$0xff] %v10201_v52  ;;  %v3648_v31 = vpack.c.bf16 %v10201_v52, %v10210_v41 }
 0x64d   : > { %12096 = vst [vmem:[#allocation25_spill] sm:$0xff] %v10207_v33  ;;  %v3647_v29 = vpack.c.bf16 %v10207_v33, %v10204_v38 }
 0x64f   : > { %v7090_v49 = vpop.f32.mrb[56].mxu1  ;;  %7120 = vmatprep.mubr.msk.bf16.mxu0 %vm3673_vm13, %v3647_v29 }
 0x650   : > { %v3575_v60 = vpop.f32.mrb[57].mxu1  ;;  %7121 = vmatmul.mubr.msk.bf16.gmra.mrb[44].mxu0 %vm3673_vm13, %v3648_v31  ;;  %v10228_v30 = vadd.f32 %v7090_v49, %v10144_v48 }
 0x651   : > { %v7091_v35 = vpop.f32.mrb[58].mxu1  ;;  %v10222_v22 = vadd.f32 %v10144_v48, %v3575_v60 }
 0x652   : > { %v10219_v58 = vadd.f32 %v7091_v35, %v10144_v48  ;;  %v3578_v47 = vpop.f32.mrb[59].mxu1  ;;  %12101 = vst [vmem:[#allocation31_spill] sm:$0xff] %v10228_v30 }
 0x653   : > { %12099 = vst [vmem:[#allocation28_spill] sm:$0xff] %v10222_v22  ;;  %v10225_v8 = vadd.f32 %v10144_v48, %v3578_v47 }
 0x654   : > { %12098 = vst [vmem:[#allocation27_spill] sm:$0xff] %v10219_v58  ;;  %v3650_v61 = vpack.c.bf16 %v10219_v58, %v10228_v30 }
 0x655   : > { %12100 = vst [vmem:[#allocation29_spill] sm:$0xff] %v10225_v8  ;;  %v3649_v14 = vpack.c.bf16 %v10225_v8, %v10222_v22 }
 0x657   : > { %v7094_v39 = vpop.f32.mrb[60].mxu1  ;;  %7124 = vmatprep.mubr.msk.bf16.mxu0 %vm3673_vm13, %v3649_v14 }
 0x658   : > { %v3591_v46 = vpop.f32.mrb[61].mxu1  ;;  %7125 = vmatmul.mubr.msk.bf16.gmra.mrb[48].mxu0 %vm3673_vm13, %v3650_v61  ;;  %v10246_v51 = vadd.f32 %v7094_v39, %v10144_v48 }
 0x659   : > { %v7095_v16 = vpop.f32.mrb[62].mxu1  ;;  %v10240_v1 = vadd.f32 %v10144_v48, %v3591_v46 }
 0x65a   : > { %v10237_v32 = vadd.f32 %v7095_v16, %v10144_v48  ;;  %v3594_v7 = vpop.f32.mrb[63].mxu1  ;;  %12105 = vst [vmem:[#allocation35_spill] sm:$0xff] %v10246_v51 }
 0x65b   : > { %12103 = vst [vmem:[#allocation33_spill] sm:$0xff] %v10240_v1  ;;  %v10243_v36 = vadd.f32 %v10144_v48, %v3594_v7 }
 0x65c   : > { %12102 = vst [vmem:[#allocation32_spill] sm:$0xff] %v10237_v32  ;;  %v3652_v23 = vpack.c.bf16 %v10237_v32, %v10246_v51 }
 0x65d   : > { %12104 = vst [vmem:[#allocation34_spill] sm:$0xff] %v10243_v36  ;;  %v3651_v11 = vpack.c.bf16 %v10243_v36, %v10240_v1 }
 0x65f   : > { %v7098_v21 = vpop.f32.mrb[64].mxu1  ;;  %7128 = vmatprep.mubr.msk.bf16.mxu0 %vm3673_vm13, %v3651_v11 }
 0x660   : > { %v3607_v17 = vpop.f32.mrb[65].mxu1  ;;  %7129 = vmatmul.mubr.msk.bf16.gmra.mrb[52].mxu0 %vm3673_vm13, %v3652_v23  ;;  %v10264_v63 = vadd.f32 %v7098_v21, %v10144_v48 }
 0x661   : > { %v7099_v6 = vpop.f32.mrb[66].mxu1  ;;  %v10258_v45 = vadd.f32 %v10144_v48, %v3607_v17 }
 0x662   : > { %v10255_v15 = vadd.f32 %v7099_v6, %v10144_v48  ;;  %v3610_v40 = vpop.f32.mrb[67].mxu1  ;;  %12109 = vst [vmem:[#allocation39_spill] sm:$0xff] %v10264_v63 }
 0x663   : > { %12107 = vst [vmem:[#allocation37_spill] sm:$0xff] %v10258_v45  ;;  %v10261_v56 = vadd.f32 %v10144_v48, %v3610_v40 }
 0x664   : > { %12106 = vst [vmem:[#allocation36_spill] sm:$0xff] %v10255_v15  ;;  %v3654_v24 = vpack.c.bf16 %v10255_v15, %v10264_v63 }
 0x665   : > { %12108 = vst [vmem:[#allocation38_spill] sm:$0xff] %v10261_v56  ;;  %v3653_v26 = vpack.c.bf16 %v10261_v56, %v10258_v45  ;;  %v4348_v56 = vld [vmem:[#allocation3 + $0xa] sm:$0xff] }
 0x667   : > { %v7102_v53 = vpop.f32.mrb[68].mxu1  ;;  %7132 = vmatprep.mubr.msk.bf16.mxu0 %vm3673_vm13, %v3653_v26 }
 0x668   : > { %v3623_v5 = vpop.f32.mrb[69].mxu1  ;;  %7133 = vmatmul.mubr.msk.bf16.gmra.mrb[56].mxu0 %vm3673_vm13, %v3654_v24  ;;  %v10282_v43 = vadd.f32 %v7102_v53, %v10144_v48 }
 0x669   : > { %v7103_v4 = vpop.f32.mrb[70].mxu1  ;;  %v10276_v27 = vadd.f32 %v10144_v48, %v3623_v5 }
 0x66a   : > { %v10273_v55 = vadd.f32 %v7103_v4, %v10144_v48  ;;  %v3626_v59 = vpop.f32.mrb[71].mxu1  ;;  %12113 = vst [vmem:[#allocation43_spill] sm:$0xff] %v10282_v43 }
 0x66b   : > { %12111 = vst [vmem:[#allocation41_spill] sm:$0xff] %v10276_v27  ;;  %v10279_v50 = vadd.f32 %v10144_v48, %v3626_v59 }
 0x66c   : > { %12110 = vst [vmem:[#allocation40_spill] sm:$0xff] %v10273_v55  ;;  %v3656_v34 = vpack.c.bf16 %v10273_v55, %v10282_v43  ;;  %v4347_v43 = vld [vmem:[#allocation3 + $0x2] sm:$0xff] }
 0x66d   : > { %12112 = vst [vmem:[#allocation42_spill] sm:$0xff] %v10279_v50  ;;  %v3655_v13 = vpack.c.bf16 %v10279_v50, %v10276_v27 }
 0x66f   : > { %7136 = vmatprep.mubr.msk.bf16.mxu0 %vm3673_vm13, %v3655_v13 }
 0x670   : > { %7137 = vmatmul.mubr.msk.bf16.gmra.mrb[60].mxu0 %vm3673_vm13, %v3656_v34 }
 0x671   : > { %7152 = vmatprep.mubr.msk.bf16.mxu0 %vm8214_vm9, %v12057_v44 }
 0x70b   : > { %v7110_v48 = vpop.f32.mrb[32].mxu0 }
 0x70c   : > { %v10298_v12 = vadd.f32 %v7110_v48, %v10295_v18  ;;  %v3760_v29 = vpop.f32.mrb[33].mxu0 }
 0x70d   : > { %v10301_v31 = vadd.f32 %v10295_v18, %v3760_v29  ;;  %v7111_v49 = vpop.f32.mrb[34].mxu0 }
 0x70e   : > { %v6687_v60 = vmul.f32 -1.442695, %v10298_v12  ;;  %v10305_v35 = vadd.f32 %v7111_v49, %v10295_v18  ;;  %v3763_v47 = vpop.f32.mrb[35].mxu0 }
 0x70f   : > { %v6685_v14 = vmul.f32 -1.442695, %v10301_v31  ;;  %v10309_v61 = vadd.f32 %v10295_v18, %v3763_v47 }
 0x710   : > { %7722 = vpow2.f32 %v6687_v60  ;;  %v6688_v39 = vmul.f32 -1.442695, %v10305_v35 }
 0x711   : > { %7724 = vpow2.f32 %v6685_v14  ;;  %v6686_v46 = vmul.f32 -1.442695, %v10309_v61 }
 0x712   : > { %7726 = vpow2.f32 %v6688_v39 }
 0x713   : > { %7728 = vpow2.f32 %v6686_v46  ;;  %v7114_v16 = vpop.f32.mrb[36].mxu0 }
 0x714   : > { %v10314_v7 = vadd.f32 %v7114_v16, %v10295_v18  ;;  %v3776_v11 = vpop.f32.mrb[37].mxu0 }
 0x715   : > { %v10317_v23 = vadd.f32 %v10295_v18, %v3776_v11  ;;  %v7115_v21 = vpop.f32.mrb[38].mxu0 }
 0x716   : > { %v6691_v17 = vmul.f32 -1.442695, %v10314_v7  ;;  %v10321_v6 = vadd.f32 %v7115_v21, %v10295_v18  ;;  %v3779_v40 = vpop.f32.mrb[39].mxu0 }
 0x717   : > { %v6689_v26 = vmul.f32 -1.442695, %v10317_v23  ;;  %v10326_v53 = vadd.f32 %v10295_v18, %v3779_v40 }
 0x718   : > { %7730 = vpow2.f32 %v6691_v17  ;;  %v6692_v24 = vmul.f32 -1.442695, %v10321_v6 }
 0x719   : > { %7732 = vpow2.f32 %v6689_v26  ;;  %v6690_v14 = vmul.f32 -1.442695, %v10326_v53 }
 0x71a   : > { %v7723_v5 = vpop.eup %7722  ;;  %7734 = vpow2.f32 %v6692_v24 }
 0x71b   : > { %v7725_v4 = vpop.eup %7724  ;;  %v3985_v59 = vadd.f32 1.0, %v7723_v5  ;;  %v7118_v13 = vpop.f32.mrb[40].mxu0 }
 0x71c   : > { %v7727_v34 = vpop.eup %7726  ;;  %v3983_v48 = vadd.f32 1.0, %v7725_v4  ;;  %v10329_v29 = vadd.f32 %v7118_v13, %v10295_v18  ;;  %v3792_v49 = vpop.f32.mrb[41].mxu0 }
 0x71d   : > { %v7729_v60 = vpop.eup %7728  ;;  %7736 = vrcp.f32 %v3985_v59  ;;  %v3986_v47 = vadd.f32 1.0, %v7727_v34  ;;  %v10333_v39 = vadd.f32 %v10295_v18, %v3792_v49  ;;  %v7119_v46 = vpop.f32.mrb[42].mxu0 }
 0x71e   : > { %7738 = vrcp.f32 %v3983_v48  ;;  %v3984_v16 = vadd.f32 1.0, %v7729_v60  ;;  %v6695_v11 = vmul.f32 -1.442695, %v10329_v29  ;;  %v10337_v21 = vadd.f32 %v7119_v46, %v10295_v18  ;;  %v3795_v17 = vpop.f32.mrb[43].mxu0 }
 0x71f   : > { %7740 = vrcp.f32 %v3986_v47  ;;  %v6693_v40 = vmul.f32 -1.442695, %v10333_v39  ;;  %v10341_v26 = vadd.f32 %v10295_v18, %v3795_v17 }
 0x720   : > { %7742 = vrcp.f32 %v3984_v16  ;;  %v6696_v24 = vmul.f32 -1.442695, %v10337_v21 }
 0x721   : > { %7744 = vpow2.f32 %v6690_v14  ;;  %v6694_v13 = vmul.f32 -1.442695, %v10341_v26 }
 0x722   : > { %v7731_v5 = vpop.eup %7730  ;;  %7746 = vpow2.f32 %v6695_v11 }
 0x723   : > { %v7733_v4 = vpop.eup %7732  ;;  %v3989_v59 = vadd.f32 1.0, %v7731_v5  ;;  %7748 = vpow2.f32 %v6693_v40  ;;  %v10345_v34 = vpop.f32.mrb[44].mxu0 }
 0x724   : > { %v3987_v48 = vadd.f32 1.0, %v7733_v4  ;;  %7750 = vpow2.f32 %v6696_v24  ;;  %v10347_v49 = vpop.f32.mrb[45].mxu0  ;;  %v7735_v47 = vpop.eup %7734 }
 0x725   : > { %7752 = vrcp.f32 %v3989_v59  ;;  %v10349_v60 = vpop.f32.mrb[46].mxu0 }
 0x726   : > { %7754 = vrcp.f32 %v3987_v48  ;;  %v10351_v46 = vpop.f32.mrb[47].mxu0 }
 0x727   : > { %v7737_v14 = vpop.eup %7736  ;;  %7756 = vpow2.f32 %v6694_v13 }
 0x728   : > { %v7739_v16 = vpop.eup %7738  ;;  %v4081_v11 = vmul.f32 %v7737_v14, %v10298_v12 }
 0x729   : > { %v7741_v17 = vpop.eup %7740  ;;  %v4079_v40 = vmul.f32 %v7739_v16, %v10301_v31 }
 0x72a   : > { %v7743_v5 = vpop.eup %7742  ;;  %4115 = vst.msk [vmem:[#allocation3 + $0x31] sm:$0xff] %vm4112_vm14, %v4081_v11  ;;  %v4082_v24 = vmul.f32 %v7741_v17, %v10305_v35  ;;  %v3990_v11 = vadd.f32 1.0, %v7735_v47 }
 0x72b   : > { %v7745_v4 = vpop.eup %7744  ;;  %4113 = vst.msk [vmem:[#allocation3 + $0x19] sm:$0xff] %vm4112_vm14, %v4079_v40  ;;  %v4080_v59 = vmul.f32 %v7743_v5, %v10309_v61  ;;  %v10359_v48 = vpop.f32.mrb[48].mxu0 }
 0x72c   : > { %v7747_v62 = vpop.eup %7746  ;;  %4116 = vst.msk [vmem:[#allocation3 + $0x39] sm:$0xff] %vm4112_vm14, %v4082_v24  ;;  %v10362_v13 = vpop.f32.mrb[49].mxu0  ;;  %v3988_v40 = vadd.f32 1.0, %v7745_v4  ;;  %7758 = vrcp.f32 %v3990_v11 }
 0x72d   : > { %v7749_v12 = vpop.eup %7748  ;;  %4114 = vst.msk [vmem:[#allocation3 + $0x21] sm:$0xff] %vm4112_vm14, %v4080_v59  ;;  %v10365_v31 = vpop.f32.mrb[50].mxu0  ;;  %v3993_v24 = vadd.f32 1.0, %v7747_v62  ;;  %v10375_v59 = vld [vmem:[%s11893_s15] ss:$0 sm:$0xff]  ;;  %v4145_v62 = vld [vmem:[#allocation3] sm:$0xff] }
 0x72e   : > { %v7751_v14 = vpop.eup %7750  ;;  %v10367_v16 = vpop.f32.mrb[51].mxu0  ;;  %v3991_v27 = vadd.f32 1.0, %v7749_v12  ;;  %7760 = vrcp.f32 %v3988_v40  ;;  %v4182_v11 = vmul.f32 %v10375_v59, %v4145_v62  ;;  %v10396_v40 = vld [vmem:[%s11893_s15 + $0x2] ss:$0 sm:$0xff]  ;;  %v10533_v25 = vadd.f32 %v10365_v31, %v10295_v18 }
 0x72f   : > { %v7753_v35 = vpop.eup %7752  ;;  %v3994_v47 = vadd.f32 1.0, %v7751_v14  ;;  %7762 = vrcp.f32 %v3993_v24  ;;  %v4384_v62 = vmul.f32 %v10396_v40, %v4347_v43  ;;  %v10415_v43 = vadd.f32 %v10345_v34, %v10295_v18 }
 0x730   : > { %v7755_v17 = vpop.eup %7754  ;;  %v4085_v61 = vmul.f32 %v7753_v35, %v10314_v7  ;;  %v10383_v7 = vld [vmem:[%s11893_s15 + $0x1] ss:$0 sm:$0xff]  ;;  %7764 = vrcp.f32 %v3991_v27  ;;  %12119 = vst [vmem:[#allocation49_spill] sm:$0xff] %v10533_v25 }
 0x731   : > { %v7757_v5 = vpop.eup %7756  ;;  %v4083_v50 = vmul.f32 %v7755_v17, %v10317_v23  ;;  %v4246_v23 = vld [vmem:[#allocation3 + $0x1] sm:$0xff]  ;;  %7766 = vrcp.f32 %v3994_v47  ;;  %v10406_v47 = vld [vmem:[%s11893_s15 + $0x3] ss:$0 sm:$0xff] }
 0x732   : > { %4119 = vst.msk [vmem:[#allocation3 + $0x61] sm:$0xff] %vm4112_vm14, %v4085_v61  ;;  %v3992_v4 = vadd.f32 1.0, %v7757_v5  ;;  %v4146_v17 = vld [vmem:[#allocation3 + $0x8] sm:$0xff]  ;;  %v4283_v61 = vmul.f32 %v10383_v7, %v4246_v23  ;;  %v4147_v27 = vld [vmem:[#allocation3 + $0x18] sm:$0xff] }
 0x733   : > { %4117 = vst.msk [vmem:[#allocation3 + $0x49] sm:$0xff] %vm4112_vm14, %v4083_v50  ;;  %v10378_v55 = vpop.f32.mrb[52].mxu0  ;;  %v4247_v50 = vld [vmem:[#allocation3 + $0x9] sm:$0xff]  ;;  %v4183_v5 = vmul.f32 %v10375_v59, %v4146_v17  ;;  %v4248_v45 = vld [vmem:[#allocation3 + $0x19] sm:$0xff]  ;;  %v4385_v17 = vmul.f32 %v10396_v40, %v4348_v56  ;;  %v4184_v1 = vmul.f32 %v10375_v59, %v4147_v27  ;;  %v4485_v8 = vmul.f32 %v10406_v47, %v4147_v27  ;;  %v10421_v56 = vld [vmem:[%s11893_s15 + $0x4] ss:$0 sm:$0xff] }
 0x734   : > { %v10385_v12 = vpop.f32.mrb[53].mxu0  ;;  %7768 = vrcp.f32 %v3992_v4  ;;  %v4284_v24 = vmul.f32 %v10383_v7, %v4247_v50  ;;  %v4315_v15 = vadd.f32 %v4283_v61, %v4182_v11  ;;  %v4285_v11 = vmul.f32 %v10383_v7, %v4248_v45  ;;  %v4148_v61 = vld [vmem:[#allocation3 + $0x20] sm:$0xff] }
 0x735   : > { %v10387_v35 = vpop.f32.mrb[54].mxu0  ;;  %v4349_v58 = vld [vmem:[#allocation3 + $0x1a] sm:$0xff]  ;;  %v6699_v27 = vmul.f32 -1.442695, %v10415_v43  ;;  %v4586_v37 = vmul.f32 %v10421_v56, %v4248_v45 }
 0x736   : > { %v10389_v14 = vpop.f32.mrb[55].mxu0  ;;  %v7759_v4 = vpop.eup %7758  ;;  %v4316_v36 = vadd.f32 %v4284_v24, %v4183_v5  ;;  %v4416_v51 = vadd.f32 %v4384_v62, %v4315_v15  ;;  %v4486_v24 = vmul.f32 %v10406_v47, %v4148_v61  ;;  %v4317_v34 = vadd.f32 %v4285_v11, %v4184_v1  ;;  %v4249_v52 = vld [vmem:[#allocation3 + $0x21] sm:$0xff] }
 0x737   : > { %v4086_v15 = vmul.f32 %v7759_v4, %v10321_v6  ;;  %v10430_v62 = vadd.f32 %v10295_v18, %v10347_v49  ;;  %v4386_v20 = vmul.f32 %v10396_v40, %v4349_v58  ;;  %v4185_v1 = vmul.f32 %v10375_v59, %v4148_v61  ;;  %v4250_v49 = vld [vmem:[#allocation3 + $0x31] sm:$0xff] }
 0x738   : > { %v7761_v50 = vpop.eup %7760  ;;  %v4417_v5 = vadd.f32 %v4385_v17, %v4316_v36  ;;  %v4517_v41 = vadd.f32 %v4485_v8, %v4416_v51  ;;  %v10441_v4 = vadd.f32 %v10349_v60, %v10295_v18  ;;  %v4286_v8 = vmul.f32 %v10383_v7, %v4249_v52 }
 0x739   : > { %v7763_v32 = vpop.eup %7762  ;;  %v4084_v36 = vmul.f32 %v7761_v50, %v10326_v53  ;;  %4120 = vst.msk [vmem:[#allocation3 + $0x69] sm:$0xff] %vm4112_vm14, %v4086_v15  ;;  %v4149_v53 = vld [vmem:[#allocation3 + $0x30] sm:$0xff]  ;;  %v4418_v50 = vadd.f32 %v4386_v20, %v4317_v34  ;;  %7770 = vpow2.f32 %v6699_v27  ;;  %v4287_v20 = vmul.f32 %v10383_v7, %v4250_v49  ;;  %v4153_v28 = vld [vmem:[#allocation3 + $0x60] sm:$0xff] }
 0x73a   : > { %v7765_v22 = vpop.eup %7764  ;;  %v4089_v17 = vmul.f32 %v7763_v32, %v10329_v29  ;;  %v4518_v51 = vadd.f32 %v4486_v24, %v4417_v5  ;;  %v6697_v29 = vmul.f32 -1.442695, %v10430_v62  ;;  %v4618_v60 = vadd.f32 %v4586_v37, %v4517_v41  ;;  %v4351_v24 = vld [vmem:[#allocation3 + $0x32] sm:$0xff] }
 0x73b   : > { %v10401_v63 = vpop.f32.mrb[56].mxu0  ;;  %v7767_v30 = vpop.eup %7766  ;;  %v4087_v6 = vmul.f32 %v7765_v22, %v10333_v39  ;;  %4118 = vst.msk [vmem:[#allocation3 + $0x51] sm:$0xff] %vm4112_vm14, %v4084_v36  ;;  %v10451_v22 = vld [vmem:[%s11893_s15 + $0x5] ss:$0 sm:$0xff]  ;;  %v10457_v39 = vadd.f32 %v10295_v18, %v10351_v46  ;;  %v4487_v11 = vmul.f32 %v10406_v47, %v4149_v53  ;;  %v4318_v61 = vadd.f32 %v4286_v8, %v4185_v1 }
 0x73c   : > { %v10408_v23 = vpop.f32.mrb[57].mxu0  ;;  %4123 = vst.msk [vmem:[#allocation3 + $0x91] sm:$0xff] %vm4112_vm14, %v4089_v17  ;;  %v4090_v32 = vmul.f32 %v7767_v30, %v10337_v21  ;;  %v4587_v30 = vmul.f32 %v10421_v56, %v4249_v52  ;;  %v4350_v21 = vld [vmem:[#allocation3 + $0x22] sm:$0xff]  ;;  %v4687_v5 = vmul.f32 %v10451_v22, %v4349_v58  ;;  %v4186_v37 = vmul.f32 %v10375_v59, %v4149_v53  ;;  %v10472_v52 = vld [vmem:[%s11893_s15 + $0x6] ss:$0 sm:$0xff]  ;;  %v4150_v58 = vld [vmem:[#allocation3 + $0x38] sm:$0xff] }
 0x73d   : > { %12114 = vst [vmem:[#allocation44_spill] sm:$0xff] %v10408_v23  ;;  %v10424_v33 = vpop.f32.mrb[58].mxu0  ;;  %4121 = vst.msk [vmem:[#allocation3 + $0x79] sm:$0xff] %vm4112_vm14, %v4087_v6  ;;  %7772 = vpow2.f32 %v6697_v29  ;;  %v6698_v41 = vmul.f32 -1.442695, %v10457_v39  ;;  %v4387_v34 = vmul.f32 %v10396_v40, %v4350_v21  ;;  %v4519_v15 = vadd.f32 %v4487_v11, %v4418_v50  ;;  %v4251_v6 = vld [vmem:[#allocation3 + $0x39] sm:$0xff] }
 0x73e   : > { %12115 = vst [vmem:[#allocation45_spill] sm:$0xff] %v10424_v33  ;;  %v7769_v38 = vpop.eup %7768  ;;  %4124 = vst.msk [vmem:[#allocation3 + $0x99] sm:$0xff] %vm4112_vm14, %v4090_v32  ;;  %v4619_v46 = vadd.f32 %v4587_v30, %v4518_v51  ;;  %v4688_v27 = vmul.f32 %v10451_v22, %v4350_v21  ;;  %v4719_v36 = vadd.f32 %v4687_v5, %v4618_v60  ;;  %v4151_v32 = vld [vmem:[#allocation3 + $0x48] sm:$0xff]  ;;  %v10482_v29 = vld [vmem:[%s11893_s15 + $0x7] ss:$0 sm:$0xff] }
 0x73f   : > { %v4088_v45 = vmul.f32 %v7769_v38, %v10341_v26  ;;  %v10462_v38 = vpop.f32.mrb[59].mxu0  ;;  %v6700_v26 = vmul.f32 -1.442695, %v10441_v4  ;;  %v4588_v17 = vmul.f32 %v10421_v56, %v4250_v49  ;;  %v4789_v1 = vmul.f32 %v10472_v52, %v4149_v53 }
 0x740   : > { %12116 = vst [vmem:[#allocation46_spill] sm:$0xff] %v10462_v38  ;;  %v4419_v8 = vadd.f32 %v4387_v34, %v4318_v61  ;;  %v4720_v51 = vadd.f32 %v4688_v27, %v4619_v46  ;;  %v4388_v50 = vmul.f32 %v10396_v40, %v4351_v24  ;;  %v4488_v60 = vmul.f32 %v10406_v47, %v4150_v58  ;;  %v4355_v38 = vld [vmem:[#allocation3 + $0x62] sm:$0xff] }
 0x741   : > { %4122 = vst.msk [vmem:[#allocation3 + $0x81] sm:$0xff] %vm4112_vm14, %v4088_v45  ;;  %7774 = vpow2.f32 %v6700_v26  ;;  %v4319_v45 = vadd.f32 %v4287_v20, %v4186_v37  ;;  %v4790_v30 = vmul.f32 %v10472_v52, %v4150_v58  ;;  %v4821_v21 = vadd.f32 %v4789_v1, %v4719_v36  ;;  %v4352_v20 = vld [vmem:[#allocation3 + $0x3a] sm:$0xff] }
 0x742   : > { %7776 = vpow2.f32 %v6698_v41  ;;  %v4620_v26 = vadd.f32 %v4588_v17, %v4519_v15  ;;  %v4187_v53 = vmul.f32 %v10375_v59, %v4150_v58  ;;  %v4288_v11 = vmul.f32 %v10383_v7, %v4251_v6  ;;  %v10503_v17 = vld [vmem:[%s11893_s15 + $0x8] ss:$0 sm:$0xff] }
 0x743   : > { %v4489_v61 = vmul.f32 %v10406_v47, %v4151_v32  ;;  %v10492_v46 = vadd.f32 %v10359_v48, %v10295_v18  ;;  %v10494_v5 = vpop.f32.mrb[60].mxu0  ;;  %v4890_v37 = vmul.f32 %v10482_v29, %v4250_v49  ;;  %v4689_v41 = vmul.f32 %v10451_v22, %v4351_v24  ;;  %v7771_v36 = vpop.eup %7770 }
 0x744   : > { %12117 = vst [vmem:[#allocation47_spill] sm:$0xff] %v10494_v5  ;;  %v4520_v34 = vadd.f32 %v4488_v60, %v4419_v8  ;;  %v4822_v27 = vadd.f32 %v4790_v30, %v4720_v51  ;;  %v10498_v15 = vpop.f32.mrb[61].mxu0  ;;  %v4420_v58 = vadd.f32 %v4388_v50, %v4319_v45  ;;  %v10507_v48 = vadd.f32 %v10295_v18, %v10362_v13  ;;  %v4252_v8 = vld [vmem:[#allocation3 + $0x49] sm:$0xff] }
 0x745   : > { %12118 = vst [vmem:[#allocation48_spill] sm:$0xff] %v10498_v15  ;;  %v4589_v49 = vmul.f32 %v10421_v56, %v4251_v6  ;;  %v4891_v1 = vmul.f32 %v10482_v29, %v4251_v6  ;;  %v4922_v2 = vadd.f32 %v4890_v37, %v4821_v21  ;;  %v4721_v51 = vadd.f32 %v4689_v41, %v4620_v26  ;;  %v4152_v60 = vld [vmem:[#allocation3 + $0x50] sm:$0xff]  ;;  %v10517_v21 = vld [vmem:[#allocation3 + $0x61] sm:$0xff]  ;;  %v10540_v15 = vpop.f32.mrb[62].mxu0 }
 0x746   : > { %v4320_v10 = vadd.f32 %v4288_v11, %v4187_v53  ;;  %v4389_v45 = vmul.f32 %v10396_v40, %v4352_v20  ;;  %v4521_v50 = vadd.f32 %v4489_v61, %v4420_v58  ;;  %v10513_v9 = vmul.f32 -1.442695, %v10492_v46  ;;  %v4353_v58 = vld [vmem:[#allocation3 + $0x4a] sm:$0xff]  ;;  %12120 = vst [vmem:[#allocation50_spill] sm:$0xff] %v10540_v15 }
 0x747   : > { %v7773_v30 = vpop.eup %7772  ;;  %v4991_v3 = vmul.f32 %v10503_v17, %v4351_v24  ;;  %v4923_v13 = vadd.f32 %v4891_v1, %v4822_v27  ;;  %v4791_v0 = vmul.f32 %v10472_v52, %v4151_v32  ;;  %v4621_v57 = vadd.f32 %v4589_v49, %v4520_v34  ;;  %v10528_v49 = vld [vmem:[%s11894_s16] ss:$0 sm:$0xff] }
 0x748   : > { %v4188_v26 = vmul.f32 %v10375_v59, %v4151_v32  ;;  %v4289_v53 = vmul.f32 %v10383_v7, %v4252_v8  ;;  %v4590_v11 = vmul.f32 %v10421_v56, %v4252_v8  ;;  %v4490_v61 = vmul.f32 %v10406_v47, %v4152_v60 }
 0x749   : > { %v4690_v37 = vmul.f32 %v10451_v22, %v4352_v20  ;;  %v4992_v24 = vmul.f32 %v10503_v17, %v4352_v20  ;;  %v5023_v41 = vadd.f32 %v4991_v3, %v4922_v2  ;;  %v4823_v27 = vadd.f32 %v4791_v0, %v4721_v51  ;;  %v4253_v2 = vld [vmem:[#allocation3 + $0x51] sm:$0xff] }
 0x74a   : > { %v4421_v34 = vadd.f32 %v4389_v45, %v4320_v10  ;;  %v4190_v32 = vmul.f32 %v10375_v59, %v4153_v28  ;;  %v4622_v19 = vadd.f32 %v4590_v11, %v4521_v50  ;;  %v4291_v3 = vmul.f32 %v10383_v7, %v10517_v21 }
 0x74b   : > { %v7775_v6 = vpop.eup %7774  ;;  %v5024_v42 = vadd.f32 %v4992_v24, %v4923_v13  ;;  %v4892_v0 = vmul.f32 %v10482_v29, %v4252_v8  ;;  %v4722_v10 = vadd.f32 %v4690_v37, %v4621_v57  ;;  %v4793_v20 = vmul.f32 %v10472_v52, %v4153_v28 }
 0x74c   : > { %v7777_v1 = vpop.eup %7776  ;;  %v4321_v51 = vadd.f32 %v4289_v53, %v4188_v26  ;;  %v4522_v45 = vadd.f32 %v4490_v61, %v4421_v34  ;;  %v4691_v54 = vmul.f32 %v10451_v22, %v4353_v58  ;;  %v10543_v50 = vadd.f32 %v10528_v49, %v5023_v41  ;;  %v4354_v61 = vld [vmem:[#allocation3 + $0x52] sm:$0xff]  ;;  %v10552_v41 = vpop.f32.mrb[63].mxu0 }
 0x74d   : > { %v4924_v31 = vadd.f32 %v4892_v0, %v4823_v27  ;;  %v4792_v13 = vmul.f32 %v10472_v52, %v4152_v60  ;;  %v3997_v11 = vadd.f32 1.0, %v7771_v36  ;;  %v4591_v24 = vmul.f32 %v10421_v56, %v4253_v2  ;;  %12121 = vst [vmem:[#allocation51_spill] sm:$0xff] %v10552_v41 }
 0x74e   : > { %v4723_v8 = vadd.f32 %v4691_v54, %v4622_v19  ;;  %v3995_v5 = vadd.f32 1.0, %v7773_v30  ;;  %v3998_v57 = vadd.f32 1.0, %v7775_v6  ;;  %v10548_v37 = vadd.f32 %v10528_v49, %v5024_v42  ;;  %v4255_v30 = vld [vmem:[#allocation3 + $0x69] sm:$0xff] }
 0x74f   : > { %v4189_v26 = vmul.f32 %v10375_v59, %v4152_v60  ;;  %v4290_v53 = vmul.f32 %v10383_v7, %v4253_v2  ;;  %v4824_v34 = vadd.f32 %v4792_v13, %v4722_v10  ;;  %v4390_v27 = vmul.f32 %v10396_v40, %v4353_v58  ;;  %v4154_v60 = vld [vmem:[#allocation3 + $0x68] sm:$0xff] }
 0x750   : > { %v4623_v0 = vadd.f32 %v4591_v24, %v4522_v45  ;;  %v4993_v36 = vmul.f32 %v10503_v17, %v4353_v58  ;;  %v3996_v15 = vadd.f32 1.0, %v7777_v1  ;;  %v6727_v54 = vmul.f32 -1.442695, %v10543_v50 }
 0x751   : > { %v4491_v19 = vmul.f32 %v10406_v47, %v4153_v28  ;;  %v4893_v42 = vmul.f32 %v10482_v29, %v4253_v2  ;;  %7778 = vrcp.f32 %v3997_v11  ;;  %v4692_v6 = vmul.f32 %v10451_v22, %v4354_v61 }
 0x752   : > { %v4825_v10 = vadd.f32 %v4793_v20, %v4723_v8  ;;  %v5025_v13 = vadd.f32 %v4993_v36, %v4924_v31  ;;  %7780 = vrcp.f32 %v3995_v5  ;;  %v6728_v41 = vmul.f32 -1.442695, %v10548_v37 }
 0x753   : > { %v4322_v45 = vadd.f32 %v4290_v53, %v4189_v26  ;;  %v4925_v24 = vadd.f32 %v4893_v42, %v4824_v34  ;;  %7782 = vrcp.f32 %v3998_v57  ;;  %v4894_v58 = vmul.f32 %v10482_v29, %v10517_v21  ;;  %v10571_v53 = vld [vmem:[#allocation3 + $0x78] sm:$0xff]  ;;  %v4356_v42 = vld [vmem:[#allocation3 + $0x6a] sm:$0xff] }
 0x754   : > { %v4422_v1 = vadd.f32 %v4390_v27, %v4321_v51  ;;  %v4724_v28 = vadd.f32 %v4692_v6, %v4623_v0  ;;  %7784 = vrcp.f32 %v3996_v15  ;;  %v4191_v2 = vmul.f32 %v10375_v59, %v4154_v60 }
 0x755   : > { %v4292_v11 = vmul.f32 %v10383_v7, %v4255_v30  ;;  %v4391_v20 = vmul.f32 %v10396_v40, %v4354_v61  ;;  %v4994_v5 = vmul.f32 %v10503_v17, %v4354_v61  ;;  %7786 = vpow2.f32 %v6727_v54 }
 0x756   : > { %v4794_v31 = vmul.f32 %v10472_v52, %v4154_v60  ;;  %v4926_v8 = vadd.f32 %v4894_v58, %v4825_v10  ;;  %v10569_v57 = vadd.f32 %v10528_v49, %v5025_v13  ;;  %7788 = vpow2.f32 %v6728_v41 }
 0x757   : > { %v4323_v51 = vadd.f32 %v4291_v3, %v4190_v32  ;;  %v4423_v26 = vadd.f32 %v4391_v20, %v4322_v45  ;;  %v5026_v15 = vadd.f32 %v4994_v5, %v4925_v24  ;;  %v4392_v34 = vmul.f32 %v10396_v40, %v4355_v38 }
 0x758   : > { %v4995_v27 = vmul.f32 %v10503_v17, %v4355_v38  ;;  %v4523_v0 = vadd.f32 %v4491_v19, %v4422_v1  ;;  %v4826_v36 = vadd.f32 %v4794_v31, %v4724_v28  ;;  %v4592_v61 = vmul.f32 %v10421_v56, %v10517_v21  ;;  %v10585_v19 = vld [vmem:[#allocation3 + $0x80] sm:$0xff] }
 0x759   : > { %v4324_v54 = vadd.f32 %v4292_v11, %v4191_v2  ;;  %v4492_v6 = vmul.f32 %v10406_v47, %v4154_v60  ;;  %v10579_v41 = vmul.f32 -1.442695, %v10507_v48  ;;  %v4895_v32 = vmul.f32 %v10482_v29, %v4255_v30 }
 0x75a   : > { %v5027_v3 = vadd.f32 %v4995_v27, %v4926_v8  ;;  %v6729_v10 = vmul.f32 -1.442695, %v10569_v57  ;;  %v4493_v13 = vmul.f32 %v10406_v47, %v10571_v53  ;;  %v10588_v21 = vadd.f32 %v10528_v49, %v5026_v15  ;;  %v4256_v15 = vld [vmem:[#allocation3 + $0x79] sm:$0xff] }
 0x75b   : > { %v7779_v45 = vpop.eup %7778  ;;  %v4524_v24 = vadd.f32 %v4492_v6, %v4423_v26  ;;  %v10591_v60 = vmul.f32 -1.442695, %v10533_v25  ;;  %v10595_v58 = vadd.f32 %v10295_v18, %v10367_v16  ;;  %v4393_v28 = vmul.f32 %v10396_v40, %v4356_v42  ;;  %v4257_v25 = vld [vmem:[#allocation3 + $0x81] sm:$0xff] }
 0x75c   : > { %v7781_v1 = vpop.eup %7780  ;;  %v4424_v2 = vadd.f32 %v4392_v34, %v4323_v51  ;;  %v4927_v11 = vadd.f32 %v4895_v32, %v4826_v36  ;;  %v4624_v20 = vadd.f32 %v4592_v61, %v4523_v0  ;;  %v4593_v31 = vmul.f32 %v10421_v56, %v4255_v30 }
 0x75d   : > { %v7783_v5 = vpop.eup %7782  ;;  %v4693_v8 = vmul.f32 %v10451_v22, %v4355_v38  ;;  %v4996_v26 = vmul.f32 %v10503_v17, %v4356_v42  ;;  %v4494_v27 = vmul.f32 %v10406_v47, %v10585_v19  ;;  %v4425_v16 = vadd.f32 %v4393_v28, %v4324_v54 }
 0x75e   : > { %v7785_v6 = vpop.eup %7784  ;;  %v10604_v33 = vadd.f32 %v10528_v49, %v5027_v3  ;;  %7790 = vpow2.f32 %v6729_v10  ;;  %v4525_v51 = vadd.f32 %v4493_v13, %v4424_v2  ;;  %v6730_v34 = vmul.f32 -1.442695, %v10588_v21  ;;  %v4357_v13 = vld [vmem:[#allocation3 + $0x7a] sm:$0xff] }
 0x75f   : > { %v4625_v0 = vadd.f32 %v4593_v31, %v4524_v24  ;;  %v4093_v30 = vmul.f32 %v7779_v45, %v10415_v43  ;;  %v4091_v38 = vmul.f32 %v7781_v1, %v10430_v62  ;;  %v7787_v36 = vpop.eup %7786  ;;  %v5028_v61 = vadd.f32 %v4996_v26, %v4927_v11  ;;  %v4358_v31 = vld [vmem:[#allocation3 + $0x82] sm:$0xff]  ;;  %v4157_v26 = vld [vmem:[#allocation3 + $0x90] sm:$0xff] }
 0x760   : > { %v4594_v32 = vmul.f32 %v10421_v56, %v4256_v15  ;;  %v4725_v23 = vadd.f32 %v4693_v8, %v4624_v20  ;;  %v10611_v54 = vmul.f32 -1.442695, %v10595_v58  ;;  %v7789_v3 = vpop.eup %7788  ;;  %v4694_v10 = vmul.f32 %v10451_v22, %v4356_v42 }
 0x761   : > { %v4526_v28 = vadd.f32 %v4494_v27, %v4425_v16  ;;  %4127 = vst.msk [vmem:[#allocation3 + $0xc1] sm:$0xff] %vm4112_vm14, %v4093_v30  ;;  %4125 = vst.msk [vmem:[#allocation3 + $0xa9] sm:$0xff] %vm4112_vm14, %v4091_v38  ;;  %v4094_v43 = vmul.f32 %v7783_v5, %v10441_v4  ;;  %v4092_v62 = vmul.f32 %v7785_v6, %v10457_v39  ;;  %v6731_v45 = vmul.f32 -1.442695, %v10604_v33 }
 0x762   : > { %v4626_v24 = vadd.f32 %v4594_v32, %v4525_v51  ;;  %v4795_v1 = vmul.f32 %v10472_v52, %v10571_v53  ;;  %v10623_v2 = vadd.f32 %v10378_v55, %v10295_v18  ;;  %v5190_v42 = vadd.f32 1.0, %v7787_v36  ;;  %v4158_v32 = vld [vmem:[#allocation3 + $0x98] sm:$0xff] }
 0x763   : > { %7792 = vpow2.f32 %v6730_v34  ;;  %v4595_v11 = vmul.f32 %v10421_v56, %v4257_v25  ;;  %v4726_v20 = vadd.f32 %v4694_v10, %v4625_v0  ;;  %4128 = vst.msk [vmem:[#allocation3 + $0xc9] sm:$0xff] %vm4112_vm14, %v4094_v43  ;;  %4126 = vst.msk [vmem:[#allocation3 + $0xb1] sm:$0xff] %vm4112_vm14, %v4092_v62  ;;  %v5191_v4 = vadd.f32 1.0, %v7789_v3  ;;  %v4258_v3 = vld [vmem:[#allocation3 + $0x91] sm:$0xff] }
 0x764   : > { %v10629_v39 = vadd.f32 %v10528_v49, %v5028_v61  ;;  %v4827_v5 = vadd.f32 %v4795_v1, %v4725_v23  ;;  %v4695_v8 = vmul.f32 %v10451_v22, %v4357_v13  ;;  %v4192_v55 = vmul.f32 %v10375_v59, %v10571_v53 }
 0x765   : > { %v4627_v27 = vadd.f32 %v4595_v11, %v4526_v28  ;;  %v4796_v6 = vmul.f32 %v10472_v52, %v10585_v19  ;;  %v10638_v16 = vadd.f32 %v10295_v18, %v10385_v12  ;;  %7794 = vpow2.f32 %v6731_v45 }
 0x766   : > { %v4293_v51 = vmul.f32 %v10383_v7, %v4256_v15  ;;  %v4896_v23 = vmul.f32 %v10482_v29, %v4256_v15  ;;  %v4727_v34 = vadd.f32 %v4695_v8, %v4626_v24  ;;  %7796 = vrcp.f32 %v5190_v42 }
 0x767   : > { %v4696_v0 = vmul.f32 %v10451_v22, %v4358_v31  ;;  %v4828_v30 = vadd.f32 %v4796_v6, %v4726_v20  ;;  %v10645_v53 = vadd.f32 %v10387_v35, %v10295_v18  ;;  %7798 = vrcp.f32 %v5191_v4  ;;  %v4259_v4 = vld [vmem:[#allocation3 + $0x99] sm:$0xff] }
 0x768   : > { %v7791_v38 = vpop.eup %7790  ;;  %v6732_v36 = vmul.f32 -1.442695, %v10629_v39  ;;  %v4797_v12 = vmul.f32 %v10472_v52, %v4157_v26  ;;  %v4928_v61 = vadd.f32 %v4896_v23, %v4827_v5  ;;  %v4193_v15 = vmul.f32 %v10375_v59, %v10585_v19 }
 0x769   : > { %v4294_v10 = vmul.f32 %v10383_v7, %v4257_v25  ;;  %v4728_v28 = vadd.f32 %v4696_v0, %v4627_v27  ;;  %v4897_v43 = vmul.f32 %v10482_v29, %v4257_v25  ;;  %v4325_v62 = vadd.f32 %v4293_v51, %v4192_v55  ;;  %v4359_v55 = vld [vmem:[#allocation3 + $0x92] sm:$0xff] }
 0x76a   : > { %v4394_v35 = vmul.f32 %v10396_v40, %v4357_v13  ;;  %v4829_v45 = vadd.f32 %v4797_v12, %v4727_v34  ;;  %v4997_v24 = vmul.f32 %v10503_v17, %v4357_v13  ;;  %v5192_v1 = vadd.f32 1.0, %v7791_v38 }
 0x76b   : > { %v4798_v42 = vmul.f32 %v10472_v52, %v4158_v32  ;;  %v4929_v11 = vadd.f32 %v4897_v43, %v4828_v30  ;;  %v10657_v20 = vmul.f32 -1.442695, %v10623_v2  ;;  %7800 = vpow2.f32 %v6732_v36  ;;  %v4360_v36 = vld [vmem:[#allocation3 + $0x9a] sm:$0xff] }
 0x76c   : > { %v4898_v19 = vmul.f32 %v10482_v29, %v4258_v3  ;;  %v5029_v5 = vadd.f32 %v4997_v24, %v4928_v61  ;;  %v10662_v25 = vadd.f32 %v10295_v18, %v10389_v14  ;;  %v4326_v27 = vadd.f32 %v4294_v10, %v4193_v15 }
 0x76d   : > { %v7793_v8 = vpop.eup %7792  ;;  %v4830_v13 = vadd.f32 %v4798_v42, %v4728_v28  ;;  %v4998_v6 = vmul.f32 %v10503_v17, %v4358_v31  ;;  %7802 = vpow2.f32 %v10513_v9  ;;  %v4495_v51 = vmul.f32 %v10406_v47, %v4157_v26 }
 0x76e   : > { %v4426_v23 = vadd.f32 %v4394_v35, %v4325_v62  ;;  %v4930_v34 = vadd.f32 %v4898_v19, %v4829_v45  ;;  %7804 = vpow2.f32 %v10579_v41  ;;  %v4899_v0 = vmul.f32 %v10482_v29, %v4259_v4 }
 0x76f   : > { %7806 = vrcp.f32 %v5192_v1  ;;  %v4395_v18 = vmul.f32 %v10396_v40, %v4358_v31  ;;  %v5030_v14 = vadd.f32 %v4998_v6, %v4929_v11  ;;  %v7795_v30 = vpop.eup %7794  ;;  %v5193_v38 = vadd.f32 1.0, %v7793_v8  ;;  %v10688_v8 = vld [vmem:[#allocation3 + $0xa8] sm:$0xff] }
 0x770   : > { %v4999_v12 = vmul.f32 %v10503_v17, %v4359_v55  ;;  %v10672_v61 = vadd.f32 %v10528_v49, %v5029_v5  ;;  %7808 = vpow2.f32 %v10591_v60  ;;  %v7797_v9 = vpop.eup %7796  ;;  %v4194_v15 = vmul.f32 %v10375_v59, %v4157_v26 }
 0x771   : > { %v4295_v41 = vmul.f32 %v10383_v7, %v4258_v3  ;;  %v4427_v10 = vadd.f32 %v4395_v18, %v4326_v27  ;;  %v4931_v28 = vadd.f32 %v4899_v0, %v4830_v13  ;;  %v7799_v43 = vpop.eup %7798  ;;  %v4596_v31 = vmul.f32 %v10421_v56, %v4258_v3 }
 0x772   : > { %v4527_v62 = vadd.f32 %v4495_v51, %v4426_v23  ;;  %v5031_v35 = vadd.f32 %v4999_v12, %v4930_v34  ;;  %7810 = vpow2.f32 %v10611_v54  ;;  %v5194_v45 = vadd.f32 1.0, %v7795_v30 }
 0x773   : > { %v4496_v24 = vmul.f32 %v10406_v47, %v4158_v32  ;;  %v5000_v1 = vmul.f32 %v10503_v17, %v4360_v36  ;;  %v10682_v60 = vadd.f32 %v10528_v49, %v5030_v14  ;;  %7812 = vrcp.f32 %v5193_v38 }
 0x774   : > { %v4195_v26 = vmul.f32 %v10375_v59, %v4158_v32  ;;  %v4296_v42 = vmul.f32 %v10383_v7, %v4259_v4  ;;  %v6733_v11 = vmul.f32 -1.442695, %v10672_v61  ;;  %v4327_v3 = vadd.f32 %v4295_v41, %v4194_v15 }
 0x775   : > { %v4396_v19 = vmul.f32 %v10396_v40, %v4359_v55  ;;  %v4528_v5 = vadd.f32 %v4496_v24, %v4427_v10  ;;  %v5032_v54 = vadd.f32 %v5000_v1, %v4931_v28  ;;  %v7801_v27 = vpop.eup %7800  ;;  %v10691_v13 = vmul.f32 %v7797_v9, %v10543_v50 }
 0x776   : > { %v10694_v6 = vadd.f32 %v10528_v49, %v5031_v35  ;;  %v4628_v51 = vadd.f32 %v4596_v31, %v4527_v62  ;;  %v10697_v32 = vmul.f32 -1.442695, %v10638_v16  ;;  %v10700_v34 = vmul.f32 %v7799_v43, %v10548_v37  ;;  %v10715_v35 = vld [vmem:[#allocation3 + $0xa9] sm:$0xff] }
 0x777   : > { %12122 = vst [vmem:[#allocation52_spill] sm:$0xff] %v10691_v13  ;;  %v7803_v23 = vpop.eup %7802  ;;  %7814 = vrcp.f32 %v5194_v45  ;;  %v4597_v0 = vmul.f32 %v10421_v56, %v4259_v4  ;;  %v6734_v18 = vmul.f32 -1.442695, %v10682_v60  ;;  %v4328_v30 = vadd.f32 %v4296_v42, %v4195_v26  ;;  %v10717_v45 = vld [vmem:[#allocation3 + $0xb0] sm:$0xff] }
 0x778   : > { %12123 = vst [vmem:[#allocation53_spill] sm:$0xff] %v10700_v34  ;;  %v7805_v14 = vpop.eup %7804  ;;  %v4697_v50 = vmul.f32 %v10451_v22, %v4359_v55  ;;  %7816 = vpow2.f32 %v6733_v11  ;;  %v4497_v38 = vmul.f32 %v10406_v47, %v10688_v8  ;;  %v4397_v9 = vmul.f32 %v10396_v40, %v4360_v36 }
 0x779   : > { %v7807_v12 = vpop.eup %7806  ;;  %v4428_v15 = vadd.f32 %v4396_v19, %v4327_v3  ;;  %v10709_v37 = vadd.f32 %v10528_v49, %v5032_v54  ;;  %v4629_v41 = vadd.f32 %v4597_v0, %v4528_v5  ;;  %v4698_v4 = vmul.f32 %v10451_v22, %v4360_v36  ;;  %v10731_v0 = vld [vmem:[#allocation3 + $0xaa] sm:$0xff] }
 0x77a   : > { %v7809_v10 = vpop.eup %7808  ;;  %v6735_v28 = vmul.f32 -1.442695, %v10694_v6  ;;  %v4729_v43 = vadd.f32 %v4697_v50, %v4628_v51  ;;  %v4001_v31 = vadd.f32 1.0, %v7803_v23  ;;  %v5195_v55 = vadd.f32 1.0, %v7801_v27 }
 0x77b   : > { %v5319_v62 = vsel %vm4112_vm14, %v10700_v34, 0.0  ;;  %7818 = vpow2.f32 %v6734_v18  ;;  %v3999_v24 = vadd.f32 1.0, %v7805_v14  ;;  %v10720_v26 = vmul.f32 %v7807_v12, %v10569_v57 }
 0x77c   : > { %v7811_v1 = vpop.eup %7810  ;;  %v4529_v42 = vadd.f32 %v4497_v38, %v4428_v15  ;;  %v4799_v36 = vmul.f32 %v10472_v52, %v10688_v8  ;;  %7820 = vrcp.f32 %v4001_v31  ;;  %v6736_v11 = vmul.f32 -1.442695, %v10709_v37 }
 0x77d   : > { %12124 = vst [vmem:[#allocation54_spill] sm:$0xff] %v10720_v26  ;;  %v4730_v3 = vadd.f32 %v4698_v4, %v4629_v41  ;;  %7822 = vrcp.f32 %v3999_v24  ;;  %v4002_v19 = vadd.f32 1.0, %v7809_v10  ;;  %v7813_v5 = vpop.eup %7812  ;;  %v4598_v54 = vmul.f32 %v10421_v56, %v10715_v35 }
 0x77e   : > { %7824 = vpow2.f32 %v6735_v28  ;;  %v4831_v27 = vadd.f32 %v4799_v36, %v4729_v43  ;;  %v4498_v57 = vmul.f32 %v10406_v47, %v10717_v45  ;;  %v5318_v51 = vsel %vm4112_vm14, %v10691_v13, 0.0 }
 0x77f   : > { %v4429_v23 = vadd.f32 %v4397_v9, %v4328_v30  ;;  %7826 = vrcp.f32 %v4002_v19  ;;  %v4000_v18 = vadd.f32 1.0, %v7811_v1  ;;  %v4630_v14 = vadd.f32 %v4598_v54, %v4529_v42  ;;  %v4261_v9 = vld [vmem:[#allocation3 + $0xb1] sm:$0xff]  ;;  %v10761_v42 = vld [vmem:[#allocation3 + $0xc1] sm:$0xff] }
 0x780   : > { %7828 = vrcp.f32 %v5195_v55  ;;  %v4900_v50 = vmul.f32 %v10482_v29, %v10715_v35  ;;  %v4800_v38 = vmul.f32 %v10472_v52, %v10717_v45  ;;  %v10738_v15 = vmul.f32 %v7813_v5, %v10588_v21  ;;  %v10744_v55 = vld [vmem:[#allocation3 + $0xc0] sm:$0xff] }
 0x781   : > { %v7815_v12 = vpop.eup %7814  ;;  %v5320_v41 = vadd.f32 %v5319_v62, %v5318_v51  ;;  %v5321_v30 = vsel %vm4112_vm14, %v10720_v26, 0.0  ;;  %7830 = vpow2.f32 %v6736_v11  ;;  %v4530_v28 = vadd.f32 %v4498_v57, %v4429_v23  ;;  %v10755_v62 = vld [vmem:[%s11892_s14] ss:$0 sm:$0xff]  ;;  %v4362_v51 = vld [vmem:[#allocation3 + $0xb2] sm:$0xff] }
 0x782   : > { %12125 = vst [vmem:[#allocation55_spill] sm:$0xff] %v10738_v15  ;;  %v7817_v10 = vpop.eup %7816  ;;  %v4932_v4 = vadd.f32 %v4900_v50, %v4831_v27  ;;  %v4699_v43 = vmul.f32 %v10451_v22, %v10731_v0  ;;  %v4832_v31 = vadd.f32 %v4800_v38, %v4730_v3  ;;  %7832 = vrcp.f32 %v4000_v18  ;;  %v7316_v23 = vld [vmem:[%s11895_s17] sm:$0xff]  }
 0x783   : > { %v10747_v24 = vmul.f32 -1.442695, %v10645_v53  ;;  %v10750_v21 = vmul.f32 -1.442695, %v10662_v25  ;;  %v10759_v1 = vadd.f32 %v10755_v62, %v10401_v63  ;;  %v4599_v36 = vmul.f32 %v10421_v56, %v4261_v9  ;;  %7141 = vmatpush3.bf16.msra.mxu0 %v7316_v23 }
 0x784   : > { %v4731_v11 = vadd.f32 %v4699_v43, %v4630_v14  ;;  %v4901_v3 = vmul.f32 %v10482_v29, %v4261_v9  ;;  %v5001_v19 = vmul.f32 %v10503_v17, %v10731_v0  ;;  %v10768_v54 = vmul.f32 %v7815_v12, %v10604_v33  ;;  %7142 = vmatprep.subr.bf16.mxu0 %v12057_v44 }
 0x785   : > { %v7819_v5 = vpop.eup %7818  ;;  %v5322_v27 = vadd.f32 %v5321_v30, %v5320_v41  ;;  %v5323_v57 = vsel %vm4112_vm14, %v10738_v15, 0.0  ;;  %v5196_v63 = vadd.f32 1.0, %v7817_v10  ;;  %v4801_v14 = vmul.f32 %v10472_v52, %v10744_v55  ;;  %v7317_v10 = vld [vmem:[%s11895_s17 + $0x8] sm:$0xff]   ;;  %v10795_v15 = vld [vmem:[#allocation3 + $0xc2] sm:$0xff] }
 0x786   : > { %v7821_v18 = vpop.eup %7820  ;;  %v4631_v50 = vadd.f32 %v4599_v36, %v4530_v28  ;;  %v4933_v38 = vadd.f32 %v4901_v3, %v4832_v31  ;;  %v5033_v43 = vadd.f32 %v5001_v19, %v4932_v4  ;;  %v4902_v33 = vmul.f32 %v10482_v29, %v10761_v42 }
 0x787   : > { %v7823_v26 = vpop.eup %7822  ;;  %v4196_v12 = vmul.f32 %v10375_v59, %v10688_v8  ;;  %v4297_v41 = vmul.f32 %v10383_v7, %v10715_v35  ;;  %v4097_v30 = vmul.f32 %v7821_v18, %v10492_v46  ;;  %v4700_v4 = vmul.f32 %v10451_v22, %v4362_v51  ;;  %v4162_v35 = vld [vmem:[#allocation3 + $0xc8] sm:$0xff]  ;;  %7143 = vmatpush3.bf16.msra.mxu0 %v7317_v10 }
 0x788   : > { %v7825_v28 = vpop.eup %7824  ;;  %v4833_v31 = vadd.f32 %v4801_v14, %v4731_v11  ;;  %v5002_v36 = vmul.f32 %v10503_v17, %v4362_v51  ;;  %v4095_v3 = vmul.f32 %v7823_v26, %v10507_v48  ;;  %v5197_v19 = vadd.f32 1.0, %v7819_v5  ;;  %v12126_v26 = vld [vmem:[#allocation49_spill] sm:$0xff]  ;;  %7144 = vmatprep.subr.bf16.mxu0 %v12057_v44 }
 0x789   : > { %v7827_v8 = vpop.eup %7826  ;;  %7834 = vrcp.f32 %v5196_v63  ;;  %v4197_v46 = vmul.f32 %v10375_v59, %v10717_v45  ;;  %v4298_v23 = vmul.f32 %v10383_v7, %v4261_v9  ;;  %4131 = vst.msk [vmem:[#allocation3 + $0xf1] sm:$0xff] %vm4112_vm14, %v4097_v30  ;;  %v4732_v11 = vadd.f32 %v4700_v4, %v4631_v50  ;;  %v7318_v50 = vld [vmem:[%s11895_s17 + $0x10] sm:$0xff]  }
 0x78a   : > { %v7829_v18 = vpop.eup %7828  ;;  %v5034_v14 = vadd.f32 %v5002_v36, %v4933_v38  ;;  %v10798_v48 = vadd.f32 %v10528_v49, %v5033_v43  ;;  %4129 = vst.msk [vmem:[#allocation3 + $0xd9] sm:$0xff] %vm4112_vm14, %v4095_v3  ;;  %v4098_v5 = vmul.f32 %v7827_v8, %v12126_v26  ;;  %v5324_v34 = vadd.f32 %v5323_v57, %v5322_v27  ;;  %v4263_v27 = vld [vmem:[#allocation3 + $0xc9] sm:$0xff] }
 0x78b   : > { %v7831_v63 = vpop.eup %7830  ;;  %v5198_v13 = vadd.f32 1.0, %v7825_v28  ;;  %v4198_v45 = vmul.f32 %v10375_v59, %v10744_v55  ;;  %v4299_v9 = vmul.f32 %v10383_v7, %v10761_v42  ;;  %v4329_v38 = vadd.f32 %v4297_v41, %v4196_v12  ;;  %7145 = vmatpush3.bf16.msra.mxu0 %v7318_v50  ;;  %v7319_v3 = vld [vmem:[%s11895_s17 + $0x18] sm:$0xff]  }
 0x78c   : > { %v4802_v43 = vmul.f32 %v10472_v52, %v4162_v35  ;;  %v4398_v30 = vmul.f32 %v10396_v40, %v10731_v0  ;;  %v4934_v4 = vadd.f32 %v4902_v33, %v4833_v31  ;;  %4132 = vst.msk [vmem:[#allocation3 + $0xf9] sm:$0xff] %vm4112_vm14, %v4098_v5  ;;  %v7833_v59 = vpop.eup %7832  ;;  %v5325_v7 = vsel %vm4112_vm14, %v10768_v54, 0.0  ;;  %7146 = vmatprep.subr.bf16.mxu0 %v12057_v44 }
 0x78d   : > { %7836 = vrcp.f32 %v5197_v19  ;;  %v5003_v57 = vmul.f32 %v10503_v17, %v10795_v15  ;;  %v4330_v12 = vadd.f32 %v4298_v23, %v4197_v46  ;;  %v10819_v10 = vadd.f32 %v10528_v49, %v5034_v14  ;;  %v12127_v23 = vld [vmem:[#allocation44_spill] sm:$0xff] }
 0x78e   : > { %v4834_v41 = vadd.f32 %v4802_v43, %v4732_v11  ;;  %v6737_v0 = vmul.f32 -1.442695, %v10798_v48  ;;  %v4096_v33 = vmul.f32 %v7833_v59, %v10595_v58  ;;  %v10824_v28 = vmul.f32 %v7829_v18, %v10629_v39  ;;  %v10842_v11 = vld [vmem:[%s11893_s15] ss:$0 sm:$0xff]  ;;  %v10864_v43 = vld [vmem:[%s11893_s15 + $0x1] ss:$0 sm:$0xff] }
 0x78f   : > { %v5199_v31 = vadd.f32 1.0, %v7831_v63  ;;  %7838 = vrcp.f32 %v5198_v13  ;;  %v4399_v36 = vmul.f32 %v10396_v40, %v4362_v51  ;;  %v4903_v8 = vmul.f32 %v10482_v29, %v4263_v27  ;;  %v4364_v51 = vld [vmem:[#allocation3 + $0xca] sm:$0xff]  ;;  %7147 = vmatpush3.bf16.msra.mxu0 %v7319_v3 }
 0x790   : > { %v4430_v19 = vadd.f32 %v4398_v30, %v4329_v38  ;;  %v5035_v46 = vadd.f32 %v5003_v57, %v4934_v4  ;;  %4130 = vst.msk [vmem:[#allocation3 + $0xe1] sm:$0xff] %vm4112_vm14, %v4096_v33  ;;  %v10834_v58 = vadd.f32 %v10755_v62, %v12127_v23  ;;  %v5326_v39 = vadd.f32 %v5325_v7, %v5324_v34  ;;  %v7320_v38 = vld [vmem:[%s11895_s17 + $0x20] sm:$0xff]  }
 0x791   : > { %v4331_v13 = vadd.f32 %v4299_v9, %v4198_v45  ;;  %v4499_v40 = vmul.f32 %v10406_v47, %v10744_v55  ;;  %v4431_v18 = vadd.f32 %v4399_v36, %v4330_v12  ;;  %v4199_v14 = vmul.f32 %v10842_v11, %v4162_v35  ;;  %v10846_v63 = vld [vmem:[#allocation3 + $0xd8] sm:$0xff]  ;;  %v10853_v45 = vld [vmem:[%s11893_s15 + $0x2] ss:$0 sm:$0xff]  ;;  %7148 = vmatprep.subr.bf16.mxu0 %v12057_v44 }
 0x792   : > { %v4935_v26 = vadd.f32 %v4903_v8, %v4834_v41  ;;  %7840 = vpow2.f32 %v6737_v0  ;;  %v6738_v5 = vmul.f32 -1.442695, %v10819_v10  ;;  %v5327_v55 = vsel %vm4112_vm14, %v10824_v28, 0.0 }
 0x793   : > { %v7835_v34 = vpop.eup %7834  ;;  %7842 = vrcp.f32 %v5199_v31  ;;  %v4400_v9 = vmul.f32 %v10853_v45, %v10795_v15  ;;  %v4500_v50 = vmul.f32 %v10406_v47, %v4162_v35  ;;  %v4300_v30 = vmul.f32 %v10864_v43, %v4263_v27  ;;  %v10875_v35 = vld [vmem:[%s11893_s15 + $0x3] ss:$0 sm:$0xff]  ;;  %7149 = vmatpush3.bf16.msra.mxu0 %v7320_v38 }
 0x794   : > { %v5004_v4 = vmul.f32 %v10503_v17, %v4364_v51  ;;  %v4531_v59 = vadd.f32 %v4499_v40, %v4430_v19  ;;  %v10869_v7 = vadd.f32 %v10528_v49, %v5035_v46  ;;  %v4501_v57 = vmul.f32 %v10875_v35, %v10846_v63  ;;  %v10892_v46 = vld [vmem:[#allocation3 + $0xd9] sm:$0xff]  ;;  %7150 = vmatprep.subr.bf16.mxu0 %v12057_v44 }
 0x795   : > { %v4532_v47 = vadd.f32 %v4500_v50, %v4431_v18  ;;  %7844 = vpow2.f32 %v10657_v20  ;;  %v6711_v12 = vmul.f32 -1.442695, %v10759_v1  ;;  %v10882_v41 = vmul.f32 %v7835_v34, %v10672_v61  ;;  %v7321_v20 = vld [vmem:[%s11895_s17 + $0x28] sm:$0xff]  }
 0x796   : > { %v4600_v0 = vmul.f32 %v10421_v56, %v10761_v42  ;;  %v5036_v33 = vadd.f32 %v5004_v4, %v4935_v26  ;;  %7846 = vpow2.f32 %v6738_v5  ;;  %v5328_v36 = vadd.f32 %v5327_v55, %v5326_v39 }
 0x797   : > { %v7837_v31 = vpop.eup %7836  ;;  %v4432_v3 = vadd.f32 %v4400_v9, %v4331_v13  ;;  %v4601_v8 = vmul.f32 %v10421_v56, %v4263_v27  ;;  %7848 = vpow2.f32 %v10697_v32  ;;  %v4332_v19 = vadd.f32 %v4300_v30, %v4199_v14  ;;  %v10894_v23 = vld [vmem:[#allocation3 + $0xe0] sm:$0xff]  ;;  %v10914_v14 = vld [vmem:[%s11893_s15 + $0x4] ss:$0 sm:$0xff]  ;;  %7151 = vmatpush3.bf16.msra.mxu0 %v7321_v20 }
 0x798   : > { %v6739_v61 = vmul.f32 -1.442695, %v10869_v7  ;;  %v4632_v42 = vadd.f32 %v4600_v0, %v4531_v59  ;;  %7850 = vpow2.f32 %v10747_v24  ;;  %v4401_v32 = vmul.f32 %v10853_v45, %v4364_v51  ;;  %v10925_v50 = vld [vmem:[#allocation3 + $0xe1] sm:$0xff] }
 0x799   : > { %v7839_v56 = vpop.eup %7838  ;;  %v4533_v27 = vadd.f32 %v4501_v57, %v4432_v3  ;;  %v4633_v39 = vadd.f32 %v4601_v8, %v4532_v47  ;;  %7852 = vpow2.f32 %v10750_v21  ;;  %v10901_v13 = vmul.f32 %v7837_v31, %v10682_v60  ;;  %v12130_v30 = vld [vmem:[#allocation45_spill] sm:$0xff] }
 0x79a   : > { %v5329_v40 = vsel %vm4112_vm14, %v10882_v41, 0.0  ;;  %v4701_v18 = vmul.f32 %v10451_v22, %v10795_v15  ;;  %v10908_v24 = vadd.f32 %v10528_v49, %v5036_v33  ;;  %v4702_v44 = vmul.f32 %v10451_v22, %v4364_v51  ;;  %v10923_v51 = vld [vmem:[#allocation3 + $0xda] sm:$0xff]  ;;  %v10939_v33 = vld [vmem:[%s11893_s15 + $0x5] ss:$0 sm:$0xff] }
 0x79b   : > { %12128 = vst [vmem:[#allocation49_spill] sm:$0xff] %v10901_v13  ;;  %v4602_v60 = vmul.f32 %v10914_v14, %v10892_v46  ;;  %v4502_v21 = vmul.f32 %v10875_v35, %v10894_v23  ;;  %7854 = vpow2.f32 %v6711_v12  ;;  %v10921_v15 = vmul.f32 %v7839_v56, %v10694_v6 }
 0x79c   : > { %v7841_v26 = vpop.eup %7840  ;;  %v4433_v5 = vadd.f32 %v4401_v32, %v4332_v19  ;;  %7856 = vpow2.f32 %v6739_v61  ;;  %v4733_v22 = vadd.f32 %v4701_v18, %v4632_v42  ;;  %v5330_v55 = vadd.f32 %v5329_v40, %v5328_v36  ;;  %v10953_v61 = vld [vmem:[#allocation3 + $0xf0] sm:$0xff] }
 0x79d   : > { %12129 = vst [vmem:[#allocation44_spill] sm:$0xff] %v10921_v15  ;;  %v7843_v34 = vpop.eup %7842  ;;  %v4634_v9 = vadd.f32 %v4602_v60, %v4533_v27  ;;  %v4734_v38 = vadd.f32 %v4702_v44, %v4633_v39  ;;  %v10929_v4 = vadd.f32 %v10755_v62, %v12130_v30  ;;  %v5331_v59 = vsel %vm4112_vm14, %v10901_v13, 0.0  ;;  %v10957_v39 = vld [vmem:[#allocation3 + $0xe2] sm:$0xff] }
 0x79e   : > { %v6740_v6 = vmul.f32 -1.442695, %v10908_v24  ;;  %v4803_v47 = vmul.f32 %v10472_v52, %v10846_v63  ;;  %v4534_v57 = vadd.f32 %v4502_v21, %v4433_v5  ;;  %v5200_v0 = vadd.f32 1.0, %v7841_v26  ;;  %v10967_v5 = vld [vmem:[%s11893_s15 + $0x6] ss:$0 sm:$0xff] }
 0x79f   : > { %v7845_v12 = vpop.eup %7844  ;;  %v4703_v31 = vmul.f32 %v10939_v33, %v10923_v51  ;;  %v4804_v36 = vmul.f32 %v10472_v52, %v10894_v23  ;;  %v10946_v3 = vmul.f32 -1.442695, %v10834_v58  ;;  %v10949_v20 = vmul.f32 %v7843_v34, %v10709_v37 }
 0x7a0   : > { %v7847_v8 = vpop.eup %7846  ;;  %v5333_v19 = vsel %vm4112_vm14, %v10921_v15, 0.0  ;;  %v4835_v42 = vadd.f32 %v4803_v47, %v4733_v22  ;;  %v4603_v56 = vmul.f32 %v10914_v14, %v10925_v50  ;;  %v5332_v27 = vadd.f32 %v5331_v59, %v5330_v55  ;;  %v12132_v55 = vld [vmem:[#allocation46_spill] sm:$0xff] }
 0x7a1   : > { %12131 = vst [vmem:[#allocation45_spill] sm:$0xff] %v10949_v20  ;;  %v7849_v32 = vpop.eup %7848  ;;  %v4735_v52 = vadd.f32 %v4703_v31, %v4634_v9  ;;  %v4836_v40 = vadd.f32 %v4804_v36, %v4734_v38  ;;  %v10960_v18 = vmul.f32 -1.442695, %v10929_v4  ;;  %7858 = vpow2.f32 %v6740_v6  ;;  %v10977_v38 = vld [vmem:[#allocation3 + $0xf1] sm:$0xff] }
 0x7a2   : > { %v7851_v37 = vpop.eup %7850  ;;  %v4904_v44 = vmul.f32 %v10482_v29, %v10892_v46  ;;  %v4635_v60 = vadd.f32 %v4603_v56, %v4534_v57  ;;  %v4005_v21 = vadd.f32 1.0, %v7845_v12  ;;  %7860 = vrcp.f32 %v5200_v0  ;;  %v10981_v12 = vld [vmem:[#allocation3 + $0xf8] sm:$0xff] }
 0x7a3   : > { %v7853_v26 = vpop.eup %7852  ;;  %v4805_v22 = vmul.f32 %v10967_v5, %v10953_v61  ;;  %v4905_v34 = vmul.f32 %v10482_v29, %v10925_v50  ;;  %v10975_v9 = vadd.f32 %v10755_v62, %v12132_v55  ;;  %v4704_v59 = vmul.f32 %v10939_v33, %v10957_v39 }
 0x7a4   : > { %v4936_v30 = vadd.f32 %v4904_v44, %v4835_v42  ;;  %7862 = vrcp.f32 %v4005_v21  ;;  %v4003_v6 = vadd.f32 1.0, %v7849_v32  ;;  %v5201_v57 = vadd.f32 1.0, %v7847_v8  ;;  %v10988_v42 = vld [vmem:[%s11893_s15 + $0x7] ss:$0 sm:$0xff] }
 0x7a5   : > { %v7855_v47 = vpop.eup %7854  ;;  %v4837_v0 = vadd.f32 %v4805_v22, %v4735_v52  ;;  %v4937_v31 = vadd.f32 %v4905_v34, %v4836_v40  ;;  %v4006_v36 = vadd.f32 1.0, %v7851_v37  ;;  %v4736_v56 = vadd.f32 %v4704_v59, %v4635_v60  ;;  %v12133_v52 = vld [vmem:[#allocation47_spill] sm:$0xff] }
 0x7a6   : > { %v7857_v29 = vpop.eup %7856  ;;  %v5005_v55 = vmul.f32 %v10503_v17, %v10923_v51  ;;  %7864 = vrcp.f32 %v4003_v6  ;;  %v4004_v15 = vadd.f32 1.0, %v7853_v26  ;;  %v4906_v8 = vmul.f32 %v10988_v42, %v10977_v38  ;;  %v10998_v37 = vld [vmem:[#allocation3 + $0xf2] sm:$0xff] }
 0x7a7   : > { %v5006_v32 = vmul.f32 %v10503_v17, %v10957_v39  ;;  %7866 = vrcp.f32 %v4006_v36  ;;  %v10996_v40 = vadd.f32 %v10755_v62, %v12133_v52  ;;  %v4806_v44 = vmul.f32 %v10967_v5, %v10981_v12  ;;  %v11002_v22 = vld [vmem:[#allocation3 + $0xf9] sm:$0xff] }
 0x7a8   : > { %v5037_v60 = vadd.f32 %v5005_v55, %v4936_v30  ;;  %7868 = vrcp.f32 %v4004_v15  ;;  %v4009_v21 = vadd.f32 1.0, %v7855_v47  ;;  %v5202_v26 = vadd.f32 1.0, %v7857_v29  ;;  %v11013_v15 = vld [vmem:[%s11893_s15 + $0x8] ss:$0 sm:$0xff] }
 0x7a9   : > { %7870 = vrcp.f32 %v5201_v57  ;;  %v4938_v34 = vadd.f32 %v4906_v8, %v4837_v0  ;;  %v5038_v59 = vadd.f32 %v5006_v32, %v4937_v31  ;;  %v4200_v17 = vmul.f32 %v10842_v11, %v10846_v63  ;;  %v11024_v0 = vld [vmem:[#allocation3 + $0xfa] sm:$0xff] }
 0x7aa   : > { %v4301_v6 = vmul.f32 %v10864_v43, %v10892_v46  ;;  %v4838_v36 = vadd.f32 %v4806_v44, %v4736_v56  ;;  %7872 = vrcp.f32 %v4009_v21  ;;  %v5334_v52 = vadd.f32 %v5333_v19, %v5332_v27 }
 0x7ab   : > { %v5335_v30 = vsel %vm4112_vm14, %v10949_v20, 0.0  ;;  %v5007_v47 = vmul.f32 %v11013_v15, %v10998_v37  ;;  %v7859_v57 = vpop.eup %7858  ;;  %v4907_v63 = vmul.f32 %v10988_v42, %v11002_v22  ;;  %v11020_v46 = vadd.f32 %v10528_v49, %v5037_v60 }
 0x7ac   : > { %7874 = vpow2.f32 %v10946_v3  ;;  %v6710_v19 = vmul.f32 -1.442695, %v10975_v9  ;;  %v7861_v27 = vpop.eup %7860  ;;  %v11027_v29 = vadd.f32 %v10528_v49, %v5038_v59  ;;  %v6715_v56 = vmul.f32 -1.442695, %v10996_v40 }
 0x7ad   : > { %7876 = vrcp.f32 %v5202_v26  ;;  %v5039_v31 = vadd.f32 %v5007_v47, %v4938_v34  ;;  %v4333_v8 = vadd.f32 %v4301_v6, %v4200_v17  ;;  %v4402_v32 = vmul.f32 %v10853_v45, %v10923_v51  ;;  %v12134_v51 = vld [vmem:[#allocation48_spill] sm:$0xff] }
 0x7ae   : > { %v7863_v55 = vpop.eup %7862  ;;  %v4939_v44 = vadd.f32 %v4907_v63, %v4838_v36  ;;  %7878 = vpow2.f32 %v10960_v18  ;;  %v5203_v3 = vadd.f32 1.0, %v7859_v57  ;;  %v4201_v60 = vmul.f32 %v10842_v11, %v10894_v23  ;;  %v11048_v23 = vld [vmem:[%s11894_s16] ss:$0 sm:$0xff] }
 0x7af   : > { %v4302_v21 = vmul.f32 %v10864_v43, %v10925_v50  ;;  %v4101_v49 = vmul.f32 %v7863_v55, %v10623_v2  ;;  %v5008_v34 = vmul.f32 %v11013_v15, %v11024_v0  ;;  %v6741_v59 = vmul.f32 -1.442695, %v11020_v46 }
 0x7b0   : > { %v7865_v26 = vpop.eup %7864  ;;  %7880 = vpow2.f32 %v6710_v19  ;;  %v11043_v17 = vadd.f32 %v10755_v62, %v12134_v51  ;;  %v11051_v50 = vadd.f32 %v11048_v23, %v5039_v31  ;;  %v6742_v2 = vmul.f32 -1.442695, %v11027_v29  ;;  %v12135_v19 = vld [vmem:[#allocation50_spill] sm:$0xff] }
 0x7b1   : > { %v7867_v18 = vpop.eup %7866  ;;  %4135 = vst.msk [vmem:[#allocation3 + $0x121] sm:$0xff] %vm4112_vm14, %v4101_v49  ;;  %v4099_v6 = vmul.f32 %v7865_v26, %v10638_v16  ;;  %7882 = vpow2.f32 %v6715_v56  ;;  %v4434_v47 = vadd.f32 %v4402_v32, %v4333_v8  ;;  %v5040_v57 = vadd.f32 %v5008_v34, %v4939_v44 }
 0x7b2   : > { %v7869_v36 = vpop.eup %7868  ;;  %v4102_v63 = vmul.f32 %v7867_v18, %v10645_v53  ;;  %v11059_v55 = vadd.f32 %v10755_v62, %v12135_v19  ;;  %7884 = vrcp.f32 %v5203_v3  ;;  %v11062_v31 = vmul.f32 %v7861_v27, %v10798_v48 }
 0x7b3   : > { %v7871_v51 = vpop.eup %7870  ;;  %v4334_v20 = vadd.f32 %v4302_v21, %v4201_v60  ;;  %4133 = vst.msk [vmem:[#allocation3 + $0x109] sm:$0xff] %vm4112_vm14, %v4099_v6  ;;  %v4100_v16 = vmul.f32 %v7869_v36, %v10662_v25  ;;  %v4202_v8 = vmul.f32 %v10842_v11, %v10953_v61  ;;  %v4303_v53 = vmul.f32 %v10864_v43, %v10977_v38 }
 0x7b4   : > { %12136 = vst [vmem:[#allocation46_spill] sm:$0xff] %v11062_v31  ;;  %v7873_v56 = vpop.eup %7872  ;;  %v4503_v32 = vmul.f32 %v10875_v35, %v10953_v61  ;;  %7886 = vpow2.f32 %v6741_v59  ;;  %4136 = vst.msk [vmem:[#allocation3 + $0x129] sm:$0xff] %vm4112_vm14, %v4102_v63  ;;  %v4403_v48 = vmul.f32 %v10853_v45, %v10957_v39  ;;  %v6743_v27 = vmul.f32 -1.442695, %v11051_v50 }
 0x7b5   : > { %7888 = vpow2.f32 %v6742_v2  ;;  %4134 = vst.msk [vmem:[#allocation3 + $0x111] sm:$0xff] %vm4112_vm14, %v4100_v16  ;;  %v4105_v25 = vmul.f32 %v7873_v56, %v10759_v1  ;;  %v5336_v3 = vadd.f32 %v5335_v30, %v5334_v52  ;;  %v11079_v21 = vadd.f32 %v11048_v23, %v5040_v57  ;;  %v12138_v1 = vld [vmem:[#allocation51_spill] sm:$0xff] }
 0x7b6   : > { %v7875_v44 = vpop.eup %7874  ;;  %v4535_v60 = vadd.f32 %v4503_v32, %v4434_v47  ;;  %v11082_v61 = vmul.f32 -1.442695, %v11043_v17  ;;  %v11085_v26 = vmul.f32 %v7871_v51, %v10819_v10  ;;  %v5337_v39 = vsel %vm4112_vm14, %v11062_v31, 0.0 }
 0x7b7   : > { %v7877_v49 = vpop.eup %7876  ;;  %v4435_v34 = vadd.f32 %v4403_v48, %v4334_v20  ;;  %4139 = vst.msk [vmem:[#allocation3 + $0x151] sm:$0xff] %vm4112_vm14, %v4105_v25  ;;  %v11092_v52 = vadd.f32 %v10755_v62, %v12138_v1  ;;  %v4604_v59 = vmul.f32 %v10914_v14, %v10977_v38  ;;  %v4203_v18 = vmul.f32 %v10842_v11, %v10981_v12 }
 0x7b8   : > { %12137 = vst [vmem:[#allocation47_spill] sm:$0xff] %v11085_v26  ;;  %v7879_v30 = vpop.eup %7878  ;;  %v4304_v10 = vmul.f32 %v10864_v43, %v11002_v22  ;;  %v6716_v2 = vmul.f32 -1.442695, %v11059_v55  ;;  %v4335_v6 = vadd.f32 %v4303_v53, %v4202_v8  ;;  %v4404_v20 = vmul.f32 %v10853_v45, %v10998_v37 }
 0x7b9   : > { %v4504_v62 = vmul.f32 %v10875_v35, %v10981_v12  ;;  %7890 = vpow2.f32 %v6743_v27  ;;  %v11106_v47 = vmul.f32 %v7877_v49, %v10869_v7  ;;  %v5338_v38 = vadd.f32 %v5337_v39, %v5336_v3 }
 0x7ba   : > { %v7881_v36 = vpop.eup %7880  ;;  %v6744_v57 = vmul.f32 -1.442695, %v11079_v21  ;;  %v4167_v63 = vld [vmem:[#allocation3 + $0x108] sm:$0xff]  ;;  %v4636_v19 = vadd.f32 %v4604_v59, %v4535_v60  ;;  %v5339_v16 = vsel %vm4112_vm14, %v11085_v26, 0.0  ;;  %v4007_v53 = vadd.f32 1.0, %v7875_v44 }
 0x7bb   : > { %12139 = vst [vmem:[#allocation48_spill] sm:$0xff] %v11106_v47  ;;  %v7883_v51 = vpop.eup %7882  ;;  %v4536_v56 = vadd.f32 %v4504_v62, %v4435_v34  ;;  %v4505_v8 = vmul.f32 %v10875_v35, %v4167_v63  ;;  %v4336_v32 = vadd.f32 %v4304_v10, %v4203_v18  ;;  %v4705_v12 = vmul.f32 %v10939_v33, %v10998_v37  ;;  %v4268_v44 = vld [vmem:[#allocation3 + $0x109] sm:$0xff] }
 0x7bc   : > { %v4010_v48 = vadd.f32 1.0, %v7879_v30  ;;  %v11115_v7 = vmul.f32 -1.442695, %v11092_v52  ;;  %v7885_v27 = vpop.eup %7884  ;;  %v4405_v25 = vmul.f32 %v10853_v45, %v11024_v0  ;;  %v4436_v3 = vadd.f32 %v4404_v20, %v4335_v6  ;;  %v4168_v20 = vld [vmem:[#allocation3 + $0x110] sm:$0xff] }
 0x7bd   : > { %v4605_v60 = vmul.f32 %v10914_v14, %v11002_v22  ;;  %v4008_v49 = vadd.f32 1.0, %v7881_v36  ;;  %v5340_v34 = vadd.f32 %v5339_v16, %v5338_v38  ;;  %7892 = vpow2.f32 %v6744_v57 }
 0x7be   : > { %v7887_v39 = vpop.eup %7886  ;;  %v4737_v1 = vadd.f32 %v4705_v12, %v4636_v19  ;;  %v4013_v59 = vadd.f32 1.0, %v7883_v51  ;;  %v5341_v30 = vsel %vm4112_vm14, %v11106_v47, 0.0  ;;  %v4537_v18 = vadd.f32 %v4505_v8, %v4436_v3  ;;  %v4369_v8 = vld [vmem:[#allocation3 + $0x10a] sm:$0xff]  ;;  %v11139_v3 = vld [vmem:[#allocation3 + $0x112] sm:$0xff] }
 0x7bf   : > { %v7889_v37 = vpop.eup %7888  ;;  %v4637_v10 = vadd.f32 %v4605_v60, %v4536_v56  ;;  %7894 = vrcp.f32 %v4007_v53  ;;  %v4437_v62 = vadd.f32 %v4405_v25, %v4336_v32  ;;  %v4706_v6 = vmul.f32 %v10939_v33, %v11024_v0  ;;  %v4269_v56 = vld [vmem:[#allocation3 + $0x111] sm:$0xff]  ;;  %v11132_v0 = vld [vmem:[#allocation3 + $0x120] sm:$0xff] }
 0x7c0   : > { %v4807_v22 = vmul.f32 %v10967_v5, %v4167_v63  ;;  %7896 = vrcp.f32 %v4010_v48  ;;  %v11127_v36 = vmul.f32 %v7885_v27, %v10908_v24  ;;  %v5204_v38 = vadd.f32 1.0, %v7887_v39  ;;  %v11141_v60 = vld [vmem:[#allocation3 + $0x121] sm:$0xff] }
 0x7c1   : > { %v4606_v57 = vmul.f32 %v10914_v14, %v4268_v44  ;;  %7898 = vrcp.f32 %v4008_v49  ;;  %v11130_v19 = vadd.f32 %v5341_v30, %v5340_v34  ;;  %v5205_v51 = vadd.f32 1.0, %v7889_v37  ;;  %v11143_v49 = vld [vmem:[#allocation3 + $0x128] sm:$0xff] }
 0x7c2   : > { %12140 = vst [vmem:[#allocation50_spill] sm:$0xff] %v11127_v36  ;;  %v4839_v16 = vadd.f32 %v4807_v22, %v4737_v1  ;;  %7900 = vrcp.f32 %v4013_v59  ;;  %v4506_v12 = vmul.f32 %v10875_v35, %v4168_v20  ;;  %v4738_v48 = vadd.f32 %v4706_v6, %v4637_v10 }
 0x7c3   : > { %v7891_v53 = vpop.eup %7890  ;;  %v4638_v32 = vadd.f32 %v4606_v57, %v4537_v18  ;;  %7902 = vpow2.f32 %v11082_v61  ;;  %v4204_v24 = vmul.f32 %v10842_v11, %v4167_v63  ;;  %v4305_v27 = vmul.f32 %v10864_v43, %v4268_v44 }
 0x7c4   : > { %v4908_v25 = vmul.f32 %v10988_v42, %v4268_v44  ;;  %7904 = vpow2.f32 %v6716_v2  ;;  %v4538_v39 = vadd.f32 %v4506_v12, %v4437_v62  ;;  %v4607_v34 = vmul.f32 %v10914_v14, %v4269_v56  ;;  %v11149_v44 = vld [vmem:[#allocation3 + $0x122] sm:$0xff] }
 0x7c5   : > { %7906 = vrcp.f32 %v5204_v38  ;;  %v4707_v1 = vmul.f32 %v10939_v33, %v4369_v8  ;;  %v5206_v61 = vadd.f32 1.0, %v7891_v53  ;;  %v4809_v63 = vmul.f32 %v10967_v5, %v11132_v0 }
 0x7c6   : > { %7908 = vrcp.f32 %v5205_v51  ;;  %v4940_v59 = vadd.f32 %v4908_v25, %v4839_v16  ;;  %v4639_v37 = vadd.f32 %v4607_v34, %v4538_v39  ;;  %v4708_v2 = vmul.f32 %v10939_v33, %v11139_v3 }
 0x7c7   : > { %v4739_v30 = vadd.f32 %v4707_v1, %v4638_v32  ;;  %v4808_v18 = vmul.f32 %v10967_v5, %v4168_v20  ;;  %v7893_v10 = vpop.eup %7892  ;;  %v4910_v62 = vmul.f32 %v10988_v42, %v11141_v60  ;;  %v4337_v6 = vadd.f32 %v4305_v27, %v4204_v24  ;;  %v11164_v1 = vld [vmem:[#allocation3 + $0x129] sm:$0xff] }
 0x7c8   : > { %v4810_v22 = vmul.f32 %v10967_v5, %v11143_v49  ;;  %v5009_v38 = vmul.f32 %v11013_v15, %v4369_v8  ;;  %v4740_v51 = vadd.f32 %v4708_v2, %v4639_v37  ;;  %v4909_v12 = vmul.f32 %v10988_v42, %v4269_v56 }
 0x7c9   : > { %v7895_v57 = vpop.eup %7894  ;;  %v4840_v16 = vadd.f32 %v4808_v18, %v4738_v48  ;;  %v4841_v53 = vadd.f32 %v4809_v63, %v4739_v30  ;;  %v5011_v32 = vmul.f32 %v11013_v15, %v11149_v44  ;;  %v4205_v39 = vmul.f32 %v10842_v11, %v4168_v20 }
 0x7ca   : > { %v7897_v25 = vpop.eup %7896  ;;  %v4406_v34 = vmul.f32 %v10853_v45, %v4369_v8  ;;  %v5041_v24 = vadd.f32 %v5009_v38, %v4940_v59  ;;  %v4306_v47 = vmul.f32 %v10864_v43, %v4269_v56  ;;  %v5010_v48 = vmul.f32 %v11013_v15, %v11139_v3 }
 0x7cb   : > { %v7899_v27 = vpop.eup %7898  ;;  %v4941_v26 = vadd.f32 %v4909_v12, %v4840_v16  ;;  %v4942_v37 = vadd.f32 %v4910_v62, %v4841_v53  ;;  %v5207_v2 = vadd.f32 1.0, %v7893_v10  ;;  %7910 = vrcp.f32 %v5206_v61 }
 0x7cc   : > { %v7901_v63 = vpop.eup %7900  ;;  %v4842_v30 = vadd.f32 %v4810_v22, %v4740_v51  ;;  %v11170_v18 = vadd.f32 %v11048_v23, %v5041_v24  ;;  %v4206_v8 = vmul.f32 %v10842_v11, %v11132_v0  ;;  %v4307_v59 = vmul.f32 %v10864_v43, %v11141_v60  ;;  %v11180_v51 = vld [vmem:[#allocation3 + $0x12a] sm:$0xff] }
 0x7cd   : > { %v7903_v20 = vpop.eup %7902  ;;  %v5042_v56 = vadd.f32 %v5010_v48, %v4941_v26  ;;  %v5043_v38 = vadd.f32 %v5011_v32, %v4942_v37  ;;  %v4911_v16 = vmul.f32 %v10988_v42, %v11164_v1  ;;  %v4438_v53 = vadd.f32 %v4406_v34, %v4337_v6 }
 0x7ce   : > { %v7905_v62 = vpop.eup %7904  ;;  %v6745_v61 = vmul.f32 -1.442695, %v11170_v18  ;;  %v4103_v10 = vmul.f32 %v7895_v57, %v10834_v58  ;;  %v4338_v12 = vadd.f32 %v4306_v47, %v4205_v39  ;;  %v4106_v26 = vmul.f32 %v7897_v25, %v10929_v4 }
 0x7cf   : > { %v7907_v22 = vpop.eup %7906  ;;  %v11183_v24 = vadd.f32 %v11048_v23, %v5042_v56  ;;  %v11186_v31 = vadd.f32 %v11048_v23, %v5043_v38  ;;  %v4507_v6 = vmul.f32 %v10875_v35, %v11132_v0  ;;  %v4943_v34 = vadd.f32 %v4911_v16, %v4842_v30  ;;  %v5488_v0 = vld [vmem:[%s11897_s19] sm:$0x7] }
 0x7d0   : > { %v7909_v32 = vpop.eup %7908  ;;  %7912 = vpow2.f32 %v6745_v61  ;;  %4137 = vst.msk [vmem:[#allocation3 + $0x139] sm:$0xff] %vm4112_vm14, %v4103_v10  ;;  %v4104_v58 = vmul.f32 %v7899_v27, %v10975_v9  ;;  %v4407_v47 = vmul.f32 %v10853_v45, %v11139_v3  ;;  %4140 = vst.msk [vmem:[#allocation3 + $0x159] sm:$0xff] %vm4112_vm14, %v4106_v26  ;;  %v4109_v4 = vmul.f32 %v7901_v63, %v10996_v40 }
 0x7d1   : > { %7914 = vrcp.f32 %v5207_v2  ;;  %v6746_v57 = vmul.f32 -1.442695, %v11183_v24  ;;  %v5343_v25 = vsel %vm4112_vm14, %v11127_v36, 0.0  ;;  %v5012_v9 = vmul.f32 %v11013_v15, %v11180_v51 }
 0x7d2   : > { %v4539_v39 = vadd.f32 %v4507_v6, %v4438_v53  ;;  %v6747_v27 = vmul.f32 -1.442695, %v11186_v31  ;;  %4138 = vst.msk [vmem:[#allocation3 + $0x141] sm:$0xff] %vm4112_vm14, %v4104_v58  ;;  %v4608_v3 = vmul.f32 %v10914_v14, %v11141_v60  ;;  %v4439_v37 = vadd.f32 %v4407_v47, %v4338_v12  ;;  %4143 = vst.msk [vmem:[#allocation3 + $0x181] sm:$0xff] %vm4112_vm14, %v4109_v4 }
 0x7d3   : > { %7916 = vpow2.f32 %v11115_v7  ;;  %v11212_v40 = vmul.f32 %v7907_v22, %v11020_v46  ;;  %v4339_v48 = vadd.f32 %v4307_v59, %v4206_v8  ;;  %v5044_v63 = vadd.f32 %v5012_v9, %v4943_v34  ;;  %v4782_v59 = vld [vmem:[#allocation3 + $0x198] sm:$0xff]  ;;  %v11247_v9 = vld [vmem:[#allocation3 + $0x150] sm:$0xff] }
 0x7d4   : > { %v5497_v2 = vsel %vm5495_vm15, %v5488_v0, 0  ;;  %v4207_v30 = vmul.f32 %v10842_v11, %v11143_v49  ;;  %v4308_v56 = vmul.f32 %v10864_v43, %v11164_v1  ;;  %v4508_v60 = vmul.f32 %v10875_v35, %v11143_v49 }
 0x7d5   : > { %12141 = vst [vmem:[#allocation51_spill] sm:$0xff] %v11212_v40  ;;  %7918 = vpow2.f32 %v6746_v57  ;;  %7157 = vmatpush3.bf16.msra.mxu1 %v5497_v2  ;;  %v7911_v38 = vpop.eup %7910  ;;  %v4408_v7 = vmul.f32 %v10853_v45, %v11149_v44  ;;  %v4640_v46 = vadd.f32 %v4608_v3, %v4539_v39  ;;  %v4011_v8 = vadd.f32 1.0, %v7903_v20  ;;  %v11249_v39 = vld [vmem:[#allocation3 + $0x151] sm:$0xff] }
 0x7d6   : > { %7920 = vpow2.f32 %v6747_v27  ;;  %v11223_v16 = vmul.f32 %v7909_v32, %v11027_v29  ;;  %v5344_v53 = vadd.f32 %v5343_v25, %v11130_v19  ;;  %v4709_v61 = vmul.f32 %v10939_v33, %v11149_v44 }
 0x7d7   : > { %v4540_v10 = vadd.f32 %v4508_v60, %v4439_v37  ;;  %v4171_v49 = vld [vmem:[#allocation3 + $0x138] sm:$0xff]  ;;  %v5345_v22 = vsel %vm4112_vm14, %v11212_v40, 0.0  ;;  %v11231_v12 = vadd.f32 %v11048_v23, %v5044_v63  ;;  %v4014_v20 = vadd.f32 1.0, %v7905_v62 }
 0x7d8   : > { %12142 = vst [vmem:[#allocation56_spill] sm:$0xff] %v11223_v16  ;;  %v4509_v26 = vmul.f32 %v10875_v35, %v4171_v49  ;;  %v4409_v29 = vmul.f32 %v10853_v45, %v11180_v51  ;;  %v4609_v19 = vmul.f32 %v10914_v14, %v11164_v1  ;;  %v11239_v32 = vmul.f32 %v10967_v5, %v4782_v59  ;;  %v4272_v58 = vld [vmem:[#allocation3 + $0x139] sm:$0xff] }
 0x7d9   : > { %v4340_v6 = vadd.f32 %v4308_v56, %v4207_v30  ;;  %v4440_v34 = vadd.f32 %v4408_v7, %v4339_v48  ;;  %v4741_v47 = vadd.f32 %v4709_v61, %v4640_v46  ;;  %7922 = vrcp.f32 %v4011_v8  ;;  %v4172_v7 = vld [vmem:[#allocation3 + $0x140] sm:$0xff] }
 0x7da   : > { %v7913_v44 = vpop.eup %7912  ;;  %v11242_v4 = vmul.f32 %v7911_v38, %v11051_v50  ;;  %v5346_v62 = vadd.f32 %v5345_v22, %v5344_v53  ;;  %v5347_v0 = vsel %vm4112_vm14, %v11223_v16, 0.0  ;;  %v4641_v25 = vadd.f32 %v4609_v19, %v4540_v10  ;;  %v4373_v61 = vld [vmem:[#allocation3 + $0x13a] sm:$0xff] }
 0x7db   : > { %v7915_v57 = vpop.eup %7914  ;;  %v6748_v1 = vmul.f32 -1.442695, %v11231_v12  ;;  %v4541_v27 = vadd.f32 %v4509_v26, %v4440_v34  ;;  %v4811_v3 = vmul.f32 %v10967_v5, %v4171_v49  ;;  %7924 = vrcp.f32 %v4014_v20  ;;  %v4273_v26 = vld [vmem:[#allocation3 + $0x141] sm:$0xff] }
 0x7dc   : > { %12143 = vst [vmem:[#allocation57_spill] sm:$0xff] %v11242_v4  ;;  %v4710_v50 = vmul.f32 %v10939_v33, %v11180_v51  ;;  %v5208_v48 = vadd.f32 1.0, %v7913_v44  ;;  %v4208_v63 = vmul.f32 %v10842_v11, %v4171_v49  ;;  %v4309_v2 = vmul.f32 %v10864_v43, %v4272_v58 }
 0x7dd   : > { %v7917_v37 = vpop.eup %7916  ;;  %v11257_v30 = vmul.f32 %v7915_v57, %v11079_v21  ;;  %v4441_v56 = vadd.f32 %v4409_v29, %v4340_v6  ;;  %v4610_v60 = vmul.f32 %v10914_v14, %v4272_v58  ;;  %v4843_v38 = vadd.f32 %v4811_v3, %v4741_v47  ;;  %v11270_v21 = vld [vmem:[#allocation3 + $0x158] sm:$0xff]  ;;  %v4374_v57 = vld [vmem:[#allocation3 + $0x142] sm:$0xff] }
 0x7de   : > { %v11260_v8 = vadd.f32 %v5347_v0, %v5346_v62  ;;  %v11264_v59 = vsel %vm4112_vm14, %v11242_v4, 0.0  ;;  %v4813_v51 = vmul.f32 %v10967_v5, %v11247_v9  ;;  %v4914_v53 = vmul.f32 %v10988_v42, %v11249_v39 }
 0x7df   : > { %12144 = vst [vmem:[#allocation58_spill] sm:$0xff] %v11257_v30  ;;  %v7919_v46 = vpop.eup %7918  ;;  %7926 = vpow2.f32 %v6748_v1  ;;  %v4642_v49 = vadd.f32 %v4610_v60, %v4541_v27  ;;  %v4912_v22 = vmul.f32 %v10988_v42, %v4272_v58  ;;  %v4742_v20 = vadd.f32 %v4710_v50, %v4641_v25 }
 0x7e0   : > { %v7921_v10 = vpop.eup %7920  ;;  %7928 = vrcp.f32 %v5208_v48  ;;  %v4341_v29 = vadd.f32 %v4309_v2, %v4208_v63  ;;  %v4510_v19 = vmul.f32 %v10875_v35, %v4172_v7  ;;  %v4012_v44 = vadd.f32 1.0, %v7917_v37  ;;  %v11282_v63 = vld [vmem:[#allocation3 + $0x159] sm:$0xff] }
 0x7e1   : > { %v5209_v6 = vadd.f32 1.0, %v7919_v46  ;;  %v4944_v34 = vadd.f32 %v4912_v22, %v4843_v38  ;;  %v4814_v47 = vmul.f32 %v10967_v5, %v11270_v21  ;;  %v4711_v62 = vmul.f32 %v10939_v33, %v4373_v61  ;;  %v11284_v2 = vld [vmem:[#allocation3 + $0x152] sm:$0xff] }
 0x7e2   : > { %v5210_v0 = vadd.f32 1.0, %v7921_v10  ;;  %v4542_v1 = vadd.f32 %v4510_v19, %v4441_v56  ;;  %v4611_v27 = vmul.f32 %v10914_v14, %v4273_v26  ;;  %v4812_v58 = vmul.f32 %v10967_v5, %v4172_v7 }
 0x7e3   : > { %v7923_v25 = vpop.eup %7922  ;;  %v4209_v3 = vmul.f32 %v10842_v11, %v4172_v7  ;;  %v4310_v50 = vmul.f32 %v10864_v43, %v4273_v26  ;;  %v4743_v37 = vadd.f32 %v4711_v62, %v4642_v49  ;;  %v5013_v48 = vmul.f32 %v11013_v15, %v4373_v61 }
 0x7e4   : > { %v4643_v60 = vadd.f32 %v4611_v27, %v4542_v1  ;;  %v4712_v38 = vmul.f32 %v10939_v33, %v4374_v57  ;;  %v4844_v56 = vadd.f32 %v4812_v58, %v4742_v20  ;;  %v4913_v46 = vmul.f32 %v10988_v42, %v4273_v26 }
 0x7e5   : > { %v7925_v10 = vpop.eup %7924  ;;  %7930 = vrcp.f32 %v5209_v6  ;;  %v4410_v22 = vmul.f32 %v10853_v45, %v4373_v61  ;;  %v4845_v7 = vadd.f32 %v4813_v51, %v4743_v37  ;;  %v5045_v19 = vadd.f32 %v5013_v48, %v4944_v34 }
 0x7e6   : > { %v4744_v4 = vadd.f32 %v4712_v38, %v4643_v60  ;;  %v4945_v49 = vadd.f32 %v4913_v46, %v4844_v56  ;;  %v5014_v62 = vmul.f32 %v11013_v15, %v4374_v57  ;;  %v4107_v16 = vmul.f32 %v7923_v25, %v11043_v17  ;;  %v4376_v17 = vld [vmem:[#allocation3 + $0x15a] sm:$0xff] }
 0x7e7   : > { %v4915_v1 = vmul.f32 %v10988_v42, %v11282_v63  ;;  %v5015_v20 = vmul.f32 %v11013_v15, %v11284_v2  ;;  %v4946_v27 = vadd.f32 %v4914_v53, %v4845_v7  ;;  %v11296_v26 = vadd.f32 %v11048_v23, %v5045_v19 }
 0x7e8   : > { %v4846_v6 = vadd.f32 %v4814_v47, %v4744_v4  ;;  %v5046_v61 = vadd.f32 %v5014_v62, %v4945_v49  ;;  %4141 = vst.msk [vmem:[#allocation3 + $0x169] sm:$0xff] %vm4112_vm14, %v4107_v16  ;;  %v4110_v51 = vmul.f32 %v7925_v10, %v11059_v55  ;;  %7932 = vrcp.f32 %v4012_v44  ;;  %v4783_v55 = vld [vmem:[#allocation3 + $0x1a0] sm:$0xff] }
 0x7e9   : > { %v7927_v34 = vpop.eup %7926  ;;  %7934 = vrcp.f32 %v5210_v0  ;;  %v4342_v58 = vadd.f32 %v4310_v50, %v4209_v3  ;;  %v4442_v25 = vadd.f32 %v4410_v22, %v4341_v29  ;;  %v6749_v37 = vmul.f32 -1.442695, %v11296_v26  ;;  %v4883_v44 = vld [vmem:[#allocation3 + $0x199] sm:$0xff] }
 0x7ea   : > { %v7929_v48 = vpop.eup %7928  ;;  %v4210_v53 = vmul.f32 %v10842_v11, %v11247_v9  ;;  %v4311_v4 = vmul.f32 %v10864_v43, %v11249_v39  ;;  %v4947_v47 = vadd.f32 %v4915_v1, %v4846_v6  ;;  %v11306_v16 = vadd.f32 %v11048_v23, %v5046_v61  ;;  %4144 = vst.msk [vmem:[#allocation3 + $0x189] sm:$0xff] %vm4112_vm14, %v4110_v51 }
 0x7eb   : > { %v4511_v29 = vmul.f32 %v10875_v35, %v11247_v9  ;;  %v4211_v0 = vmul.f32 %v10842_v11, %v11270_v21  ;;  %v4411_v3 = vmul.f32 %v10853_v45, %v4374_v57  ;;  %v5047_v50 = vadd.f32 %v5015_v20, %v4946_v27  ;;  %v4884_v9 = vld [vmem:[#allocation3 + $0x1a1] sm:$0xff] }
 0x7ec   : > { %v4312_v60 = vmul.f32 %v10864_v43, %v11282_v63  ;;  %v5016_v38 = vmul.f32 %v11013_v15, %v4376_v17  ;;  %7936 = vpow2.f32 %v6749_v37  ;;  %v6750_v56 = vmul.f32 -1.442695, %v11306_v16  ;;  %v4984_v57 = vld [vmem:[#allocation3 + $0x19a] sm:$0xff] }
 0x7ed   : > { %v4443_v46 = vadd.f32 %v4411_v3, %v4342_v58  ;;  %v4543_v10 = vadd.f32 %v4511_v29, %v4442_v25  ;;  %v11319_v22 = vmul.f32 %v10967_v5, %v4783_v55  ;;  %v11322_v7 = vmul.f32 %v10988_v42, %v4883_v44 }
 0x7ee   : > { %v5350_v11 = vadd.f32 %v11264_v59, %v11260_v8  ;;  %7938 = vpow2.f32 %v6750_v56  ;;  %v5048_v43 = vadd.f32 %v5016_v38, %v4947_v47  ;;  %v11327_v19 = vadd.f32 %v11048_v23, %v5047_v50  ;;  %v4579_v38 = vld [vmem:[#allocation3 + $0x181] sm:$0xff] }
 0x7ef   : > { %v7931_v49 = vpop.eup %7930  ;;  %v11330_v62 = vmul.f32 %v7929_v48, %v11170_v18  ;;  %v5351_v1 = vsel %vm4112_vm14, %v11257_v30, 0.0  ;;  %v4612_v20 = vmul.f32 %v10914_v14, %v11249_v39  ;;  %v4512_v27 = vmul.f32 %v10875_v35, %v11270_v21  ;;  %v4175_v47 = vld [vmem:[#allocation3 + $0x168] sm:$0xff] }
 0x7f0   : > { %v4343_v8 = vadd.f32 %v4311_v4, %v4210_v53  ;;  %v4344_v59 = vadd.f32 %v4312_v60, %v4211_v0  ;;  %v4412_v6 = vmul.f32 %v10853_v45, %v11284_v2  ;;  %v11341_v61 = vmul.f32 %v10988_v42, %v4884_v9  ;;  %v4276_v50 = vld [vmem:[#allocation3 + $0x169] sm:$0xff] }
 0x7f1   : > { %12145 = vst [vmem:[#allocation59_spill] sm:$0xff] %v11330_v62  ;;  %v5211_v51 = vadd.f32 1.0, %v7927_v34  ;;  %v4544_v18 = vadd.f32 %v4512_v27, %v4443_v46  ;;  %v4644_v58 = vadd.f32 %v4612_v20, %v4543_v10  ;;  %v11344_v25 = vmul.f32 %v11013_v15, %v4984_v57 }
 0x7f2   : > { %v7933_v37 = vpop.eup %7932  ;;  %v5352_v48 = vadd.f32 %v5351_v1, %v5350_v11  ;;  %v4413_v39 = vmul.f32 %v10853_v45, %v4376_v17  ;;  %v11348_v21 = vadd.f32 %v11048_v23, %v5048_v43  ;;  %v6751_v53 = vmul.f32 -1.442695, %v11327_v19  ;;  %v8143_v43 = vld [vmem:[%s11893_s15 + $0x1] ss:$0 sm:$0xff] }
 0x7f3   : > { %v7935_v4 = vpop.eup %7934  ;;  %v11352_v55 = vmul.f32 %v7931_v49, %v11183_v24  ;;  %v5353_v34 = vsel %vm4112_vm14, %v11330_v62, 0.0  ;;  %v4613_v44 = vmul.f32 %v10914_v14, %v11282_v63  ;;  %v4713_v29 = vmul.f32 %v10939_v33, %v11284_v2  ;;  %v4478_v24 = vld [vmem:[#allocation3 + $0x180] sm:$0xff] }
 0x7f4   : > { %v4444_v45 = vadd.f32 %v4412_v6, %v4343_v8  ;;  %v11360_v0 = vadd.f32 %v4413_v39, %v4344_v59  ;;  %v4714_v3 = vmul.f32 %v10939_v33, %v4376_v17  ;;  %v4108_v60 = vmul.f32 %v7933_v37, %v11092_v52  ;;  %v8142_v17 = vld [vmem:[%s11893_s15] ss:$0 sm:$0xff]  ;;  %v4479_v6 = vld [vmem:[#allocation3 + $0x188] sm:$0xff] }
 0x7f5   : > { %12146 = vst [vmem:[#allocation60_spill] sm:$0xff] %v11352_v55  ;;  %7940 = vrcp.f32 %v5211_v51  ;;  %v4513_v56 = vmul.f32 %v10875_v35, %v4175_v47  ;;  %v4745_v46 = vadd.f32 %v4713_v29, %v4644_v58  ;;  %v4645_v10 = vadd.f32 %v4613_v44, %v4544_v18  ;;  %v4580_v37 = vld [vmem:[#allocation3 + $0x189] sm:$0xff] }
 0x7f6   : > { %v7937_v9 = vpop.eup %7936  ;;  %v5354_v63 = vadd.f32 %v5353_v34, %v5352_v48  ;;  %4142 = vst.msk [vmem:[#allocation3 + $0x171] sm:$0xff] %vm4112_vm14, %v4108_v60  ;;  %7942 = vpow2.f32 %v6751_v53  ;;  %v6752_v2 = vmul.f32 -1.442695, %v11348_v21  ;;  %v11368_v11 = vmul.f32 %v7935_v4, %v11186_v31  ;;  %v4680_v48 = vld [vmem:[#allocation3 + $0x182] sm:$0xff]  ;;  %v4681_v39 = vld [vmem:[#allocation3 + $0x18a] sm:$0xff] }
 0x7f7   : > { %v5355_v52 = vsel %vm4112_vm14, %v11352_v55, 0.0  ;;  %v4212_v57 = vmul.f32 %v8142_v17, %v4175_v47  ;;  %v4313_v49 = vmul.f32 %v8143_v43, %v4276_v50  ;;  %v4815_v1 = vmul.f32 %v10967_v5, %v4175_v47 }
 0x7f8   : > { %12147 = vst [vmem:[#allocation61_spill] sm:$0xff] %v11368_v11  ;;  %v7939_v20 = vpop.eup %7938  ;;  %v4515_v27 = vmul.f32 %v10875_v35, %v4478_v24  ;;  %v11381_v31 = vmul.f32 %v10914_v14, %v4579_v38  ;;  %v4817_v8 = vmul.f32 %v10967_v5, %v4478_v24  ;;  %v11385_v59 = vmul.f32 %v10988_v42, %v4579_v38 }
 0x7f9   : > { %v5212_v51 = vadd.f32 1.0, %v7937_v9  ;;  %v4545_v18 = vadd.f32 %v4513_v56, %v4444_v45  ;;  %v4847_v58 = vadd.f32 %v4815_v1, %v4745_v46  ;;  %v4746_v53 = vadd.f32 %v4714_v3, %v4645_v10  ;;  %v8144_v45 = vld [vmem:[%s11893_s15 + $0x3] ss:$0 sm:$0xff] }
 0x7fa   : > { %v11387_v47 = vadd.f32 %v5355_v52, %v5354_v63  ;;  %v4614_v35 = vmul.f32 %v10914_v14, %v4276_v50  ;;  %7944 = vpow2.f32 %v6752_v2  ;;  %v11392_v4 = vsel %vm4112_vm14, %v11368_v11, 0.0 }
 0x7fb   : > { %v5213_v34 = vadd.f32 1.0, %v7939_v20  ;;  %v4345_v44 = vadd.f32 %v4313_v49, %v4212_v57  ;;  %v4916_v29 = vmul.f32 %v10988_v42, %v4276_v50  ;;  %v4516_v60 = vmul.f32 %v8144_v45, %v4479_v6 }
 0x7fc   : > { %v4617_v3 = vmul.f32 %v10914_v14, %v4580_v37  ;;  %v4717_v24 = vmul.f32 %v10939_v33, %v4680_v48  ;;  %v4718_v38 = vmul.f32 %v10939_v33, %v4681_v39  ;;  %v4818_v56 = vmul.f32 %v10967_v5, %v4479_v6  ;;  %v8145_v14 = vld [vmem:[%s11893_s15 + $0x2] ss:$0 sm:$0xff] }
 0x7fd   : > { %7946 = vrcp.f32 %v5212_v51  ;;  %v4646_v46 = vadd.f32 %v4614_v35, %v4545_v18  ;;  %v4948_v10 = vadd.f32 %v4916_v29, %v4847_v58  ;;  %v4919_v9 = vmul.f32 %v10988_v42, %v4580_v37  ;;  %v4176_v63 = vld [vmem:[#allocation3 + $0x170] sm:$0xff] }
 0x7fe   : > { %v4277_v50 = vld [vmem:[#allocation3 + $0x171] sm:$0xff]  ;;  %v4213_v52 = vmul.f32 %v8142_v17, %v4176_v63  ;;  %v4514_v20 = vmul.f32 %v8144_v45, %v4176_v63  ;;  %7948 = vrcp.f32 %v5213_v34  ;;  %v4816_v29 = vmul.f32 %v10967_v5, %v4176_v63 }
 0x7ff   : > { %v4377_v2 = vld [vmem:[#allocation3 + $0x16a] sm:$0xff]  ;;  %v4314_v57 = vmul.f32 %v8143_v43, %v4277_v50  ;;  %v4378_v49 = vld [vmem:[#allocation3 + $0x172] sm:$0xff]  ;;  %v7941_v11 = vpop.eup %7940  ;;  %v4917_v34 = vmul.f32 %v10988_v42, %v4277_v50  ;;  %v5020_v63 = vmul.f32 %v11013_v15, %v4681_v39 }
 0x800   : > { %v4414_v1 = vmul.f32 %v8145_v14, %v4377_v2  ;;  %v4415_v6 = vmul.f32 %v8145_v14, %v4378_v49  ;;  %v8146_v51 = vld [vmem:[%s11893_s15 + $0x4] ss:$0 sm:$0xff]  ;;  %v4715_v58 = vmul.f32 %v10939_v33, %v4377_v2  ;;  %v7943_v37 = vpop.eup %7942  ;;  %v4546_v35 = vadd.f32 %v4514_v20, %v11360_v0 }
 0x801   : > { %v4615_v18 = vmul.f32 %v8146_v51, %v4277_v50  ;;  %v4346_v17 = vadd.f32 %v4314_v57, %v4213_v52  ;;  %v4716_v55 = vmul.f32 %v10939_v33, %v4378_v49  ;;  %v5017_v14 = vmul.f32 %v11013_v15, %v4377_v2 }
 0x802   : > { %v4446_v43 = vadd.f32 %v4414_v1, %v4345_v44  ;;  %v4747_v45 = vadd.f32 %v4715_v58, %v4646_v46  ;;  %v4848_v51 = vadd.f32 %v4816_v29, %v4746_v53  ;;  %v5018_v36 = vmul.f32 %v11013_v15, %v4378_v49 }
 0x803   : > { %v4447_v62 = vadd.f32 %v4415_v6, %v4346_v17  ;;  %v4647_v40 = vadd.f32 %v4615_v18, %v4546_v35  ;;  %v5049_v13 = vadd.f32 %v5017_v14, %v4948_v10  ;;  %v5214_v44 = vadd.f32 1.0, %v7943_v37 }
 0x804   : > { %v4547_v30 = vadd.f32 %v4515_v27, %v4446_v43  ;;  %v4849_v52 = vadd.f32 %v4817_v8, %v4747_v45  ;;  %v7945_v57 = vpop.eup %7944  ;;  %v4949_v1 = vadd.f32 %v4917_v34, %v4848_v51  ;;  %v5019_v46 = vmul.f32 %v11013_v15, %v4680_v48  ;;  %v4985_v8 = vld [vmem:[#allocation3 + $0x1a2] sm:$0xff] }
 0x805   : > { %v4748_v0 = vadd.f32 %v4716_v55, %v4647_v40  ;;  %v4548_v5 = vadd.f32 %v4516_v60, %v4447_v62  ;;  %v11421_v27 = vadd.f32 %v11048_v23, %v5049_v13  ;;  %v5215_v55 = vadd.f32 1.0, %v7945_v57 }
 0x806   : > { %v4648_v33 = vadd.f32 %v11381_v31, %v4547_v30  ;;  %v4950_v42 = vadd.f32 %v11385_v59, %v4849_v52  ;;  %v5050_v2 = vadd.f32 %v5018_v36, %v4949_v1  ;;  %7950 = vrcp.f32 %v5214_v44 }
 0x807   : > { %v4649_v53 = vadd.f32 %v4617_v3, %v4548_v5  ;;  %v4850_v10 = vadd.f32 %v4818_v56, %v4748_v0  ;;  %v7947_v49 = vpop.eup %7946  ;;  %v6753_v62 = vmul.f32 -1.442695, %v11421_v27  ;;  %v5022_v39 = vmul.f32 %v11013_v15, %v4985_v8 }
 0x808   : > { %v4749_v50 = vadd.f32 %v4717_v24, %v4648_v33  ;;  %v5051_v40 = vadd.f32 %v5019_v46, %v4950_v42  ;;  %v11426_v48 = vadd.f32 %v11048_v23, %v5050_v2  ;;  %v7949_v13 = vpop.eup %7948  ;;  %v11433_v36 = vmul.f32 %v7941_v11, %v11231_v12 }
 0x809   : > { %v4750_v30 = vadd.f32 %v4718_v38, %v4649_v53  ;;  %v4951_v59 = vadd.f32 %v4919_v9, %v4850_v10  ;;  %7952 = vpow2.f32 %v6753_v62  ;;  %v5358_v15 = vadd.f32 %v11392_v4, %v11387_v47 }
 0x80a   : > { %v4851_v31 = vadd.f32 %v11239_v32, %v4749_v50  ;;  %v11430_v60 = vadd.f32 %v11048_v23, %v5051_v40  ;;  %v6754_v32 = vmul.f32 -1.442695, %v11426_v48  ;;  %7954 = vrcp.f32 %v5215_v55 }
 0x80b   : > { %v4852_v3 = vadd.f32 %v11319_v22, %v4750_v30  ;;  %v5052_v38 = vadd.f32 %v5020_v63, %v4951_v59  ;;  %v11445_v22 = vmul.f32 %v7947_v49, %v11296_v26  ;;  %v11452_v58 = vmul.f32 %v7949_v13, %v11306_v16 }
 0x80c   : > { %v4952_v24 = vadd.f32 %v11322_v7, %v4851_v31  ;;  %v6755_v56 = vmul.f32 -1.442695, %v11430_v60  ;;  %7956 = vpow2.f32 %v6754_v32  ;;  %v5359_v7 = vsel %vm4112_vm14, %v11433_v36, 0.0 }
 0x80d   : > { %v4953_v9 = vadd.f32 %v11341_v61, %v4852_v3  ;;  %v5091_v12 = vadd.f32 %v11048_v23, %v5052_v38  ;;  %v5360_v4 = vadd.f32 %v5359_v7, %v5358_v15  ;;  %v5361_v26 = vsel %vm4112_vm14, %v11445_v22, 0.0 }
 0x80e   : > { %v5053_v20 = vadd.f32 %v11344_v25, %v4952_v24  ;;  %7958 = vpow2.f32 %v6755_v56 }
 0x80f   : > { %v5054_v11 = vadd.f32 %v5022_v39, %v4953_v9  ;;  %v6756_v18 = vmul.f32 -1.442695, %v5091_v12  ;;  %v5362_v35 = vadd.f32 %v5361_v26, %v5360_v4 }
 0x810   : > { %v5092_v6 = vadd.f32 %v11048_v23, %v5053_v20  ;;  %v7951_v25 = vpop.eup %7950 }
 0x811   : > { %v5093_v47 = vadd.f32 %v11048_v23, %v5054_v11  ;;  %7960 = vpow2.f32 %v6756_v18  ;;  %v11457_v45 = vmul.f32 %v7951_v25, %v11327_v19  ;;  %v5363_v23 = vsel %vm4112_vm14, %v11452_v58, 0.0 }
 0x812   : > { %v6757_v61 = vmul.f32 -1.442695, %v5092_v6  ;;  %v5364_v52 = vadd.f32 %v5363_v23, %v5362_v35 }
 0x813   : > { %v6758_v37 = vmul.f32 -1.442695, %v5093_v47  ;;  %v7953_v17 = vpop.eup %7952  ;;  %v5365_v57 = vsel %vm4112_vm14, %v11457_v45, 0.0 }
 0x814   : > { %7962 = vpow2.f32 %v6757_v61  ;;  %v5216_v43 = vadd.f32 1.0, %v7953_v17  ;;  %v7955_v29 = vpop.eup %7954  ;;  %v5366_v5 = vadd.f32 %v5365_v57, %v5364_v52  ;;  %v7323_v52 = vld [vmem:[%s11899_s21 + $0x8] sm:$0xff]   ;;  %v7324_v57 = vld [vmem:[%s11899_s21 + $0x10] sm:$0xff]  }
 0x815   : > { %7964 = vpow2.f32 %v6758_v37  ;;  %v11462_v44 = vmul.f32 %v7955_v29, %v11348_v21 }
 0x816   : > { %v7957_v34 = vpop.eup %7956  ;;  %7966 = vrcp.f32 %v5216_v43 }
 0x817   : > { %v5217_v14 = vadd.f32 1.0, %v7957_v34  ;;  %v5367_v46 = vsel %vm4112_vm14, %v11462_v44, 0.0 }
 0x818   : > { %v7959_v16 = vpop.eup %7958  ;;  %v5368_v50 = vadd.f32 %v5367_v46, %v5366_v5  ;;  %v5490_v5 = vld [vmem:[%s11898_s20] sm:$0x1] }
 0x819   : > { %v5218_v51 = vadd.f32 1.0, %v7959_v16  ;;  %7968 = vrcp.f32 %v5217_v14 }
 0x81b   : > { %v7961_v0 = vpop.eup %7960  ;;  %7970 = vrcp.f32 %v5218_v51  ;;  %v7322_v51 = vld [vmem:[%s11899_s21] sm:$0xff]  }
 0x81c   : > { %v5219_v19 = vadd.f32 1.0, %v7961_v0  ;;  %7162 = vmatprep.subr.bf16.mxu0 %v7322_v51  ;;  %v7325_v0 = vld [vmem:[%s11899_s21 + $0x18] sm:$0xff]  }
 0x81e   : > { %v7963_v1 = vpop.eup %7962  ;;  %7972 = vrcp.f32 %v5219_v19  ;;  %v7326_v19 = vld [vmem:[%s11899_s21 + $0x20] sm:$0xff]  }
 0x81f   : > { %v5220_v33 = vadd.f32 1.0, %v7963_v1  ;;  %v7965_v42 = vpop.eup %7964  ;;  %v7327_v1 = vld [vmem:[%s11899_s21 + $0x28] sm:$0xff]  }
 0x820   : > { %v5221_v63 = vadd.f32 1.0, %v7965_v42  ;;  %v7967_v53 = vpop.eup %7966 }
 0x821   : > { %7974 = vrcp.f32 %v5220_v33  ;;  %v11469_v21 = vmul.f32 %v7967_v53, %v11421_v27 }
 0x822   : > { %7976 = vrcp.f32 %v5221_v63 }
 0x823   : > { %v7969_v10 = vpop.eup %7968  ;;  %v5369_v8 = vsel %vm4112_vm14, %v11469_v21, 0.0 }
 0x824   : > { %v11474_v49 = vmul.f32 %v7969_v10, %v11426_v48  ;;  %v5370_v40 = vadd.f32 %v5369_v8, %v5368_v50 }
 0x825   : > { %v7971_v2 = vpop.eup %7970 }
 0x826   : > { %v11477_v62 = vmul.f32 %v7971_v2, %v11430_v60  ;;  %v5371_v55 = vsel %vm4112_vm14, %v11474_v49, 0.0 }
 0x827   : > { %v5372_v31 = vadd.f32 %v5371_v55, %v5370_v40  ;;  %v12148_v40 = vld [vmem:[#allocation30_spill] sm:$0xff] }
 0x828   : > { %v7973_v30 = vpop.eup %7972  ;;  %v5373_v27 = vsel %vm4112_vm14, %v11477_v62, 0.0  ;;  %v12149_v55 = vsub.s32 0, %v12148_v40 }
 0x829   : > { %v11483_v59 = vmul.f32 %v7973_v30, %v5091_v12  ;;  %v5374_v39 = vadd.f32 %v5373_v27, %v5372_v31  ;;  %v12150_v31 = vld [vmem:[#allocation52_spill] sm:$0xff] }
 0x82b   : > { %v7975_v13 = vpop.eup %7974  ;;  %v5375_v48 = vsel %vm4112_vm14, %v11483_v59, 0.0 }
 0x82c   : > { %v11485_v3 = vmul.f32 %v7975_v13, %v5092_v6  ;;  %v7977_v24 = vpop.eup %7976  ;;  %v5376_v60 = vadd.f32 %v5375_v48, %v5374_v39  ;;  %v12151_v13 = vld [vmem:[#allocation53_spill] sm:$0xff]  ;;  %v12152_v48 = vld [vmem:[#allocation54_spill] sm:$0xff] }
 0x82d   : > { %v11489_v38 = vmul.f32 %v7977_v24, %v5093_v47  ;;  %v5401_v47 = vld [vmem:[%s11896_s18] sm:$0x1] }
 0x82e   : > { %v5377_v32 = vsel %vm4112_vm14, %v11485_v3, 0.0 }
 0x82f   : > { %v5378_v56 = vadd.f32 %v5377_v32, %v5376_v60  ;;  %v5379_v15 = vsel %vm4112_vm14, %v11489_v38, 0.0  ;;  %v12153_v60 = vld [vmem:[#allocation55_spill] sm:$0xff] }
 0x831   : > { %v5380_v9 = vadd.f32 %v5379_v15, %v5378_v56 }
 0x833   : > { %v5381_v20 = vrot.slane %v5380_v9, 4 }
 0x835   : > { %v5382_v12 = vadd.f32 %v5381_v20, %v5380_v9 }
 0x837   : > { %v5383_v7 = vrot.slane %v5382_v12, 2 }
 0x839   : > { %v5384_v11 = vadd.f32 %v5383_v7, %v5382_v12 }
 0x83b   : > { %v5385_v6 = vrot.slane %v5384_v11, 1 }
 0x83d   : > { %v5386_v18 = vadd.f32 %v5385_v6, %v5384_v11  ;;  %v12154_v11 = vld [vmem:[#allocation49_spill] sm:$0xff] }
 0x83f   : > { %v5387_v61 = vmul.f32 0.00390625, %v5386_v18  ;;  %v12155_v18 = vld [vmem:[#allocation44_spill] sm:$0xff] }
 0x841   : > { %v5400_v4 = vpack.c.bf16 %v5387_v61, %v5387_v61 }
 0x843   : > { %7153 = vmatmul.mubr.msk.bf16.vlgmr.msra.gmra.mrb[64].mxu0 %vm4112_vm14, %v5400_v4  ;;  %v12156_v4 = vld [vmem:[#allocation45_spill] sm:$0xff] }
 0x844   : > { %7163 = vmatpush3.bf16.msra.mxu0 %v7322_v51  ;;  %v12162_v51 = vld [vmem:[#allocation56_spill] sm:$0xff] }
 0x845   : > { %7164 = vmatprep.subr.bf16.mxu0 %v7323_v52 }
 0x848   : > { %7165 = vmatpush3.bf16.msra.mxu0 %v7323_v52 }
 0x849   : > { %7166 = vmatprep.subr.bf16.mxu0 %v7324_v57 }
 0x84c   : > { %7167 = vmatpush3.bf16.msra.mxu0 %v7324_v57  ;;  %v12163_v57 = vld [vmem:[#allocation57_spill] sm:$0xff] }
 0x84d   : > { %7168 = vmatprep.subr.bf16.mxu0 %v7325_v0 }
 0x850   : > { %7169 = vmatpush3.bf16.msra.mxu0 %v7325_v0 }
 0x851   : > { %7170 = vmatprep.subr.bf16.mxu0 %v7326_v19 }
 0x854   : > { %7171 = vmatpush3.bf16.msra.mxu0 %v7326_v19  ;;  %v12164_v19 = vld [vmem:[#allocation58_spill] sm:$0xff] }
 0x855   : > { %7172 = vmatprep.subr.bf16.mxu0 %v7327_v1 }
 0x858   : > { %7173 = vmatpush3.bf16.msra.mxu0 %v7327_v1 }
 0x916   : > { %v5475_v25 = vpop.f32.mrb[64].mxu0 }
 0x917   : > { %v5476_v26 = vadd.f32 %v5475_v25, %v5401_v47  ;;  %v7154_v37 = vpop.f32.mrb[65].mxu0 }
 0x918   : > { %v5478_v17 = vpop.f32.mrb[66].mxu0  ;;  %v12158_v37 = vld [vmem:[#allocation47_spill] sm:$0xff] }
 0x919   : > { %v6766_v43 = vmul.f32 -1.442695, %v5476_v26  ;;  %v7155_v35 = vpop.f32.mrb[67].mxu0 }
 0x91b   : > { %7978 = vpow2.f32 %v6766_v43  ;;  %v12159_v43 = vld [vmem:[#allocation48_spill] sm:$0xff] }
 0x925   : > { %v7979_v29 = vpop.eup %7978 }
 0x926   : > { %v5484_v23 = vadd.f32 1.0, %v7979_v29  ;;  %v12160_v29 = vld [vmem:[#allocation50_spill] sm:$0xff] }
 0x928   : > { %7980 = vrcp.f32 %v5484_v23 }
 0x932   : > { %v7981_v34 = vpop.eup %7980 }
 0x933   : > { %v5487_v16 = vmul.f32 %v7981_v34, %v5476_v26 }
 0x935   : > { %v5489_v14 = vpack.c.bf16 %v5487_v16, %v5487_v16  ;;  %v12161_v16 = vld [vmem:[#allocation51_spill] sm:$0xff] }
 0x937   : > { %7159 = vmatmul.mubr.msk.bf16.vlgmr.msra.gmra.mrb[72].mxu1 %vm5491_vm0, %v5489_v14 }
 0xa0a   : > { %v5533_v33 = vpop.f32.mrb[72].mxu1 }
 0xa0b   : > { %v5534_v46 = vadd.f32 %v5533_v33, %v5490_v5  ;;  %v7160_v42 = vpop.f32.mrb[73].mxu1 }
 0xa0c   : > { %v5536_v63 = vpop.f32.mrb[74].mxu1 }
 0xa0d   : > { %v6768_v53 = vmul.f32 -1.442695, %v5534_v46  ;;  %v7161_v50 = vpop.f32.mrb[75].mxu1  ;;  %v12165_v46 = vld [vmem:[#allocation59_spill] sm:$0xff]  ;;  %v12166_v63 = vld [vmem:[#allocation60_spill] sm:$0xff] }
 0xa0e   : > { %v12167_v50 = vld [vmem:[#allocation61_spill] sm:$0xff] }
 0xa0f   : > { %7982 = vpow2.f32 %v6768_v53 }
 0xa19   : > { %v7983_v10 = vpop.eup %7982 }
 0xa1a   : > { %v5542_v8 = vadd.f32 1.0, %v7983_v10 }
 0xa1c   : > { %7984 = vrcp.f32 %v5542_v8 }
 0xa26   : > { %v7985_v2 = vpop.eup %7984 }
 0xa27   : > { %v5548_v30 = vrot.slane %v7985_v2, %v12149_v55 }
 0xa29   : > { %v5549_v27 = vmul.f32 %v5548_v30, %v12150_v31  ;;  %v5550_v39 = vmul.f32 %v5548_v30, %v12151_v13  ;;  %v5551_v24 = vmul.f32 %v5548_v30, %v12152_v48  ;;  %v5552_v32 = vmul.f32 %v5548_v30, %v12153_v60 }
 0xa2a   : > { %v5553_v56 = vmul.f32 %v5548_v30, %v10768_v54  ;;  %v5554_v15 = vmul.f32 %v5548_v30, %v10824_v28  ;;  %v5555_v7 = vmul.f32 %v5548_v30, %v10882_v41  ;;  %v5556_v6 = vmul.f32 %v5548_v30, %v12154_v11  ;;  %v12157_v28 = vld [vmem:[#allocation46_spill] sm:$0xff]  ;;  %v12168_v11 = vld [vmem:[#allocation23_spill] sm:$0xff] }
 0xa2b   : > { %v5593_v9 = vpack.c.bf16 %v5550_v39, %v5549_v27  ;;  %v5594_v20 = vpack.c.bf16 %v5552_v32, %v5551_v24  ;;  %v5557_v61 = vmul.f32 %v5548_v30, %v12155_v18  ;;  %v5558_v47 = vmul.f32 %v5548_v30, %v12156_v4  ;;  %v12169_v18 = vld [vmem:[#allocation20_spill] sm:$0xff]  ;;  %v12170_v4 = vld [vmem:[#allocation21_spill] sm:$0xff] }
 0xa2c   : > { %v5595_v12 = vpack.c.bf16 %v5554_v15, %v5553_v56  ;;  %v5596_v54 = vpack.c.bf16 %v5556_v6, %v5555_v7  ;;  %v5559_v26 = vmul.f32 %v5548_v30, %v12157_v28  ;;  %v5560_v17 = vmul.f32 %v5548_v30, %v12158_v37 }
 0xa2d   : > { %7174 = vmatprep.mubr.msk.bf16.mxu0 %vm4112_vm14, %v5593_v9  ;;  %v5597_v25 = vpack.c.bf16 %v5558_v47, %v5557_v61  ;;  %v5561_v35 = vmul.f32 %v5548_v30, %v12159_v43  ;;  %v5562_v41 = vmul.f32 %v5548_v30, %v12160_v29  ;;  %v5563_v14 = vmul.f32 %v5548_v30, %v12161_v16  ;;  %v12172_v16 = vld [vmem:[#allocation11_spill] sm:$0xff] }
 0xa2e   : > { %7175 = vmatmul.mubr.msk.bf16.vlgmr.msra.gmra.mrb[68].mxu0 %vm4112_vm14, %v5594_v20  ;;  %v5598_v23 = vpack.c.bf16 %v5560_v17, %v5559_v26  ;;  %v5564_v52 = vmul.f32 %v5548_v30, %v12162_v51  ;;  %v5565_v0 = vmul.f32 %v5548_v30, %v12163_v57  ;;  %v5566_v1 = vmul.f32 %v5548_v30, %v12164_v19  ;;  %v12173_v51 = vld [vmem:[#allocation16_spill] sm:$0xff]  ;;  %v12174_v57 = vld [vmem:[#allocation19_spill] sm:$0xff] }
 0xa2f   : > { %7178 = vmatprep.mubr.msk.bf16.mxu0 %vm4112_vm14, %v5595_v12  ;;  %v5599_v34 = vpack.c.bf16 %v5562_v41, %v5561_v35  ;;  %v5567_v42 = vmul.f32 %v5548_v30, %v12165_v46  ;;  %v5568_v53 = vmul.f32 %v5548_v30, %v12166_v63  ;;  %v5569_v10 = vmul.f32 %v5548_v30, %v12167_v50  ;;  %v12175_v19 = vld [vmem:[#allocation24_spill] sm:$0xff] }
 0xa30   : > { %v5600_v5 = vpack.c.bf16 %v5564_v52, %v5563_v14  ;;  %v5601_v33 = vpack.c.bf16 %v5566_v1, %v5565_v0  ;;  %v5570_v8 = vmul.f32 %v5548_v30, %v11433_v36  ;;  %v5571_v55 = vmul.f32 %v5548_v30, %v11445_v22 }
 0xa31   : > { %v5602_v2 = vpack.c.bf16 %v5568_v53, %v5567_v42  ;;  %v5572_v31 = vmul.f32 %v5548_v30, %v11452_v58  ;;  %v5573_v27 = vmul.f32 %v5548_v30, %v11457_v45  ;;  %v5574_v13 = vmul.f32 %v5548_v30, %v11462_v44 }
 0xa32   : > { %v5603_v40 = vpack.c.bf16 %v5570_v8, %v5569_v10  ;;  %v5575_v36 = vmul.f32 %v5548_v30, %v11469_v21  ;;  %v5576_v24 = vmul.f32 %v5548_v30, %v11474_v49  ;;  %v5577_v60 = vmul.f32 %v5548_v30, %v11477_v62  ;;  %v7328_v21 = vld [vmem:[%s11901_s23] sm:$0xff]   ;;  %v7329_v49 = vld [vmem:[%s11901_s23 + $0x8] ss:$0 sps:$4 sm:$0xff]  }
 0xa33   : > { %v5604_v39 = vpack.c.bf16 %v5572_v31, %v5571_v55  ;;  %v5605_v48 = vpack.c.bf16 %v5574_v13, %v5573_v27  ;;  %v5578_v22 = vmul.f32 %v5548_v30, %v11483_v59  ;;  %v5579_v45 = vmul.f32 %v5548_v30, %v11485_v3  ;;  %7206 = vmatprep.subr.bf16.mxu1 %v7328_v21  ;;  %v11581_v59 = vld [vmem:[%s11900_s22] ss:$0 sm:$0xff]  ;;  %v12177_v31 = vld [vmem:[#allocation12_spill] sm:$0xff]  ;;  %v12178_v13 = vld [vmem:[#allocation13_spill] sm:$0xff] }
 0xa34   : > { %v5606_v32 = vpack.c.bf16 %v5576_v24, %v5575_v36  ;;  %v5580_v44 = vmul.f32 %v5548_v30, %v11489_v38  ;;  %7207 = vmatpush3.bf16.msra.mxu1 %v7328_v21  ;;  %v5977_v62 = vsel %vm3722_vm12, %v7329_v49, 0 }
 0xa35   : > { %v5607_v58 = vpack.c.bf16 %v5578_v22, %v5577_v60  ;;  %7243 = vmatprep.subr.msk.bf16.mxu1 %vm3722_vm12, %v7329_v49 }
 0xa36   : > { %7179 = vmatmul.mubr.msk.bf16.gmra.mrb[72].mxu0 %vm4112_vm14, %v5596_v54  ;;  %v5608_v56 = vpack.c.bf16 %v5580_v44, %v5579_v45  ;;  %v12171_v54 = vld [vmem:[#allocation22_spill] sm:$0xff] }
 0xa37   : > { %7182 = vmatprep.mubr.msk.bf16.mxu0 %vm4112_vm14, %v5597_v25 }
 0xa38   : > { %7209 = vmatpush3.bf16.msra.mxu1 %v5977_v62  ;;  %v12180_v62 = vld [vmem:[#allocation26_spill] sm:$0xff] }
 0xa3e   : > { %7183 = vmatmul.mubr.msk.bf16.gmra.mrb[76].mxu0 %vm4112_vm14, %v5598_v23 }
 0xa3f   : > { %7186 = vmatprep.mubr.msk.bf16.mxu0 %vm4112_vm14, %v5599_v34 }
 0xa46   : > { %7187 = vmatmul.mubr.msk.bf16.gmra.mrb[80].mxu0 %vm4112_vm14, %v5600_v5 }
 0xa47   : > { %7190 = vmatprep.mubr.msk.bf16.mxu0 %vm4112_vm14, %v5601_v33 }
 0xa4e   : > { %7191 = vmatmul.mubr.msk.bf16.gmra.mrb[84].mxu0 %vm4112_vm14, %v5602_v2 }
 0xa4f   : > { %7194 = vmatprep.mubr.msk.bf16.mxu0 %vm4112_vm14, %v5603_v40  ;;  %v12176_v40 = vld [vmem:[#allocation15_spill] sm:$0xff] }
 0xa56   : > { %7195 = vmatmul.mubr.msk.bf16.gmra.mrb[88].mxu0 %vm4112_vm14, %v5604_v39 }
 0xa57   : > { %7198 = vmatprep.mubr.msk.bf16.mxu0 %vm4112_vm14, %v5605_v48  ;;  %v12179_v48 = vld [vmem:[#allocation14_spill] sm:$0xff] }
 0xa5e   : > { %7199 = vmatmul.mubr.msk.bf16.gmra.mrb[92].mxu0 %vm4112_vm14, %v5606_v32 }
 0xa5f   : > { %7202 = vmatprep.mubr.msk.bf16.mxu0 %vm4112_vm14, %v5607_v58 }
 0xa66   : > { %7203 = vmatmul.mubr.msk.bf16.gmra.mrb[96].mxu0 %vm4112_vm14, %v5608_v56 }
 0xb01   : > { %v7176_v3 = vpop.f32.mrb[68].mxu0 }
 0xb02   : > { %v5743_v38 = vadd.f32 %v7176_v3, %v11581_v59  ;;  %v5734_v30 = vpop.f32.mrb[69].mxu0 }
 0xb03   : > { %v5735_v15 = vadd.f32 %v11581_v59, %v5734_v30  ;;  %v7177_v9 = vpop.f32.mrb[70].mxu0 }
 0xb04   : > { %v5746_v20 = vadd.f32 %v7177_v9, %v11581_v59  ;;  %v5737_v12 = vpop.f32.mrb[71].mxu0  ;;  %v5863_v6 = vadd.f32 %v5743_v38, %v12168_v11  ;;  %v12181_v38 = vld [vmem:[#allocation17_spill] sm:$0xff] }
 0xb05   : > { %v5738_v7 = vadd.f32 %v11581_v59, %v5737_v12  ;;  %v5861_v47 = vadd.f32 %v5735_v15, %v12170_v4  ;;  %v12182_v15 = vld [vmem:[#allocation18_spill] sm:$0xff] }
 0xb06   : > { %v5864_v61 = vadd.f32 %v5746_v20, %v12169_v18  ;;  %v12183_v20 = vld [vmem:[#allocation25_spill] sm:$0xff] }
 0xb07   : > { %v5862_v25 = vadd.f32 %v5738_v7, %v12171_v54 }
 0xb08   : > { %v5897_v28 = vpack.c.bf16 %v5864_v61, %v5863_v6 }
 0xb09   : > { %v5896_v26 = vpack.c.bf16 %v5862_v25, %v5861_v47  ;;  %v7180_v37 = vpop.f32.mrb[72].mxu0 }
 0xb0a   : > { %v5759_v17 = vadd.f32 %v7180_v37, %v11581_v59  ;;  %v5750_v43 = vpop.f32.mrb[73].mxu0 }
 0xb0b   : > { %v5751_v35 = vadd.f32 %v11581_v59, %v5750_v43  ;;  %v7181_v29 = vpop.f32.mrb[74].mxu0  ;;  %7210 = vmatprep.mubr.msk.bf16.mxu1 %vm3673_vm13, %v5896_v26  ;;  %v12184_v26 = vld [vmem:[#allocation31_spill] sm:$0xff] }
 0xb0c   : > { %v5762_v41 = vadd.f32 %v7181_v29, %v11581_v59  ;;  %v5753_v23 = vpop.f32.mrb[75].mxu0  ;;  %7211 = vmatmul.mubr.msk.bf16.vlgmr.msra.gmra.mrb[76].mxu1 %vm3673_vm13, %v5897_v28  ;;  %v5867_v14 = vadd.f32 %v5759_v17, %v12172_v16  ;;  %v12185_v17 = vld [vmem:[#allocation27_spill] sm:$0xff] }
 0xb0d   : > { %v5754_v34 = vadd.f32 %v11581_v59, %v5753_v23  ;;  %v5865_v0 = vadd.f32 %v5751_v35, %v12174_v57  ;;  %v12186_v35 = vld [vmem:[#allocation28_spill] sm:$0xff] }
 0xb0e   : > { %v5868_v52 = vadd.f32 %v5762_v41, %v12173_v51  ;;  %v12187_v41 = vld [vmem:[#allocation29_spill] sm:$0xff] }
 0xb0f   : > { %v5866_v1 = vadd.f32 %v5754_v34, %v12175_v19 }
 0xb10   : > { %v5899_v5 = vpack.c.bf16 %v5868_v52, %v5867_v14 }
 0xb11   : > { %v5898_v33 = vpack.c.bf16 %v5866_v1, %v5865_v0  ;;  %v7184_v46 = vpop.f32.mrb[76].mxu0 }
 0xb12   : > { %v5775_v42 = vadd.f32 %v7184_v46, %v11581_v59  ;;  %v5766_v63 = vpop.f32.mrb[77].mxu0 }
 0xb13   : > { %v5767_v53 = vadd.f32 %v11581_v59, %v5766_v63  ;;  %v7185_v50 = vpop.f32.mrb[78].mxu0  ;;  %7214 = vmatprep.mubr.msk.bf16.mxu1 %vm3673_vm13, %v5898_v33  ;;  %v12188_v33 = vld [vmem:[#allocation35_spill] sm:$0xff] }
 0xb14   : > { %v5778_v10 = vadd.f32 %v7185_v50, %v11581_v59  ;;  %v5769_v8 = vpop.f32.mrb[79].mxu0  ;;  %7215 = vmatmul.mubr.msk.bf16.gmra.mrb[80].mxu1 %vm3673_vm13, %v5899_v5  ;;  %v5871_v55 = vadd.f32 %v5775_v42, %v12176_v40  ;;  %v12189_v42 = vld [vmem:[#allocation32_spill] sm:$0xff] }
 0xb15   : > { %v5770_v2 = vadd.f32 %v11581_v59, %v5769_v8  ;;  %v5869_v39 = vadd.f32 %v5767_v53, %v12178_v13  ;;  %v12190_v53 = vld [vmem:[#allocation33_spill] sm:$0xff] }
 0xb16   : > { %v5872_v27 = vadd.f32 %v5778_v10, %v12177_v31  ;;  %v12191_v10 = vld [vmem:[#allocation34_spill] sm:$0xff] }
 0xb17   : > { %v5870_v36 = vadd.f32 %v5770_v2, %v12179_v48 }
 0xb18   : > { %v5901_v24 = vpack.c.bf16 %v5872_v27, %v5871_v55 }
 0xb19   : > { %v5900_v60 = vpack.c.bf16 %v5870_v36, %v5869_v39  ;;  %v7188_v22 = vpop.f32.mrb[80].mxu0 }
 0xb1a   : > { %v5791_v32 = vadd.f32 %v7188_v22, %v11581_v59  ;;  %v5782_v58 = vpop.f32.mrb[81].mxu0 }
 0xb1b   : > { %v5783_v45 = vadd.f32 %v11581_v59, %v5782_v58  ;;  %v7189_v44 = vpop.f32.mrb[82].mxu0  ;;  %7218 = vmatprep.mubr.msk.bf16.mxu1 %vm3673_vm13, %v5900_v60  ;;  %v12192_v60 = vld [vmem:[#allocation39_spill] sm:$0xff] }
 0xb1c   : > { %v5794_v56 = vadd.f32 %v7189_v44, %v11581_v59  ;;  %v5785_v21 = vpop.f32.mrb[83].mxu0  ;;  %7219 = vmatmul.mubr.msk.bf16.gmra.mrb[84].mxu1 %vm3673_vm13, %v5901_v24  ;;  %v5875_v3 = vadd.f32 %v5791_v32, %v12180_v62  ;;  %v12193_v32 = vld [vmem:[#allocation36_spill] sm:$0xff] }
 0xb1d   : > { %v5786_v49 = vadd.f32 %v11581_v59, %v5785_v21  ;;  %v5873_v9 = vadd.f32 %v5783_v45, %v12182_v15  ;;  %v12194_v45 = vld [vmem:[#allocation37_spill] sm:$0xff] }
 0xb1e   : > { %v5876_v30 = vadd.f32 %v5794_v56, %v12181_v38  ;;  %v12195_v56 = vld [vmem:[#allocation38_spill] sm:$0xff] }
 0xb1f   : > { %v5874_v12 = vadd.f32 %v5786_v49, %v12183_v20 }
 0xb20   : > { %v5903_v7 = vpack.c.bf16 %v5876_v30, %v5875_v3 }
 0xb21   : > { %v5902_v11 = vpack.c.bf16 %v5874_v12, %v5873_v9  ;;  %v7192_v6 = vpop.f32.mrb[84].mxu0 }
 0xb22   : > { %v5807_v18 = vadd.f32 %v7192_v6, %v11581_v59  ;;  %v5798_v61 = vpop.f32.mrb[85].mxu0 }
 0xb23   : > { %v5799_v4 = vadd.f32 %v11581_v59, %v5798_v61  ;;  %v7193_v47 = vpop.f32.mrb[86].mxu0  ;;  %7222 = vmatprep.mubr.msk.bf16.mxu1 %vm3673_vm13, %v5902_v11  ;;  %v12196_v11 = vld [vmem:[#allocation43_spill] sm:$0xff] }
 0xb24   : > { %v5810_v54 = vadd.f32 %v7193_v47, %v11581_v59  ;;  %v5801_v25 = vpop.f32.mrb[87].mxu0  ;;  %7223 = vmatmul.mubr.msk.bf16.gmra.mrb[88].mxu1 %vm3673_vm13, %v5903_v7  ;;  %v5879_v37 = vadd.f32 %v5807_v18, %v12184_v26  ;;  %v12197_v18 = vld [vmem:[#allocation40_spill] sm:$0xff] }
 0xb25   : > { %v5802_v28 = vadd.f32 %v11581_v59, %v5801_v25  ;;  %v5877_v29 = vadd.f32 %v5799_v4, %v12186_v35  ;;  %v12198_v4 = vld [vmem:[#allocation41_spill] sm:$0xff] }
 0xb26   : > { %v5880_v43 = vadd.f32 %v5810_v54, %v12185_v17  ;;  %v12199_v54 = vld [vmem:[#allocation42_spill] sm:$0xff] }
 0xb27   : > { %v5878_v23 = vadd.f32 %v5802_v28, %v12187_v41 }
 0xb28   : > { %v5905_v34 = vpack.c.bf16 %v5880_v43, %v5879_v37  ;;  %v11666_v37 = vld [vmem:[%s11902_s24] ss:$0 sm:$0xff] }
 0xb29   : > { %v5904_v16 = vpack.c.bf16 %v5878_v23, %v5877_v29  ;;  %v7196_v14 = vpop.f32.mrb[88].mxu0 }
 0xb2a   : > { %v5823_v51 = vadd.f32 %v7196_v14, %v11581_v59  ;;  %v5814_v52 = vpop.f32.mrb[89].mxu0 }
 0xb2b   : > { %v5815_v57 = vadd.f32 %v11581_v59, %v5814_v52  ;;  %v7197_v0 = vpop.f32.mrb[90].mxu0  ;;  %7226 = vmatprep.mubr.msk.bf16.mxu1 %vm3673_vm13, %v5904_v16 }
 0xb2c   : > { %v5826_v19 = vadd.f32 %v7197_v0, %v11581_v59  ;;  %v5817_v1 = vpop.f32.mrb[91].mxu0  ;;  %7227 = vmatmul.mubr.msk.bf16.gmra.mrb[92].mxu1 %vm3673_vm13, %v5905_v34  ;;  %v5883_v46 = vadd.f32 %v5823_v51, %v12188_v33 }
 0xb2d   : > { %v5818_v5 = vadd.f32 %v11581_v59, %v5817_v1  ;;  %v5881_v50 = vadd.f32 %v5815_v57, %v12190_v53 }
 0xb2e   : > { %v5884_v63 = vadd.f32 %v5826_v19, %v12189_v42 }
 0xb2f   : > { %v5882_v8 = vadd.f32 %v5818_v5, %v12191_v10 }
 0xb30   : > { %v5907_v2 = vpack.c.bf16 %v5884_v63, %v5883_v46 }
 0xb31   : > { %v5906_v40 = vpack.c.bf16 %v5882_v8, %v5881_v50  ;;  %v7200_v55 = vpop.f32.mrb[92].mxu0 }
 0xb32   : > { %v5839_v31 = vadd.f32 %v7200_v55, %v11581_v59  ;;  %v5830_v27 = vpop.f32.mrb[93].mxu0 }
 0xb33   : > { %v5831_v13 = vadd.f32 %v11581_v59, %v5830_v27  ;;  %v7201_v39 = vpop.f32.mrb[94].mxu0  ;;  %7230 = vmatprep.mubr.msk.bf16.mxu1 %vm3673_vm13, %v5906_v40 }
 0xb34   : > { %v5842_v48 = vadd.f32 %v7201_v39, %v11581_v59  ;;  %v5833_v36 = vpop.f32.mrb[95].mxu0  ;;  %7231 = vmatmul.mubr.msk.bf16.gmra.mrb[96].mxu1 %vm3673_vm13, %v5907_v2  ;;  %v5887_v22 = vadd.f32 %v5839_v31, %v12192_v60 }
 0xb35   : > { %v5834_v24 = vadd.f32 %v11581_v59, %v5833_v36  ;;  %v5885_v44 = vadd.f32 %v5831_v13, %v12194_v45 }
 0xb36   : > { %v5888_v58 = vadd.f32 %v5842_v48, %v12193_v32 }
 0xb37   : > { %v5886_v21 = vadd.f32 %v5834_v24, %v12195_v56 }
 0xb38   : > { %v5909_v49 = vpack.c.bf16 %v5888_v58, %v5887_v22 }
 0xb39   : > { %v5908_v62 = vpack.c.bf16 %v5886_v21, %v5885_v44  ;;  %v7204_v3 = vpop.f32.mrb[96].mxu0 }
 0xb3a   : > { %v5855_v38 = vadd.f32 %v7204_v3, %v11581_v59  ;;  %v5846_v30 = vpop.f32.mrb[97].mxu0 }
 0xb3b   : > { %v5847_v15 = vadd.f32 %v11581_v59, %v5846_v30  ;;  %v7205_v9 = vpop.f32.mrb[98].mxu0  ;;  %7234 = vmatprep.mubr.msk.bf16.mxu1 %vm3673_vm13, %v5908_v62 }
 0xb3c   : > { %v5858_v20 = vadd.f32 %v7205_v9, %v11581_v59  ;;  %v5849_v12 = vpop.f32.mrb[99].mxu0  ;;  %7235 = vmatmul.mubr.msk.bf16.gmra.mrb[100].mxu1 %vm3673_vm13, %v5909_v49  ;;  %v5891_v6 = vadd.f32 %v5855_v38, %v12196_v11 }
 0xb3d   : > { %v5850_v7 = vadd.f32 %v11581_v59, %v5849_v12  ;;  %v5889_v47 = vadd.f32 %v5847_v15, %v12198_v4 }
 0xb3e   : > { %v5892_v61 = vadd.f32 %v5858_v20, %v12197_v18 }
 0xb3f   : > { %v5890_v25 = vadd.f32 %v5850_v7, %v12199_v54 }
 0xb40   : > { %v5911_v28 = vpack.c.bf16 %v5892_v61, %v5891_v6 }
 0xb41   : > { %v5910_v26 = vpack.c.bf16 %v5890_v25, %v5889_v47 }
 0xb43   : > { %7238 = vmatprep.mubr.msk.bf16.mxu1 %vm3673_vm13, %v5910_v26 }
 0xb44   : > { %7239 = vmatmul.mubr.msk.bf16.gmra.mrb[104].mxu1 %vm3673_vm13, %v5911_v28 }
 0xbdf   : > { %v7212_v59 = vpop.f32.mrb[76].mxu1 }
 0xbe0   : > { %v11669_v17 = vadd.f32 %v7212_v59, %v11666_v37  ;;  %v6013_v43 = vpop.f32.mrb[77].mxu1 }
 0xbe1   : > { %v11672_v35 = vadd.f32 %v11666_v37, %v6013_v43  ;;  %v7213_v29 = vpop.f32.mrb[78].mxu1 }
 0xbe2   : > { %v6813_v41 = vmul.f32 -1.442695, %v11669_v17  ;;  %v11676_v23 = vadd.f32 %v7213_v29, %v11666_v37  ;;  %v6016_v34 = vpop.f32.mrb[79].mxu1 }
 0xbe3   : > { %v6811_v16 = vmul.f32 -1.442695, %v11672_v35  ;;  %v11680_v14 = vadd.f32 %v11666_v37, %v6016_v34 }
 0xbe4   : > { %7986 = vpow2.f32 %v6813_v41  ;;  %v6814_v51 = vmul.f32 -1.442695, %v11676_v23 }
 0xbe5   : > { %7988 = vpow2.f32 %v6811_v16  ;;  %v6812_v52 = vmul.f32 -1.442695, %v11680_v14 }
 0xbe6   : > { %7990 = vpow2.f32 %v6814_v51 }
 0xbe7   : > { %7992 = vpow2.f32 %v6812_v52  ;;  %v7216_v57 = vpop.f32.mrb[80].mxu1 }
 0xbe8   : > { %v11685_v0 = vadd.f32 %v7216_v57, %v11666_v37  ;;  %v6029_v19 = vpop.f32.mrb[81].mxu1 }
 0xbe9   : > { %v11688_v1 = vadd.f32 %v11666_v37, %v6029_v19  ;;  %v7217_v5 = vpop.f32.mrb[82].mxu1 }
 0xbea   : > { %v6817_v33 = vmul.f32 -1.442695, %v11685_v0  ;;  %v11692_v46 = vadd.f32 %v7217_v5, %v11666_v37  ;;  %v6032_v42 = vpop.f32.mrb[83].mxu1 }
 0xbeb   : > { %v6815_v63 = vmul.f32 -1.442695, %v11688_v1  ;;  %v11696_v53 = vadd.f32 %v11666_v37, %v6032_v42 }
 0xbec   : > { %7994 = vpow2.f32 %v6817_v33  ;;  %v6818_v50 = vmul.f32 -1.442695, %v11692_v46 }
 0xbed   : > { %7996 = vpow2.f32 %v6815_v63  ;;  %v6816_v10 = vmul.f32 -1.442695, %v11696_v53 }
 0xbee   : > { %v7987_v8 = vpop.eup %7986  ;;  %7998 = vpow2.f32 %v6818_v50 }
 0xbef   : > { %v7989_v2 = vpop.eup %7988  ;;  %v6238_v40 = vadd.f32 1.0, %v7987_v8  ;;  %8000 = vpow2.f32 %v6816_v10  ;;  %v7220_v55 = vpop.f32.mrb[84].mxu1 }
 0xbf0   : > { %v7991_v31 = vpop.eup %7990  ;;  %v6236_v27 = vadd.f32 1.0, %v7989_v2  ;;  %v11701_v13 = vadd.f32 %v7220_v55, %v11666_v37  ;;  %v6045_v39 = vpop.f32.mrb[85].mxu1 }
 0xbf1   : > { %v7993_v48 = vpop.eup %7992  ;;  %8002 = vrcp.f32 %v6238_v40  ;;  %v6239_v36 = vadd.f32 1.0, %v7991_v31  ;;  %v11704_v24 = vadd.f32 %v11666_v37, %v6045_v39  ;;  %v7221_v60 = vpop.f32.mrb[86].mxu1 }
 0xbf2   : > { %8004 = vrcp.f32 %v6236_v27  ;;  %v6237_v22 = vadd.f32 1.0, %v7993_v48  ;;  %v6821_v32 = vmul.f32 -1.442695, %v11701_v13  ;;  %v11708_v58 = vadd.f32 %v7221_v60, %v11666_v37  ;;  %v6048_v45 = vpop.f32.mrb[87].mxu1 }
 0xbf3   : > { %8006 = vrcp.f32 %v6239_v36  ;;  %v6819_v44 = vmul.f32 -1.442695, %v11704_v24  ;;  %v11712_v56 = vadd.f32 %v11666_v37, %v6048_v45 }
 0xbf4   : > { %8008 = vrcp.f32 %v6237_v22  ;;  %v6822_v21 = vmul.f32 -1.442695, %v11708_v58 }
 0xbf5   : > { %8010 = vpow2.f32 %v6821_v32  ;;  %v6820_v49 = vmul.f32 -1.442695, %v11712_v56 }
 0xbf6   : > { %v7995_v62 = vpop.eup %7994  ;;  %8012 = vpow2.f32 %v6819_v44 }
 0xbf7   : > { %v7997_v3 = vpop.eup %7996  ;;  %v6242_v38 = vadd.f32 1.0, %v7995_v62  ;;  %8014 = vpow2.f32 %v6822_v21  ;;  %v7224_v30 = vpop.f32.mrb[88].mxu1 }
 0xbf8   : > { %v7999_v15 = vpop.eup %7998  ;;  %v6240_v9 = vadd.f32 1.0, %v7997_v3  ;;  %8016 = vpow2.f32 %v6820_v49  ;;  %v11717_v20 = vadd.f32 %v7224_v30, %v11666_v37  ;;  %v6061_v12 = vpop.f32.mrb[89].mxu1 }
 0xbf9   : > { %v8001_v7 = vpop.eup %8000  ;;  %8018 = vrcp.f32 %v6242_v38  ;;  %v6243_v11 = vadd.f32 1.0, %v7999_v15  ;;  %v11720_v6 = vadd.f32 %v11666_v37, %v6061_v12  ;;  %v7225_v18 = vpop.f32.mrb[90].mxu1 }
 0xbfa   : > { %8020 = vrcp.f32 %v6240_v9  ;;  %v6241_v61 = vadd.f32 1.0, %v8001_v7  ;;  %v6825_v4 = vmul.f32 -1.442695, %v11717_v20  ;;  %v11724_v47 = vadd.f32 %v7225_v18, %v11666_v37  ;;  %v6064_v54 = vpop.f32.mrb[91].mxu1 }
 0xbfb   : > { %v8003_v25 = vpop.eup %8002  ;;  %8022 = vrcp.f32 %v6243_v11  ;;  %v6823_v28 = vmul.f32 -1.442695, %v11720_v6  ;;  %v11728_v26 = vadd.f32 %v11666_v37, %v6064_v54 }
 0xbfc   : > { %v8005_v59 = vpop.eup %8004  ;;  %8024 = vrcp.f32 %v6241_v61  ;;  %v6826_v43 = vmul.f32 -1.442695, %v11724_v47  ;;  %v6334_v5 = vmul.f32 %v8003_v25, %v11669_v17 }
 0xbfd   : > { %v8007_v29 = vpop.eup %8006  ;;  %8026 = vpow2.f32 %v6825_v4  ;;  %v6824_v41 = vmul.f32 -1.442695, %v11728_v26  ;;  %v6332_v51 = vmul.f32 %v8005_v59, %v11672_v35 }
 0xbfe   : > { %v8009_v34 = vpop.eup %8008  ;;  %8028 = vpow2.f32 %v6823_v28  ;;  %v6335_v10 = vmul.f32 %v8007_v29, %v11676_v23 }
 0xbff   : > { %v8011_v16 = vpop.eup %8010  ;;  %v6333_v52 = vmul.f32 %v8009_v34, %v11680_v14  ;;  %8030 = vpow2.f32 %v6826_v43  ;;  %v7228_v57 = vpop.f32.mrb[92].mxu1 }
 0xc00   : > { %v8013_v19 = vpop.eup %8012  ;;  %v6246_v33 = vadd.f32 1.0, %v8011_v16  ;;  %8032 = vpow2.f32 %v6824_v41  ;;  %v11736_v42 = vadd.f32 %v7228_v57, %v11666_v37  ;;  %v6077_v63 = vpop.f32.mrb[93].mxu1 }
 0xc01   : > { %v8015_v50 = vpop.eup %8014  ;;  %v6364_v8 = vadd.f32 %v6333_v52, %v6332_v51  ;;  %v6244_v2 = vadd.f32 1.0, %v8013_v19  ;;  %v11740_v35 = vadd.f32 %v11666_v37, %v6077_v63  ;;  %v7229_v14 = vpop.f32.mrb[94].mxu1 }
 0xc02   : > { %v8017_v40 = vpop.eup %8016  ;;  %8034 = vrcp.f32 %v6246_v33  ;;  %v6247_v55 = vadd.f32 1.0, %v8015_v50  ;;  %v6829_v17 = vmul.f32 -1.442695, %v11736_v42  ;;  %v11744_v31 = vadd.f32 %v7229_v14, %v11666_v37  ;;  %v6080_v27 = vpop.f32.mrb[95].mxu1 }
 0xc03   : > { %v8019_v39 = vpop.eup %8018  ;;  %v6365_v48 = vadd.f32 %v6364_v8, %v6334_v5  ;;  %8036 = vrcp.f32 %v6244_v2  ;;  %v6245_v36 = vadd.f32 1.0, %v8017_v40  ;;  %v6827_v23 = vmul.f32 -1.442695, %v11740_v35 }
 0xc04   : > { %v8021_v60 = vpop.eup %8020  ;;  %8038 = vrcp.f32 %v6247_v55  ;;  %v6830_v22 = vmul.f32 -1.442695, %v11744_v31  ;;  %v11749_v32 = vadd.f32 %v11666_v37, %v6080_v27  ;;  %v6338_v38 = vmul.f32 %v8019_v39, %v11685_v0 }
 0xc05   : > { %v8023_v45 = vpop.eup %8022  ;;  %v6336_v44 = vmul.f32 %v8021_v60, %v11688_v1  ;;  %v6366_v21 = vadd.f32 %v6365_v48, %v6335_v10  ;;  %8040 = vrcp.f32 %v6245_v36 }
 0xc06   : > { %v8025_v49 = vpop.eup %8024  ;;  %8042 = vpow2.f32 %v6829_v17  ;;  %v6828_v62 = vmul.f32 -1.442695, %v11749_v32  ;;  %v6339_v7 = vmul.f32 %v8023_v45, %v11692_v46 }
 0xc07   : > { %v8027_v3 = vpop.eup %8026  ;;  %v6367_v30 = vadd.f32 %v6366_v21, %v6336_v44  ;;  %v6337_v15 = vmul.f32 %v8025_v49, %v11696_v53  ;;  %8044 = vpow2.f32 %v6827_v23  ;;  %v7232_v9 = vpop.f32.mrb[96].mxu1 }
 0xc08   : > { %v8029_v12 = vpop.eup %8028  ;;  %v6250_v11 = vadd.f32 1.0, %v8027_v3  ;;  %8046 = vpow2.f32 %v6830_v22  ;;  %v11757_v1 = vadd.f32 %v7232_v9, %v11666_v37  ;;  %v6093_v18 = vpop.f32.mrb[97].mxu1 }
 0xc09   : > { %v8031_v61 = vpop.eup %8030  ;;  %v6368_v4 = vadd.f32 %v6367_v30, %v6337_v15  ;;  %v6248_v54 = vadd.f32 1.0, %v8029_v12  ;;  %8048 = vpow2.f32 %v6828_v62  ;;  %v11760_v0 = vadd.f32 %v11666_v37, %v6093_v18  ;;  %v7233_v25 = vpop.f32.mrb[98].mxu1 }
 0xc0a   : > { %v8033_v53 = vpop.eup %8032  ;;  %8050 = vrcp.f32 %v6250_v11  ;;  %v6251_v28 = vadd.f32 1.0, %v8031_v61  ;;  %v6833_v59 = vmul.f32 -1.442695, %v11757_v1  ;;  %v11764_v46 = vadd.f32 %v7233_v25, %v11666_v37  ;;  %v6096_v43 = vpop.f32.mrb[99].mxu1 }
 0xc0b   : > { %v6369_v29 = vadd.f32 %v6368_v4, %v6338_v38  ;;  %8052 = vrcp.f32 %v6248_v54  ;;  %v6249_v41 = vadd.f32 1.0, %v8033_v53  ;;  %v6831_v34 = vmul.f32 -1.442695, %v11760_v0 }
 0xc0c   : > { %v8035_v16 = vpop.eup %8034  ;;  %8054 = vrcp.f32 %v6251_v28  ;;  %v6834_v51 = vmul.f32 -1.442695, %v11764_v46  ;;  %v11769_v52 = vadd.f32 %v11666_v37, %v6096_v43 }
 0xc0d   : > { %v8037_v57 = vpop.eup %8036  ;;  %v6370_v19 = vadd.f32 %v6369_v29, %v6339_v7  ;;  %8056 = vrcp.f32 %v6249_v41  ;;  %v6342_v27 = vmul.f32 %v8035_v16, %v11701_v13 }
 0xc0e   : > { %v8039_v5 = vpop.eup %8038  ;;  %v6340_v33 = vmul.f32 %v8037_v57, %v11704_v24  ;;  %8058 = vpow2.f32 %v6833_v59  ;;  %v6832_v63 = vmul.f32 -1.442695, %v11769_v52 }
 0xc0f   : > { %v8041_v50 = vpop.eup %8040  ;;  %8060 = vpow2.f32 %v6831_v34  ;;  %v7236_v10 = vpop.f32.mrb[100].mxu1  ;;  %v6343_v23 = vmul.f32 %v8039_v5, %v11708_v58 }
 0xc10   : > { %v8043_v8 = vpop.eup %8042  ;;  %v6371_v2 = vadd.f32 %v6370_v19, %v6340_v33  ;;  %v6341_v14 = vmul.f32 %v8041_v50, %v11712_v56  ;;  %8062 = vpow2.f32 %v6834_v51  ;;  %v11775_v40 = vadd.f32 %v7236_v10, %v11666_v37  ;;  %v6109_v55 = vpop.f32.mrb[101].mxu1 }
 0xc11   : > { %v8045_v17 = vpop.eup %8044  ;;  %v6254_v39 = vadd.f32 1.0, %v8043_v8  ;;  %8064 = vpow2.f32 %v6832_v63  ;;  %v11779_v24 = vadd.f32 %v11666_v37, %v6109_v55  ;;  %v7237_v48 = vpop.f32.mrb[102].mxu1 }
 0xc12   : > { %v8047_v36 = vpop.eup %8046  ;;  %v6372_v60 = vadd.f32 %v6371_v2, %v6341_v14  ;;  %v6252_v22 = vadd.f32 1.0, %v8045_v17  ;;  %v11783_v56 = vadd.f32 %v7237_v48, %v11666_v37  ;;  %v6112_v45 = vpop.f32.mrb[103].mxu1  ;;  %v6837_v13 = vmul.f32 -1.442695, %v11775_v40 }
 0xc13   : > { %v8049_v44 = vpop.eup %8048  ;;  %8066 = vrcp.f32 %v6254_v39  ;;  %v6255_v21 = vadd.f32 1.0, %v8047_v36  ;;  %v11787_v49 = vadd.f32 %v11666_v37, %v6112_v45  ;;  %v6835_v58 = vmul.f32 -1.442695, %v11779_v24 }
 0xc14   : > { %v8051_v62 = vpop.eup %8050  ;;  %v6373_v3 = vadd.f32 %v6372_v60, %v6342_v27  ;;  %8068 = vrcp.f32 %v6252_v22  ;;  %v6253_v38 = vadd.f32 1.0, %v8049_v44  ;;  %v6838_v15 = vmul.f32 -1.442695, %v11783_v56 }
 0xc15   : > { %v8053_v30 = vpop.eup %8052  ;;  %8070 = vrcp.f32 %v6255_v21  ;;  %v6836_v11 = vmul.f32 -1.442695, %v11787_v49  ;;  %v6346_v61 = vmul.f32 %v8051_v62, %v11717_v20 }
 0xc16   : > { %v8055_v9 = vpop.eup %8054  ;;  %v6344_v12 = vmul.f32 %v8053_v30, %v11720_v6  ;;  %v6374_v7 = vadd.f32 %v6373_v3, %v6343_v23  ;;  %8072 = vrcp.f32 %v6253_v38 }
 0xc17   : > { %v8057_v18 = vpop.eup %8056  ;;  %8074 = vpow2.f32 %v6837_v13  ;;  %v7240_v4 = vpop.f32.mrb[104].mxu1  ;;  %v6347_v6 = vmul.f32 %v8055_v9, %v11724_v47 }
 0xc18   : > { %v8059_v54 = vpop.eup %8058  ;;  %v6375_v25 = vadd.f32 %v6374_v7, %v6344_v12  ;;  %v6345_v53 = vmul.f32 %v8057_v18, %v11728_v26  ;;  %8076 = vpow2.f32 %v6835_v58  ;;  %v11796_v28 = vadd.f32 %v7240_v4, %v11666_v37  ;;  %v6125_v59 = vpop.f32.mrb[105].mxu1 }
 0xc19   : > { %v8061_v43 = vpop.eup %8060  ;;  %v6258_v29 = vadd.f32 1.0, %v8059_v54  ;;  %8078 = vpow2.f32 %v6838_v15  ;;  %v11800_v41 = vadd.f32 %v11666_v37, %v6125_v59  ;;  %v7241_v20 = vpop.f32.mrb[106].mxu1 }
 0xc1a   : > { %v8063_v34 = vpop.eup %8062  ;;  %v6376_v16 = vadd.f32 %v6375_v25, %v6345_v53  ;;  %v6256_v51 = vadd.f32 1.0, %v8061_v43  ;;  %8080 = vpow2.f32 %v6836_v11  ;;  %v6841_v26 = vmul.f32 -1.442695, %v11796_v28  ;;  %v6128_v57 = vpop.f32.mrb[107].mxu1 }
 0xc1b   : > { %v8065_v19 = vpop.eup %8064  ;;  %8082 = vrcp.f32 %v6258_v29  ;;  %v6259_v5 = vadd.f32 1.0, %v8063_v34  ;;  %v6839_v33 = vmul.f32 -1.442695, %v11800_v41  ;;  %v11805_v47 = vadd.f32 %v7241_v20, %v11666_v37 }
 0xc1c   : > { %v6377_v63 = vadd.f32 %v6376_v16, %v6346_v61  ;;  %8084 = vrcp.f32 %v6256_v51  ;;  %v6257_v50 = vadd.f32 1.0, %v8065_v19  ;;  %v11808_v10 = vadd.f32 %v11666_v37, %v6128_v57 }
 0xc1d   : > { %v8067_v8 = vpop.eup %8066  ;;  %8086 = vrcp.f32 %v6259_v5  ;;  %v6842_v2 = vmul.f32 -1.442695, %v11805_v47 }
 0xc1e   : > { %v8069_v14 = vpop.eup %8068  ;;  %v6378_v55 = vadd.f32 %v6377_v63, %v6347_v6  ;;  %8088 = vrcp.f32 %v6257_v50  ;;  %v6840_v17 = vmul.f32 -1.442695, %v11808_v10  ;;  %v6350_v44 = vmul.f32 %v8067_v8, %v11736_v42 }
 0xc1f   : > { %v8071_v27 = vpop.eup %8070  ;;  %v6348_v39 = vmul.f32 %v8069_v14, %v11740_v35  ;;  %8090 = vpow2.f32 %v6841_v26 }
 0xc20   : > { %v8073_v48 = vpop.eup %8072  ;;  %8092 = vpow2.f32 %v6839_v33  ;;  %v6351_v3 = vmul.f32 %v8071_v27, %v11744_v31 }
 0xc21   : > { %v8075_v36 = vpop.eup %8074  ;;  %v6379_v23 = vadd.f32 %v6378_v55, %v6348_v39  ;;  %v6349_v37 = vmul.f32 %v8073_v48, %v11749_v32  ;;  %8094 = vpow2.f32 %v6842_v2 }
 0xc22   : > { %v8077_v60 = vpop.eup %8076  ;;  %v6262_v22 = vadd.f32 1.0, %v8075_v36  ;;  %8096 = vpow2.f32 %v6840_v17 }
 0xc23   : > { %v8079_v45 = vpop.eup %8078  ;;  %v6380_v21 = vadd.f32 %v6379_v23, %v6349_v37  ;;  %v6260_v13 = vadd.f32 1.0, %v8077_v60 }
 0xc24   : > { %v8081_v62 = vpop.eup %8080  ;;  %v6263_v58 = vadd.f32 1.0, %v8079_v45 }
 0xc25   : > { %v8083_v35 = vpop.eup %8082  ;;  %v6381_v38 = vadd.f32 %v6380_v21, %v6350_v44  ;;  %8098 = vrcp.f32 %v6260_v13  ;;  %v6261_v30 = vadd.f32 1.0, %v8081_v62 }
 0xc26   : > { %v8085_v15 = vpop.eup %8084  ;;  %8100 = vrcp.f32 %v6262_v22  ;;  %v6354_v54 = vmul.f32 %v8083_v35, %v11757_v1 }
 0xc27   : > { %v8087_v32 = vpop.eup %8086  ;;  %v6352_v9 = vmul.f32 %v8085_v15, %v11760_v0  ;;  %v6382_v12 = vadd.f32 %v6381_v38, %v6351_v3  ;;  %8102 = vrcp.f32 %v6261_v30 }
 0xc28   : > { %v8089_v7 = vpop.eup %8088  ;;  %8104 = vrcp.f32 %v6263_v58  ;;  %v6355_v43 = vmul.f32 %v8087_v32, %v11764_v46 }
 0xc29   : > { %v8091_v11 = vpop.eup %8090  ;;  %v6383_v42 = vadd.f32 %v6382_v12, %v6352_v9  ;;  %v6353_v18 = vmul.f32 %v8089_v7, %v11769_v52 }
 0xc2a   : > { %v8093_v61 = vpop.eup %8092  ;;  %v6266_v31 = vadd.f32 1.0, %v8091_v11 }
 0xc2b   : > { %v8095_v4 = vpop.eup %8094  ;;  %v6384_v25 = vadd.f32 %v6383_v42, %v6353_v18  ;;  %v6264_v53 = vadd.f32 1.0, %v8093_v61 }
 0xc2c   : > { %v8097_v59 = vpop.eup %8096  ;;  %v6267_v0 = vadd.f32 1.0, %v8095_v4 }
 0xc2d   : > { %v6385_v6 = vadd.f32 %v6384_v25, %v6354_v54  ;;  %8106 = vrcp.f32 %v6264_v53  ;;  %v6265_v29 = vadd.f32 1.0, %v8097_v59 }
 0xc2e   : > { %8108 = vrcp.f32 %v6266_v31 }
 0xc2f   : > { %v8099_v20 = vpop.eup %8098  ;;  %v6386_v34 = vadd.f32 %v6385_v6, %v6355_v43  ;;  %8110 = vrcp.f32 %v6265_v29 }
 0xc30   : > { %v8101_v52 = vpop.eup %8100  ;;  %v6356_v16 = vmul.f32 %v8099_v20, %v11779_v24  ;;  %8112 = vrcp.f32 %v6267_v0 }
 0xc31   : > { %v8103_v51 = vpop.eup %8102  ;;  %v6358_v19 = vmul.f32 %v8101_v52, %v11775_v40 }
 0xc32   : > { %v6387_v26 = vadd.f32 %v6386_v34, %v6356_v16  ;;  %v6357_v1 = vmul.f32 %v8103_v51, %v11787_v49  ;;  %v8105_v57 = vpop.eup %8104 }
 0xc33   : > { %v6359_v5 = vmul.f32 %v8105_v57, %v11783_v56 }
 0xc34   : > { %v6388_v46 = vadd.f32 %v6387_v26, %v6357_v1 }
 0xc36   : > { %v6389_v33 = vadd.f32 %v6388_v46, %v6358_v19 }
 0xc37   : > { %v8107_v63 = vpop.eup %8106 }
 0xc38   : > { %v8109_v50 = vpop.eup %8108  ;;  %v6360_v8 = vmul.f32 %v8107_v63, %v11800_v41  ;;  %v6390_v2 = vadd.f32 %v6389_v33, %v6359_v5 }
 0xc39   : > { %v8111_v24 = vpop.eup %8110  ;;  %v6362_v49 = vmul.f32 %v8109_v50, %v11796_v28 }
 0xc3a   : > { %v6391_v14 = vadd.f32 %v6390_v2, %v6360_v8  ;;  %v6361_v55 = vmul.f32 %v8111_v24, %v11808_v10  ;;  %v8113_v17 = vpop.eup %8112 }
 0xc3b   : > { %v6363_v56 = vmul.f32 %v8113_v17, %v11805_v47 }
 0xc3c   : > { %v6392_v40 = vadd.f32 %v6391_v14, %v6361_v55 }
 0xc3e   : > { %v6393_v27 = vadd.f32 %v6392_v40, %v6362_v49 }
 0xc40   : > { %v6394_v39 = vadd.f32 %v6393_v27, %v6363_v56 }
 0xc42   : > { %v6395_v48 = vrot.slane %v6394_v39, 4 }
 0xc44   : > { %v6396_v41 = vadd.f32 %v6395_v48, %v6394_v39 }
 0xc46   : > { %v6397_v36 = vrot.slane %v6396_v41, 2 }
 0xc48   : > { %v6398_v23 = vadd.f32 %v6397_v36, %v6396_v41 }
 0xc4a   : > { %v6399_v37 = vrot.slane %v6398_v23, 1 }
 0xc4c   : > { %v6400_v60 = vadd.f32 %v6399_v37, %v6398_v23 }
 0xc4e   : > { %v6401_v10 = vmul.f32 0.00390625, %v6400_v60 }
 0xc50   : > { %6402 = vst [vmem:[%s8404_s6] sm:$0x1] %v6401_v10 }
 0xc51   : > { %8160 = shalt.err (!%p8157_p4)
}
 0xc52   : > { %s8161_s6 = scalar_lea.hbm %s11833_s28, 16  ;;  %s8165_s9 = scalar_lea.hbm %s11903_s25, 32 }
 0xc53   : > { %p8162_p7 = scmp.ne.s32.totalorder %s11833_s28, %s8161_s6  ;;  %p8166_p10 = scmp.lt.u32.totalorder %s11833_s28, %s11903_s25 }
 0xc54   : > { %p8167_p11 = scmp.lt.u32.totalorder %s8165_s9, %s8161_s6  ;;  %p8169_p13 = scmp.lt.u32.totalorder %s8161_s6, %s11833_s28 }
 0xc55   : > { %p8163_p8 = pnand %p8162_p7, %p8384_p5 }
 0xc56   : > { %p8168_p12 = por %p8167_p11, %p8166_p10 }
 0xc57   : > { %p8164_p9 = pneg %p8163_p8 }
 0xc58   : > { %p8170_p0 = por %p8169_p13, %p8168_p12 }
 0xc5a   : > { %p8171_p1 = pnand %p8170_p0, %p8164_p9 }
 0xc5c   : > { %8174 = shalt.err (!%p8171_p1)
}
 0xc5d   : > { %7244 = dma.vmem_to_hbm [thread:$0]  (%p8384_p5), %s11835_s5, 16, %s11833_s28, %s6404_s1  }
 0xc5e PF: > { %p7250_p2 = scmp.ge.s32.totalorder %s8209_s30, 2  ;;  %s6428_s8 = sand.u32 1, %s8197_s29  }
 0xc5f   : > { %s6429_s7 = scalar_lea.sflag [#allocation5], %s6428_s8 }
 0xc60   : > { %p7247_p3 = pnand %p7250_p2, %p8388_p6 }
 0xc62   : > { %8192 = dma.done.wait (!%p7247_p3), %s6429_s7, 16  }
 0xc63   : > { %8194 = vsyncadd (!%p7247_p3), %s6429_s7, 4294967280  ;;  %s12202_s30 = sld [smem:[#allocation8_spill]]  ;;  %s12203_s6 = sld [smem:[#allocation7_spill]] }
 0xc64   : > { %s12204_s3 = sld [smem:[#allocation9_spill]]  ;;  %s12205_s29 = smov %s8201_s2 }
 0xc69   : > { %p35_p4 = scmp.ge.s32.totalorder %s12202_s30, 4   ;;  %s12206_s2 = smov %s12203_s6 }
 0xc6a   : > { %s12207_s6 = smov %s12204_s3 }
 0xc6b   :  { %37 = sbr.rel (!%p35_p4) target bundleno = 16 (0x10), region = 163 }
 0xc72   :  { %6433 = vsyncpa [#allocation5], 1 }
 0xc73   :  { %6435 = vsyncpa [#allocation5 + $0x1], 1 }

</bundles_post_ra>
